<compile_context>
chip_gen: v7x
topology: tpu7x:2x2x1
jax: 0.10.0
libtpu: 0.0.40
codegen_flags: <defaults>
</compile_context>

<pallas_src>
import functools

import jax
import jax.numpy as jnp
from jax.experimental import pallas as pl
from jax.experimental.pallas import tpu as pltpu

F32 = jnp.float32
BF16 = jnp.bfloat16
EPS = 1e-12
_VMEM = pl.BlockSpec(memory_space=pltpu.MemorySpace.VMEM)

CFG = dict(B=2, ST=8, SV=8, H=32, NH=4, HD=8, INTER=64,
           VFEAT=16, LOC=5, VOCAB=100, MAXPOS=64, TYPES=2, VTGT=16)

# Kernel input ordering: runtime activations first, then pre-packed weights.
_RUNTIME_NAMES = ("emb", "imgs", "locs", "tmask", "vmask")
_PARAM_NAMES = (
    "emb_g", "emb_b", "wimg", "bimg", "wloc", "bloc", "vemb_g", "vemb_b",
    "wq", "bq", "wk", "bk", "wv", "bv", "wo", "bo",
    "g1", "be1", "wi", "bi", "wo2", "bo2", "g2", "be2",
    "pool_w", "pool_b",
    "hw1", "hb1", "hg", "hbe", "hw2", "hb2",
    "lcw", "lcb",
    "bw1", "bb1", "bg", "bbe", "bw2", "bb2",
    "lwcat", "lbcat", "vwcat", "vbcat",
)
_IN_NAMES = _RUNTIME_NAMES + _PARAM_NAMES


def _gelu(x):
    # TODO(synk): ViLBERT uses exact erf GELU; tanh approximation kept because
    # erf is not guaranteed to lower through Mosaic.
    c = 0.7978845608028654  # sqrt(2/pi)
    return 0.5 * x * (1.0 + jnp.tanh(c * (x + 0.044715 * x * x * x)))


def _ln(x, g, b, eps=EPS):
    mean = jnp.mean(x, axis=-1, keepdims=True)
    var = jnp.mean(jnp.square(x - mean), axis=-1, keepdims=True)
    return (x - mean) * jax.lax.rsqrt(var + eps) * g + b


# ----------------------------- the fused kernel ------------------------------

def _forward_kernel(*refs, cfg):
    B, ST, SV, H = cfg["B"], cfg["ST"], cfg["SV"], cfg["H"]
    NH, HD = cfg["NH"], cfg["HD"]

    n_in = len(_IN_NAMES)
    r = dict(zip(_IN_NAMES, refs[:n_in]))
    (pooled_cat_ref, bin_ref, pooled_v_ref,
     ling_ref, vis_ref, seqv_ref) = refs[n_in:]

    def bdot(x, w):
        # bf16 MXU operands, f32 accumulation (elementwise math stays f32).
        return jnp.dot(x.astype(BF16), w, preferred_element_type=F32)

    # ---- embeddings (text LN; image + location projections + LN) -----------
    t = _ln(r["emb"][...], r["emb_g"][...], r["emb_b"][...])          # (B*ST,H)
    img = bdot(r["imgs"][...], r["wimg"][...]) + r["bimg"][...]
    loc = bdot(r["locs"][...], r["wloc"][...]) + r["bloc"][...]
    v = _ln(img + loc, r["vemb_g"][...], r["vemb_b"][...])            # (B*SV,H)

    # additive attention masks computed in-kernel from the 0/1 masks
    t_add = (1.0 - r["tmask"][...]) * -10000.0                        # (B,ST)
    v_add = (1.0 - r["vmask"][...]) * -10000.0                        # (B,SV)

    # ---- one fused transformer block (l = static layer index) --------------
    def block(xq, xkv, mask_add, Sq, Skv, l):
        q = bdot(xq, r["wq"][l]) + r["bq"][l]
        k = bdot(xkv, r["wk"][l]) + r["bk"][l]
        vv = bdot(xkv, r["wv"][l]) + r["bv"][l]
        q = q * (HD ** -0.5)

        q3 = q.reshape(B, Sq, H)
        k3 = k.reshape(B, Skv, H)
        v3 = vv.reshape(B, Skv, H)
        # hoisted mask broadcast (once per block, not per head)
        maskb = jnp.broadcast_to(mask_add[:, None, :], (B, Sq, Skv))

        attn = jnp.zeros((B * Sq, H), F32)
        for h in range(NH):                     # static; each dot batched on B
            sl = slice(h * HD, (h + 1) * HD)
            s = jnp.einsum("bqd,bkd->bqk",
                           q3[:, :, sl].astype(BF16),
                           k3[:, :, sl].astype(BF16),
                           preferred_element_type=F32) + maskb
            s = s - jnp.max(s, axis=-1, keepdims=True)
            p = jnp.exp(s)
            p = p * pl.reciprocal(jnp.sum(p, axis=-1, keepdims=True),
                                  approx=True)
            ctx = jnp.einsum("bqk,bkd->bqd", p.astype(BF16),
                             v3[:, :, sl].astype(BF16),
                             preferred_element_type=F32)      # (B,Sq,HD)
            # fold the head concat into the output projection (accumulate)
            attn = attn + jnp.dot(ctx.reshape(B * Sq, HD).astype(BF16),
                                  r["wo"][l, h],
                                  preferred_element_type=F32)
        x = _ln(attn + r["bo"][l] + xq, r["g1"][l], r["be1"][l])
        inter = _gelu(bdot(x, r["wi"][l]) + r["bi"][l])
        out2 = bdot(inter, r["wo2"][l]) + r["bo2"][l]
        return _ln(out2 + x, r["g2"][l], r["be2"][l])

    # layer order: [t self-attn, v self-attn, co-attn(t<-v), co-attn(v<-t)]
    # TODO(synk): ViLBERT's full interleaved multi-depth dual-stream encoder is
    # reduced to this 4-block toy configuration.
    t = block(t, t, t_add, ST, ST, 0)
    v = block(v, v, v_add, SV, SV, 1)
    t, v = (block(t, v, v_add, ST, SV, 2),
            block(v, t, t_add, SV, ST, 3))

    # ---- poolers + pooled-output task heads ---------------------------------
    t_cls = jnp.concatenate([t[b * ST:b * ST + 1, :] for b in range(B)], axis=0)
    v_cls = jnp.concatenate([v[b * SV:b * SV + 1, :] for b in range(B)], axis=0)
    pooled_t = jnp.tanh(bdot(t_cls, r["pool_w"][0]) + r["pool_b"][0])
    pooled_v = jnp.tanh(bdot(v_cls, r["pool_w"][1]) + r["pool_b"][1])
    pooled = pooled_t * pooled_v
    pooled_v_ref[...] = pooled_v

    def classif(x, w1, b1, g, be, w2, b2):
        # Linear -> GeLU -> LayerNorm -> Linear (SimpleClassifier / ImageClassifFC)
        h1 = _gelu(bdot(x, w1) + b1)
        h1 = _ln(h1, g, be)
        return bdot(h1, w2) + b2

    # stacked heads: [vil_prediction, vil_prediction_gqa, ImageClassifFC]
    # (their last-layer weights are zero-padded to 8 output lanes at pack time)
    houts = [classif(pooled, r["hw1"][i], r["hb1"][i], r["hg"][i], r["hbe"][i],
                     r["hw2"][i], r["hb2"][i]) for i in range(3)]
    logit_tri = bdot(pooled, r["lcw"][...]) + r["lcb"][...]           # (B,4)
    # [pred(1) | gqa(8) | logit(1) | tri(3) | align(1)]
    pooled_cat_ref[...] = jnp.concatenate(
        [houts[0][:, :1], houts[1], logit_tri, houts[2][:, :1]], axis=-1)

    # vil_binary: pooled pairs reshaped to (B//2, 2H) via lane concat
    pooled_pair = jnp.concatenate(
        [jnp.concatenate([pooled[2 * i:2 * i + 1, :],
                          pooled[2 * i + 1:2 * i + 2, :]], axis=-1)
         for i in range(B // 2)], axis=0)
    bin_ref[...] = classif(pooled_pair, r["bw1"][...], r["bb1"][...],
                           r["bg"][...], r["bbe"][...],
                           r["bw2"][...], r["bb2"][...])

    # ---- per-token heads (lane-concatenated weights) ------------------------
    ling_ref[...] = bdot(t, r["lwcat"][...]) + r["lbcat"][...]
    vis_ref[...] = bdot(v, r["vwcat"][...]) + r["vbcat"][...]
    seqv_ref[...] = v


# --------------------------- parameter creation -----------------------------

class _KeyGen:
    def __init__(self, key):
        self.key = key

    def __call__(self):
        self.key, k = jax.random.split(self.key)
        return k


def init_params(key, cfg):
    kg = _KeyGen(key)
    H, INTER = cfg["H"], cfg["INTER"]

    def lin(din, dout):
        return {"w": jax.random.normal(kg(), (din, dout), F32) * 0.02,
                "b": jnp.zeros((dout,), F32)}

    def ln(dim):
        return {"g": jnp.ones((dim,), F32), "b": jnp.zeros((dim,), F32)}

    def transformer_layer():
        return {"q": lin(H, H), "k": lin(H, H), "v": lin(H, H),
                "o": lin(H, H), "ln1": ln(H),
                "i": lin(H, INTER), "o2": lin(INTER, H), "ln2": ln(H)}

    def head(din, dhid, dout):
        return {"w1": jax.random.normal(kg(), (din, dhid), F32) * 0.02,
                "b1": jnp.zeros((dhid,), F32),
                "g": jnp.ones((dhid,), F32), "be": jnp.zeros((dhid,), F32),
                "w2": jax.random.normal(kg(), (dhid, dout), F32) * 0.02,
                "b2": jnp.zeros((dout,), F32)}

    return {
        "word_emb": jax.random.normal(kg(), (cfg["VOCAB"], H), F32) * 0.02,
        "pos_emb": jax.random.normal(kg(), (cfg["MAXPOS"], H), F32) * 0.02,
        "type_emb": jax.random.normal(kg(), (cfg["TYPES"], H), F32) * 0.02,
        "emb_ln": ln(H),
        "img_proj": lin(cfg["VFEAT"], H),
        "loc_proj": lin(cfg["LOC"], H),
        "v_emb_ln": ln(H),
        "t_layer": transformer_layer(),
        "v_layer": transformer_layer(),
        "co_t": transformer_layer(),
        "co_v": transformer_layer(),
        "t_pooler": lin(H, H),
        "v_pooler": lin(H, H),
        "vil_prediction": head(H, 2 * H, 1),
        "vil_prediction_gqa": head(H, 2 * H, 8),
        "vil_binary": head(2 * H, 2 * H, 2),
        "vil_logit": lin(H, 1),
        "vil_tri": lin(H, 3),
        "vision_pred": lin(H, cfg["VTGT"]),
        "vision_logit": lin(H, 1),
        "ling_pred": lin(H, cfg["VOCAB"]),
        "ling_logit": lin(H, 1),
        "image_classif_fc": head(H, 2 * H, 1),
    }


def pack_params(p, cfg):
    """Pre-pack all kernel weights ONCE (stacking, bf16 cast, bias reshapes)."""
    H, NH, HD = cfg["H"], cfg["NH"], cfg["HD"]
    L = [p["t_layer"], p["v_layer"], p["co_t"], p["co_v"]]

    def row(b):
        return b.reshape(1, -1)

    def stk_w(key):
        return jnp.stack([l[key]["w"] for l in L]).astype(BF16)

    def stk_b(key):
        return jnp.stack([row(l[key]["b"]) for l in L])

    def stk_ln(key, which):
        return jnp.stack([row(l[key][which]) for l in L])

    heads = [p["vil_prediction"], p["vil_prediction_gqa"], p["image_classif_fc"]]
    HOUT = 8
    hw2 = jnp.stack([jnp.pad(h["w2"], ((0, 0), (0, HOUT - h["w2"].shape[1])))
                     for h in heads]).astype(BF16)
    hb2 = jnp.stack([row(jnp.pad(h["b2"], (0, HOUT - h["b2"].shape[0])))
                     for h in heads])
    bn = p["vil_binary"]

    return dict(
        # JAX-side embedding tables (gather runs outside the kernel)
        word_emb=p["word_emb"], pos_emb=p["pos_emb"], type_emb=p["type_emb"],
        # kernel-side packed weights
        emb_g=row(p["emb_ln"]["g"]), emb_b=row(p["emb_ln"]["b"]),
        wimg=p["img_proj"]["w"].astype(BF16), bimg=row(p["img_proj"]["b"]),
        wloc=p["loc_proj"]["w"].astype(BF16), bloc=row(p["loc_proj"]["b"]),
        vemb_g=row(p["v_emb_ln"]["g"]), vemb_b=row(p["v_emb_ln"]["b"]),
        wq=stk_w("q"), bq=stk_b("q"),
        wk=stk_w("k"), bk=stk_b("k"),
        wv=stk_w("v"), bv=stk_b("v"),
        # output projection stored head-split: (L, NH, HD, H)
        wo=jnp.stack([l["o"]["w"].reshape(NH, HD, H) for l in L]).astype(BF16),
        bo=stk_b("o"),
        g1=stk_ln("ln1", "g"), be1=stk_ln("ln1", "b"),
        wi=stk_w("i"), bi=stk_b("i"),
        wo2=stk_w("o2"), bo2=stk_b("o2"),
        g2=stk_ln("ln2", "g"), be2=stk_ln("ln2", "b"),
        pool_w=jnp.stack([p["t_pooler"]["w"], p["v_pooler"]["w"]]).astype(BF16),
        pool_b=jnp.stack([row(p["t_pooler"]["b"]), row(p["v_pooler"]["b"])]),
        hw1=jnp.stack([h["w1"] for h in heads]).astype(BF16),
        hb1=jnp.stack([row(h["b1"]) for h in heads]),
        hg=jnp.stack([row(h["g"]) for h in heads]),
        hbe=jnp.stack([row(h["be"]) for h in heads]),
        hw2=hw2, hb2=hb2,
        lcw=jnp.concatenate([p["vil_logit"]["w"], p["vil_tri"]["w"]],
                            axis=1).astype(BF16),
        lcb=row(jnp.concatenate([p["vil_logit"]["b"], p["vil_tri"]["b"]])),
        bw1=bn["w1"].astype(BF16), bb1=row(bn["b1"]),
        bg=row(bn["g"]), bbe=row(bn["be"]),
        bw2=bn["w2"].astype(BF16), bb2=row(bn["b2"]),
        lwcat=jnp.concatenate([p["ling_pred"]["w"], p["ling_logit"]["w"]],
                              axis=1).astype(BF16),
        lbcat=row(jnp.concatenate([p["ling_pred"]["b"], p["ling_logit"]["b"]])),
        vwcat=jnp.concatenate([p["vision_pred"]["w"], p["vision_logit"]["w"]],
                              axis=1).astype(BF16),
        vbcat=row(jnp.concatenate([p["vision_pred"]["b"],
                                   p["vision_logit"]["b"]])),
    )


# ------------------------------- model glue ---------------------------------

def vilbert_for_retrieval_forward(pk, input_txt, input_imgs, image_loc, *,
                                  cfg, token_type_ids=None,
                                  attention_mask=None,
                                  image_attention_mask=None,
                                  co_attention_mask=None, task_ids=None,
                                  output_all_encoded_layers=False,
                                  output_all_attention_masks=False):
    B, ST, SV, H = cfg["B"], cfg["ST"], cfg["SV"], cfg["H"]
    if token_type_ids is None:
        token_type_ids = jnp.zeros_like(input_txt)
    if attention_mask is None:
        attention_mask = jnp.ones((B, ST), F32)
    if image_attention_mask is None:
        image_attention_mask = jnp.ones((B, SV), F32)
    # Dropout omitted (eval mode); co_attention_mask / task_ids unused here.

    # embedding gathers stay in JAX (tiny, fused by XLA); everything else is
    # a single pallas_call.
    emb = (pk["word_emb"][input_txt] + pk["pos_emb"][:ST][None]
           + pk["type_emb"][token_type_ids]).reshape(B * ST, H)

    ins = [emb,
           input_imgs.reshape(B * SV, cfg["VFEAT"]).astype(F32),
           image_loc.reshape(B * SV, cfg["LOC"]).astype(F32),
           attention_mask.astype(F32),
           image_attention_mask.astype(F32)]
    ins += [pk[k] for k in _PARAM_NAMES]

    ncat = 1 + 8 + 4 + 1   # pred | gqa | logit+tri | alignment
    out_shape = (
        jax.ShapeDtypeStruct((B, ncat), F32),                     # pooled_cat
        jax.ShapeDtypeStruct((B // 2, 2), F32),                   # vil_binary
        jax.ShapeDtypeStruct((B, H), F32),                        # pooled_v
        jax.ShapeDtypeStruct((B * ST, cfg["VOCAB"] + 1), F32),    # ling heads
        jax.ShapeDtypeStruct((B * SV, cfg["VTGT"] + 1), F32),     # vision heads
        jax.ShapeDtypeStruct((B * SV, H), F32),                   # seq_output_v
    )
    (pooled_cat, vil_binary_prediction, pooled_v_out,
     ling_cat, vis_cat, seq_v) = pl.pallas_call(
        functools.partial(_forward_kernel, cfg=cfg),
        out_shape=out_shape,
        in_specs=[_VMEM] * len(ins),
        out_specs=[_VMEM] * len(out_shape),
    )(*ins)

    sequence_output_v = seq_v.reshape(B, SV, H)
    vil_prediction = pooled_cat[:, 0:1]
    vil_prediction_gqa = pooled_cat[:, 1:9]
    vil_logit = pooled_cat[:, 9:10]
    vil_tri_prediction = pooled_cat[:, 10:13]
    alignment_logits = pooled_cat[:, 13:14]          # ImageClassifFC output

    linguisic_prediction = ling_cat[:, :cfg["VOCAB"]].reshape(B, ST,
                                                              cfg["VOCAB"])
    linguisic_logit = ling_cat[:, cfg["VOCAB"]:].reshape(B, ST, 1)
    vision_prediction = vis_cat[:, :cfg["VTGT"]].reshape(B, SV, cfg["VTGT"])
    vision_logit = vis_cat[:, cfg["VTGT"]:].reshape(B, SV, 1)

    all_attention_mask = None   # output_all_attention_masks=False

    return (alignment_logits, vil_prediction, vil_prediction_gqa, vil_logit,
            vil_binary_prediction, vil_tri_prediction, vision_prediction,
            vision_logit, linguisic_prediction, linguisic_logit,
            all_attention_mask, sequence_output_v, pooled_v_out)


# --------------------------------- main --------------------------------------

if __name__ == "__main__":
    cfg = CFG
    key = jax.random.PRNGKey(0)
    kp, k1, k2, k3 = jax.random.split(key, 4)

    packed = pack_params(init_params(kp, cfg), cfg)   # pre-pack once
    input_txt = jax.random.randint(k1, (cfg["B"], cfg["ST"]), 0, cfg["VOCAB"])
    input_imgs = jax.random.normal(k2, (cfg["B"], cfg["SV"], cfg["VFEAT"]), F32)
    image_loc = jax.random.uniform(k3, (cfg["B"], cfg["SV"], cfg["LOC"]),
                                   dtype=F32)

    fwd = jax.jit(functools.partial(vilbert_for_retrieval_forward, cfg=cfg))
    outs = fwd(packed, input_txt, input_imgs, image_loc)
    jax.block_until_ready([o for o in outs if o is not None])
    print("KERNEL_OK")
</pallas_src>

<mosaic_0001>
module attributes {stable_mosaic.version = 11 : i64} {
  func.func @_forward_kernel(%arg0: memref<16x32xf32, #tpu.memory_space<vmem>>, %arg1: memref<16x16xf32, #tpu.memory_space<vmem>>, %arg2: memref<16x5xf32, #tpu.memory_space<vmem>>, %arg3: memref<2x8xf32, #tpu.memory_space<vmem>>, %arg4: memref<2x8xf32, #tpu.memory_space<vmem>>, %arg5: memref<1x32xf32, #tpu.memory_space<vmem>>, %arg6: memref<1x32xf32, #tpu.memory_space<vmem>>, %arg7: memref<16x32xbf16, #tpu.memory_space<vmem>>, %arg8: memref<1x32xf32, #tpu.memory_space<vmem>>, %arg9: memref<5x32xbf16, #tpu.memory_space<vmem>>, %arg10: memref<1x32xf32, #tpu.memory_space<vmem>>, %arg11: memref<1x32xf32, #tpu.memory_space<vmem>>, %arg12: memref<1x32xf32, #tpu.memory_space<vmem>>, %arg13: memref<4x32x32xbf16, #tpu.memory_space<vmem>>, %arg14: memref<4x1x32xf32, #tpu.memory_space<vmem>>, %arg15: memref<4x32x32xbf16, #tpu.memory_space<vmem>>, %arg16: memref<4x1x32xf32, #tpu.memory_space<vmem>>, %arg17: memref<4x32x32xbf16, #tpu.memory_space<vmem>>, %arg18: memref<4x1x32xf32, #tpu.memory_space<vmem>>, %arg19: memref<4x4x8x32xbf16, #tpu.memory_space<vmem>>, %arg20: memref<4x1x32xf32, #tpu.memory_space<vmem>>, %arg21: memref<4x1x32xf32, #tpu.memory_space<vmem>>, %arg22: memref<4x1x32xf32, #tpu.memory_space<vmem>>, %arg23: memref<4x32x64xbf16, #tpu.memory_space<vmem>>, %arg24: memref<4x1x64xf32, #tpu.memory_space<vmem>>, %arg25: memref<4x64x32xbf16, #tpu.memory_space<vmem>>, %arg26: memref<4x1x32xf32, #tpu.memory_space<vmem>>, %arg27: memref<4x1x32xf32, #tpu.memory_space<vmem>>, %arg28: memref<4x1x32xf32, #tpu.memory_space<vmem>>, %arg29: memref<2x32x32xbf16, #tpu.memory_space<vmem>>, %arg30: memref<2x1x32xf32, #tpu.memory_space<vmem>>, %arg31: memref<3x32x64xbf16, #tpu.memory_space<vmem>>, %arg32: memref<3x1x64xf32, #tpu.memory_space<vmem>>, %arg33: memref<3x1x64xf32, #tpu.memory_space<vmem>>, %arg34: memref<3x1x64xf32, #tpu.memory_space<vmem>>, %arg35: memref<3x64x8xbf16, #tpu.memory_space<vmem>>, %arg36: memref<3x1x8xf32, #tpu.memory_space<vmem>>, %arg37: memref<32x4xbf16, #tpu.memory_space<vmem>>, %arg38: memref<1x4xf32, #tpu.memory_space<vmem>>, %arg39: memref<64x64xbf16, #tpu.memory_space<vmem>>, %arg40: memref<1x64xf32, #tpu.memory_space<vmem>>, %arg41: memref<1x64xf32, #tpu.memory_space<vmem>>, %arg42: memref<1x64xf32, #tpu.memory_space<vmem>>, %arg43: memref<64x2xbf16, #tpu.memory_space<vmem>>, %arg44: memref<1x2xf32, #tpu.memory_space<vmem>>, %arg45: memref<32x101xbf16, #tpu.memory_space<vmem>>, %arg46: memref<1x101xf32, #tpu.memory_space<vmem>>, %arg47: memref<32x17xbf16, #tpu.memory_space<vmem>>, %arg48: memref<1x17xf32, #tpu.memory_space<vmem>>, %arg49: memref<2x14xf32, #tpu.memory_space<vmem>>, %arg50: memref<1x2xf32, #tpu.memory_space<vmem>>, %arg51: memref<2x32xf32, #tpu.memory_space<vmem>>, %arg52: memref<16x101xf32, #tpu.memory_space<vmem>>, %arg53: memref<16x17xf32, #tpu.memory_space<vmem>>, %arg54: memref<16x32xf32, #tpu.memory_space<vmem>>) attributes {dimension_semantics = [], scalar_prefetch = 0 : i64, scratch_operands = 0 : i64, tpu.core_type = #tpu.core_type<tc>} {
    %c0 = arith.constant 0 : index
    %c0_0 = arith.constant 0 : index
    %0 = vector.load %arg0[%c0, %c0_0] : memref<16x32xf32, #tpu.memory_space<vmem>>, vector<16x32xf32>
    %c0_1 = arith.constant 0 : index
    %c0_2 = arith.constant 0 : index
    %1 = vector.load %arg5[%c0_1, %c0_2] : memref<1x32xf32, #tpu.memory_space<vmem>>, vector<1x32xf32>
    %c0_3 = arith.constant 0 : index
    %c0_4 = arith.constant 0 : index
    %2 = vector.load %arg6[%c0_3, %c0_4] : memref<1x32xf32, #tpu.memory_space<vmem>>, vector<1x32xf32>
    %cst = arith.constant dense<0.000000e+00> : vector<16xf32>
    %3 = vector.multi_reduction <add>, %0, %cst [1] : vector<16x32xf32> to vector<16xf32>
    %4 = vector.shape_cast %3 : vector<16xf32> to vector<16x1xf32>
    %cst_5 = arith.constant 3.200000e+01 : f32
    %5 = vector.broadcast %cst_5 : f32 to vector<16x1xf32>
    %6 = arith.divf %4, %5 : vector<16x1xf32>
    %7 = vector.broadcast %6 : vector<16x1xf32> to vector<16x32xf32>
    %8 = arith.subf %0, %7 : vector<16x32xf32>
    %9 = arith.mulf %8, %8 : vector<16x32xf32>
    %cst_6 = arith.constant dense<0.000000e+00> : vector<16xf32>
    %10 = vector.multi_reduction <add>, %9, %cst_6 [1] : vector<16x32xf32> to vector<16xf32>
    %11 = vector.shape_cast %10 : vector<16xf32> to vector<16x1xf32>
    %cst_7 = arith.constant 3.200000e+01 : f32
    %12 = vector.broadcast %cst_7 : f32 to vector<16x1xf32>
    %13 = arith.divf %11, %12 : vector<16x1xf32>
    %14 = vector.broadcast %6 : vector<16x1xf32> to vector<16x32xf32>
    %15 = arith.subf %0, %14 : vector<16x32xf32>
    %cst_8 = arith.constant 9.99999996E-13 : f32
    %16 = vector.broadcast %cst_8 : f32 to vector<16x1xf32>
    %17 = arith.addf %13, %16 : vector<16x1xf32>
    %18 = math.rsqrt %17 : vector<16x1xf32>
    %19 = vector.broadcast %18 : vector<16x1xf32> to vector<16x32xf32>
    %20 = arith.mulf %15, %19 : vector<16x32xf32>
    %21 = vector.broadcast %1 : vector<1x32xf32> to vector<16x32xf32>
    %22 = arith.mulf %20, %21 : vector<16x32xf32>
    %23 = vector.broadcast %2 : vector<1x32xf32> to vector<16x32xf32>
    %24 = arith.addf %22, %23 : vector<16x32xf32>
    %c0_9 = arith.constant 0 : index
    %c0_10 = arith.constant 0 : index
    %25 = vector.load %arg1[%c0_9, %c0_10] : memref<16x16xf32, #tpu.memory_space<vmem>>, vector<16x16xf32>
    %c0_11 = arith.constant 0 : index
    %c0_12 = arith.constant 0 : index
    %26 = vector.load %arg7[%c0_11, %c0_12] : memref<16x32xbf16, #tpu.memory_space<vmem>>, vector<16x32xbf16>
    %27 = arith.truncf %25 : vector<16x16xf32> to vector<16x16xbf16>
    %cst_13 = arith.constant dense<0.000000e+00> : vector<16x32xf32>
    %28 = tpu.matmul %27, %26, %cst_13 {dimension_numbers = #tpu.dot_dimension_numbers<[1], [0], [0], [1], [0, 0, 1, 1], [], []>} : vector<16x16xbf16>, vector<16x32xbf16>, vector<16x32xf32> -> vector<16x32xf32>
    %c0_14 = arith.constant 0 : index
    %c0_15 = arith.constant 0 : index
    %29 = vector.load %arg8[%c0_14, %c0_15] : memref<1x32xf32, #tpu.memory_space<vmem>>, vector<1x32xf32>
    %30 = vector.broadcast %29 : vector<1x32xf32> to vector<16x32xf32>
    %31 = arith.addf %28, %30 : vector<16x32xf32>
    %c0_16 = arith.constant 0 : index
    %c0_17 = arith.constant 0 : index
    %32 = vector.load %arg2[%c0_16, %c0_17] : memref<16x5xf32, #tpu.memory_space<vmem>>, vector<16x5xf32>
    %c0_18 = arith.constant 0 : index
    %c0_19 = arith.constant 0 : index
    %33 = vector.load %arg9[%c0_18, %c0_19] : memref<5x32xbf16, #tpu.memory_space<vmem>>, vector<5x32xbf16>
    %34 = arith.truncf %32 : vector<16x5xf32> to vector<16x5xbf16>
    %cst_20 = arith.constant dense<0.000000e+00> : vector<16x32xf32>
    %35 = tpu.matmul %34, %33, %cst_20 {dimension_numbers = #tpu.dot_dimension_numbers<[1], [0], [0], [1], [0, 0, 1, 1], [], []>} : vector<16x5xbf16>, vector<5x32xbf16>, vector<16x32xf32> -> vector<16x32xf32>
    %c0_21 = arith.constant 0 : index
    %c0_22 = arith.constant 0 : index
    %36 = vector.load %arg10[%c0_21, %c0_22] : memref<1x32xf32, #tpu.memory_space<vmem>>, vector<1x32xf32>
    %37 = vector.broadcast %36 : vector<1x32xf32> to vector<16x32xf32>
    %38 = arith.addf %35, %37 : vector<16x32xf32>
    %39 = arith.addf %31, %38 : vector<16x32xf32>
    %c0_23 = arith.constant 0 : index
    %c0_24 = arith.constant 0 : index
    %40 = vector.load %arg11[%c0_23, %c0_24] : memref<1x32xf32, #tpu.memory_space<vmem>>, vector<1x32xf32>
    %c0_25 = arith.constant 0 : index
    %c0_26 = arith.constant 0 : index
    %41 = vector.load %arg12[%c0_25, %c0_26] : memref<1x32xf32, #tpu.memory_space<vmem>>, vector<1x32xf32>
    %cst_27 = arith.constant dense<0.000000e+00> : vector<16xf32>
    %42 = vector.multi_reduction <add>, %39, %cst_27 [1] : vector<16x32xf32> to vector<16xf32>
    %43 = vector.shape_cast %42 : vector<16xf32> to vector<16x1xf32>
    %cst_28 = arith.constant 3.200000e+01 : f32
    %44 = vector.broadcast %cst_28 : f32 to vector<16x1xf32>
    %45 = arith.divf %43, %44 : vector<16x1xf32>
    %46 = vector.broadcast %45 : vector<16x1xf32> to vector<16x32xf32>
    %47 = arith.subf %39, %46 : vector<16x32xf32>
    %48 = arith.mulf %47, %47 : vector<16x32xf32>
    %cst_29 = arith.constant dense<0.000000e+00> : vector<16xf32>
    %49 = vector.multi_reduction <add>, %48, %cst_29 [1] : vector<16x32xf32> to vector<16xf32>
    %50 = vector.shape_cast %49 : vector<16xf32> to vector<16x1xf32>
    %cst_30 = arith.constant 3.200000e+01 : f32
    %51 = vector.broadcast %cst_30 : f32 to vector<16x1xf32>
    %52 = arith.divf %50, %51 : vector<16x1xf32>
    %53 = vector.broadcast %45 : vector<16x1xf32> to vector<16x32xf32>
    %54 = arith.subf %39, %53 : vector<16x32xf32>
    %cst_31 = arith.constant 9.99999996E-13 : f32
    %55 = vector.broadcast %cst_31 : f32 to vector<16x1xf32>
    %56 = arith.addf %52, %55 : vector<16x1xf32>
    %57 = math.rsqrt %56 : vector<16x1xf32>
    %58 = vector.broadcast %57 : vector<16x1xf32> to vector<16x32xf32>
    %59 = arith.mulf %54, %58 : vector<16x32xf32>
    %60 = vector.broadcast %40 : vector<1x32xf32> to vector<16x32xf32>
    %61 = arith.mulf %59, %60 : vector<16x32xf32>
    %62 = vector.broadcast %41 : vector<1x32xf32> to vector<16x32xf32>
    %63 = arith.addf %61, %62 : vector<16x32xf32>
    %c0_32 = arith.constant 0 : index
    %c0_33 = arith.constant 0 : index
    %64 = vector.load %arg3[%c0_32, %c0_33] : memref<2x8xf32, #tpu.memory_space<vmem>>, vector<2x8xf32>
    %cst_34 = arith.constant 1.000000e+00 : f32
    %65 = vector.broadcast %cst_34 : f32 to vector<2x8xf32>
    %66 = arith.subf %65, %64 : vector<2x8xf32>
    %cst_35 = arith.constant -1.000000e+04 : f32
    %67 = vector.broadcast %cst_35 : f32 to vector<2x8xf32>
    %68 = arith.mulf %66, %67 : vector<2x8xf32>
    %c0_36 = arith.constant 0 : index
    %c0_37 = arith.constant 0 : index
    %69 = vector.load %arg4[%c0_36, %c0_37] : memref<2x8xf32, #tpu.memory_space<vmem>>, vector<2x8xf32>
    %cst_38 = arith.constant 1.000000e+00 : f32
    %70 = vector.broadcast %cst_38 : f32 to vector<2x8xf32>
    %71 = arith.subf %70, %69 : vector<2x8xf32>
    %cst_39 = arith.constant -1.000000e+04 : f32
    %72 = vector.broadcast %cst_39 : f32 to vector<2x8xf32>
    %73 = arith.mulf %71, %72 : vector<2x8xf32>
    %c0_40 = arith.constant 0 : index
    %c0_41 = arith.constant 0 : index
    %c0_42 = arith.constant 0 : index
    %74 = vector.load %arg13[%c0_40, %c0_41, %c0_42] : memref<4x32x32xbf16, #tpu.memory_space<vmem>>, vector<1x32x32xbf16>
    %75 = vector.shape_cast %74 : vector<1x32x32xbf16> to vector<32x32xbf16>
    %76 = arith.truncf %24 : vector<16x32xf32> to vector<16x32xbf16>
    %cst_43 = arith.constant dense<0.000000e+00> : vector<16x32xf32>
    %77 = tpu.matmul %76, %75, %cst_43 {dimension_numbers = #tpu.dot_dimension_numbers<[1], [0], [0], [1], [0, 0, 1, 1], [], []>} : vector<16x32xbf16>, vector<32x32xbf16>, vector<16x32xf32> -> vector<16x32xf32>
    %c0_44 = arith.constant 0 : index
    %c0_45 = arith.constant 0 : index
    %c0_46 = arith.constant 0 : index
    %78 = vector.load %arg14[%c0_44, %c0_45, %c0_46] : memref<4x1x32xf32, #tpu.memory_space<vmem>>, vector<1x1x32xf32>
    %79 = vector.shape_cast %78 : vector<1x1x32xf32> to vector<1x32xf32>
    %80 = vector.broadcast %79 : vector<1x32xf32> to vector<16x32xf32>
    %81 = arith.addf %77, %80 : vector<16x32xf32>
    %c0_47 = arith.constant 0 : index
    %c0_48 = arith.constant 0 : index
    %c0_49 = arith.constant 0 : index
    %82 = vector.load %arg15[%c0_47, %c0_48, %c0_49] : memref<4x32x32xbf16, #tpu.memory_space<vmem>>, vector<1x32x32xbf16>
    %83 = vector.shape_cast %82 : vector<1x32x32xbf16> to vector<32x32xbf16>
    %84 = arith.truncf %24 : vector<16x32xf32> to vector<16x32xbf16>
    %cst_50 = arith.constant dense<0.000000e+00> : vector<16x32xf32>
    %85 = tpu.matmul %84, %83, %cst_50 {dimension_numbers = #tpu.dot_dimension_numbers<[1], [0], [0], [1], [0, 0, 1, 1], [], []>} : vector<16x32xbf16>, vector<32x32xbf16>, vector<16x32xf32> -> vector<16x32xf32>
    %c0_51 = arith.constant 0 : index
    %c0_52 = arith.constant 0 : index
    %c0_53 = arith.constant 0 : index
    %86 = vector.load %arg16[%c0_51, %c0_52, %c0_53] : memref<4x1x32xf32, #tpu.memory_space<vmem>>, vector<1x1x32xf32>
    %87 = vector.shape_cast %86 : vector<1x1x32xf32> to vector<1x32xf32>
    %88 = vector.broadcast %87 : vector<1x32xf32> to vector<16x32xf32>
    %89 = arith.addf %85, %88 : vector<16x32xf32>
    %c0_54 = arith.constant 0 : index
    %c0_55 = arith.constant 0 : index
    %c0_56 = arith.constant 0 : index
    %90 = vector.load %arg17[%c0_54, %c0_55, %c0_56] : memref<4x32x32xbf16, #tpu.memory_space<vmem>>, vector<1x32x32xbf16>
    %91 = vector.shape_cast %90 : vector<1x32x32xbf16> to vector<32x32xbf16>
    %92 = arith.truncf %24 : vector<16x32xf32> to vector<16x32xbf16>
    %cst_57 = arith.constant dense<0.000000e+00> : vector<16x32xf32>
    %93 = tpu.matmul %92, %91, %cst_57 {dimension_numbers = #tpu.dot_dimension_numbers<[1], [0], [0], [1], [0, 0, 1, 1], [], []>} : vector<16x32xbf16>, vector<32x32xbf16>, vector<16x32xf32> -> vector<16x32xf32>
    %c0_58 = arith.constant 0 : index
    %c0_59 = arith.constant 0 : index
    %c0_60 = arith.constant 0 : index
    %94 = vector.load %arg18[%c0_58, %c0_59, %c0_60] : memref<4x1x32xf32, #tpu.memory_space<vmem>>, vector<1x1x32xf32>
    %95 = vector.shape_cast %94 : vector<1x1x32xf32> to vector<1x32xf32>
    %96 = vector.broadcast %95 : vector<1x32xf32> to vector<16x32xf32>
    %97 = arith.addf %93, %96 : vector<16x32xf32>
    %cst_61 = arith.constant 0.353553385 : f32
    %98 = vector.broadcast %cst_61 : f32 to vector<16x32xf32>
    %99 = arith.mulf %81, %98 : vector<16x32xf32>
    %100 = vector.shape_cast %99 : vector<16x32xf32> to vector<2x8x32xf32>
    %101 = vector.shape_cast %89 : vector<16x32xf32> to vector<2x8x32xf32>
    %102 = vector.shape_cast %97 : vector<16x32xf32> to vector<2x8x32xf32>
    %103 = vector.shape_cast %68 : vector<2x8xf32> to vector<2x1x8xf32>
    %104 = vector.shape_cast %103 : vector<2x1x8xf32> to vector<2x1x8xf32>
    %105 = vector.broadcast %104 : vector<2x1x8xf32> to vector<2x8x8xf32>
    %cst_62 = arith.constant 0.000000e+00 : f32
    %106 = vector.broadcast %cst_62 : f32 to vector<16x32xf32>
    %107 = vector.extract_strided_slice %100 {offsets = [0, 0, 0], sizes = [2, 8, 8], strides = [1, 1, 1]} : vector<2x8x32xf32> to vector<2x8x8xf32>
    %108 = arith.truncf %107 : vector<2x8x8xf32> to vector<2x8x8xbf16>
    %109 = vector.extract_strided_slice %101 {offsets = [0, 0, 0], sizes = [2, 8, 8], strides = [1, 1, 1]} : vector<2x8x32xf32> to vector<2x8x8xf32>
    %110 = arith.truncf %109 : vector<2x8x8xf32> to vector<2x8x8xbf16>
    "tpu.trace_start"() <{level = 10 : i32, message = "bqd,bkd->bqk"}> : () -> ()
    %cst_63 = arith.constant dense<0.000000e+00> : vector<2x8x8xf32>
    %111 = tpu.matmul %108, %110, %cst_63 {dimension_numbers = #tpu.dot_dimension_numbers<[2], [2], [1], [1], [0, 0, 0, 1, 1, 1], [0], [0]>} : vector<2x8x8xbf16>, vector<2x8x8xbf16>, vector<2x8x8xf32> -> vector<2x8x8xf32>
    "tpu.trace_stop"() : () -> ()
    %112 = arith.addf %111, %105 : vector<2x8x8xf32>
    %cst_64 = arith.constant dense<0xFF800000> : vector<2x8xf32>
    %113 = vector.multi_reduction <maximumf>, %112, %cst_64 [2] : vector<2x8x8xf32> to vector<2x8xf32>
    %114 = vector.shape_cast %113 : vector<2x8xf32> to vector<2x8x1xf32>
    %115 = vector.broadcast %114 : vector<2x8x1xf32> to vector<2x8x8xf32>
    %116 = arith.subf %112, %115 : vector<2x8x8xf32>
    %117 = math.exp %116 : vector<2x8x8xf32>
    %cst_65 = arith.constant dense<0.000000e+00> : vector<2x8xf32>
    %118 = vector.multi_reduction <add>, %117, %cst_65 [2] : vector<2x8x8xf32> to vector<2x8xf32>
    %119 = vector.shape_cast %118 : vector<2x8xf32> to vector<2x8x1xf32>
    %120 = tpu.reciprocal %119 {approx = true} : vector<2x8x1xf32> -> vector<2x8x1xf32>
    %121 = vector.broadcast %120 : vector<2x8x1xf32> to vector<2x8x8xf32>
    %122 = arith.mulf %117, %121 : vector<2x8x8xf32>
    %123 = arith.truncf %122 : vector<2x8x8xf32> to vector<2x8x8xbf16>
    %124 = vector.extract_strided_slice %102 {offsets = [0, 0, 0], sizes = [2, 8, 8], strides = [1, 1, 1]} : vector<2x8x32xf32> to vector<2x8x8xf32>
    %125 = arith.truncf %124 : vector<2x8x8xf32> to vector<2x8x8xbf16>
    "tpu.trace_start"() <{level = 10 : i32, message = "bqk,bkd->bqd"}> : () -> ()
    %cst_66 = arith.constant dense<0.000000e+00> : vector<2x8x8xf32>
    %126 = tpu.matmul %123, %125, %cst_66 {dimension_numbers = #tpu.dot_dimension_numbers<[2], [1], [1], [2], [0, 0, 0, 1, 1, 2], [0], [0]>} : vector<2x8x8xbf16>, vector<2x8x8xbf16>, vector<2x8x8xf32> -> vector<2x8x8xf32>
    "tpu.trace_stop"() : () -> ()
    %127 = vector.shape_cast %126 : vector<2x8x8xf32> to vector<16x8xf32>
    %128 = arith.truncf %127 : vector<16x8xf32> to vector<16x8xbf16>
    %c0_67 = arith.constant 0 : index
    %c0_68 = arith.constant 0 : index
    %c0_69 = arith.constant 0 : index
    %c0_70 = arith.constant 0 : index
    %129 = vector.load %arg19[%c0_67, %c0_68, %c0_69, %c0_70] : memref<4x4x8x32xbf16, #tpu.memory_space<vmem>>, vector<1x1x8x32xbf16>
    %130 = vector.shape_cast %129 : vector<1x1x8x32xbf16> to vector<8x32xbf16>
    %cst_71 = arith.constant dense<0.000000e+00> : vector<16x32xf32>
    %131 = tpu.matmul %128, %130, %cst_71 {dimension_numbers = #tpu.dot_dimension_numbers<[1], [0], [0], [1], [0, 0, 1, 1], [], []>} : vector<16x8xbf16>, vector<8x32xbf16>, vector<16x32xf32> -> vector<16x32xf32>
    %132 = arith.addf %106, %131 : vector<16x32xf32>
    %133 = vector.extract_strided_slice %100 {offsets = [0, 0, 8], sizes = [2, 8, 8], strides = [1, 1, 1]} : vector<2x8x32xf32> to vector<2x8x8xf32>
    %134 = arith.truncf %133 : vector<2x8x8xf32> to vector<2x8x8xbf16>
    %135 = vector.extract_strided_slice %101 {offsets = [0, 0, 8], sizes = [2, 8, 8], strides = [1, 1, 1]} : vector<2x8x32xf32> to vector<2x8x8xf32>
    %136 = arith.truncf %135 : vector<2x8x8xf32> to vector<2x8x8xbf16>
    "tpu.trace_start"() <{level = 10 : i32, message = "bqd,bkd->bqk"}> : () -> ()
    %cst_72 = arith.constant dense<0.000000e+00> : vector<2x8x8xf32>
    %137 = tpu.matmul %134, %136, %cst_72 {dimension_numbers = #tpu.dot_dimension_numbers<[2], [2], [1], [1], [0, 0, 0, 1, 1, 1], [0], [0]>} : vector<2x8x8xbf16>, vector<2x8x8xbf16>, vector<2x8x8xf32> -> vector<2x8x8xf32>
    "tpu.trace_stop"() : () -> ()
    %138 = arith.addf %137, %105 : vector<2x8x8xf32>
    %cst_73 = arith.constant dense<0xFF800000> : vector<2x8xf32>
    %139 = vector.multi_reduction <maximumf>, %138, %cst_73 [2] : vector<2x8x8xf32> to vector<2x8xf32>
    %140 = vector.shape_cast %139 : vector<2x8xf32> to vector<2x8x1xf32>
    %141 = vector.broadcast %140 : vector<2x8x1xf32> to vector<2x8x8xf32>
    %142 = arith.subf %138, %141 : vector<2x8x8xf32>
    %143 = math.exp %142 : vector<2x8x8xf32>
    %cst_74 = arith.constant dense<0.000000e+00> : vector<2x8xf32>
    %144 = vector.multi_reduction <add>, %143, %cst_74 [2] : vector<2x8x8xf32> to vector<2x8xf32>
    %145 = vector.shape_cast %144 : vector<2x8xf32> to vector<2x8x1xf32>
    %146 = tpu.reciprocal %145 {approx = true} : vector<2x8x1xf32> -> vector<2x8x1xf32>
    %147 = vector.broadcast %146 : vector<2x8x1xf32> to vector<2x8x8xf32>
    %148 = arith.mulf %143, %147 : vector<2x8x8xf32>
    %149 = arith.truncf %148 : vector<2x8x8xf32> to vector<2x8x8xbf16>
    %150 = vector.extract_strided_slice %102 {offsets = [0, 0, 8], sizes = [2, 8, 8], strides = [1, 1, 1]} : vector<2x8x32xf32> to vector<2x8x8xf32>
    %151 = arith.truncf %150 : vector<2x8x8xf32> to vector<2x8x8xbf16>
    "tpu.trace_start"() <{level = 10 : i32, message = "bqk,bkd->bqd"}> : () -> ()
    %cst_75 = arith.constant dense<0.000000e+00> : vector<2x8x8xf32>
    %152 = tpu.matmul %149, %151, %cst_75 {dimension_numbers = #tpu.dot_dimension_numbers<[2], [1], [1], [2], [0, 0, 0, 1, 1, 2], [0], [0]>} : vector<2x8x8xbf16>, vector<2x8x8xbf16>, vector<2x8x8xf32> -> vector<2x8x8xf32>
    "tpu.trace_stop"() : () -> ()
    %153 = vector.shape_cast %152 : vector<2x8x8xf32> to vector<16x8xf32>
    %154 = arith.truncf %153 : vector<16x8xf32> to vector<16x8xbf16>
    %c0_76 = arith.constant 0 : index
    %c1 = arith.constant 1 : index
    %c0_77 = arith.constant 0 : index
    %c0_78 = arith.constant 0 : index
    %155 = vector.load %arg19[%c0_76, %c1, %c0_77, %c0_78] : memref<4x4x8x32xbf16, #tpu.memory_space<vmem>>, vector<1x1x8x32xbf16>
    %156 = vector.shape_cast %155 : vector<1x1x8x32xbf16> to vector<8x32xbf16>
    %cst_79 = arith.constant dense<0.000000e+00> : vector<16x32xf32>
    %157 = tpu.matmul %154, %156, %cst_79 {dimension_numbers = #tpu.dot_dimension_numbers<[1], [0], [0], [1], [0, 0, 1, 1], [], []>} : vector<16x8xbf16>, vector<8x32xbf16>, vector<16x32xf32> -> vector<16x32xf32>
    %158 = arith.addf %132, %157 : vector<16x32xf32>
    %159 = vector.extract_strided_slice %100 {offsets = [0, 0, 16], sizes = [2, 8, 8], strides = [1, 1, 1]} : vector<2x8x32xf32> to vector<2x8x8xf32>
    %160 = arith.truncf %159 : vector<2x8x8xf32> to vector<2x8x8xbf16>
    %161 = vector.extract_strided_slice %101 {offsets = [0, 0, 16], sizes = [2, 8, 8], strides = [1, 1, 1]} : vector<2x8x32xf32> to vector<2x8x8xf32>
    %162 = arith.truncf %161 : vector<2x8x8xf32> to vector<2x8x8xbf16>
    "tpu.trace_start"() <{level = 10 : i32, message = "bqd,bkd->bqk"}> : () -> ()
    %cst_80 = arith.constant dense<0.000000e+00> : vector<2x8x8xf32>
    %163 = tpu.matmul %160, %162, %cst_80 {dimension_numbers = #tpu.dot_dimension_numbers<[2], [2], [1], [1], [0, 0, 0, 1, 1, 1], [0], [0]>} : vector<2x8x8xbf16>, vector<2x8x8xbf16>, vector<2x8x8xf32> -> vector<2x8x8xf32>
    "tpu.trace_stop"() : () -> ()
    %164 = arith.addf %163, %105 : vector<2x8x8xf32>
    %cst_81 = arith.constant dense<0xFF800000> : vector<2x8xf32>
    %165 = vector.multi_reduction <maximumf>, %164, %cst_81 [2] : vector<2x8x8xf32> to vector<2x8xf32>
    %166 = vector.shape_cast %165 : vector<2x8xf32> to vector<2x8x1xf32>
    %167 = vector.broadcast %166 : vector<2x8x1xf32> to vector<2x8x8xf32>
    %168 = arith.subf %164, %167 : vector<2x8x8xf32>
    %169 = math.exp %168 : vector<2x8x8xf32>
    %cst_82 = arith.constant dense<0.000000e+00> : vector<2x8xf32>
    %170 = vector.multi_reduction <add>, %169, %cst_82 [2] : vector<2x8x8xf32> to vector<2x8xf32>
    %171 = vector.shape_cast %170 : vector<2x8xf32> to vector<2x8x1xf32>
    %172 = tpu.reciprocal %171 {approx = true} : vector<2x8x1xf32> -> vector<2x8x1xf32>
    %173 = vector.broadcast %172 : vector<2x8x1xf32> to vector<2x8x8xf32>
    %174 = arith.mulf %169, %173 : vector<2x8x8xf32>
    %175 = arith.truncf %174 : vector<2x8x8xf32> to vector<2x8x8xbf16>
    %176 = vector.extract_strided_slice %102 {offsets = [0, 0, 16], sizes = [2, 8, 8], strides = [1, 1, 1]} : vector<2x8x32xf32> to vector<2x8x8xf32>
    %177 = arith.truncf %176 : vector<2x8x8xf32> to vector<2x8x8xbf16>
    "tpu.trace_start"() <{level = 10 : i32, message = "bqk,bkd->bqd"}> : () -> ()
    %cst_83 = arith.constant dense<0.000000e+00> : vector<2x8x8xf32>
    %178 = tpu.matmul %175, %177, %cst_83 {dimension_numbers = #tpu.dot_dimension_numbers<[2], [1], [1], [2], [0, 0, 0, 1, 1, 2], [0], [0]>} : vector<2x8x8xbf16>, vector<2x8x8xbf16>, vector<2x8x8xf32> -> vector<2x8x8xf32>
    "tpu.trace_stop"() : () -> ()
    %179 = vector.shape_cast %178 : vector<2x8x8xf32> to vector<16x8xf32>
    %180 = arith.truncf %179 : vector<16x8xf32> to vector<16x8xbf16>
    %c0_84 = arith.constant 0 : index
    %c2 = arith.constant 2 : index
    %c0_85 = arith.constant 0 : index
    %c0_86 = arith.constant 0 : index
    %181 = vector.load %arg19[%c0_84, %c2, %c0_85, %c0_86] : memref<4x4x8x32xbf16, #tpu.memory_space<vmem>>, vector<1x1x8x32xbf16>
    %182 = vector.shape_cast %181 : vector<1x1x8x32xbf16> to vector<8x32xbf16>
    %cst_87 = arith.constant dense<0.000000e+00> : vector<16x32xf32>
    %183 = tpu.matmul %180, %182, %cst_87 {dimension_numbers = #tpu.dot_dimension_numbers<[1], [0], [0], [1], [0, 0, 1, 1], [], []>} : vector<16x8xbf16>, vector<8x32xbf16>, vector<16x32xf32> -> vector<16x32xf32>
    %184 = arith.addf %158, %183 : vector<16x32xf32>
    %185 = vector.extract_strided_slice %100 {offsets = [0, 0, 24], sizes = [2, 8, 8], strides = [1, 1, 1]} : vector<2x8x32xf32> to vector<2x8x8xf32>
    %186 = arith.truncf %185 : vector<2x8x8xf32> to vector<2x8x8xbf16>
    %187 = vector.extract_strided_slice %101 {offsets = [0, 0, 24], sizes = [2, 8, 8], strides = [1, 1, 1]} : vector<2x8x32xf32> to vector<2x8x8xf32>
    %188 = arith.truncf %187 : vector<2x8x8xf32> to vector<2x8x8xbf16>
    "tpu.trace_start"() <{level = 10 : i32, message = "bqd,bkd->bqk"}> : () -> ()
    %cst_88 = arith.constant dense<0.000000e+00> : vector<2x8x8xf32>
    %189 = tpu.matmul %186, %188, %cst_88 {dimension_numbers = #tpu.dot_dimension_numbers<[2], [2], [1], [1], [0, 0, 0, 1, 1, 1], [0], [0]>} : vector<2x8x8xbf16>, vector<2x8x8xbf16>, vector<2x8x8xf32> -> vector<2x8x8xf32>
    "tpu.trace_stop"() : () -> ()
    %190 = arith.addf %189, %105 : vector<2x8x8xf32>
    %cst_89 = arith.constant dense<0xFF800000> : vector<2x8xf32>
    %191 = vector.multi_reduction <maximumf>, %190, %cst_89 [2] : vector<2x8x8xf32> to vector<2x8xf32>
    %192 = vector.shape_cast %191 : vector<2x8xf32> to vector<2x8x1xf32>
    %193 = vector.broadcast %192 : vector<2x8x1xf32> to vector<2x8x8xf32>
    %194 = arith.subf %190, %193 : vector<2x8x8xf32>
    %195 = math.exp %194 : vector<2x8x8xf32>
    %cst_90 = arith.constant dense<0.000000e+00> : vector<2x8xf32>
    %196 = vector.multi_reduction <add>, %195, %cst_90 [2] : vector<2x8x8xf32> to vector<2x8xf32>
    %197 = vector.shape_cast %196 : vector<2x8xf32> to vector<2x8x1xf32>
    %198 = tpu.reciprocal %197 {approx = true} : vector<2x8x1xf32> -> vector<2x8x1xf32>
    %199 = vector.broadcast %198 : vector<2x8x1xf32> to vector<2x8x8xf32>
    %200 = arith.mulf %195, %199 : vector<2x8x8xf32>
    %201 = arith.truncf %200 : vector<2x8x8xf32> to vector<2x8x8xbf16>
    %202 = vector.extract_strided_slice %102 {offsets = [0, 0, 24], sizes = [2, 8, 8], strides = [1, 1, 1]} : vector<2x8x32xf32> to vector<2x8x8xf32>
    %203 = arith.truncf %202 : vector<2x8x8xf32> to vector<2x8x8xbf16>
    "tpu.trace_start"() <{level = 10 : i32, message = "bqk,bkd->bqd"}> : () -> ()
    %cst_91 = arith.constant dense<0.000000e+00> : vector<2x8x8xf32>
    %204 = tpu.matmul %201, %203, %cst_91 {dimension_numbers = #tpu.dot_dimension_numbers<[2], [1], [1], [2], [0, 0, 0, 1, 1, 2], [0], [0]>} : vector<2x8x8xbf16>, vector<2x8x8xbf16>, vector<2x8x8xf32> -> vector<2x8x8xf32>
    "tpu.trace_stop"() : () -> ()
    %205 = vector.shape_cast %204 : vector<2x8x8xf32> to vector<16x8xf32>
    %206 = arith.truncf %205 : vector<16x8xf32> to vector<16x8xbf16>
    %c0_92 = arith.constant 0 : index
    %c3 = arith.constant 3 : index
    %c0_93 = arith.constant 0 : index
    %c0_94 = arith.constant 0 : index
    %207 = vector.load %arg19[%c0_92, %c3, %c0_93, %c0_94] : memref<4x4x8x32xbf16, #tpu.memory_space<vmem>>, vector<1x1x8x32xbf16>
    %208 = vector.shape_cast %207 : vector<1x1x8x32xbf16> to vector<8x32xbf16>
    %cst_95 = arith.constant dense<0.000000e+00> : vector<16x32xf32>
    %209 = tpu.matmul %206, %208, %cst_95 {dimension_numbers = #tpu.dot_dimension_numbers<[1], [0], [0], [1], [0, 0, 1, 1], [], []>} : vector<16x8xbf16>, vector<8x32xbf16>, vector<16x32xf32> -> vector<16x32xf32>
    %210 = arith.addf %184, %209 : vector<16x32xf32>
    %c0_96 = arith.constant 0 : index
    %c0_97 = arith.constant 0 : index
    %c0_98 = arith.constant 0 : index
    %211 = vector.load %arg20[%c0_96, %c0_97, %c0_98] : memref<4x1x32xf32, #tpu.memory_space<vmem>>, vector<1x1x32xf32>
    %212 = vector.shape_cast %211 : vector<1x1x32xf32> to vector<1x32xf32>
    %213 = vector.broadcast %212 : vector<1x32xf32> to vector<16x32xf32>
    %214 = arith.addf %210, %213 : vector<16x32xf32>
    %215 = arith.addf %214, %24 : vector<16x32xf32>
    %c0_99 = arith.constant 0 : index
    %c0_100 = arith.constant 0 : index
    %c0_101 = arith.constant 0 : index
    %216 = vector.load %arg21[%c0_99, %c0_100, %c0_101] : memref<4x1x32xf32, #tpu.memory_space<vmem>>, vector<1x1x32xf32>
    %217 = vector.shape_cast %216 : vector<1x1x32xf32> to vector<1x32xf32>
    %c0_102 = arith.constant 0 : index
    %c0_103 = arith.constant 0 : index
    %c0_104 = arith.constant 0 : index
    %218 = vector.load %arg22[%c0_102, %c0_103, %c0_104] : memref<4x1x32xf32, #tpu.memory_space<vmem>>, vector<1x1x32xf32>
    %219 = vector.shape_cast %218 : vector<1x1x32xf32> to vector<1x32xf32>
    %cst_105 = arith.constant dense<0.000000e+00> : vector<16xf32>
    %220 = vector.multi_reduction <add>, %215, %cst_105 [1] : vector<16x32xf32> to vector<16xf32>
    %221 = vector.shape_cast %220 : vector<16xf32> to vector<16x1xf32>
    %cst_106 = arith.constant 3.200000e+01 : f32
    %222 = vector.broadcast %cst_106 : f32 to vector<16x1xf32>
    %223 = arith.divf %221, %222 : vector<16x1xf32>
    %224 = vector.broadcast %223 : vector<16x1xf32> to vector<16x32xf32>
    %225 = arith.subf %215, %224 : vector<16x32xf32>
    %226 = arith.mulf %225, %225 : vector<16x32xf32>
    %cst_107 = arith.constant dense<0.000000e+00> : vector<16xf32>
    %227 = vector.multi_reduction <add>, %226, %cst_107 [1] : vector<16x32xf32> to vector<16xf32>
    %228 = vector.shape_cast %227 : vector<16xf32> to vector<16x1xf32>
    %cst_108 = arith.constant 3.200000e+01 : f32
    %229 = vector.broadcast %cst_108 : f32 to vector<16x1xf32>
    %230 = arith.divf %228, %229 : vector<16x1xf32>
    %231 = vector.broadcast %223 : vector<16x1xf32> to vector<16x32xf32>
    %232 = arith.subf %215, %231 : vector<16x32xf32>
    %cst_109 = arith.constant 9.99999996E-13 : f32
    %233 = vector.broadcast %cst_109 : f32 to vector<16x1xf32>
    %234 = arith.addf %230, %233 : vector<16x1xf32>
    %235 = math.rsqrt %234 : vector<16x1xf32>
    %236 = vector.broadcast %235 : vector<16x1xf32> to vector<16x32xf32>
    %237 = arith.mulf %232, %236 : vector<16x32xf32>
    %238 = vector.broadcast %217 : vector<1x32xf32> to vector<16x32xf32>
    %239 = arith.mulf %237, %238 : vector<16x32xf32>
    %240 = vector.broadcast %219 : vector<1x32xf32> to vector<16x32xf32>
    %241 = arith.addf %239, %240 : vector<16x32xf32>
    %c0_110 = arith.constant 0 : index
    %c0_111 = arith.constant 0 : index
    %c0_112 = arith.constant 0 : index
    %242 = vector.load %arg23[%c0_110, %c0_111, %c0_112] : memref<4x32x64xbf16, #tpu.memory_space<vmem>>, vector<1x32x64xbf16>
    %243 = vector.shape_cast %242 : vector<1x32x64xbf16> to vector<32x64xbf16>
    %244 = arith.truncf %241 : vector<16x32xf32> to vector<16x32xbf16>
    %cst_113 = arith.constant dense<0.000000e+00> : vector<16x64xf32>
    %245 = tpu.matmul %244, %243, %cst_113 {dimension_numbers = #tpu.dot_dimension_numbers<[1], [0], [0], [1], [0, 0, 1, 1], [], []>} : vector<16x32xbf16>, vector<32x64xbf16>, vector<16x64xf32> -> vector<16x64xf32>
    %c0_114 = arith.constant 0 : index
    %c0_115 = arith.constant 0 : index
    %c0_116 = arith.constant 0 : index
    %246 = vector.load %arg24[%c0_114, %c0_115, %c0_116] : memref<4x1x64xf32, #tpu.memory_space<vmem>>, vector<1x1x64xf32>
    %247 = vector.shape_cast %246 : vector<1x1x64xf32> to vector<1x64xf32>
    %248 = vector.broadcast %247 : vector<1x64xf32> to vector<16x64xf32>
    %249 = arith.addf %245, %248 : vector<16x64xf32>
    %cst_117 = arith.constant 5.000000e-01 : f32
    %250 = vector.broadcast %cst_117 : f32 to vector<16x64xf32>
    %251 = arith.mulf %250, %249 : vector<16x64xf32>
    %cst_118 = arith.constant 4.471500e-02 : f32
    %252 = vector.broadcast %cst_118 : f32 to vector<16x64xf32>
    %253 = arith.mulf %252, %249 : vector<16x64xf32>
    %254 = arith.mulf %253, %249 : vector<16x64xf32>
    %255 = arith.mulf %254, %249 : vector<16x64xf32>
    %256 = arith.addf %249, %255 : vector<16x64xf32>
    %cst_119 = arith.constant 0.797884583 : f32
    %257 = vector.broadcast %cst_119 : f32 to vector<16x64xf32>
    %258 = arith.mulf %257, %256 : vector<16x64xf32>
    %259 = math.tanh %258 : vector<16x64xf32>
    %cst_120 = arith.constant 1.000000e+00 : f32
    %260 = vector.broadcast %cst_120 : f32 to vector<16x64xf32>
    %261 = arith.addf %260, %259 : vector<16x64xf32>
    %262 = arith.mulf %251, %261 : vector<16x64xf32>
    %c0_121 = arith.constant 0 : index
    %c0_122 = arith.constant 0 : index
    %c0_123 = arith.constant 0 : index
    %263 = vector.load %arg25[%c0_121, %c0_122, %c0_123] : memref<4x64x32xbf16, #tpu.memory_space<vmem>>, vector<1x64x32xbf16>
    %264 = vector.shape_cast %263 : vector<1x64x32xbf16> to vector<64x32xbf16>
    %265 = arith.truncf %262 : vector<16x64xf32> to vector<16x64xbf16>
    %cst_124 = arith.constant dense<0.000000e+00> : vector<16x32xf32>
    %266 = tpu.matmul %265, %264, %cst_124 {dimension_numbers = #tpu.dot_dimension_numbers<[1], [0], [0], [1], [0, 0, 1, 1], [], []>} : vector<16x64xbf16>, vector<64x32xbf16>, vector<16x32xf32> -> vector<16x32xf32>
    %c0_125 = arith.constant 0 : index
    %c0_126 = arith.constant 0 : index
    %c0_127 = arith.constant 0 : index
    %267 = vector.load %arg26[%c0_125, %c0_126, %c0_127] : memref<4x1x32xf32, #tpu.memory_space<vmem>>, vector<1x1x32xf32>
    %268 = vector.shape_cast %267 : vector<1x1x32xf32> to vector<1x32xf32>
    %269 = vector.broadcast %268 : vector<1x32xf32> to vector<16x32xf32>
    %270 = arith.addf %266, %269 : vector<16x32xf32>
    %271 = arith.addf %270, %241 : vector<16x32xf32>
    %c0_128 = arith.constant 0 : index
    %c0_129 = arith.constant 0 : index
    %c0_130 = arith.constant 0 : index
    %272 = vector.load %arg27[%c0_128, %c0_129, %c0_130] : memref<4x1x32xf32, #tpu.memory_space<vmem>>, vector<1x1x32xf32>
    %273 = vector.shape_cast %272 : vector<1x1x32xf32> to vector<1x32xf32>
    %c0_131 = arith.constant 0 : index
    %c0_132 = arith.constant 0 : index
    %c0_133 = arith.constant 0 : index
    %274 = vector.load %arg28[%c0_131, %c0_132, %c0_133] : memref<4x1x32xf32, #tpu.memory_space<vmem>>, vector<1x1x32xf32>
    %275 = vector.shape_cast %274 : vector<1x1x32xf32> to vector<1x32xf32>
    %cst_134 = arith.constant dense<0.000000e+00> : vector<16xf32>
    %276 = vector.multi_reduction <add>, %271, %cst_134 [1] : vector<16x32xf32> to vector<16xf32>
    %277 = vector.shape_cast %276 : vector<16xf32> to vector<16x1xf32>
    %cst_135 = arith.constant 3.200000e+01 : f32
    %278 = vector.broadcast %cst_135 : f32 to vector<16x1xf32>
    %279 = arith.divf %277, %278 : vector<16x1xf32>
    %280 = vector.broadcast %279 : vector<16x1xf32> to vector<16x32xf32>
    %281 = arith.subf %271, %280 : vector<16x32xf32>
    %282 = arith.mulf %281, %281 : vector<16x32xf32>
    %cst_136 = arith.constant dense<0.000000e+00> : vector<16xf32>
    %283 = vector.multi_reduction <add>, %282, %cst_136 [1] : vector<16x32xf32> to vector<16xf32>
    %284 = vector.shape_cast %283 : vector<16xf32> to vector<16x1xf32>
    %cst_137 = arith.constant 3.200000e+01 : f32
    %285 = vector.broadcast %cst_137 : f32 to vector<16x1xf32>
    %286 = arith.divf %284, %285 : vector<16x1xf32>
    %287 = vector.broadcast %279 : vector<16x1xf32> to vector<16x32xf32>
    %288 = arith.subf %271, %287 : vector<16x32xf32>
    %cst_138 = arith.constant 9.99999996E-13 : f32
    %289 = vector.broadcast %cst_138 : f32 to vector<16x1xf32>
    %290 = arith.addf %286, %289 : vector<16x1xf32>
    %291 = math.rsqrt %290 : vector<16x1xf32>
    %292 = vector.broadcast %291 : vector<16x1xf32> to vector<16x32xf32>
    %293 = arith.mulf %288, %292 : vector<16x32xf32>
    %294 = vector.broadcast %273 : vector<1x32xf32> to vector<16x32xf32>
    %295 = arith.mulf %293, %294 : vector<16x32xf32>
    %296 = vector.broadcast %275 : vector<1x32xf32> to vector<16x32xf32>
    %297 = arith.addf %295, %296 : vector<16x32xf32>
    %c1_139 = arith.constant 1 : index
    %c0_140 = arith.constant 0 : index
    %c0_141 = arith.constant 0 : index
    %298 = vector.load %arg13[%c1_139, %c0_140, %c0_141] : memref<4x32x32xbf16, #tpu.memory_space<vmem>>, vector<1x32x32xbf16>
    %299 = vector.shape_cast %298 : vector<1x32x32xbf16> to vector<32x32xbf16>
    %300 = arith.truncf %63 : vector<16x32xf32> to vector<16x32xbf16>
    %cst_142 = arith.constant dense<0.000000e+00> : vector<16x32xf32>
    %301 = tpu.matmul %300, %299, %cst_142 {dimension_numbers = #tpu.dot_dimension_numbers<[1], [0], [0], [1], [0, 0, 1, 1], [], []>} : vector<16x32xbf16>, vector<32x32xbf16>, vector<16x32xf32> -> vector<16x32xf32>
    %c1_143 = arith.constant 1 : index
    %c0_144 = arith.constant 0 : index
    %c0_145 = arith.constant 0 : index
    %302 = vector.load %arg14[%c1_143, %c0_144, %c0_145] : memref<4x1x32xf32, #tpu.memory_space<vmem>>, vector<1x1x32xf32>
    %303 = vector.shape_cast %302 : vector<1x1x32xf32> to vector<1x32xf32>
    %304 = vector.broadcast %303 : vector<1x32xf32> to vector<16x32xf32>
    %305 = arith.addf %301, %304 : vector<16x32xf32>
    %c1_146 = arith.constant 1 : index
    %c0_147 = arith.constant 0 : index
    %c0_148 = arith.constant 0 : index
    %306 = vector.load %arg15[%c1_146, %c0_147, %c0_148] : memref<4x32x32xbf16, #tpu.memory_space<vmem>>, vector<1x32x32xbf16>
    %307 = vector.shape_cast %306 : vector<1x32x32xbf16> to vector<32x32xbf16>
    %308 = arith.truncf %63 : vector<16x32xf32> to vector<16x32xbf16>
    %cst_149 = arith.constant dense<0.000000e+00> : vector<16x32xf32>
    %309 = tpu.matmul %308, %307, %cst_149 {dimension_numbers = #tpu.dot_dimension_numbers<[1], [0], [0], [1], [0, 0, 1, 1], [], []>} : vector<16x32xbf16>, vector<32x32xbf16>, vector<16x32xf32> -> vector<16x32xf32>
    %c1_150 = arith.constant 1 : index
    %c0_151 = arith.constant 0 : index
    %c0_152 = arith.constant 0 : index
    %310 = vector.load %arg16[%c1_150, %c0_151, %c0_152] : memref<4x1x32xf32, #tpu.memory_space<vmem>>, vector<1x1x32xf32>
    %311 = vector.shape_cast %310 : vector<1x1x32xf32> to vector<1x32xf32>
    %312 = vector.broadcast %311 : vector<1x32xf32> to vector<16x32xf32>
    %313 = arith.addf %309, %312 : vector<16x32xf32>
    %c1_153 = arith.constant 1 : index
    %c0_154 = arith.constant 0 : index
    %c0_155 = arith.constant 0 : index
    %314 = vector.load %arg17[%c1_153, %c0_154, %c0_155] : memref<4x32x32xbf16, #tpu.memory_space<vmem>>, vector<1x32x32xbf16>
    %315 = vector.shape_cast %314 : vector<1x32x32xbf16> to vector<32x32xbf16>
    %316 = arith.truncf %63 : vector<16x32xf32> to vector<16x32xbf16>
    %cst_156 = arith.constant dense<0.000000e+00> : vector<16x32xf32>
    %317 = tpu.matmul %316, %315, %cst_156 {dimension_numbers = #tpu.dot_dimension_numbers<[1], [0], [0], [1], [0, 0, 1, 1], [], []>} : vector<16x32xbf16>, vector<32x32xbf16>, vector<16x32xf32> -> vector<16x32xf32>
    %c1_157 = arith.constant 1 : index
    %c0_158 = arith.constant 0 : index
    %c0_159 = arith.constant 0 : index
    %318 = vector.load %arg18[%c1_157, %c0_158, %c0_159] : memref<4x1x32xf32, #tpu.memory_space<vmem>>, vector<1x1x32xf32>
    %319 = vector.shape_cast %318 : vector<1x1x32xf32> to vector<1x32xf32>
    %320 = vector.broadcast %319 : vector<1x32xf32> to vector<16x32xf32>
    %321 = arith.addf %317, %320 : vector<16x32xf32>
    %cst_160 = arith.constant 0.353553385 : f32
    %322 = vector.broadcast %cst_160 : f32 to vector<16x32xf32>
    %323 = arith.mulf %305, %322 : vector<16x32xf32>
    %324 = vector.shape_cast %323 : vector<16x32xf32> to vector<2x8x32xf32>
    %325 = vector.shape_cast %313 : vector<16x32xf32> to vector<2x8x32xf32>
    %326 = vector.shape_cast %321 : vector<16x32xf32> to vector<2x8x32xf32>
    %327 = vector.shape_cast %73 : vector<2x8xf32> to vector<2x1x8xf32>
    %328 = vector.shape_cast %327 : vector<2x1x8xf32> to vector<2x1x8xf32>
    %329 = vector.broadcast %328 : vector<2x1x8xf32> to vector<2x8x8xf32>
    %cst_161 = arith.constant 0.000000e+00 : f32
    %330 = vector.broadcast %cst_161 : f32 to vector<16x32xf32>
    %331 = vector.extract_strided_slice %324 {offsets = [0, 0, 0], sizes = [2, 8, 8], strides = [1, 1, 1]} : vector<2x8x32xf32> to vector<2x8x8xf32>
    %332 = arith.truncf %331 : vector<2x8x8xf32> to vector<2x8x8xbf16>
    %333 = vector.extract_strided_slice %325 {offsets = [0, 0, 0], sizes = [2, 8, 8], strides = [1, 1, 1]} : vector<2x8x32xf32> to vector<2x8x8xf32>
    %334 = arith.truncf %333 : vector<2x8x8xf32> to vector<2x8x8xbf16>
    "tpu.trace_start"() <{level = 10 : i32, message = "bqd,bkd->bqk"}> : () -> ()
    %cst_162 = arith.constant dense<0.000000e+00> : vector<2x8x8xf32>
    %335 = tpu.matmul %332, %334, %cst_162 {dimension_numbers = #tpu.dot_dimension_numbers<[2], [2], [1], [1], [0, 0, 0, 1, 1, 1], [0], [0]>} : vector<2x8x8xbf16>, vector<2x8x8xbf16>, vector<2x8x8xf32> -> vector<2x8x8xf32>
    "tpu.trace_stop"() : () -> ()
    %336 = arith.addf %335, %329 : vector<2x8x8xf32>
    %cst_163 = arith.constant dense<0xFF800000> : vector<2x8xf32>
    %337 = vector.multi_reduction <maximumf>, %336, %cst_163 [2] : vector<2x8x8xf32> to vector<2x8xf32>
    %338 = vector.shape_cast %337 : vector<2x8xf32> to vector<2x8x1xf32>
    %339 = vector.broadcast %338 : vector<2x8x1xf32> to vector<2x8x8xf32>
    %340 = arith.subf %336, %339 : vector<2x8x8xf32>
    %341 = math.exp %340 : vector<2x8x8xf32>
    %cst_164 = arith.constant dense<0.000000e+00> : vector<2x8xf32>
    %342 = vector.multi_reduction <add>, %341, %cst_164 [2] : vector<2x8x8xf32> to vector<2x8xf32>
    %343 = vector.shape_cast %342 : vector<2x8xf32> to vector<2x8x1xf32>
    %344 = tpu.reciprocal %343 {approx = true} : vector<2x8x1xf32> -> vector<2x8x1xf32>
    %345 = vector.broadcast %344 : vector<2x8x1xf32> to vector<2x8x8xf32>
    %346 = arith.mulf %341, %345 : vector<2x8x8xf32>
    %347 = arith.truncf %346 : vector<2x8x8xf32> to vector<2x8x8xbf16>
    %348 = vector.extract_strided_slice %326 {offsets = [0, 0, 0], sizes = [2, 8, 8], strides = [1, 1, 1]} : vector<2x8x32xf32> to vector<2x8x8xf32>
    %349 = arith.truncf %348 : vector<2x8x8xf32> to vector<2x8x8xbf16>
    "tpu.trace_start"() <{level = 10 : i32, message = "bqk,bkd->bqd"}> : () -> ()
    %cst_165 = arith.constant dense<0.000000e+00> : vector<2x8x8xf32>
    %350 = tpu.matmul %347, %349, %cst_165 {dimension_numbers = #tpu.dot_dimension_numbers<[2], [1], [1], [2], [0, 0, 0, 1, 1, 2], [0], [0]>} : vector<2x8x8xbf16>, vector<2x8x8xbf16>, vector<2x8x8xf32> -> vector<2x8x8xf32>
    "tpu.trace_stop"() : () -> ()
    %351 = vector.shape_cast %350 : vector<2x8x8xf32> to vector<16x8xf32>
    %352 = arith.truncf %351 : vector<16x8xf32> to vector<16x8xbf16>
    %c1_166 = arith.constant 1 : index
    %c0_167 = arith.constant 0 : index
    %c0_168 = arith.constant 0 : index
    %c0_169 = arith.constant 0 : index
    %353 = vector.load %arg19[%c1_166, %c0_167, %c0_168, %c0_169] : memref<4x4x8x32xbf16, #tpu.memory_space<vmem>>, vector<1x1x8x32xbf16>
    %354 = vector.shape_cast %353 : vector<1x1x8x32xbf16> to vector<8x32xbf16>
    %cst_170 = arith.constant dense<0.000000e+00> : vector<16x32xf32>
    %355 = tpu.matmul %352, %354, %cst_170 {dimension_numbers = #tpu.dot_dimension_numbers<[1], [0], [0], [1], [0, 0, 1, 1], [], []>} : vector<16x8xbf16>, vector<8x32xbf16>, vector<16x32xf32> -> vector<16x32xf32>
    %356 = arith.addf %330, %355 : vector<16x32xf32>
    %357 = vector.extract_strided_slice %324 {offsets = [0, 0, 8], sizes = [2, 8, 8], strides = [1, 1, 1]} : vector<2x8x32xf32> to vector<2x8x8xf32>
    %358 = arith.truncf %357 : vector<2x8x8xf32> to vector<2x8x8xbf16>
    %359 = vector.extract_strided_slice %325 {offsets = [0, 0, 8], sizes = [2, 8, 8], strides = [1, 1, 1]} : vector<2x8x32xf32> to vector<2x8x8xf32>
    %360 = arith.truncf %359 : vector<2x8x8xf32> to vector<2x8x8xbf16>
    "tpu.trace_start"() <{level = 10 : i32, message = "bqd,bkd->bqk"}> : () -> ()
    %cst_171 = arith.constant dense<0.000000e+00> : vector<2x8x8xf32>
    %361 = tpu.matmul %358, %360, %cst_171 {dimension_numbers = #tpu.dot_dimension_numbers<[2], [2], [1], [1], [0, 0, 0, 1, 1, 1], [0], [0]>} : vector<2x8x8xbf16>, vector<2x8x8xbf16>, vector<2x8x8xf32> -> vector<2x8x8xf32>
    "tpu.trace_stop"() : () -> ()
    %362 = arith.addf %361, %329 : vector<2x8x8xf32>
    %cst_172 = arith.constant dense<0xFF800000> : vector<2x8xf32>
    %363 = vector.multi_reduction <maximumf>, %362, %cst_172 [2] : vector<2x8x8xf32> to vector<2x8xf32>
    %364 = vector.shape_cast %363 : vector<2x8xf32> to vector<2x8x1xf32>
    %365 = vector.broadcast %364 : vector<2x8x1xf32> to vector<2x8x8xf32>
    %366 = arith.subf %362, %365 : vector<2x8x8xf32>
    %367 = math.exp %366 : vector<2x8x8xf32>
    %cst_173 = arith.constant dense<0.000000e+00> : vector<2x8xf32>
    %368 = vector.multi_reduction <add>, %367, %cst_173 [2] : vector<2x8x8xf32> to vector<2x8xf32>
    %369 = vector.shape_cast %368 : vector<2x8xf32> to vector<2x8x1xf32>
    %370 = tpu.reciprocal %369 {approx = true} : vector<2x8x1xf32> -> vector<2x8x1xf32>
    %371 = vector.broadcast %370 : vector<2x8x1xf32> to vector<2x8x8xf32>
    %372 = arith.mulf %367, %371 : vector<2x8x8xf32>
    %373 = arith.truncf %372 : vector<2x8x8xf32> to vector<2x8x8xbf16>
    %374 = vector.extract_strided_slice %326 {offsets = [0, 0, 8], sizes = [2, 8, 8], strides = [1, 1, 1]} : vector<2x8x32xf32> to vector<2x8x8xf32>
    %375 = arith.truncf %374 : vector<2x8x8xf32> to vector<2x8x8xbf16>
    "tpu.trace_start"() <{level = 10 : i32, message = "bqk,bkd->bqd"}> : () -> ()
    %cst_174 = arith.constant dense<0.000000e+00> : vector<2x8x8xf32>
    %376 = tpu.matmul %373, %375, %cst_174 {dimension_numbers = #tpu.dot_dimension_numbers<[2], [1], [1], [2], [0, 0, 0, 1, 1, 2], [0], [0]>} : vector<2x8x8xbf16>, vector<2x8x8xbf16>, vector<2x8x8xf32> -> vector<2x8x8xf32>
    "tpu.trace_stop"() : () -> ()
    %377 = vector.shape_cast %376 : vector<2x8x8xf32> to vector<16x8xf32>
    %378 = arith.truncf %377 : vector<16x8xf32> to vector<16x8xbf16>
    %c1_175 = arith.constant 1 : index
    %c1_176 = arith.constant 1 : index
    %c0_177 = arith.constant 0 : index
    %c0_178 = arith.constant 0 : index
    %379 = vector.load %arg19[%c1_175, %c1_176, %c0_177, %c0_178] : memref<4x4x8x32xbf16, #tpu.memory_space<vmem>>, vector<1x1x8x32xbf16>
    %380 = vector.shape_cast %379 : vector<1x1x8x32xbf16> to vector<8x32xbf16>
    %cst_179 = arith.constant dense<0.000000e+00> : vector<16x32xf32>
    %381 = tpu.matmul %378, %380, %cst_179 {dimension_numbers = #tpu.dot_dimension_numbers<[1], [0], [0], [1], [0, 0, 1, 1], [], []>} : vector<16x8xbf16>, vector<8x32xbf16>, vector<16x32xf32> -> vector<16x32xf32>
    %382 = arith.addf %356, %381 : vector<16x32xf32>
    %383 = vector.extract_strided_slice %324 {offsets = [0, 0, 16], sizes = [2, 8, 8], strides = [1, 1, 1]} : vector<2x8x32xf32> to vector<2x8x8xf32>
    %384 = arith.truncf %383 : vector<2x8x8xf32> to vector<2x8x8xbf16>
    %385 = vector.extract_strided_slice %325 {offsets = [0, 0, 16], sizes = [2, 8, 8], strides = [1, 1, 1]} : vector<2x8x32xf32> to vector<2x8x8xf32>
    %386 = arith.truncf %385 : vector<2x8x8xf32> to vector<2x8x8xbf16>
    "tpu.trace_start"() <{level = 10 : i32, message = "bqd,bkd->bqk"}> : () -> ()
    %cst_180 = arith.constant dense<0.000000e+00> : vector<2x8x8xf32>
    %387 = tpu.matmul %384, %386, %cst_180 {dimension_numbers = #tpu.dot_dimension_numbers<[2], [2], [1], [1], [0, 0, 0, 1, 1, 1], [0], [0]>} : vector<2x8x8xbf16>, vector<2x8x8xbf16>, vector<2x8x8xf32> -> vector<2x8x8xf32>
    "tpu.trace_stop"() : () -> ()
    %388 = arith.addf %387, %329 : vector<2x8x8xf32>
    %cst_181 = arith.constant dense<0xFF800000> : vector<2x8xf32>
    %389 = vector.multi_reduction <maximumf>, %388, %cst_181 [2] : vector<2x8x8xf32> to vector<2x8xf32>
    %390 = vector.shape_cast %389 : vector<2x8xf32> to vector<2x8x1xf32>
    %391 = vector.broadcast %390 : vector<2x8x1xf32> to vector<2x8x8xf32>
    %392 = arith.subf %388, %391 : vector<2x8x8xf32>
    %393 = math.exp %392 : vector<2x8x8xf32>
    %cst_182 = arith.constant dense<0.000000e+00> : vector<2x8xf32>
    %394 = vector.multi_reduction <add>, %393, %cst_182 [2] : vector<2x8x8xf32> to vector<2x8xf32>
    %395 = vector.shape_cast %394 : vector<2x8xf32> to vector<2x8x1xf32>
    %396 = tpu.reciprocal %395 {approx = true} : vector<2x8x1xf32> -> vector<2x8x1xf32>
    %397 = vector.broadcast %396 : vector<2x8x1xf32> to vector<2x8x8xf32>
    %398 = arith.mulf %393, %397 : vector<2x8x8xf32>
    %399 = arith.truncf %398 : vector<2x8x8xf32> to vector<2x8x8xbf16>
    %400 = vector.extract_strided_slice %326 {offsets = [0, 0, 16], sizes = [2, 8, 8], strides = [1, 1, 1]} : vector<2x8x32xf32> to vector<2x8x8xf32>
    %401 = arith.truncf %400 : vector<2x8x8xf32> to vector<2x8x8xbf16>
    "tpu.trace_start"() <{level = 10 : i32, message = "bqk,bkd->bqd"}> : () -> ()
    %cst_183 = arith.constant dense<0.000000e+00> : vector<2x8x8xf32>
    %402 = tpu.matmul %399, %401, %cst_183 {dimension_numbers = #tpu.dot_dimension_numbers<[2], [1], [1], [2], [0, 0, 0, 1, 1, 2], [0], [0]>} : vector<2x8x8xbf16>, vector<2x8x8xbf16>, vector<2x8x8xf32> -> vector<2x8x8xf32>
    "tpu.trace_stop"() : () -> ()
    %403 = vector.shape_cast %402 : vector<2x8x8xf32> to vector<16x8xf32>
    %404 = arith.truncf %403 : vector<16x8xf32> to vector<16x8xbf16>
    %c1_184 = arith.constant 1 : index
    %c2_185 = arith.constant 2 : index
    %c0_186 = arith.constant 0 : index
    %c0_187 = arith.constant 0 : index
    %405 = vector.load %arg19[%c1_184, %c2_185, %c0_186, %c0_187] : memref<4x4x8x32xbf16, #tpu.memory_space<vmem>>, vector<1x1x8x32xbf16>
    %406 = vector.shape_cast %405 : vector<1x1x8x32xbf16> to vector<8x32xbf16>
    %cst_188 = arith.constant dense<0.000000e+00> : vector<16x32xf32>
    %407 = tpu.matmul %404, %406, %cst_188 {dimension_numbers = #tpu.dot_dimension_numbers<[1], [0], [0], [1], [0, 0, 1, 1], [], []>} : vector<16x8xbf16>, vector<8x32xbf16>, vector<16x32xf32> -> vector<16x32xf32>
    %408 = arith.addf %382, %407 : vector<16x32xf32>
    %409 = vector.extract_strided_slice %324 {offsets = [0, 0, 24], sizes = [2, 8, 8], strides = [1, 1, 1]} : vector<2x8x32xf32> to vector<2x8x8xf32>
    %410 = arith.truncf %409 : vector<2x8x8xf32> to vector<2x8x8xbf16>
    %411 = vector.extract_strided_slice %325 {offsets = [0, 0, 24], sizes = [2, 8, 8], strides = [1, 1, 1]} : vector<2x8x32xf32> to vector<2x8x8xf32>
    %412 = arith.truncf %411 : vector<2x8x8xf32> to vector<2x8x8xbf16>
    "tpu.trace_start"() <{level = 10 : i32, message = "bqd,bkd->bqk"}> : () -> ()
    %cst_189 = arith.constant dense<0.000000e+00> : vector<2x8x8xf32>
    %413 = tpu.matmul %410, %412, %cst_189 {dimension_numbers = #tpu.dot_dimension_numbers<[2], [2], [1], [1], [0, 0, 0, 1, 1, 1], [0], [0]>} : vector<2x8x8xbf16>, vector<2x8x8xbf16>, vector<2x8x8xf32> -> vector<2x8x8xf32>
    "tpu.trace_stop"() : () -> ()
    %414 = arith.addf %413, %329 : vector<2x8x8xf32>
    %cst_190 = arith.constant dense<0xFF800000> : vector<2x8xf32>
    %415 = vector.multi_reduction <maximumf>, %414, %cst_190 [2] : vector<2x8x8xf32> to vector<2x8xf32>
    %416 = vector.shape_cast %415 : vector<2x8xf32> to vector<2x8x1xf32>
    %417 = vector.broadcast %416 : vector<2x8x1xf32> to vector<2x8x8xf32>
    %418 = arith.subf %414, %417 : vector<2x8x8xf32>
    %419 = math.exp %418 : vector<2x8x8xf32>
    %cst_191 = arith.constant dense<0.000000e+00> : vector<2x8xf32>
    %420 = vector.multi_reduction <add>, %419, %cst_191 [2] : vector<2x8x8xf32> to vector<2x8xf32>
    %421 = vector.shape_cast %420 : vector<2x8xf32> to vector<2x8x1xf32>
    %422 = tpu.reciprocal %421 {approx = true} : vector<2x8x1xf32> -> vector<2x8x1xf32>
    %423 = vector.broadcast %422 : vector<2x8x1xf32> to vector<2x8x8xf32>
    %424 = arith.mulf %419, %423 : vector<2x8x8xf32>
    %425 = arith.truncf %424 : vector<2x8x8xf32> to vector<2x8x8xbf16>
    %426 = vector.extract_strided_slice %326 {offsets = [0, 0, 24], sizes = [2, 8, 8], strides = [1, 1, 1]} : vector<2x8x32xf32> to vector<2x8x8xf32>
    %427 = arith.truncf %426 : vector<2x8x8xf32> to vector<2x8x8xbf16>
    "tpu.trace_start"() <{level = 10 : i32, message = "bqk,bkd->bqd"}> : () -> ()
    %cst_192 = arith.constant dense<0.000000e+00> : vector<2x8x8xf32>
    %428 = tpu.matmul %425, %427, %cst_192 {dimension_numbers = #tpu.dot_dimension_numbers<[2], [1], [1], [2], [0, 0, 0, 1, 1, 2], [0], [0]>} : vector<2x8x8xbf16>, vector<2x8x8xbf16>, vector<2x8x8xf32> -> vector<2x8x8xf32>
    "tpu.trace_stop"() : () -> ()
    %429 = vector.shape_cast %428 : vector<2x8x8xf32> to vector<16x8xf32>
    %430 = arith.truncf %429 : vector<16x8xf32> to vector<16x8xbf16>
    %c1_193 = arith.constant 1 : index
    %c3_194 = arith.constant 3 : index
    %c0_195 = arith.constant 0 : index
    %c0_196 = arith.constant 0 : index
    %431 = vector.load %arg19[%c1_193, %c3_194, %c0_195, %c0_196] : memref<4x4x8x32xbf16, #tpu.memory_space<vmem>>, vector<1x1x8x32xbf16>
    %432 = vector.shape_cast %431 : vector<1x1x8x32xbf16> to vector<8x32xbf16>
    %cst_197 = arith.constant dense<0.000000e+00> : vector<16x32xf32>
    %433 = tpu.matmul %430, %432, %cst_197 {dimension_numbers = #tpu.dot_dimension_numbers<[1], [0], [0], [1], [0, 0, 1, 1], [], []>} : vector<16x8xbf16>, vector<8x32xbf16>, vector<16x32xf32> -> vector<16x32xf32>
    %434 = arith.addf %408, %433 : vector<16x32xf32>
    %c1_198 = arith.constant 1 : index
    %c0_199 = arith.constant 0 : index
    %c0_200 = arith.constant 0 : index
    %435 = vector.load %arg20[%c1_198, %c0_199, %c0_200] : memref<4x1x32xf32, #tpu.memory_space<vmem>>, vector<1x1x32xf32>
    %436 = vector.shape_cast %435 : vector<1x1x32xf32> to vector<1x32xf32>
    %437 = vector.broadcast %436 : vector<1x32xf32> to vector<16x32xf32>
    %438 = arith.addf %434, %437 : vector<16x32xf32>
    %439 = arith.addf %438, %63 : vector<16x32xf32>
    %c1_201 = arith.constant 1 : index
    %c0_202 = arith.constant 0 : index
    %c0_203 = arith.constant 0 : index
    %440 = vector.load %arg21[%c1_201, %c0_202, %c0_203] : memref<4x1x32xf32, #tpu.memory_space<vmem>>, vector<1x1x32xf32>
    %441 = vector.shape_cast %440 : vector<1x1x32xf32> to vector<1x32xf32>
    %c1_204 = arith.constant 1 : index
    %c0_205 = arith.constant 0 : index
    %c0_206 = arith.constant 0 : index
    %442 = vector.load %arg22[%c1_204, %c0_205, %c0_206] : memref<4x1x32xf32, #tpu.memory_space<vmem>>, vector<1x1x32xf32>
    %443 = vector.shape_cast %442 : vector<1x1x32xf32> to vector<1x32xf32>
    %cst_207 = arith.constant dense<0.000000e+00> : vector<16xf32>
    %444 = vector.multi_reduction <add>, %439, %cst_207 [1] : vector<16x32xf32> to vector<16xf32>
    %445 = vector.shape_cast %444 : vector<16xf32> to vector<16x1xf32>
    %cst_208 = arith.constant 3.200000e+01 : f32
    %446 = vector.broadcast %cst_208 : f32 to vector<16x1xf32>
    %447 = arith.divf %445, %446 : vector<16x1xf32>
    %448 = vector.broadcast %447 : vector<16x1xf32> to vector<16x32xf32>
    %449 = arith.subf %439, %448 : vector<16x32xf32>
    %450 = arith.mulf %449, %449 : vector<16x32xf32>
    %cst_209 = arith.constant dense<0.000000e+00> : vector<16xf32>
    %451 = vector.multi_reduction <add>, %450, %cst_209 [1] : vector<16x32xf32> to vector<16xf32>
    %452 = vector.shape_cast %451 : vector<16xf32> to vector<16x1xf32>
    %cst_210 = arith.constant 3.200000e+01 : f32
    %453 = vector.broadcast %cst_210 : f32 to vector<16x1xf32>
    %454 = arith.divf %452, %453 : vector<16x1xf32>
    %455 = vector.broadcast %447 : vector<16x1xf32> to vector<16x32xf32>
    %456 = arith.subf %439, %455 : vector<16x32xf32>
    %cst_211 = arith.constant 9.99999996E-13 : f32
    %457 = vector.broadcast %cst_211 : f32 to vector<16x1xf32>
    %458 = arith.addf %454, %457 : vector<16x1xf32>
    %459 = math.rsqrt %458 : vector<16x1xf32>
    %460 = vector.broadcast %459 : vector<16x1xf32> to vector<16x32xf32>
    %461 = arith.mulf %456, %460 : vector<16x32xf32>
    %462 = vector.broadcast %441 : vector<1x32xf32> to vector<16x32xf32>
    %463 = arith.mulf %461, %462 : vector<16x32xf32>
    %464 = vector.broadcast %443 : vector<1x32xf32> to vector<16x32xf32>
    %465 = arith.addf %463, %464 : vector<16x32xf32>
    %c1_212 = arith.constant 1 : index
    %c0_213 = arith.constant 0 : index
    %c0_214 = arith.constant 0 : index
    %466 = vector.load %arg23[%c1_212, %c0_213, %c0_214] : memref<4x32x64xbf16, #tpu.memory_space<vmem>>, vector<1x32x64xbf16>
    %467 = vector.shape_cast %466 : vector<1x32x64xbf16> to vector<32x64xbf16>
    %468 = arith.truncf %465 : vector<16x32xf32> to vector<16x32xbf16>
    %cst_215 = arith.constant dense<0.000000e+00> : vector<16x64xf32>
    %469 = tpu.matmul %468, %467, %cst_215 {dimension_numbers = #tpu.dot_dimension_numbers<[1], [0], [0], [1], [0, 0, 1, 1], [], []>} : vector<16x32xbf16>, vector<32x64xbf16>, vector<16x64xf32> -> vector<16x64xf32>
    %c1_216 = arith.constant 1 : index
    %c0_217 = arith.constant 0 : index
    %c0_218 = arith.constant 0 : index
    %470 = vector.load %arg24[%c1_216, %c0_217, %c0_218] : memref<4x1x64xf32, #tpu.memory_space<vmem>>, vector<1x1x64xf32>
    %471 = vector.shape_cast %470 : vector<1x1x64xf32> to vector<1x64xf32>
    %472 = vector.broadcast %471 : vector<1x64xf32> to vector<16x64xf32>
    %473 = arith.addf %469, %472 : vector<16x64xf32>
    %cst_219 = arith.constant 5.000000e-01 : f32
    %474 = vector.broadcast %cst_219 : f32 to vector<16x64xf32>
    %475 = arith.mulf %474, %473 : vector<16x64xf32>
    %cst_220 = arith.constant 4.471500e-02 : f32
    %476 = vector.broadcast %cst_220 : f32 to vector<16x64xf32>
    %477 = arith.mulf %476, %473 : vector<16x64xf32>
    %478 = arith.mulf %477, %473 : vector<16x64xf32>
    %479 = arith.mulf %478, %473 : vector<16x64xf32>
    %480 = arith.addf %473, %479 : vector<16x64xf32>
    %cst_221 = arith.constant 0.797884583 : f32
    %481 = vector.broadcast %cst_221 : f32 to vector<16x64xf32>
    %482 = arith.mulf %481, %480 : vector<16x64xf32>
    %483 = math.tanh %482 : vector<16x64xf32>
    %cst_222 = arith.constant 1.000000e+00 : f32
    %484 = vector.broadcast %cst_222 : f32 to vector<16x64xf32>
    %485 = arith.addf %484, %483 : vector<16x64xf32>
    %486 = arith.mulf %475, %485 : vector<16x64xf32>
    %c1_223 = arith.constant 1 : index
    %c0_224 = arith.constant 0 : index
    %c0_225 = arith.constant 0 : index
    %487 = vector.load %arg25[%c1_223, %c0_224, %c0_225] : memref<4x64x32xbf16, #tpu.memory_space<vmem>>, vector<1x64x32xbf16>
    %488 = vector.shape_cast %487 : vector<1x64x32xbf16> to vector<64x32xbf16>
    %489 = arith.truncf %486 : vector<16x64xf32> to vector<16x64xbf16>
    %cst_226 = arith.constant dense<0.000000e+00> : vector<16x32xf32>
    %490 = tpu.matmul %489, %488, %cst_226 {dimension_numbers = #tpu.dot_dimension_numbers<[1], [0], [0], [1], [0, 0, 1, 1], [], []>} : vector<16x64xbf16>, vector<64x32xbf16>, vector<16x32xf32> -> vector<16x32xf32>
    %c1_227 = arith.constant 1 : index
    %c0_228 = arith.constant 0 : index
    %c0_229 = arith.constant 0 : index
    %491 = vector.load %arg26[%c1_227, %c0_228, %c0_229] : memref<4x1x32xf32, #tpu.memory_space<vmem>>, vector<1x1x32xf32>
    %492 = vector.shape_cast %491 : vector<1x1x32xf32> to vector<1x32xf32>
    %493 = vector.broadcast %492 : vector<1x32xf32> to vector<16x32xf32>
    %494 = arith.addf %490, %493 : vector<16x32xf32>
    %495 = arith.addf %494, %465 : vector<16x32xf32>
    %c1_230 = arith.constant 1 : index
    %c0_231 = arith.constant 0 : index
    %c0_232 = arith.constant 0 : index
    %496 = vector.load %arg27[%c1_230, %c0_231, %c0_232] : memref<4x1x32xf32, #tpu.memory_space<vmem>>, vector<1x1x32xf32>
    %497 = vector.shape_cast %496 : vector<1x1x32xf32> to vector<1x32xf32>
    %c1_233 = arith.constant 1 : index
    %c0_234 = arith.constant 0 : index
    %c0_235 = arith.constant 0 : index
    %498 = vector.load %arg28[%c1_233, %c0_234, %c0_235] : memref<4x1x32xf32, #tpu.memory_space<vmem>>, vector<1x1x32xf32>
    %499 = vector.shape_cast %498 : vector<1x1x32xf32> to vector<1x32xf32>
    %cst_236 = arith.constant dense<0.000000e+00> : vector<16xf32>
    %500 = vector.multi_reduction <add>, %495, %cst_236 [1] : vector<16x32xf32> to vector<16xf32>
    %501 = vector.shape_cast %500 : vector<16xf32> to vector<16x1xf32>
    %cst_237 = arith.constant 3.200000e+01 : f32
    %502 = vector.broadcast %cst_237 : f32 to vector<16x1xf32>
    %503 = arith.divf %501, %502 : vector<16x1xf32>
    %504 = vector.broadcast %503 : vector<16x1xf32> to vector<16x32xf32>
    %505 = arith.subf %495, %504 : vector<16x32xf32>
    %506 = arith.mulf %505, %505 : vector<16x32xf32>
    %cst_238 = arith.constant dense<0.000000e+00> : vector<16xf32>
    %507 = vector.multi_reduction <add>, %506, %cst_238 [1] : vector<16x32xf32> to vector<16xf32>
    %508 = vector.shape_cast %507 : vector<16xf32> to vector<16x1xf32>
    %cst_239 = arith.constant 3.200000e+01 : f32
    %509 = vector.broadcast %cst_239 : f32 to vector<16x1xf32>
    %510 = arith.divf %508, %509 : vector<16x1xf32>
    %511 = vector.broadcast %503 : vector<16x1xf32> to vector<16x32xf32>
    %512 = arith.subf %495, %511 : vector<16x32xf32>
    %cst_240 = arith.constant 9.99999996E-13 : f32
    %513 = vector.broadcast %cst_240 : f32 to vector<16x1xf32>
    %514 = arith.addf %510, %513 : vector<16x1xf32>
    %515 = math.rsqrt %514 : vector<16x1xf32>
    %516 = vector.broadcast %515 : vector<16x1xf32> to vector<16x32xf32>
    %517 = arith.mulf %512, %516 : vector<16x32xf32>
    %518 = vector.broadcast %497 : vector<1x32xf32> to vector<16x32xf32>
    %519 = arith.mulf %517, %518 : vector<16x32xf32>
    %520 = vector.broadcast %499 : vector<1x32xf32> to vector<16x32xf32>
    %521 = arith.addf %519, %520 : vector<16x32xf32>
    %c2_241 = arith.constant 2 : index
    %c0_242 = arith.constant 0 : index
    %c0_243 = arith.constant 0 : index
    %522 = vector.load %arg13[%c2_241, %c0_242, %c0_243] : memref<4x32x32xbf16, #tpu.memory_space<vmem>>, vector<1x32x32xbf16>
    %523 = vector.shape_cast %522 : vector<1x32x32xbf16> to vector<32x32xbf16>
    %524 = arith.truncf %297 : vector<16x32xf32> to vector<16x32xbf16>
    %cst_244 = arith.constant dense<0.000000e+00> : vector<16x32xf32>
    %525 = tpu.matmul %524, %523, %cst_244 {dimension_numbers = #tpu.dot_dimension_numbers<[1], [0], [0], [1], [0, 0, 1, 1], [], []>} : vector<16x32xbf16>, vector<32x32xbf16>, vector<16x32xf32> -> vector<16x32xf32>
    %c2_245 = arith.constant 2 : index
    %c0_246 = arith.constant 0 : index
    %c0_247 = arith.constant 0 : index
    %526 = vector.load %arg14[%c2_245, %c0_246, %c0_247] : memref<4x1x32xf32, #tpu.memory_space<vmem>>, vector<1x1x32xf32>
    %527 = vector.shape_cast %526 : vector<1x1x32xf32> to vector<1x32xf32>
    %528 = vector.broadcast %527 : vector<1x32xf32> to vector<16x32xf32>
    %529 = arith.addf %525, %528 : vector<16x32xf32>
    %c2_248 = arith.constant 2 : index
    %c0_249 = arith.constant 0 : index
    %c0_250 = arith.constant 0 : index
    %530 = vector.load %arg15[%c2_248, %c0_249, %c0_250] : memref<4x32x32xbf16, #tpu.memory_space<vmem>>, vector<1x32x32xbf16>
    %531 = vector.shape_cast %530 : vector<1x32x32xbf16> to vector<32x32xbf16>
    %532 = arith.truncf %521 : vector<16x32xf32> to vector<16x32xbf16>
    %cst_251 = arith.constant dense<0.000000e+00> : vector<16x32xf32>
    %533 = tpu.matmul %532, %531, %cst_251 {dimension_numbers = #tpu.dot_dimension_numbers<[1], [0], [0], [1], [0, 0, 1, 1], [], []>} : vector<16x32xbf16>, vector<32x32xbf16>, vector<16x32xf32> -> vector<16x32xf32>
    %c2_252 = arith.constant 2 : index
    %c0_253 = arith.constant 0 : index
    %c0_254 = arith.constant 0 : index
    %534 = vector.load %arg16[%c2_252, %c0_253, %c0_254] : memref<4x1x32xf32, #tpu.memory_space<vmem>>, vector<1x1x32xf32>
    %535 = vector.shape_cast %534 : vector<1x1x32xf32> to vector<1x32xf32>
    %536 = vector.broadcast %535 : vector<1x32xf32> to vector<16x32xf32>
    %537 = arith.addf %533, %536 : vector<16x32xf32>
    %c2_255 = arith.constant 2 : index
    %c0_256 = arith.constant 0 : index
    %c0_257 = arith.constant 0 : index
    %538 = vector.load %arg17[%c2_255, %c0_256, %c0_257] : memref<4x32x32xbf16, #tpu.memory_space<vmem>>, vector<1x32x32xbf16>
    %539 = vector.shape_cast %538 : vector<1x32x32xbf16> to vector<32x32xbf16>
    %540 = arith.truncf %521 : vector<16x32xf32> to vector<16x32xbf16>
    %cst_258 = arith.constant dense<0.000000e+00> : vector<16x32xf32>
    %541 = tpu.matmul %540, %539, %cst_258 {dimension_numbers = #tpu.dot_dimension_numbers<[1], [0], [0], [1], [0, 0, 1, 1], [], []>} : vector<16x32xbf16>, vector<32x32xbf16>, vector<16x32xf32> -> vector<16x32xf32>
    %c2_259 = arith.constant 2 : index
    %c0_260 = arith.constant 0 : index
    %c0_261 = arith.constant 0 : index
    %542 = vector.load %arg18[%c2_259, %c0_260, %c0_261] : memref<4x1x32xf32, #tpu.memory_space<vmem>>, vector<1x1x32xf32>
    %543 = vector.shape_cast %542 : vector<1x1x32xf32> to vector<1x32xf32>
    %544 = vector.broadcast %543 : vector<1x32xf32> to vector<16x32xf32>
    %545 = arith.addf %541, %544 : vector<16x32xf32>
    %cst_262 = arith.constant 0.353553385 : f32
    %546 = vector.broadcast %cst_262 : f32 to vector<16x32xf32>
    %547 = arith.mulf %529, %546 : vector<16x32xf32>
    %548 = vector.shape_cast %547 : vector<16x32xf32> to vector<2x8x32xf32>
    %549 = vector.shape_cast %537 : vector<16x32xf32> to vector<2x8x32xf32>
    %550 = vector.shape_cast %545 : vector<16x32xf32> to vector<2x8x32xf32>
    %551 = vector.shape_cast %73 : vector<2x8xf32> to vector<2x1x8xf32>
    %552 = vector.shape_cast %551 : vector<2x1x8xf32> to vector<2x1x8xf32>
    %553 = vector.broadcast %552 : vector<2x1x8xf32> to vector<2x8x8xf32>
    %cst_263 = arith.constant 0.000000e+00 : f32
    %554 = vector.broadcast %cst_263 : f32 to vector<16x32xf32>
    %555 = vector.extract_strided_slice %548 {offsets = [0, 0, 0], sizes = [2, 8, 8], strides = [1, 1, 1]} : vector<2x8x32xf32> to vector<2x8x8xf32>
    %556 = arith.truncf %555 : vector<2x8x8xf32> to vector<2x8x8xbf16>
    %557 = vector.extract_strided_slice %549 {offsets = [0, 0, 0], sizes = [2, 8, 8], strides = [1, 1, 1]} : vector<2x8x32xf32> to vector<2x8x8xf32>
    %558 = arith.truncf %557 : vector<2x8x8xf32> to vector<2x8x8xbf16>
    "tpu.trace_start"() <{level = 10 : i32, message = "bqd,bkd->bqk"}> : () -> ()
    %cst_264 = arith.constant dense<0.000000e+00> : vector<2x8x8xf32>
    %559 = tpu.matmul %556, %558, %cst_264 {dimension_numbers = #tpu.dot_dimension_numbers<[2], [2], [1], [1], [0, 0, 0, 1, 1, 1], [0], [0]>} : vector<2x8x8xbf16>, vector<2x8x8xbf16>, vector<2x8x8xf32> -> vector<2x8x8xf32>
    "tpu.trace_stop"() : () -> ()
    %560 = arith.addf %559, %553 : vector<2x8x8xf32>
    %cst_265 = arith.constant dense<0xFF800000> : vector<2x8xf32>
    %561 = vector.multi_reduction <maximumf>, %560, %cst_265 [2] : vector<2x8x8xf32> to vector<2x8xf32>
    %562 = vector.shape_cast %561 : vector<2x8xf32> to vector<2x8x1xf32>
    %563 = vector.broadcast %562 : vector<2x8x1xf32> to vector<2x8x8xf32>
    %564 = arith.subf %560, %563 : vector<2x8x8xf32>
    %565 = math.exp %564 : vector<2x8x8xf32>
    %cst_266 = arith.constant dense<0.000000e+00> : vector<2x8xf32>
    %566 = vector.multi_reduction <add>, %565, %cst_266 [2] : vector<2x8x8xf32> to vector<2x8xf32>
    %567 = vector.shape_cast %566 : vector<2x8xf32> to vector<2x8x1xf32>
    %568 = tpu.reciprocal %567 {approx = true} : vector<2x8x1xf32> -> vector<2x8x1xf32>
    %569 = vector.broadcast %568 : vector<2x8x1xf32> to vector<2x8x8xf32>
    %570 = arith.mulf %565, %569 : vector<2x8x8xf32>
    %571 = arith.truncf %570 : vector<2x8x8xf32> to vector<2x8x8xbf16>
    %572 = vector.extract_strided_slice %550 {offsets = [0, 0, 0], sizes = [2, 8, 8], strides = [1, 1, 1]} : vector<2x8x32xf32> to vector<2x8x8xf32>
    %573 = arith.truncf %572 : vector<2x8x8xf32> to vector<2x8x8xbf16>
    "tpu.trace_start"() <{level = 10 : i32, message = "bqk,bkd->bqd"}> : () -> ()
    %cst_267 = arith.constant dense<0.000000e+00> : vector<2x8x8xf32>
    %574 = tpu.matmul %571, %573, %cst_267 {dimension_numbers = #tpu.dot_dimension_numbers<[2], [1], [1], [2], [0, 0, 0, 1, 1, 2], [0], [0]>} : vector<2x8x8xbf16>, vector<2x8x8xbf16>, vector<2x8x8xf32> -> vector<2x8x8xf32>
    "tpu.trace_stop"() : () -> ()
    %575 = vector.shape_cast %574 : vector<2x8x8xf32> to vector<16x8xf32>
    %576 = arith.truncf %575 : vector<16x8xf32> to vector<16x8xbf16>
    %c2_268 = arith.constant 2 : index
    %c0_269 = arith.constant 0 : index
    %c0_270 = arith.constant 0 : index
    %c0_271 = arith.constant 0 : index
    %577 = vector.load %arg19[%c2_268, %c0_269, %c0_270, %c0_271] : memref<4x4x8x32xbf16, #tpu.memory_space<vmem>>, vector<1x1x8x32xbf16>
    %578 = vector.shape_cast %577 : vector<1x1x8x32xbf16> to vector<8x32xbf16>
    %cst_272 = arith.constant dense<0.000000e+00> : vector<16x32xf32>
    %579 = tpu.matmul %576, %578, %cst_272 {dimension_numbers = #tpu.dot_dimension_numbers<[1], [0], [0], [1], [0, 0, 1, 1], [], []>} : vector<16x8xbf16>, vector<8x32xbf16>, vector<16x32xf32> -> vector<16x32xf32>
    %580 = arith.addf %554, %579 : vector<16x32xf32>
    %581 = vector.extract_strided_slice %548 {offsets = [0, 0, 8], sizes = [2, 8, 8], strides = [1, 1, 1]} : vector<2x8x32xf32> to vector<2x8x8xf32>
    %582 = arith.truncf %581 : vector<2x8x8xf32> to vector<2x8x8xbf16>
    %583 = vector.extract_strided_slice %549 {offsets = [0, 0, 8], sizes = [2, 8, 8], strides = [1, 1, 1]} : vector<2x8x32xf32> to vector<2x8x8xf32>
    %584 = arith.truncf %583 : vector<2x8x8xf32> to vector<2x8x8xbf16>
    "tpu.trace_start"() <{level = 10 : i32, message = "bqd,bkd->bqk"}> : () -> ()
    %cst_273 = arith.constant dense<0.000000e+00> : vector<2x8x8xf32>
    %585 = tpu.matmul %582, %584, %cst_273 {dimension_numbers = #tpu.dot_dimension_numbers<[2], [2], [1], [1], [0, 0, 0, 1, 1, 1], [0], [0]>} : vector<2x8x8xbf16>, vector<2x8x8xbf16>, vector<2x8x8xf32> -> vector<2x8x8xf32>
    "tpu.trace_stop"() : () -> ()
    %586 = arith.addf %585, %553 : vector<2x8x8xf32>
    %cst_274 = arith.constant dense<0xFF800000> : vector<2x8xf32>
    %587 = vector.multi_reduction <maximumf>, %586, %cst_274 [2] : vector<2x8x8xf32> to vector<2x8xf32>
    %588 = vector.shape_cast %587 : vector<2x8xf32> to vector<2x8x1xf32>
    %589 = vector.broadcast %588 : vector<2x8x1xf32> to vector<2x8x8xf32>
    %590 = arith.subf %586, %589 : vector<2x8x8xf32>
    %591 = math.exp %590 : vector<2x8x8xf32>
    %cst_275 = arith.constant dense<0.000000e+00> : vector<2x8xf32>
    %592 = vector.multi_reduction <add>, %591, %cst_275 [2] : vector<2x8x8xf32> to vector<2x8xf32>
    %593 = vector.shape_cast %592 : vector<2x8xf32> to vector<2x8x1xf32>
    %594 = tpu.reciprocal %593 {approx = true} : vector<2x8x1xf32> -> vector<2x8x1xf32>
    %595 = vector.broadcast %594 : vector<2x8x1xf32> to vector<2x8x8xf32>
    %596 = arith.mulf %591, %595 : vector<2x8x8xf32>
    %597 = arith.truncf %596 : vector<2x8x8xf32> to vector<2x8x8xbf16>
    %598 = vector.extract_strided_slice %550 {offsets = [0, 0, 8], sizes = [2, 8, 8], strides = [1, 1, 1]} : vector<2x8x32xf32> to vector<2x8x8xf32>
    %599 = arith.truncf %598 : vector<2x8x8xf32> to vector<2x8x8xbf16>
    "tpu.trace_start"() <{level = 10 : i32, message = "bqk,bkd->bqd"}> : () -> ()
    %cst_276 = arith.constant dense<0.000000e+00> : vector<2x8x8xf32>
    %600 = tpu.matmul %597, %599, %cst_276 {dimension_numbers = #tpu.dot_dimension_numbers<[2], [1], [1], [2], [0, 0, 0, 1, 1, 2], [0], [0]>} : vector<2x8x8xbf16>, vector<2x8x8xbf16>, vector<2x8x8xf32> -> vector<2x8x8xf32>
    "tpu.trace_stop"() : () -> ()
    %601 = vector.shape_cast %600 : vector<2x8x8xf32> to vector<16x8xf32>
    %602 = arith.truncf %601 : vector<16x8xf32> to vector<16x8xbf16>
    %c2_277 = arith.constant 2 : index
    %c1_278 = arith.constant 1 : index
    %c0_279 = arith.constant 0 : index
    %c0_280 = arith.constant 0 : index
    %603 = vector.load %arg19[%c2_277, %c1_278, %c0_279, %c0_280] : memref<4x4x8x32xbf16, #tpu.memory_space<vmem>>, vector<1x1x8x32xbf16>
    %604 = vector.shape_cast %603 : vector<1x1x8x32xbf16> to vector<8x32xbf16>
    %cst_281 = arith.constant dense<0.000000e+00> : vector<16x32xf32>
    %605 = tpu.matmul %602, %604, %cst_281 {dimension_numbers = #tpu.dot_dimension_numbers<[1], [0], [0], [1], [0, 0, 1, 1], [], []>} : vector<16x8xbf16>, vector<8x32xbf16>, vector<16x32xf32> -> vector<16x32xf32>
    %606 = arith.addf %580, %605 : vector<16x32xf32>
    %607 = vector.extract_strided_slice %548 {offsets = [0, 0, 16], sizes = [2, 8, 8], strides = [1, 1, 1]} : vector<2x8x32xf32> to vector<2x8x8xf32>
    %608 = arith.truncf %607 : vector<2x8x8xf32> to vector<2x8x8xbf16>
    %609 = vector.extract_strided_slice %549 {offsets = [0, 0, 16], sizes = [2, 8, 8], strides = [1, 1, 1]} : vector<2x8x32xf32> to vector<2x8x8xf32>
    %610 = arith.truncf %609 : vector<2x8x8xf32> to vector<2x8x8xbf16>
    "tpu.trace_start"() <{level = 10 : i32, message = "bqd,bkd->bqk"}> : () -> ()
    %cst_282 = arith.constant dense<0.000000e+00> : vector<2x8x8xf32>
    %611 = tpu.matmul %608, %610, %cst_282 {dimension_numbers = #tpu.dot_dimension_numbers<[2], [2], [1], [1], [0, 0, 0, 1, 1, 1], [0], [0]>} : vector<2x8x8xbf16>, vector<2x8x8xbf16>, vector<2x8x8xf32> -> vector<2x8x8xf32>
    "tpu.trace_stop"() : () -> ()
    %612 = arith.addf %611, %553 : vector<2x8x8xf32>
    %cst_283 = arith.constant dense<0xFF800000> : vector<2x8xf32>
    %613 = vector.multi_reduction <maximumf>, %612, %cst_283 [2] : vector<2x8x8xf32> to vector<2x8xf32>
    %614 = vector.shape_cast %613 : vector<2x8xf32> to vector<2x8x1xf32>
    %615 = vector.broadcast %614 : vector<2x8x1xf32> to vector<2x8x8xf32>
    %616 = arith.subf %612, %615 : vector<2x8x8xf32>
    %617 = math.exp %616 : vector<2x8x8xf32>
    %cst_284 = arith.constant dense<0.000000e+00> : vector<2x8xf32>
    %618 = vector.multi_reduction <add>, %617, %cst_284 [2] : vector<2x8x8xf32> to vector<2x8xf32>
    %619 = vector.shape_cast %618 : vector<2x8xf32> to vector<2x8x1xf32>
    %620 = tpu.reciprocal %619 {approx = true} : vector<2x8x1xf32> -> vector<2x8x1xf32>
    %621 = vector.broadcast %620 : vector<2x8x1xf32> to vector<2x8x8xf32>
    %622 = arith.mulf %617, %621 : vector<2x8x8xf32>
    %623 = arith.truncf %622 : vector<2x8x8xf32> to vector<2x8x8xbf16>
    %624 = vector.extract_strided_slice %550 {offsets = [0, 0, 16], sizes = [2, 8, 8], strides = [1, 1, 1]} : vector<2x8x32xf32> to vector<2x8x8xf32>
    %625 = arith.truncf %624 : vector<2x8x8xf32> to vector<2x8x8xbf16>
    "tpu.trace_start"() <{level = 10 : i32, message = "bqk,bkd->bqd"}> : () -> ()
    %cst_285 = arith.constant dense<0.000000e+00> : vector<2x8x8xf32>
    %626 = tpu.matmul %623, %625, %cst_285 {dimension_numbers = #tpu.dot_dimension_numbers<[2], [1], [1], [2], [0, 0, 0, 1, 1, 2], [0], [0]>} : vector<2x8x8xbf16>, vector<2x8x8xbf16>, vector<2x8x8xf32> -> vector<2x8x8xf32>
    "tpu.trace_stop"() : () -> ()
    %627 = vector.shape_cast %626 : vector<2x8x8xf32> to vector<16x8xf32>
    %628 = arith.truncf %627 : vector<16x8xf32> to vector<16x8xbf16>
    %c2_286 = arith.constant 2 : index
    %c2_287 = arith.constant 2 : index
    %c0_288 = arith.constant 0 : index
    %c0_289 = arith.constant 0 : index
    %629 = vector.load %arg19[%c2_286, %c2_287, %c0_288, %c0_289] : memref<4x4x8x32xbf16, #tpu.memory_space<vmem>>, vector<1x1x8x32xbf16>
    %630 = vector.shape_cast %629 : vector<1x1x8x32xbf16> to vector<8x32xbf16>
    %cst_290 = arith.constant dense<0.000000e+00> : vector<16x32xf32>
    %631 = tpu.matmul %628, %630, %cst_290 {dimension_numbers = #tpu.dot_dimension_numbers<[1], [0], [0], [1], [0, 0, 1, 1], [], []>} : vector<16x8xbf16>, vector<8x32xbf16>, vector<16x32xf32> -> vector<16x32xf32>
    %632 = arith.addf %606, %631 : vector<16x32xf32>
    %633 = vector.extract_strided_slice %548 {offsets = [0, 0, 24], sizes = [2, 8, 8], strides = [1, 1, 1]} : vector<2x8x32xf32> to vector<2x8x8xf32>
    %634 = arith.truncf %633 : vector<2x8x8xf32> to vector<2x8x8xbf16>
    %635 = vector.extract_strided_slice %549 {offsets = [0, 0, 24], sizes = [2, 8, 8], strides = [1, 1, 1]} : vector<2x8x32xf32> to vector<2x8x8xf32>
    %636 = arith.truncf %635 : vector<2x8x8xf32> to vector<2x8x8xbf16>
    "tpu.trace_start"() <{level = 10 : i32, message = "bqd,bkd->bqk"}> : () -> ()
    %cst_291 = arith.constant dense<0.000000e+00> : vector<2x8x8xf32>
    %637 = tpu.matmul %634, %636, %cst_291 {dimension_numbers = #tpu.dot_dimension_numbers<[2], [2], [1], [1], [0, 0, 0, 1, 1, 1], [0], [0]>} : vector<2x8x8xbf16>, vector<2x8x8xbf16>, vector<2x8x8xf32> -> vector<2x8x8xf32>
    "tpu.trace_stop"() : () -> ()
    %638 = arith.addf %637, %553 : vector<2x8x8xf32>
    %cst_292 = arith.constant dense<0xFF800000> : vector<2x8xf32>
    %639 = vector.multi_reduction <maximumf>, %638, %cst_292 [2] : vector<2x8x8xf32> to vector<2x8xf32>
    %640 = vector.shape_cast %639 : vector<2x8xf32> to vector<2x8x1xf32>
    %641 = vector.broadcast %640 : vector<2x8x1xf32> to vector<2x8x8xf32>
    %642 = arith.subf %638, %641 : vector<2x8x8xf32>
    %643 = math.exp %642 : vector<2x8x8xf32>
    %cst_293 = arith.constant dense<0.000000e+00> : vector<2x8xf32>
    %644 = vector.multi_reduction <add>, %643, %cst_293 [2] : vector<2x8x8xf32> to vector<2x8xf32>
    %645 = vector.shape_cast %644 : vector<2x8xf32> to vector<2x8x1xf32>
    %646 = tpu.reciprocal %645 {approx = true} : vector<2x8x1xf32> -> vector<2x8x1xf32>
    %647 = vector.broadcast %646 : vector<2x8x1xf32> to vector<2x8x8xf32>
    %648 = arith.mulf %643, %647 : vector<2x8x8xf32>
    %649 = arith.truncf %648 : vector<2x8x8xf32> to vector<2x8x8xbf16>
    %650 = vector.extract_strided_slice %550 {offsets = [0, 0, 24], sizes = [2, 8, 8], strides = [1, 1, 1]} : vector<2x8x32xf32> to vector<2x8x8xf32>
    %651 = arith.truncf %650 : vector<2x8x8xf32> to vector<2x8x8xbf16>
    "tpu.trace_start"() <{level = 10 : i32, message = "bqk,bkd->bqd"}> : () -> ()
    %cst_294 = arith.constant dense<0.000000e+00> : vector<2x8x8xf32>
    %652 = tpu.matmul %649, %651, %cst_294 {dimension_numbers = #tpu.dot_dimension_numbers<[2], [1], [1], [2], [0, 0, 0, 1, 1, 2], [0], [0]>} : vector<2x8x8xbf16>, vector<2x8x8xbf16>, vector<2x8x8xf32> -> vector<2x8x8xf32>
    "tpu.trace_stop"() : () -> ()
    %653 = vector.shape_cast %652 : vector<2x8x8xf32> to vector<16x8xf32>
    %654 = arith.truncf %653 : vector<16x8xf32> to vector<16x8xbf16>
    %c2_295 = arith.constant 2 : index
    %c3_296 = arith.constant 3 : index
    %c0_297 = arith.constant 0 : index
    %c0_298 = arith.constant 0 : index
    %655 = vector.load %arg19[%c2_295, %c3_296, %c0_297, %c0_298] : memref<4x4x8x32xbf16, #tpu.memory_space<vmem>>, vector<1x1x8x32xbf16>
    %656 = vector.shape_cast %655 : vector<1x1x8x32xbf16> to vector<8x32xbf16>
    %cst_299 = arith.constant dense<0.000000e+00> : vector<16x32xf32>
    %657 = tpu.matmul %654, %656, %cst_299 {dimension_numbers = #tpu.dot_dimension_numbers<[1], [0], [0], [1], [0, 0, 1, 1], [], []>} : vector<16x8xbf16>, vector<8x32xbf16>, vector<16x32xf32> -> vector<16x32xf32>
    %658 = arith.addf %632, %657 : vector<16x32xf32>
    %c2_300 = arith.constant 2 : index
    %c0_301 = arith.constant 0 : index
    %c0_302 = arith.constant 0 : index
    %659 = vector.load %arg20[%c2_300, %c0_301, %c0_302] : memref<4x1x32xf32, #tpu.memory_space<vmem>>, vector<1x1x32xf32>
    %660 = vector.shape_cast %659 : vector<1x1x32xf32> to vector<1x32xf32>
    %661 = vector.broadcast %660 : vector<1x32xf32> to vector<16x32xf32>
    %662 = arith.addf %658, %661 : vector<16x32xf32>
    %663 = arith.addf %662, %297 : vector<16x32xf32>
    %c2_303 = arith.constant 2 : index
    %c0_304 = arith.constant 0 : index
    %c0_305 = arith.constant 0 : index
    %664 = vector.load %arg21[%c2_303, %c0_304, %c0_305] : memref<4x1x32xf32, #tpu.memory_space<vmem>>, vector<1x1x32xf32>
    %665 = vector.shape_cast %664 : vector<1x1x32xf32> to vector<1x32xf32>
    %c2_306 = arith.constant 2 : index
    %c0_307 = arith.constant 0 : index
    %c0_308 = arith.constant 0 : index
    %666 = vector.load %arg22[%c2_306, %c0_307, %c0_308] : memref<4x1x32xf32, #tpu.memory_space<vmem>>, vector<1x1x32xf32>
    %667 = vector.shape_cast %666 : vector<1x1x32xf32> to vector<1x32xf32>
    %cst_309 = arith.constant dense<0.000000e+00> : vector<16xf32>
    %668 = vector.multi_reduction <add>, %663, %cst_309 [1] : vector<16x32xf32> to vector<16xf32>
    %669 = vector.shape_cast %668 : vector<16xf32> to vector<16x1xf32>
    %cst_310 = arith.constant 3.200000e+01 : f32
    %670 = vector.broadcast %cst_310 : f32 to vector<16x1xf32>
    %671 = arith.divf %669, %670 : vector<16x1xf32>
    %672 = vector.broadcast %671 : vector<16x1xf32> to vector<16x32xf32>
    %673 = arith.subf %663, %672 : vector<16x32xf32>
    %674 = arith.mulf %673, %673 : vector<16x32xf32>
    %cst_311 = arith.constant dense<0.000000e+00> : vector<16xf32>
    %675 = vector.multi_reduction <add>, %674, %cst_311 [1] : vector<16x32xf32> to vector<16xf32>
    %676 = vector.shape_cast %675 : vector<16xf32> to vector<16x1xf32>
    %cst_312 = arith.constant 3.200000e+01 : f32
    %677 = vector.broadcast %cst_312 : f32 to vector<16x1xf32>
    %678 = arith.divf %676, %677 : vector<16x1xf32>
    %679 = vector.broadcast %671 : vector<16x1xf32> to vector<16x32xf32>
    %680 = arith.subf %663, %679 : vector<16x32xf32>
    %cst_313 = arith.constant 9.99999996E-13 : f32
    %681 = vector.broadcast %cst_313 : f32 to vector<16x1xf32>
    %682 = arith.addf %678, %681 : vector<16x1xf32>
    %683 = math.rsqrt %682 : vector<16x1xf32>
    %684 = vector.broadcast %683 : vector<16x1xf32> to vector<16x32xf32>
    %685 = arith.mulf %680, %684 : vector<16x32xf32>
    %686 = vector.broadcast %665 : vector<1x32xf32> to vector<16x32xf32>
    %687 = arith.mulf %685, %686 : vector<16x32xf32>
    %688 = vector.broadcast %667 : vector<1x32xf32> to vector<16x32xf32>
    %689 = arith.addf %687, %688 : vector<16x32xf32>
    %c2_314 = arith.constant 2 : index
    %c0_315 = arith.constant 0 : index
    %c0_316 = arith.constant 0 : index
    %690 = vector.load %arg23[%c2_314, %c0_315, %c0_316] : memref<4x32x64xbf16, #tpu.memory_space<vmem>>, vector<1x32x64xbf16>
    %691 = vector.shape_cast %690 : vector<1x32x64xbf16> to vector<32x64xbf16>
    %692 = arith.truncf %689 : vector<16x32xf32> to vector<16x32xbf16>
    %cst_317 = arith.constant dense<0.000000e+00> : vector<16x64xf32>
    %693 = tpu.matmul %692, %691, %cst_317 {dimension_numbers = #tpu.dot_dimension_numbers<[1], [0], [0], [1], [0, 0, 1, 1], [], []>} : vector<16x32xbf16>, vector<32x64xbf16>, vector<16x64xf32> -> vector<16x64xf32>
    %c2_318 = arith.constant 2 : index
    %c0_319 = arith.constant 0 : index
    %c0_320 = arith.constant 0 : index
    %694 = vector.load %arg24[%c2_318, %c0_319, %c0_320] : memref<4x1x64xf32, #tpu.memory_space<vmem>>, vector<1x1x64xf32>
    %695 = vector.shape_cast %694 : vector<1x1x64xf32> to vector<1x64xf32>
    %696 = vector.broadcast %695 : vector<1x64xf32> to vector<16x64xf32>
    %697 = arith.addf %693, %696 : vector<16x64xf32>
    %cst_321 = arith.constant 5.000000e-01 : f32
    %698 = vector.broadcast %cst_321 : f32 to vector<16x64xf32>
    %699 = arith.mulf %698, %697 : vector<16x64xf32>
    %cst_322 = arith.constant 4.471500e-02 : f32
    %700 = vector.broadcast %cst_322 : f32 to vector<16x64xf32>
    %701 = arith.mulf %700, %697 : vector<16x64xf32>
    %702 = arith.mulf %701, %697 : vector<16x64xf32>
    %703 = arith.mulf %702, %697 : vector<16x64xf32>
    %704 = arith.addf %697, %703 : vector<16x64xf32>
    %cst_323 = arith.constant 0.797884583 : f32
    %705 = vector.broadcast %cst_323 : f32 to vector<16x64xf32>
    %706 = arith.mulf %705, %704 : vector<16x64xf32>
    %707 = math.tanh %706 : vector<16x64xf32>
    %cst_324 = arith.constant 1.000000e+00 : f32
    %708 = vector.broadcast %cst_324 : f32 to vector<16x64xf32>
    %709 = arith.addf %708, %707 : vector<16x64xf32>
    %710 = arith.mulf %699, %709 : vector<16x64xf32>
    %c2_325 = arith.constant 2 : index
    %c0_326 = arith.constant 0 : index
    %c0_327 = arith.constant 0 : index
    %711 = vector.load %arg25[%c2_325, %c0_326, %c0_327] : memref<4x64x32xbf16, #tpu.memory_space<vmem>>, vector<1x64x32xbf16>
    %712 = vector.shape_cast %711 : vector<1x64x32xbf16> to vector<64x32xbf16>
    %713 = arith.truncf %710 : vector<16x64xf32> to vector<16x64xbf16>
    %cst_328 = arith.constant dense<0.000000e+00> : vector<16x32xf32>
    %714 = tpu.matmul %713, %712, %cst_328 {dimension_numbers = #tpu.dot_dimension_numbers<[1], [0], [0], [1], [0, 0, 1, 1], [], []>} : vector<16x64xbf16>, vector<64x32xbf16>, vector<16x32xf32> -> vector<16x32xf32>
    %c2_329 = arith.constant 2 : index
    %c0_330 = arith.constant 0 : index
    %c0_331 = arith.constant 0 : index
    %715 = vector.load %arg26[%c2_329, %c0_330, %c0_331] : memref<4x1x32xf32, #tpu.memory_space<vmem>>, vector<1x1x32xf32>
    %716 = vector.shape_cast %715 : vector<1x1x32xf32> to vector<1x32xf32>
    %717 = vector.broadcast %716 : vector<1x32xf32> to vector<16x32xf32>
    %718 = arith.addf %714, %717 : vector<16x32xf32>
    %719 = arith.addf %718, %689 : vector<16x32xf32>
    %c2_332 = arith.constant 2 : index
    %c0_333 = arith.constant 0 : index
    %c0_334 = arith.constant 0 : index
    %720 = vector.load %arg27[%c2_332, %c0_333, %c0_334] : memref<4x1x32xf32, #tpu.memory_space<vmem>>, vector<1x1x32xf32>
    %721 = vector.shape_cast %720 : vector<1x1x32xf32> to vector<1x32xf32>
    %c2_335 = arith.constant 2 : index
    %c0_336 = arith.constant 0 : index
    %c0_337 = arith.constant 0 : index
    %722 = vector.load %arg28[%c2_335, %c0_336, %c0_337] : memref<4x1x32xf32, #tpu.memory_space<vmem>>, vector<1x1x32xf32>
    %723 = vector.shape_cast %722 : vector<1x1x32xf32> to vector<1x32xf32>
    %cst_338 = arith.constant dense<0.000000e+00> : vector<16xf32>
    %724 = vector.multi_reduction <add>, %719, %cst_338 [1] : vector<16x32xf32> to vector<16xf32>
    %725 = vector.shape_cast %724 : vector<16xf32> to vector<16x1xf32>
    %cst_339 = arith.constant 3.200000e+01 : f32
    %726 = vector.broadcast %cst_339 : f32 to vector<16x1xf32>
    %727 = arith.divf %725, %726 : vector<16x1xf32>
    %728 = vector.broadcast %727 : vector<16x1xf32> to vector<16x32xf32>
    %729 = arith.subf %719, %728 : vector<16x32xf32>
    %730 = arith.mulf %729, %729 : vector<16x32xf32>
    %cst_340 = arith.constant dense<0.000000e+00> : vector<16xf32>
    %731 = vector.multi_reduction <add>, %730, %cst_340 [1] : vector<16x32xf32> to vector<16xf32>
    %732 = vector.shape_cast %731 : vector<16xf32> to vector<16x1xf32>
    %cst_341 = arith.constant 3.200000e+01 : f32
    %733 = vector.broadcast %cst_341 : f32 to vector<16x1xf32>
    %734 = arith.divf %732, %733 : vector<16x1xf32>
    %735 = vector.broadcast %727 : vector<16x1xf32> to vector<16x32xf32>
    %736 = arith.subf %719, %735 : vector<16x32xf32>
    %cst_342 = arith.constant 9.99999996E-13 : f32
    %737 = vector.broadcast %cst_342 : f32 to vector<16x1xf32>
    %738 = arith.addf %734, %737 : vector<16x1xf32>
    %739 = math.rsqrt %738 : vector<16x1xf32>
    %740 = vector.broadcast %739 : vector<16x1xf32> to vector<16x32xf32>
    %741 = arith.mulf %736, %740 : vector<16x32xf32>
    %742 = vector.broadcast %721 : vector<1x32xf32> to vector<16x32xf32>
    %743 = arith.mulf %741, %742 : vector<16x32xf32>
    %744 = vector.broadcast %723 : vector<1x32xf32> to vector<16x32xf32>
    %745 = arith.addf %743, %744 : vector<16x32xf32>
    %c3_343 = arith.constant 3 : index
    %c0_344 = arith.constant 0 : index
    %c0_345 = arith.constant 0 : index
    %746 = vector.load %arg13[%c3_343, %c0_344, %c0_345] : memref<4x32x32xbf16, #tpu.memory_space<vmem>>, vector<1x32x32xbf16>
    %747 = vector.shape_cast %746 : vector<1x32x32xbf16> to vector<32x32xbf16>
    %748 = arith.truncf %521 : vector<16x32xf32> to vector<16x32xbf16>
    %cst_346 = arith.constant dense<0.000000e+00> : vector<16x32xf32>
    %749 = tpu.matmul %748, %747, %cst_346 {dimension_numbers = #tpu.dot_dimension_numbers<[1], [0], [0], [1], [0, 0, 1, 1], [], []>} : vector<16x32xbf16>, vector<32x32xbf16>, vector<16x32xf32> -> vector<16x32xf32>
    %c3_347 = arith.constant 3 : index
    %c0_348 = arith.constant 0 : index
    %c0_349 = arith.constant 0 : index
    %750 = vector.load %arg14[%c3_347, %c0_348, %c0_349] : memref<4x1x32xf32, #tpu.memory_space<vmem>>, vector<1x1x32xf32>
    %751 = vector.shape_cast %750 : vector<1x1x32xf32> to vector<1x32xf32>
    %752 = vector.broadcast %751 : vector<1x32xf32> to vector<16x32xf32>
    %753 = arith.addf %749, %752 : vector<16x32xf32>
    %c3_350 = arith.constant 3 : index
    %c0_351 = arith.constant 0 : index
    %c0_352 = arith.constant 0 : index
    %754 = vector.load %arg15[%c3_350, %c0_351, %c0_352] : memref<4x32x32xbf16, #tpu.memory_space<vmem>>, vector<1x32x32xbf16>
    %755 = vector.shape_cast %754 : vector<1x32x32xbf16> to vector<32x32xbf16>
    %756 = arith.truncf %297 : vector<16x32xf32> to vector<16x32xbf16>
    %cst_353 = arith.constant dense<0.000000e+00> : vector<16x32xf32>
    %757 = tpu.matmul %756, %755, %cst_353 {dimension_numbers = #tpu.dot_dimension_numbers<[1], [0], [0], [1], [0, 0, 1, 1], [], []>} : vector<16x32xbf16>, vector<32x32xbf16>, vector<16x32xf32> -> vector<16x32xf32>
    %c3_354 = arith.constant 3 : index
    %c0_355 = arith.constant 0 : index
    %c0_356 = arith.constant 0 : index
    %758 = vector.load %arg16[%c3_354, %c0_355, %c0_356] : memref<4x1x32xf32, #tpu.memory_space<vmem>>, vector<1x1x32xf32>
    %759 = vector.shape_cast %758 : vector<1x1x32xf32> to vector<1x32xf32>
    %760 = vector.broadcast %759 : vector<1x32xf32> to vector<16x32xf32>
    %761 = arith.addf %757, %760 : vector<16x32xf32>
    %c3_357 = arith.constant 3 : index
    %c0_358 = arith.constant 0 : index
    %c0_359 = arith.constant 0 : index
    %762 = vector.load %arg17[%c3_357, %c0_358, %c0_359] : memref<4x32x32xbf16, #tpu.memory_space<vmem>>, vector<1x32x32xbf16>
    %763 = vector.shape_cast %762 : vector<1x32x32xbf16> to vector<32x32xbf16>
    %764 = arith.truncf %297 : vector<16x32xf32> to vector<16x32xbf16>
    %cst_360 = arith.constant dense<0.000000e+00> : vector<16x32xf32>
    %765 = tpu.matmul %764, %763, %cst_360 {dimension_numbers = #tpu.dot_dimension_numbers<[1], [0], [0], [1], [0, 0, 1, 1], [], []>} : vector<16x32xbf16>, vector<32x32xbf16>, vector<16x32xf32> -> vector<16x32xf32>
    %c3_361 = arith.constant 3 : index
    %c0_362 = arith.constant 0 : index
    %c0_363 = arith.constant 0 : index
    %766 = vector.load %arg18[%c3_361, %c0_362, %c0_363] : memref<4x1x32xf32, #tpu.memory_space<vmem>>, vector<1x1x32xf32>
    %767 = vector.shape_cast %766 : vector<1x1x32xf32> to vector<1x32xf32>
    %768 = vector.broadcast %767 : vector<1x32xf32> to vector<16x32xf32>
    %769 = arith.addf %765, %768 : vector<16x32xf32>
    %cst_364 = arith.constant 0.353553385 : f32
    %770 = vector.broadcast %cst_364 : f32 to vector<16x32xf32>
    %771 = arith.mulf %753, %770 : vector<16x32xf32>
    %772 = vector.shape_cast %771 : vector<16x32xf32> to vector<2x8x32xf32>
    %773 = vector.shape_cast %761 : vector<16x32xf32> to vector<2x8x32xf32>
    %774 = vector.shape_cast %769 : vector<16x32xf32> to vector<2x8x32xf32>
    %775 = vector.shape_cast %68 : vector<2x8xf32> to vector<2x1x8xf32>
    %776 = vector.shape_cast %775 : vector<2x1x8xf32> to vector<2x1x8xf32>
    %777 = vector.broadcast %776 : vector<2x1x8xf32> to vector<2x8x8xf32>
    %cst_365 = arith.constant 0.000000e+00 : f32
    %778 = vector.broadcast %cst_365 : f32 to vector<16x32xf32>
    %779 = vector.extract_strided_slice %772 {offsets = [0, 0, 0], sizes = [2, 8, 8], strides = [1, 1, 1]} : vector<2x8x32xf32> to vector<2x8x8xf32>
    %780 = arith.truncf %779 : vector<2x8x8xf32> to vector<2x8x8xbf16>
    %781 = vector.extract_strided_slice %773 {offsets = [0, 0, 0], sizes = [2, 8, 8], strides = [1, 1, 1]} : vector<2x8x32xf32> to vector<2x8x8xf32>
    %782 = arith.truncf %781 : vector<2x8x8xf32> to vector<2x8x8xbf16>
    "tpu.trace_start"() <{level = 10 : i32, message = "bqd,bkd->bqk"}> : () -> ()
    %cst_366 = arith.constant dense<0.000000e+00> : vector<2x8x8xf32>
    %783 = tpu.matmul %780, %782, %cst_366 {dimension_numbers = #tpu.dot_dimension_numbers<[2], [2], [1], [1], [0, 0, 0, 1, 1, 1], [0], [0]>} : vector<2x8x8xbf16>, vector<2x8x8xbf16>, vector<2x8x8xf32> -> vector<2x8x8xf32>
    "tpu.trace_stop"() : () -> ()
    %784 = arith.addf %783, %777 : vector<2x8x8xf32>
    %cst_367 = arith.constant dense<0xFF800000> : vector<2x8xf32>
    %785 = vector.multi_reduction <maximumf>, %784, %cst_367 [2] : vector<2x8x8xf32> to vector<2x8xf32>
    %786 = vector.shape_cast %785 : vector<2x8xf32> to vector<2x8x1xf32>
    %787 = vector.broadcast %786 : vector<2x8x1xf32> to vector<2x8x8xf32>
    %788 = arith.subf %784, %787 : vector<2x8x8xf32>
    %789 = math.exp %788 : vector<2x8x8xf32>
    %cst_368 = arith.constant dense<0.000000e+00> : vector<2x8xf32>
    %790 = vector.multi_reduction <add>, %789, %cst_368 [2] : vector<2x8x8xf32> to vector<2x8xf32>
    %791 = vector.shape_cast %790 : vector<2x8xf32> to vector<2x8x1xf32>
    %792 = tpu.reciprocal %791 {approx = true} : vector<2x8x1xf32> -> vector<2x8x1xf32>
    %793 = vector.broadcast %792 : vector<2x8x1xf32> to vector<2x8x8xf32>
    %794 = arith.mulf %789, %793 : vector<2x8x8xf32>
    %795 = arith.truncf %794 : vector<2x8x8xf32> to vector<2x8x8xbf16>
    %796 = vector.extract_strided_slice %774 {offsets = [0, 0, 0], sizes = [2, 8, 8], strides = [1, 1, 1]} : vector<2x8x32xf32> to vector<2x8x8xf32>
    %797 = arith.truncf %796 : vector<2x8x8xf32> to vector<2x8x8xbf16>
    "tpu.trace_start"() <{level = 10 : i32, message = "bqk,bkd->bqd"}> : () -> ()
    %cst_369 = arith.constant dense<0.000000e+00> : vector<2x8x8xf32>
    %798 = tpu.matmul %795, %797, %cst_369 {dimension_numbers = #tpu.dot_dimension_numbers<[2], [1], [1], [2], [0, 0, 0, 1, 1, 2], [0], [0]>} : vector<2x8x8xbf16>, vector<2x8x8xbf16>, vector<2x8x8xf32> -> vector<2x8x8xf32>
    "tpu.trace_stop"() : () -> ()
    %799 = vector.shape_cast %798 : vector<2x8x8xf32> to vector<16x8xf32>
    %800 = arith.truncf %799 : vector<16x8xf32> to vector<16x8xbf16>
    %c3_370 = arith.constant 3 : index
    %c0_371 = arith.constant 0 : index
    %c0_372 = arith.constant 0 : index
    %c0_373 = arith.constant 0 : index
    %801 = vector.load %arg19[%c3_370, %c0_371, %c0_372, %c0_373] : memref<4x4x8x32xbf16, #tpu.memory_space<vmem>>, vector<1x1x8x32xbf16>
    %802 = vector.shape_cast %801 : vector<1x1x8x32xbf16> to vector<8x32xbf16>
    %cst_374 = arith.constant dense<0.000000e+00> : vector<16x32xf32>
    %803 = tpu.matmul %800, %802, %cst_374 {dimension_numbers = #tpu.dot_dimension_numbers<[1], [0], [0], [1], [0, 0, 1, 1], [], []>} : vector<16x8xbf16>, vector<8x32xbf16>, vector<16x32xf32> -> vector<16x32xf32>
    %804 = arith.addf %778, %803 : vector<16x32xf32>
    %805 = vector.extract_strided_slice %772 {offsets = [0, 0, 8], sizes = [2, 8, 8], strides = [1, 1, 1]} : vector<2x8x32xf32> to vector<2x8x8xf32>
    %806 = arith.truncf %805 : vector<2x8x8xf32> to vector<2x8x8xbf16>
    %807 = vector.extract_strided_slice %773 {offsets = [0, 0, 8], sizes = [2, 8, 8], strides = [1, 1, 1]} : vector<2x8x32xf32> to vector<2x8x8xf32>
    %808 = arith.truncf %807 : vector<2x8x8xf32> to vector<2x8x8xbf16>
    "tpu.trace_start"() <{level = 10 : i32, message = "bqd,bkd->bqk"}> : () -> ()
    %cst_375 = arith.constant dense<0.000000e+00> : vector<2x8x8xf32>
    %809 = tpu.matmul %806, %808, %cst_375 {dimension_numbers = #tpu.dot_dimension_numbers<[2], [2], [1], [1], [0, 0, 0, 1, 1, 1], [0], [0]>} : vector<2x8x8xbf16>, vector<2x8x8xbf16>, vector<2x8x8xf32> -> vector<2x8x8xf32>
    "tpu.trace_stop"() : () -> ()
    %810 = arith.addf %809, %777 : vector<2x8x8xf32>
    %cst_376 = arith.constant dense<0xFF800000> : vector<2x8xf32>
    %811 = vector.multi_reduction <maximumf>, %810, %cst_376 [2] : vector<2x8x8xf32> to vector<2x8xf32>
    %812 = vector.shape_cast %811 : vector<2x8xf32> to vector<2x8x1xf32>
    %813 = vector.broadcast %812 : vector<2x8x1xf32> to vector<2x8x8xf32>
    %814 = arith.subf %810, %813 : vector<2x8x8xf32>
    %815 = math.exp %814 : vector<2x8x8xf32>
    %cst_377 = arith.constant dense<0.000000e+00> : vector<2x8xf32>
    %816 = vector.multi_reduction <add>, %815, %cst_377 [2] : vector<2x8x8xf32> to vector<2x8xf32>
    %817 = vector.shape_cast %816 : vector<2x8xf32> to vector<2x8x1xf32>
    %818 = tpu.reciprocal %817 {approx = true} : vector<2x8x1xf32> -> vector<2x8x1xf32>
    %819 = vector.broadcast %818 : vector<2x8x1xf32> to vector<2x8x8xf32>
    %820 = arith.mulf %815, %819 : vector<2x8x8xf32>
    %821 = arith.truncf %820 : vector<2x8x8xf32> to vector<2x8x8xbf16>
    %822 = vector.extract_strided_slice %774 {offsets = [0, 0, 8], sizes = [2, 8, 8], strides = [1, 1, 1]} : vector<2x8x32xf32> to vector<2x8x8xf32>
    %823 = arith.truncf %822 : vector<2x8x8xf32> to vector<2x8x8xbf16>
    "tpu.trace_start"() <{level = 10 : i32, message = "bqk,bkd->bqd"}> : () -> ()
    %cst_378 = arith.constant dense<0.000000e+00> : vector<2x8x8xf32>
    %824 = tpu.matmul %821, %823, %cst_378 {dimension_numbers = #tpu.dot_dimension_numbers<[2], [1], [1], [2], [0, 0, 0, 1, 1, 2], [0], [0]>} : vector<2x8x8xbf16>, vector<2x8x8xbf16>, vector<2x8x8xf32> -> vector<2x8x8xf32>
    "tpu.trace_stop"() : () -> ()
    %825 = vector.shape_cast %824 : vector<2x8x8xf32> to vector<16x8xf32>
    %826 = arith.truncf %825 : vector<16x8xf32> to vector<16x8xbf16>
    %c3_379 = arith.constant 3 : index
    %c1_380 = arith.constant 1 : index
    %c0_381 = arith.constant 0 : index
    %c0_382 = arith.constant 0 : index
    %827 = vector.load %arg19[%c3_379, %c1_380, %c0_381, %c0_382] : memref<4x4x8x32xbf16, #tpu.memory_space<vmem>>, vector<1x1x8x32xbf16>
    %828 = vector.shape_cast %827 : vector<1x1x8x32xbf16> to vector<8x32xbf16>
    %cst_383 = arith.constant dense<0.000000e+00> : vector<16x32xf32>
    %829 = tpu.matmul %826, %828, %cst_383 {dimension_numbers = #tpu.dot_dimension_numbers<[1], [0], [0], [1], [0, 0, 1, 1], [], []>} : vector<16x8xbf16>, vector<8x32xbf16>, vector<16x32xf32> -> vector<16x32xf32>
    %830 = arith.addf %804, %829 : vector<16x32xf32>
    %831 = vector.extract_strided_slice %772 {offsets = [0, 0, 16], sizes = [2, 8, 8], strides = [1, 1, 1]} : vector<2x8x32xf32> to vector<2x8x8xf32>
    %832 = arith.truncf %831 : vector<2x8x8xf32> to vector<2x8x8xbf16>
    %833 = vector.extract_strided_slice %773 {offsets = [0, 0, 16], sizes = [2, 8, 8], strides = [1, 1, 1]} : vector<2x8x32xf32> to vector<2x8x8xf32>
    %834 = arith.truncf %833 : vector<2x8x8xf32> to vector<2x8x8xbf16>
    "tpu.trace_start"() <{level = 10 : i32, message = "bqd,bkd->bqk"}> : () -> ()
    %cst_384 = arith.constant dense<0.000000e+00> : vector<2x8x8xf32>
    %835 = tpu.matmul %832, %834, %cst_384 {dimension_numbers = #tpu.dot_dimension_numbers<[2], [2], [1], [1], [0, 0, 0, 1, 1, 1], [0], [0]>} : vector<2x8x8xbf16>, vector<2x8x8xbf16>, vector<2x8x8xf32> -> vector<2x8x8xf32>
    "tpu.trace_stop"() : () -> ()
    %836 = arith.addf %835, %777 : vector<2x8x8xf32>
    %cst_385 = arith.constant dense<0xFF800000> : vector<2x8xf32>
    %837 = vector.multi_reduction <maximumf>, %836, %cst_385 [2] : vector<2x8x8xf32> to vector<2x8xf32>
    %838 = vector.shape_cast %837 : vector<2x8xf32> to vector<2x8x1xf32>
    %839 = vector.broadcast %838 : vector<2x8x1xf32> to vector<2x8x8xf32>
    %840 = arith.subf %836, %839 : vector<2x8x8xf32>
    %841 = math.exp %840 : vector<2x8x8xf32>
    %cst_386 = arith.constant dense<0.000000e+00> : vector<2x8xf32>
    %842 = vector.multi_reduction <add>, %841, %cst_386 [2] : vector<2x8x8xf32> to vector<2x8xf32>
    %843 = vector.shape_cast %842 : vector<2x8xf32> to vector<2x8x1xf32>
    %844 = tpu.reciprocal %843 {approx = true} : vector<2x8x1xf32> -> vector<2x8x1xf32>
    %845 = vector.broadcast %844 : vector<2x8x1xf32> to vector<2x8x8xf32>
    %846 = arith.mulf %841, %845 : vector<2x8x8xf32>
    %847 = arith.truncf %846 : vector<2x8x8xf32> to vector<2x8x8xbf16>
    %848 = vector.extract_strided_slice %774 {offsets = [0, 0, 16], sizes = [2, 8, 8], strides = [1, 1, 1]} : vector<2x8x32xf32> to vector<2x8x8xf32>
    %849 = arith.truncf %848 : vector<2x8x8xf32> to vector<2x8x8xbf16>
    "tpu.trace_start"() <{level = 10 : i32, message = "bqk,bkd->bqd"}> : () -> ()
    %cst_387 = arith.constant dense<0.000000e+00> : vector<2x8x8xf32>
    %850 = tpu.matmul %847, %849, %cst_387 {dimension_numbers = #tpu.dot_dimension_numbers<[2], [1], [1], [2], [0, 0, 0, 1, 1, 2], [0], [0]>} : vector<2x8x8xbf16>, vector<2x8x8xbf16>, vector<2x8x8xf32> -> vector<2x8x8xf32>
    "tpu.trace_stop"() : () -> ()
    %851 = vector.shape_cast %850 : vector<2x8x8xf32> to vector<16x8xf32>
    %852 = arith.truncf %851 : vector<16x8xf32> to vector<16x8xbf16>
    %c3_388 = arith.constant 3 : index
    %c2_389 = arith.constant 2 : index
    %c0_390 = arith.constant 0 : index
    %c0_391 = arith.constant 0 : index
    %853 = vector.load %arg19[%c3_388, %c2_389, %c0_390, %c0_391] : memref<4x4x8x32xbf16, #tpu.memory_space<vmem>>, vector<1x1x8x32xbf16>
    %854 = vector.shape_cast %853 : vector<1x1x8x32xbf16> to vector<8x32xbf16>
    %cst_392 = arith.constant dense<0.000000e+00> : vector<16x32xf32>
    %855 = tpu.matmul %852, %854, %cst_392 {dimension_numbers = #tpu.dot_dimension_numbers<[1], [0], [0], [1], [0, 0, 1, 1], [], []>} : vector<16x8xbf16>, vector<8x32xbf16>, vector<16x32xf32> -> vector<16x32xf32>
    %856 = arith.addf %830, %855 : vector<16x32xf32>
    %857 = vector.extract_strided_slice %772 {offsets = [0, 0, 24], sizes = [2, 8, 8], strides = [1, 1, 1]} : vector<2x8x32xf32> to vector<2x8x8xf32>
    %858 = arith.truncf %857 : vector<2x8x8xf32> to vector<2x8x8xbf16>
    %859 = vector.extract_strided_slice %773 {offsets = [0, 0, 24], sizes = [2, 8, 8], strides = [1, 1, 1]} : vector<2x8x32xf32> to vector<2x8x8xf32>
    %860 = arith.truncf %859 : vector<2x8x8xf32> to vector<2x8x8xbf16>
    "tpu.trace_start"() <{level = 10 : i32, message = "bqd,bkd->bqk"}> : () -> ()
    %cst_393 = arith.constant dense<0.000000e+00> : vector<2x8x8xf32>
    %861 = tpu.matmul %858, %860, %cst_393 {dimension_numbers = #tpu.dot_dimension_numbers<[2], [2], [1], [1], [0, 0, 0, 1, 1, 1], [0], [0]>} : vector<2x8x8xbf16>, vector<2x8x8xbf16>, vector<2x8x8xf32> -> vector<2x8x8xf32>
    "tpu.trace_stop"() : () -> ()
    %862 = arith.addf %861, %777 : vector<2x8x8xf32>
    %cst_394 = arith.constant dense<0xFF800000> : vector<2x8xf32>
    %863 = vector.multi_reduction <maximumf>, %862, %cst_394 [2] : vector<2x8x8xf32> to vector<2x8xf32>
    %864 = vector.shape_cast %863 : vector<2x8xf32> to vector<2x8x1xf32>
    %865 = vector.broadcast %864 : vector<2x8x1xf32> to vector<2x8x8xf32>
    %866 = arith.subf %862, %865 : vector<2x8x8xf32>
    %867 = math.exp %866 : vector<2x8x8xf32>
    %cst_395 = arith.constant dense<0.000000e+00> : vector<2x8xf32>
    %868 = vector.multi_reduction <add>, %867, %cst_395 [2] : vector<2x8x8xf32> to vector<2x8xf32>
    %869 = vector.shape_cast %868 : vector<2x8xf32> to vector<2x8x1xf32>
    %870 = tpu.reciprocal %869 {approx = true} : vector<2x8x1xf32> -> vector<2x8x1xf32>
    %871 = vector.broadcast %870 : vector<2x8x1xf32> to vector<2x8x8xf32>
    %872 = arith.mulf %867, %871 : vector<2x8x8xf32>
    %873 = arith.truncf %872 : vector<2x8x8xf32> to vector<2x8x8xbf16>
    %874 = vector.extract_strided_slice %774 {offsets = [0, 0, 24], sizes = [2, 8, 8], strides = [1, 1, 1]} : vector<2x8x32xf32> to vector<2x8x8xf32>
    %875 = arith.truncf %874 : vector<2x8x8xf32> to vector<2x8x8xbf16>
    "tpu.trace_start"() <{level = 10 : i32, message = "bqk,bkd->bqd"}> : () -> ()
    %cst_396 = arith.constant dense<0.000000e+00> : vector<2x8x8xf32>
    %876 = tpu.matmul %873, %875, %cst_396 {dimension_numbers = #tpu.dot_dimension_numbers<[2], [1], [1], [2], [0, 0, 0, 1, 1, 2], [0], [0]>} : vector<2x8x8xbf16>, vector<2x8x8xbf16>, vector<2x8x8xf32> -> vector<2x8x8xf32>
    "tpu.trace_stop"() : () -> ()
    %877 = vector.shape_cast %876 : vector<2x8x8xf32> to vector<16x8xf32>
    %878 = arith.truncf %877 : vector<16x8xf32> to vector<16x8xbf16>
    %c3_397 = arith.constant 3 : index
    %c3_398 = arith.constant 3 : index
    %c0_399 = arith.constant 0 : index
    %c0_400 = arith.constant 0 : index
    %879 = vector.load %arg19[%c3_397, %c3_398, %c0_399, %c0_400] : memref<4x4x8x32xbf16, #tpu.memory_space<vmem>>, vector<1x1x8x32xbf16>
    %880 = vector.shape_cast %879 : vector<1x1x8x32xbf16> to vector<8x32xbf16>
    %cst_401 = arith.constant dense<0.000000e+00> : vector<16x32xf32>
    %881 = tpu.matmul %878, %880, %cst_401 {dimension_numbers = #tpu.dot_dimension_numbers<[1], [0], [0], [1], [0, 0, 1, 1], [], []>} : vector<16x8xbf16>, vector<8x32xbf16>, vector<16x32xf32> -> vector<16x32xf32>
    %882 = arith.addf %856, %881 : vector<16x32xf32>
    %c3_402 = arith.constant 3 : index
    %c0_403 = arith.constant 0 : index
    %c0_404 = arith.constant 0 : index
    %883 = vector.load %arg20[%c3_402, %c0_403, %c0_404] : memref<4x1x32xf32, #tpu.memory_space<vmem>>, vector<1x1x32xf32>
    %884 = vector.shape_cast %883 : vector<1x1x32xf32> to vector<1x32xf32>
    %885 = vector.broadcast %884 : vector<1x32xf32> to vector<16x32xf32>
    %886 = arith.addf %882, %885 : vector<16x32xf32>
    %887 = arith.addf %886, %521 : vector<16x32xf32>
    %c3_405 = arith.constant 3 : index
    %c0_406 = arith.constant 0 : index
    %c0_407 = arith.constant 0 : index
    %888 = vector.load %arg21[%c3_405, %c0_406, %c0_407] : memref<4x1x32xf32, #tpu.memory_space<vmem>>, vector<1x1x32xf32>
    %889 = vector.shape_cast %888 : vector<1x1x32xf32> to vector<1x32xf32>
    %c3_408 = arith.constant 3 : index
    %c0_409 = arith.constant 0 : index
    %c0_410 = arith.constant 0 : index
    %890 = vector.load %arg22[%c3_408, %c0_409, %c0_410] : memref<4x1x32xf32, #tpu.memory_space<vmem>>, vector<1x1x32xf32>
    %891 = vector.shape_cast %890 : vector<1x1x32xf32> to vector<1x32xf32>
    %cst_411 = arith.constant dense<0.000000e+00> : vector<16xf32>
    %892 = vector.multi_reduction <add>, %887, %cst_411 [1] : vector<16x32xf32> to vector<16xf32>
    %893 = vector.shape_cast %892 : vector<16xf32> to vector<16x1xf32>
    %cst_412 = arith.constant 3.200000e+01 : f32
    %894 = vector.broadcast %cst_412 : f32 to vector<16x1xf32>
    %895 = arith.divf %893, %894 : vector<16x1xf32>
    %896 = vector.broadcast %895 : vector<16x1xf32> to vector<16x32xf32>
    %897 = arith.subf %887, %896 : vector<16x32xf32>
    %898 = arith.mulf %897, %897 : vector<16x32xf32>
    %cst_413 = arith.constant dense<0.000000e+00> : vector<16xf32>
    %899 = vector.multi_reduction <add>, %898, %cst_413 [1] : vector<16x32xf32> to vector<16xf32>
    %900 = vector.shape_cast %899 : vector<16xf32> to vector<16x1xf32>
    %cst_414 = arith.constant 3.200000e+01 : f32
    %901 = vector.broadcast %cst_414 : f32 to vector<16x1xf32>
    %902 = arith.divf %900, %901 : vector<16x1xf32>
    %903 = vector.broadcast %895 : vector<16x1xf32> to vector<16x32xf32>
    %904 = arith.subf %887, %903 : vector<16x32xf32>
    %cst_415 = arith.constant 9.99999996E-13 : f32
    %905 = vector.broadcast %cst_415 : f32 to vector<16x1xf32>
    %906 = arith.addf %902, %905 : vector<16x1xf32>
    %907 = math.rsqrt %906 : vector<16x1xf32>
    %908 = vector.broadcast %907 : vector<16x1xf32> to vector<16x32xf32>
    %909 = arith.mulf %904, %908 : vector<16x32xf32>
    %910 = vector.broadcast %889 : vector<1x32xf32> to vector<16x32xf32>
    %911 = arith.mulf %909, %910 : vector<16x32xf32>
    %912 = vector.broadcast %891 : vector<1x32xf32> to vector<16x32xf32>
    %913 = arith.addf %911, %912 : vector<16x32xf32>
    %c3_416 = arith.constant 3 : index
    %c0_417 = arith.constant 0 : index
    %c0_418 = arith.constant 0 : index
    %914 = vector.load %arg23[%c3_416, %c0_417, %c0_418] : memref<4x32x64xbf16, #tpu.memory_space<vmem>>, vector<1x32x64xbf16>
    %915 = vector.shape_cast %914 : vector<1x32x64xbf16> to vector<32x64xbf16>
    %916 = arith.truncf %913 : vector<16x32xf32> to vector<16x32xbf16>
    %cst_419 = arith.constant dense<0.000000e+00> : vector<16x64xf32>
    %917 = tpu.matmul %916, %915, %cst_419 {dimension_numbers = #tpu.dot_dimension_numbers<[1], [0], [0], [1], [0, 0, 1, 1], [], []>} : vector<16x32xbf16>, vector<32x64xbf16>, vector<16x64xf32> -> vector<16x64xf32>
    %c3_420 = arith.constant 3 : index
    %c0_421 = arith.constant 0 : index
    %c0_422 = arith.constant 0 : index
    %918 = vector.load %arg24[%c3_420, %c0_421, %c0_422] : memref<4x1x64xf32, #tpu.memory_space<vmem>>, vector<1x1x64xf32>
    %919 = vector.shape_cast %918 : vector<1x1x64xf32> to vector<1x64xf32>
    %920 = vector.broadcast %919 : vector<1x64xf32> to vector<16x64xf32>
    %921 = arith.addf %917, %920 : vector<16x64xf32>
    %cst_423 = arith.constant 5.000000e-01 : f32
    %922 = vector.broadcast %cst_423 : f32 to vector<16x64xf32>
    %923 = arith.mulf %922, %921 : vector<16x64xf32>
    %cst_424 = arith.constant 4.471500e-02 : f32
    %924 = vector.broadcast %cst_424 : f32 to vector<16x64xf32>
    %925 = arith.mulf %924, %921 : vector<16x64xf32>
    %926 = arith.mulf %925, %921 : vector<16x64xf32>
    %927 = arith.mulf %926, %921 : vector<16x64xf32>
    %928 = arith.addf %921, %927 : vector<16x64xf32>
    %cst_425 = arith.constant 0.797884583 : f32
    %929 = vector.broadcast %cst_425 : f32 to vector<16x64xf32>
    %930 = arith.mulf %929, %928 : vector<16x64xf32>
    %931 = math.tanh %930 : vector<16x64xf32>
    %cst_426 = arith.constant 1.000000e+00 : f32
    %932 = vector.broadcast %cst_426 : f32 to vector<16x64xf32>
    %933 = arith.addf %932, %931 : vector<16x64xf32>
    %934 = arith.mulf %923, %933 : vector<16x64xf32>
    %c3_427 = arith.constant 3 : index
    %c0_428 = arith.constant 0 : index
    %c0_429 = arith.constant 0 : index
    %935 = vector.load %arg25[%c3_427, %c0_428, %c0_429] : memref<4x64x32xbf16, #tpu.memory_space<vmem>>, vector<1x64x32xbf16>
    %936 = vector.shape_cast %935 : vector<1x64x32xbf16> to vector<64x32xbf16>
    %937 = arith.truncf %934 : vector<16x64xf32> to vector<16x64xbf16>
    %cst_430 = arith.constant dense<0.000000e+00> : vector<16x32xf32>
    %938 = tpu.matmul %937, %936, %cst_430 {dimension_numbers = #tpu.dot_dimension_numbers<[1], [0], [0], [1], [0, 0, 1, 1], [], []>} : vector<16x64xbf16>, vector<64x32xbf16>, vector<16x32xf32> -> vector<16x32xf32>
    %c3_431 = arith.constant 3 : index
    %c0_432 = arith.constant 0 : index
    %c0_433 = arith.constant 0 : index
    %939 = vector.load %arg26[%c3_431, %c0_432, %c0_433] : memref<4x1x32xf32, #tpu.memory_space<vmem>>, vector<1x1x32xf32>
    %940 = vector.shape_cast %939 : vector<1x1x32xf32> to vector<1x32xf32>
    %941 = vector.broadcast %940 : vector<1x32xf32> to vector<16x32xf32>
    %942 = arith.addf %938, %941 : vector<16x32xf32>
    %943 = arith.addf %942, %913 : vector<16x32xf32>
    %c3_434 = arith.constant 3 : index
    %c0_435 = arith.constant 0 : index
    %c0_436 = arith.constant 0 : index
    %944 = vector.load %arg27[%c3_434, %c0_435, %c0_436] : memref<4x1x32xf32, #tpu.memory_space<vmem>>, vector<1x1x32xf32>
    %945 = vector.shape_cast %944 : vector<1x1x32xf32> to vector<1x32xf32>
    %c3_437 = arith.constant 3 : index
    %c0_438 = arith.constant 0 : index
    %c0_439 = arith.constant 0 : index
    %946 = vector.load %arg28[%c3_437, %c0_438, %c0_439] : memref<4x1x32xf32, #tpu.memory_space<vmem>>, vector<1x1x32xf32>
    %947 = vector.shape_cast %946 : vector<1x1x32xf32> to vector<1x32xf32>
    %cst_440 = arith.constant dense<0.000000e+00> : vector<16xf32>
    %948 = vector.multi_reduction <add>, %943, %cst_440 [1] : vector<16x32xf32> to vector<16xf32>
    %949 = vector.shape_cast %948 : vector<16xf32> to vector<16x1xf32>
    %cst_441 = arith.constant 3.200000e+01 : f32
    %950 = vector.broadcast %cst_441 : f32 to vector<16x1xf32>
    %951 = arith.divf %949, %950 : vector<16x1xf32>
    %952 = vector.broadcast %951 : vector<16x1xf32> to vector<16x32xf32>
    %953 = arith.subf %943, %952 : vector<16x32xf32>
    %954 = arith.mulf %953, %953 : vector<16x32xf32>
    %cst_442 = arith.constant dense<0.000000e+00> : vector<16xf32>
    %955 = vector.multi_reduction <add>, %954, %cst_442 [1] : vector<16x32xf32> to vector<16xf32>
    %956 = vector.shape_cast %955 : vector<16xf32> to vector<16x1xf32>
    %cst_443 = arith.constant 3.200000e+01 : f32
    %957 = vector.broadcast %cst_443 : f32 to vector<16x1xf32>
    %958 = arith.divf %956, %957 : vector<16x1xf32>
    %959 = vector.broadcast %951 : vector<16x1xf32> to vector<16x32xf32>
    %960 = arith.subf %943, %959 : vector<16x32xf32>
    %cst_444 = arith.constant 9.99999996E-13 : f32
    %961 = vector.broadcast %cst_444 : f32 to vector<16x1xf32>
    %962 = arith.addf %958, %961 : vector<16x1xf32>
    %963 = math.rsqrt %962 : vector<16x1xf32>
    %964 = vector.broadcast %963 : vector<16x1xf32> to vector<16x32xf32>
    %965 = arith.mulf %960, %964 : vector<16x32xf32>
    %966 = vector.broadcast %945 : vector<1x32xf32> to vector<16x32xf32>
    %967 = arith.mulf %965, %966 : vector<16x32xf32>
    %968 = vector.broadcast %947 : vector<1x32xf32> to vector<16x32xf32>
    %969 = arith.addf %967, %968 : vector<16x32xf32>
    %970 = vector.extract_strided_slice %745 {offsets = [0, 0], sizes = [1, 32], strides = [1, 1]} : vector<16x32xf32> to vector<1x32xf32>
    %971 = vector.extract_strided_slice %745 {offsets = [8, 0], sizes = [1, 32], strides = [1, 1]} : vector<16x32xf32> to vector<1x32xf32>
    %972 = tpu.concatenate %970, %971 in 0 : vector<1x32xf32>, vector<1x32xf32> -> vector<2x32xf32>
    %973 = vector.extract_strided_slice %969 {offsets = [0, 0], sizes = [1, 32], strides = [1, 1]} : vector<16x32xf32> to vector<1x32xf32>
    %974 = vector.extract_strided_slice %969 {offsets = [8, 0], sizes = [1, 32], strides = [1, 1]} : vector<16x32xf32> to vector<1x32xf32>
    %975 = tpu.concatenate %973, %974 in 0 : vector<1x32xf32>, vector<1x32xf32> -> vector<2x32xf32>
    %c0_445 = arith.constant 0 : index
    %c0_446 = arith.constant 0 : index
    %c0_447 = arith.constant 0 : index
    %976 = vector.load %arg29[%c0_445, %c0_446, %c0_447] : memref<2x32x32xbf16, #tpu.memory_space<vmem>>, vector<1x32x32xbf16>
    %977 = vector.shape_cast %976 : vector<1x32x32xbf16> to vector<32x32xbf16>
    %978 = arith.truncf %972 : vector<2x32xf32> to vector<2x32xbf16>
    %cst_448 = arith.constant dense<0.000000e+00> : vector<2x32xf32>
    %979 = tpu.matmul %978, %977, %cst_448 {dimension_numbers = #tpu.dot_dimension_numbers<[1], [0], [0], [1], [0, 0, 1, 1], [], []>} : vector<2x32xbf16>, vector<32x32xbf16>, vector<2x32xf32> -> vector<2x32xf32>
    %c0_449 = arith.constant 0 : index
    %c0_450 = arith.constant 0 : index
    %c0_451 = arith.constant 0 : index
    %980 = vector.load %arg30[%c0_449, %c0_450, %c0_451] : memref<2x1x32xf32, #tpu.memory_space<vmem>>, vector<1x1x32xf32>
    %981 = vector.shape_cast %980 : vector<1x1x32xf32> to vector<1x32xf32>
    %982 = vector.broadcast %981 : vector<1x32xf32> to vector<2x32xf32>
    %983 = arith.addf %979, %982 : vector<2x32xf32>
    %984 = math.tanh %983 : vector<2x32xf32>
    %c1_452 = arith.constant 1 : index
    %c0_453 = arith.constant 0 : index
    %c0_454 = arith.constant 0 : index
    %985 = vector.load %arg29[%c1_452, %c0_453, %c0_454] : memref<2x32x32xbf16, #tpu.memory_space<vmem>>, vector<1x32x32xbf16>
    %986 = vector.shape_cast %985 : vector<1x32x32xbf16> to vector<32x32xbf16>
    %987 = arith.truncf %975 : vector<2x32xf32> to vector<2x32xbf16>
    %cst_455 = arith.constant dense<0.000000e+00> : vector<2x32xf32>
    %988 = tpu.matmul %987, %986, %cst_455 {dimension_numbers = #tpu.dot_dimension_numbers<[1], [0], [0], [1], [0, 0, 1, 1], [], []>} : vector<2x32xbf16>, vector<32x32xbf16>, vector<2x32xf32> -> vector<2x32xf32>
    %c1_456 = arith.constant 1 : index
    %c0_457 = arith.constant 0 : index
    %c0_458 = arith.constant 0 : index
    %989 = vector.load %arg30[%c1_456, %c0_457, %c0_458] : memref<2x1x32xf32, #tpu.memory_space<vmem>>, vector<1x1x32xf32>
    %990 = vector.shape_cast %989 : vector<1x1x32xf32> to vector<1x32xf32>
    %991 = vector.broadcast %990 : vector<1x32xf32> to vector<2x32xf32>
    %992 = arith.addf %988, %991 : vector<2x32xf32>
    %993 = math.tanh %992 : vector<2x32xf32>
    %994 = arith.mulf %984, %993 : vector<2x32xf32>
    %c0_459 = arith.constant 0 : index
    %c0_460 = arith.constant 0 : index
    %995 = vector.load %arg51[%c0_459, %c0_460] : memref<2x32xf32, #tpu.memory_space<vmem>>, vector<2x32xf32>
    tpu.vector_store %arg51[%c0_459, %c0_460], %993 {strides = array<i32>} : memref<2x32xf32, #tpu.memory_space<vmem>>, vector<2x32xf32>,
    %c0_461 = arith.constant 0 : index
    %c0_462 = arith.constant 0 : index
    %c0_463 = arith.constant 0 : index
    %996 = vector.load %arg31[%c0_461, %c0_462, %c0_463] : memref<3x32x64xbf16, #tpu.memory_space<vmem>>, vector<1x32x64xbf16>
    %997 = vector.shape_cast %996 : vector<1x32x64xbf16> to vector<32x64xbf16>
    %c0_464 = arith.constant 0 : index
    %c0_465 = arith.constant 0 : index
    %c0_466 = arith.constant 0 : index
    %998 = vector.load %arg32[%c0_464, %c0_465, %c0_466] : memref<3x1x64xf32, #tpu.memory_space<vmem>>, vector<1x1x64xf32>
    %999 = vector.shape_cast %998 : vector<1x1x64xf32> to vector<1x64xf32>
    %c0_467 = arith.constant 0 : index
    %c0_468 = arith.constant 0 : index
    %c0_469 = arith.constant 0 : index
    %1000 = vector.load %arg33[%c0_467, %c0_468, %c0_469] : memref<3x1x64xf32, #tpu.memory_space<vmem>>, vector<1x1x64xf32>
    %1001 = vector.shape_cast %1000 : vector<1x1x64xf32> to vector<1x64xf32>
    %c0_470 = arith.constant 0 : index
    %c0_471 = arith.constant 0 : index
    %c0_472 = arith.constant 0 : index
    %1002 = vector.load %arg34[%c0_470, %c0_471, %c0_472] : memref<3x1x64xf32, #tpu.memory_space<vmem>>, vector<1x1x64xf32>
    %1003 = vector.shape_cast %1002 : vector<1x1x64xf32> to vector<1x64xf32>
    %c0_473 = arith.constant 0 : index
    %c0_474 = arith.constant 0 : index
    %c0_475 = arith.constant 0 : index
    %1004 = vector.load %arg35[%c0_473, %c0_474, %c0_475] : memref<3x64x8xbf16, #tpu.memory_space<vmem>>, vector<1x64x8xbf16>
    %1005 = vector.shape_cast %1004 : vector<1x64x8xbf16> to vector<64x8xbf16>
    %c0_476 = arith.constant 0 : index
    %c0_477 = arith.constant 0 : index
    %c0_478 = arith.constant 0 : index
    %1006 = vector.load %arg36[%c0_476, %c0_477, %c0_478] : memref<3x1x8xf32, #tpu.memory_space<vmem>>, vector<1x1x8xf32>
    %1007 = vector.shape_cast %1006 : vector<1x1x8xf32> to vector<1x8xf32>
    %1008 = arith.truncf %994 : vector<2x32xf32> to vector<2x32xbf16>
    %cst_479 = arith.constant dense<0.000000e+00> : vector<2x64xf32>
    %1009 = tpu.matmul %1008, %997, %cst_479 {dimension_numbers = #tpu.dot_dimension_numbers<[1], [0], [0], [1], [0, 0, 1, 1], [], []>} : vector<2x32xbf16>, vector<32x64xbf16>, vector<2x64xf32> -> vector<2x64xf32>
    %1010 = vector.broadcast %999 : vector<1x64xf32> to vector<2x64xf32>
    %1011 = arith.addf %1009, %1010 : vector<2x64xf32>
    %cst_480 = arith.constant 5.000000e-01 : f32
    %1012 = vector.broadcast %cst_480 : f32 to vector<2x64xf32>
    %1013 = arith.mulf %1012, %1011 : vector<2x64xf32>
    %cst_481 = arith.constant 4.471500e-02 : f32
    %1014 = vector.broadcast %cst_481 : f32 to vector<2x64xf32>
    %1015 = arith.mulf %1014, %1011 : vector<2x64xf32>
    %1016 = arith.mulf %1015, %1011 : vector<2x64xf32>
    %1017 = arith.mulf %1016, %1011 : vector<2x64xf32>
    %1018 = arith.addf %1011, %1017 : vector<2x64xf32>
    %cst_482 = arith.constant 0.797884583 : f32
    %1019 = vector.broadcast %cst_482 : f32 to vector<2x64xf32>
    %1020 = arith.mulf %1019, %1018 : vector<2x64xf32>
    %1021 = math.tanh %1020 : vector<2x64xf32>
    %cst_483 = arith.constant 1.000000e+00 : f32
    %1022 = vector.broadcast %cst_483 : f32 to vector<2x64xf32>
    %1023 = arith.addf %1022, %1021 : vector<2x64xf32>
    %1024 = arith.mulf %1013, %1023 : vector<2x64xf32>
    %cst_484 = arith.constant dense<0.000000e+00> : vector<2xf32>
    %1025 = vector.multi_reduction <add>, %1024, %cst_484 [1] : vector<2x64xf32> to vector<2xf32>
    %1026 = vector.shape_cast %1025 : vector<2xf32> to vector<2x1xf32>
    %cst_485 = arith.constant 6.400000e+01 : f32
    %1027 = vector.broadcast %cst_485 : f32 to vector<2x1xf32>
    %1028 = arith.divf %1026, %1027 : vector<2x1xf32>
    %1029 = vector.broadcast %1028 : vector<2x1xf32> to vector<2x64xf32>
    %1030 = arith.subf %1024, %1029 : vector<2x64xf32>
    %1031 = arith.mulf %1030, %1030 : vector<2x64xf32>
    %cst_486 = arith.constant dense<0.000000e+00> : vector<2xf32>
    %1032 = vector.multi_reduction <add>, %1031, %cst_486 [1] : vector<2x64xf32> to vector<2xf32>
    %1033 = vector.shape_cast %1032 : vector<2xf32> to vector<2x1xf32>
    %cst_487 = arith.constant 6.400000e+01 : f32
    %1034 = vector.broadcast %cst_487 : f32 to vector<2x1xf32>
    %1035 = arith.divf %1033, %1034 : vector<2x1xf32>
    %1036 = vector.broadcast %1028 : vector<2x1xf32> to vector<2x64xf32>
    %1037 = arith.subf %1024, %1036 : vector<2x64xf32>
    %cst_488 = arith.constant 9.99999996E-13 : f32
    %1038 = vector.broadcast %cst_488 : f32 to vector<2x1xf32>
    %1039 = arith.addf %1035, %1038 : vector<2x1xf32>
    %1040 = math.rsqrt %1039 : vector<2x1xf32>
    %1041 = vector.broadcast %1040 : vector<2x1xf32> to vector<2x64xf32>
    %1042 = arith.mulf %1037, %1041 : vector<2x64xf32>
    %1043 = vector.broadcast %1001 : vector<1x64xf32> to vector<2x64xf32>
    %1044 = arith.mulf %1042, %1043 : vector<2x64xf32>
    %1045 = vector.broadcast %1003 : vector<1x64xf32> to vector<2x64xf32>
    %1046 = arith.addf %1044, %1045 : vector<2x64xf32>
    %1047 = arith.truncf %1046 : vector<2x64xf32> to vector<2x64xbf16>
    %cst_489 = arith.constant dense<0.000000e+00> : vector<2x8xf32>
    %1048 = tpu.matmul %1047, %1005, %cst_489 {dimension_numbers = #tpu.dot_dimension_numbers<[1], [0], [0], [1], [0, 0, 1, 1], [], []>} : vector<2x64xbf16>, vector<64x8xbf16>, vector<2x8xf32> -> vector<2x8xf32>
    %1049 = vector.broadcast %1007 : vector<1x8xf32> to vector<2x8xf32>
    %1050 = arith.addf %1048, %1049 : vector<2x8xf32>
    %c1_490 = arith.constant 1 : index
    %c0_491 = arith.constant 0 : index
    %c0_492 = arith.constant 0 : index
    %1051 = vector.load %arg31[%c1_490, %c0_491, %c0_492] : memref<3x32x64xbf16, #tpu.memory_space<vmem>>, vector<1x32x64xbf16>
    %1052 = vector.shape_cast %1051 : vector<1x32x64xbf16> to vector<32x64xbf16>
    %c1_493 = arith.constant 1 : index
    %c0_494 = arith.constant 0 : index
    %c0_495 = arith.constant 0 : index
    %1053 = vector.load %arg32[%c1_493, %c0_494, %c0_495] : memref<3x1x64xf32, #tpu.memory_space<vmem>>, vector<1x1x64xf32>
    %1054 = vector.shape_cast %1053 : vector<1x1x64xf32> to vector<1x64xf32>
    %c1_496 = arith.constant 1 : index
    %c0_497 = arith.constant 0 : index
    %c0_498 = arith.constant 0 : index
    %1055 = vector.load %arg33[%c1_496, %c0_497, %c0_498] : memref<3x1x64xf32, #tpu.memory_space<vmem>>, vector<1x1x64xf32>
    %1056 = vector.shape_cast %1055 : vector<1x1x64xf32> to vector<1x64xf32>
    %c1_499 = arith.constant 1 : index
    %c0_500 = arith.constant 0 : index
    %c0_501 = arith.constant 0 : index
    %1057 = vector.load %arg34[%c1_499, %c0_500, %c0_501] : memref<3x1x64xf32, #tpu.memory_space<vmem>>, vector<1x1x64xf32>
    %1058 = vector.shape_cast %1057 : vector<1x1x64xf32> to vector<1x64xf32>
    %c1_502 = arith.constant 1 : index
    %c0_503 = arith.constant 0 : index
    %c0_504 = arith.constant 0 : index
    %1059 = vector.load %arg35[%c1_502, %c0_503, %c0_504] : memref<3x64x8xbf16, #tpu.memory_space<vmem>>, vector<1x64x8xbf16>
    %1060 = vector.shape_cast %1059 : vector<1x64x8xbf16> to vector<64x8xbf16>
    %c1_505 = arith.constant 1 : index
    %c0_506 = arith.constant 0 : index
    %c0_507 = arith.constant 0 : index
    %1061 = vector.load %arg36[%c1_505, %c0_506, %c0_507] : memref<3x1x8xf32, #tpu.memory_space<vmem>>, vector<1x1x8xf32>
    %1062 = vector.shape_cast %1061 : vector<1x1x8xf32> to vector<1x8xf32>
    %1063 = arith.truncf %994 : vector<2x32xf32> to vector<2x32xbf16>
    %cst_508 = arith.constant dense<0.000000e+00> : vector<2x64xf32>
    %1064 = tpu.matmul %1063, %1052, %cst_508 {dimension_numbers = #tpu.dot_dimension_numbers<[1], [0], [0], [1], [0, 0, 1, 1], [], []>} : vector<2x32xbf16>, vector<32x64xbf16>, vector<2x64xf32> -> vector<2x64xf32>
    %1065 = vector.broadcast %1054 : vector<1x64xf32> to vector<2x64xf32>
    %1066 = arith.addf %1064, %1065 : vector<2x64xf32>
    %cst_509 = arith.constant 5.000000e-01 : f32
    %1067 = vector.broadcast %cst_509 : f32 to vector<2x64xf32>
    %1068 = arith.mulf %1067, %1066 : vector<2x64xf32>
    %cst_510 = arith.constant 4.471500e-02 : f32
    %1069 = vector.broadcast %cst_510 : f32 to vector<2x64xf32>
    %1070 = arith.mulf %1069, %1066 : vector<2x64xf32>
    %1071 = arith.mulf %1070, %1066 : vector<2x64xf32>
    %1072 = arith.mulf %1071, %1066 : vector<2x64xf32>
    %1073 = arith.addf %1066, %1072 : vector<2x64xf32>
    %cst_511 = arith.constant 0.797884583 : f32
    %1074 = vector.broadcast %cst_511 : f32 to vector<2x64xf32>
    %1075 = arith.mulf %1074, %1073 : vector<2x64xf32>
    %1076 = math.tanh %1075 : vector<2x64xf32>
    %cst_512 = arith.constant 1.000000e+00 : f32
    %1077 = vector.broadcast %cst_512 : f32 to vector<2x64xf32>
    %1078 = arith.addf %1077, %1076 : vector<2x64xf32>
    %1079 = arith.mulf %1068, %1078 : vector<2x64xf32>
    %cst_513 = arith.constant dense<0.000000e+00> : vector<2xf32>
    %1080 = vector.multi_reduction <add>, %1079, %cst_513 [1] : vector<2x64xf32> to vector<2xf32>
    %1081 = vector.shape_cast %1080 : vector<2xf32> to vector<2x1xf32>
    %cst_514 = arith.constant 6.400000e+01 : f32
    %1082 = vector.broadcast %cst_514 : f32 to vector<2x1xf32>
    %1083 = arith.divf %1081, %1082 : vector<2x1xf32>
    %1084 = vector.broadcast %1083 : vector<2x1xf32> to vector<2x64xf32>
    %1085 = arith.subf %1079, %1084 : vector<2x64xf32>
    %1086 = arith.mulf %1085, %1085 : vector<2x64xf32>
    %cst_515 = arith.constant dense<0.000000e+00> : vector<2xf32>
    %1087 = vector.multi_reduction <add>, %1086, %cst_515 [1] : vector<2x64xf32> to vector<2xf32>
    %1088 = vector.shape_cast %1087 : vector<2xf32> to vector<2x1xf32>
    %cst_516 = arith.constant 6.400000e+01 : f32
    %1089 = vector.broadcast %cst_516 : f32 to vector<2x1xf32>
    %1090 = arith.divf %1088, %1089 : vector<2x1xf32>
    %1091 = vector.broadcast %1083 : vector<2x1xf32> to vector<2x64xf32>
    %1092 = arith.subf %1079, %1091 : vector<2x64xf32>
    %cst_517 = arith.constant 9.99999996E-13 : f32
    %1093 = vector.broadcast %cst_517 : f32 to vector<2x1xf32>
    %1094 = arith.addf %1090, %1093 : vector<2x1xf32>
    %1095 = math.rsqrt %1094 : vector<2x1xf32>
    %1096 = vector.broadcast %1095 : vector<2x1xf32> to vector<2x64xf32>
    %1097 = arith.mulf %1092, %1096 : vector<2x64xf32>
    %1098 = vector.broadcast %1056 : vector<1x64xf32> to vector<2x64xf32>
    %1099 = arith.mulf %1097, %1098 : vector<2x64xf32>
    %1100 = vector.broadcast %1058 : vector<1x64xf32> to vector<2x64xf32>
    %1101 = arith.addf %1099, %1100 : vector<2x64xf32>
    %1102 = arith.truncf %1101 : vector<2x64xf32> to vector<2x64xbf16>
    %cst_518 = arith.constant dense<0.000000e+00> : vector<2x8xf32>
    %1103 = tpu.matmul %1102, %1060, %cst_518 {dimension_numbers = #tpu.dot_dimension_numbers<[1], [0], [0], [1], [0, 0, 1, 1], [], []>} : vector<2x64xbf16>, vector<64x8xbf16>, vector<2x8xf32> -> vector<2x8xf32>
    %1104 = vector.broadcast %1062 : vector<1x8xf32> to vector<2x8xf32>
    %1105 = arith.addf %1103, %1104 : vector<2x8xf32>
    %c2_519 = arith.constant 2 : index
    %c0_520 = arith.constant 0 : index
    %c0_521 = arith.constant 0 : index
    %1106 = vector.load %arg31[%c2_519, %c0_520, %c0_521] : memref<3x32x64xbf16, #tpu.memory_space<vmem>>, vector<1x32x64xbf16>
    %1107 = vector.shape_cast %1106 : vector<1x32x64xbf16> to vector<32x64xbf16>
    %c2_522 = arith.constant 2 : index
    %c0_523 = arith.constant 0 : index
    %c0_524 = arith.constant 0 : index
    %1108 = vector.load %arg32[%c2_522, %c0_523, %c0_524] : memref<3x1x64xf32, #tpu.memory_space<vmem>>, vector<1x1x64xf32>
    %1109 = vector.shape_cast %1108 : vector<1x1x64xf32> to vector<1x64xf32>
    %c2_525 = arith.constant 2 : index
    %c0_526 = arith.constant 0 : index
    %c0_527 = arith.constant 0 : index
    %1110 = vector.load %arg33[%c2_525, %c0_526, %c0_527] : memref<3x1x64xf32, #tpu.memory_space<vmem>>, vector<1x1x64xf32>
    %1111 = vector.shape_cast %1110 : vector<1x1x64xf32> to vector<1x64xf32>
    %c2_528 = arith.constant 2 : index
    %c0_529 = arith.constant 0 : index
    %c0_530 = arith.constant 0 : index
    %1112 = vector.load %arg34[%c2_528, %c0_529, %c0_530] : memref<3x1x64xf32, #tpu.memory_space<vmem>>, vector<1x1x64xf32>
    %1113 = vector.shape_cast %1112 : vector<1x1x64xf32> to vector<1x64xf32>
    %c2_531 = arith.constant 2 : index
    %c0_532 = arith.constant 0 : index
    %c0_533 = arith.constant 0 : index
    %1114 = vector.load %arg35[%c2_531, %c0_532, %c0_533] : memref<3x64x8xbf16, #tpu.memory_space<vmem>>, vector<1x64x8xbf16>
    %1115 = vector.shape_cast %1114 : vector<1x64x8xbf16> to vector<64x8xbf16>
    %c2_534 = arith.constant 2 : index
    %c0_535 = arith.constant 0 : index
    %c0_536 = arith.constant 0 : index
    %1116 = vector.load %arg36[%c2_534, %c0_535, %c0_536] : memref<3x1x8xf32, #tpu.memory_space<vmem>>, vector<1x1x8xf32>
    %1117 = vector.shape_cast %1116 : vector<1x1x8xf32> to vector<1x8xf32>
    %1118 = arith.truncf %994 : vector<2x32xf32> to vector<2x32xbf16>
    %cst_537 = arith.constant dense<0.000000e+00> : vector<2x64xf32>
    %1119 = tpu.matmul %1118, %1107, %cst_537 {dimension_numbers = #tpu.dot_dimension_numbers<[1], [0], [0], [1], [0, 0, 1, 1], [], []>} : vector<2x32xbf16>, vector<32x64xbf16>, vector<2x64xf32> -> vector<2x64xf32>
    %1120 = vector.broadcast %1109 : vector<1x64xf32> to vector<2x64xf32>
    %1121 = arith.addf %1119, %1120 : vector<2x64xf32>
    %cst_538 = arith.constant 5.000000e-01 : f32
    %1122 = vector.broadcast %cst_538 : f32 to vector<2x64xf32>
    %1123 = arith.mulf %1122, %1121 : vector<2x64xf32>
    %cst_539 = arith.constant 4.471500e-02 : f32
    %1124 = vector.broadcast %cst_539 : f32 to vector<2x64xf32>
    %1125 = arith.mulf %1124, %1121 : vector<2x64xf32>
    %1126 = arith.mulf %1125, %1121 : vector<2x64xf32>
    %1127 = arith.mulf %1126, %1121 : vector<2x64xf32>
    %1128 = arith.addf %1121, %1127 : vector<2x64xf32>
    %cst_540 = arith.constant 0.797884583 : f32
    %1129 = vector.broadcast %cst_540 : f32 to vector<2x64xf32>
    %1130 = arith.mulf %1129, %1128 : vector<2x64xf32>
    %1131 = math.tanh %1130 : vector<2x64xf32>
    %cst_541 = arith.constant 1.000000e+00 : f32
    %1132 = vector.broadcast %cst_541 : f32 to vector<2x64xf32>
    %1133 = arith.addf %1132, %1131 : vector<2x64xf32>
    %1134 = arith.mulf %1123, %1133 : vector<2x64xf32>
    %cst_542 = arith.constant dense<0.000000e+00> : vector<2xf32>
    %1135 = vector.multi_reduction <add>, %1134, %cst_542 [1] : vector<2x64xf32> to vector<2xf32>
    %1136 = vector.shape_cast %1135 : vector<2xf32> to vector<2x1xf32>
    %cst_543 = arith.constant 6.400000e+01 : f32
    %1137 = vector.broadcast %cst_543 : f32 to vector<2x1xf32>
    %1138 = arith.divf %1136, %1137 : vector<2x1xf32>
    %1139 = vector.broadcast %1138 : vector<2x1xf32> to vector<2x64xf32>
    %1140 = arith.subf %1134, %1139 : vector<2x64xf32>
    %1141 = arith.mulf %1140, %1140 : vector<2x64xf32>
    %cst_544 = arith.constant dense<0.000000e+00> : vector<2xf32>
    %1142 = vector.multi_reduction <add>, %1141, %cst_544 [1] : vector<2x64xf32> to vector<2xf32>
    %1143 = vector.shape_cast %1142 : vector<2xf32> to vector<2x1xf32>
    %cst_545 = arith.constant 6.400000e+01 : f32
    %1144 = vector.broadcast %cst_545 : f32 to vector<2x1xf32>
    %1145 = arith.divf %1143, %1144 : vector<2x1xf32>
    %1146 = vector.broadcast %1138 : vector<2x1xf32> to vector<2x64xf32>
    %1147 = arith.subf %1134, %1146 : vector<2x64xf32>
    %cst_546 = arith.constant 9.99999996E-13 : f32
    %1148 = vector.broadcast %cst_546 : f32 to vector<2x1xf32>
    %1149 = arith.addf %1145, %1148 : vector<2x1xf32>
    %1150 = math.rsqrt %1149 : vector<2x1xf32>
    %1151 = vector.broadcast %1150 : vector<2x1xf32> to vector<2x64xf32>
    %1152 = arith.mulf %1147, %1151 : vector<2x64xf32>
    %1153 = vector.broadcast %1111 : vector<1x64xf32> to vector<2x64xf32>
    %1154 = arith.mulf %1152, %1153 : vector<2x64xf32>
    %1155 = vector.broadcast %1113 : vector<1x64xf32> to vector<2x64xf32>
    %1156 = arith.addf %1154, %1155 : vector<2x64xf32>
    %1157 = arith.truncf %1156 : vector<2x64xf32> to vector<2x64xbf16>
    %cst_547 = arith.constant dense<0.000000e+00> : vector<2x8xf32>
    %1158 = tpu.matmul %1157, %1115, %cst_547 {dimension_numbers = #tpu.dot_dimension_numbers<[1], [0], [0], [1], [0, 0, 1, 1], [], []>} : vector<2x64xbf16>, vector<64x8xbf16>, vector<2x8xf32> -> vector<2x8xf32>
    %1159 = vector.broadcast %1117 : vector<1x8xf32> to vector<2x8xf32>
    %1160 = arith.addf %1158, %1159 : vector<2x8xf32>
    %c0_548 = arith.constant 0 : index
    %c0_549 = arith.constant 0 : index
    %1161 = vector.load %arg37[%c0_548, %c0_549] : memref<32x4xbf16, #tpu.memory_space<vmem>>, vector<32x4xbf16>
    %1162 = arith.truncf %994 : vector<2x32xf32> to vector<2x32xbf16>
    %cst_550 = arith.constant dense<0.000000e+00> : vector<2x4xf32>
    %1163 = tpu.matmul %1162, %1161, %cst_550 {dimension_numbers = #tpu.dot_dimension_numbers<[1], [0], [0], [1], [0, 0, 1, 1], [], []>} : vector<2x32xbf16>, vector<32x4xbf16>, vector<2x4xf32> -> vector<2x4xf32>
    %c0_551 = arith.constant 0 : index
    %c0_552 = arith.constant 0 : index
    %1164 = vector.load %arg38[%c0_551, %c0_552] : memref<1x4xf32, #tpu.memory_space<vmem>>, vector<1x4xf32>
    %1165 = vector.broadcast %1164 : vector<1x4xf32> to vector<2x4xf32>
    %1166 = arith.addf %1163, %1165 : vector<2x4xf32>
    %1167 = vector.extract_strided_slice %1050 {offsets = [0, 0], sizes = [2, 1], strides = [1, 1]} : vector<2x8xf32> to vector<2x1xf32>
    %1168 = vector.extract_strided_slice %1160 {offsets = [0, 0], sizes = [2, 1], strides = [1, 1]} : vector<2x8xf32> to vector<2x1xf32>
    %1169 = tpu.concatenate %1167, %1105, %1166, %1168 in 1 : vector<2x1xf32>, vector<2x8xf32>, vector<2x4xf32>, vector<2x1xf32> -> vector<2x14xf32>
    %c0_553 = arith.constant 0 : index
    %c0_554 = arith.constant 0 : index
    %1170 = vector.load %arg49[%c0_553, %c0_554] : memref<2x14xf32, #tpu.memory_space<vmem>>, vector<2x14xf32>
    tpu.vector_store %arg49[%c0_553, %c0_554], %1169 {strides = array<i32>} : memref<2x14xf32, #tpu.memory_space<vmem>>, vector<2x14xf32>,
    %1171 = vector.extract_strided_slice %994 {offsets = [0, 0], sizes = [1, 32], strides = [1, 1]} : vector<2x32xf32> to vector<1x32xf32>
    %1172 = vector.extract_strided_slice %994 {offsets = [1, 0], sizes = [1, 32], strides = [1, 1]} : vector<2x32xf32> to vector<1x32xf32>
    %1173 = tpu.concatenate %1171, %1172 in 1 : vector<1x32xf32>, vector<1x32xf32> -> vector<1x64xf32>
    %c0_555 = arith.constant 0 : index
    %c0_556 = arith.constant 0 : index
    %1174 = vector.load %arg39[%c0_555, %c0_556] : memref<64x64xbf16, #tpu.memory_space<vmem>>, vector<64x64xbf16>
    %c0_557 = arith.constant 0 : index
    %c0_558 = arith.constant 0 : index
    %1175 = vector.load %arg40[%c0_557, %c0_558] : memref<1x64xf32, #tpu.memory_space<vmem>>, vector<1x64xf32>
    %c0_559 = arith.constant 0 : index
    %c0_560 = arith.constant 0 : index
    %1176 = vector.load %arg41[%c0_559, %c0_560] : memref<1x64xf32, #tpu.memory_space<vmem>>, vector<1x64xf32>
    %c0_561 = arith.constant 0 : index
    %c0_562 = arith.constant 0 : index
    %1177 = vector.load %arg42[%c0_561, %c0_562] : memref<1x64xf32, #tpu.memory_space<vmem>>, vector<1x64xf32>
    %c0_563 = arith.constant 0 : index
    %c0_564 = arith.constant 0 : index
    %1178 = vector.load %arg43[%c0_563, %c0_564] : memref<64x2xbf16, #tpu.memory_space<vmem>>, vector<64x2xbf16>
    %c0_565 = arith.constant 0 : index
    %c0_566 = arith.constant 0 : index
    %1179 = vector.load %arg44[%c0_565, %c0_566] : memref<1x2xf32, #tpu.memory_space<vmem>>, vector<1x2xf32>
    %1180 = arith.truncf %1173 : vector<1x64xf32> to vector<1x64xbf16>
    %cst_567 = arith.constant dense<0.000000e+00> : vector<1x64xf32>
    %1181 = tpu.matmul %1180, %1174, %cst_567 {dimension_numbers = #tpu.dot_dimension_numbers<[1], [0], [0], [1], [0, 0, 1, 1], [], []>} : vector<1x64xbf16>, vector<64x64xbf16>, vector<1x64xf32> -> vector<1x64xf32>
    %1182 = arith.addf %1181, %1175 : vector<1x64xf32>
    %cst_568 = arith.constant 5.000000e-01 : f32
    %1183 = vector.broadcast %cst_568 : f32 to vector<1x64xf32>
    %1184 = arith.mulf %1183, %1182 : vector<1x64xf32>
    %cst_569 = arith.constant 4.471500e-02 : f32
    %1185 = vector.broadcast %cst_569 : f32 to vector<1x64xf32>
    %1186 = arith.mulf %1185, %1182 : vector<1x64xf32>
    %1187 = arith.mulf %1186, %1182 : vector<1x64xf32>
    %1188 = arith.mulf %1187, %1182 : vector<1x64xf32>
    %1189 = arith.addf %1182, %1188 : vector<1x64xf32>
    %cst_570 = arith.constant 0.797884583 : f32
    %1190 = vector.broadcast %cst_570 : f32 to vector<1x64xf32>
    %1191 = arith.mulf %1190, %1189 : vector<1x64xf32>
    %1192 = math.tanh %1191 : vector<1x64xf32>
    %cst_571 = arith.constant 1.000000e+00 : f32
    %1193 = vector.broadcast %cst_571 : f32 to vector<1x64xf32>
    %1194 = arith.addf %1193, %1192 : vector<1x64xf32>
    %1195 = arith.mulf %1184, %1194 : vector<1x64xf32>
    %cst_572 = arith.constant dense<0.000000e+00> : vector<1xf32>
    %1196 = vector.multi_reduction <add>, %1195, %cst_572 [1] : vector<1x64xf32> to vector<1xf32>
    %1197 = vector.shape_cast %1196 : vector<1xf32> to vector<1x1xf32>
    %cst_573 = arith.constant 6.400000e+01 : f32
    %1198 = vector.broadcast %cst_573 : f32 to vector<1x1xf32>
    %1199 = arith.divf %1197, %1198 : vector<1x1xf32>
    %1200 = vector.broadcast %1199 : vector<1x1xf32> to vector<1x64xf32>
    %1201 = arith.subf %1195, %1200 : vector<1x64xf32>
    %1202 = arith.mulf %1201, %1201 : vector<1x64xf32>
    %cst_574 = arith.constant dense<0.000000e+00> : vector<1xf32>
    %1203 = vector.multi_reduction <add>, %1202, %cst_574 [1] : vector<1x64xf32> to vector<1xf32>
    %1204 = vector.shape_cast %1203 : vector<1xf32> to vector<1x1xf32>
    %cst_575 = arith.constant 6.400000e+01 : f32
    %1205 = vector.broadcast %cst_575 : f32 to vector<1x1xf32>
    %1206 = arith.divf %1204, %1205 : vector<1x1xf32>
    %1207 = vector.broadcast %1199 : vector<1x1xf32> to vector<1x64xf32>
    %1208 = arith.subf %1195, %1207 : vector<1x64xf32>
    %cst_576 = arith.constant 9.99999996E-13 : f32
    %1209 = vector.broadcast %cst_576 : f32 to vector<1x1xf32>
    %1210 = arith.addf %1206, %1209 : vector<1x1xf32>
    %1211 = math.rsqrt %1210 : vector<1x1xf32>
    %1212 = vector.broadcast %1211 : vector<1x1xf32> to vector<1x64xf32>
    %1213 = arith.mulf %1208, %1212 : vector<1x64xf32>
    %1214 = arith.mulf %1213, %1176 : vector<1x64xf32>
    %1215 = arith.addf %1214, %1177 : vector<1x64xf32>
    %1216 = arith.truncf %1215 : vector<1x64xf32> to vector<1x64xbf16>
    %cst_577 = arith.constant dense<0.000000e+00> : vector<1x2xf32>
    %1217 = tpu.matmul %1216, %1178, %cst_577 {dimension_numbers = #tpu.dot_dimension_numbers<[1], [0], [0], [1], [0, 0, 1, 1], [], []>} : vector<1x64xbf16>, vector<64x2xbf16>, vector<1x2xf32> -> vector<1x2xf32>
    %1218 = arith.addf %1217, %1179 : vector<1x2xf32>
    %c0_578 = arith.constant 0 : index
    %c0_579 = arith.constant 0 : index
    %1219 = vector.load %arg50[%c0_578, %c0_579] : memref<1x2xf32, #tpu.memory_space<vmem>>, vector<1x2xf32>
    tpu.vector_store %arg50[%c0_578, %c0_579], %1218 {strides = array<i32>} : memref<1x2xf32, #tpu.memory_space<vmem>>, vector<1x2xf32>,
    %c0_580 = arith.constant 0 : index
    %c0_581 = arith.constant 0 : index
    %1220 = vector.load %arg45[%c0_580, %c0_581] : memref<32x101xbf16, #tpu.memory_space<vmem>>, vector<32x101xbf16>
    %1221 = arith.truncf %745 : vector<16x32xf32> to vector<16x32xbf16>
    %cst_582 = arith.constant dense<0.000000e+00> : vector<16x101xf32>
    %1222 = tpu.matmul %1221, %1220, %cst_582 {dimension_numbers = #tpu.dot_dimension_numbers<[1], [0], [0], [1], [0, 0, 1, 1], [], []>} : vector<16x32xbf16>, vector<32x101xbf16>, vector<16x101xf32> -> vector<16x101xf32>
    %c0_583 = arith.constant 0 : index
    %c0_584 = arith.constant 0 : index
    %1223 = vector.load %arg46[%c0_583, %c0_584] : memref<1x101xf32, #tpu.memory_space<vmem>>, vector<1x101xf32>
    %1224 = vector.broadcast %1223 : vector<1x101xf32> to vector<16x101xf32>
    %1225 = arith.addf %1222, %1224 : vector<16x101xf32>
    %c0_585 = arith.constant 0 : index
    %c0_586 = arith.constant 0 : index
    %1226 = vector.load %arg52[%c0_585, %c0_586] : memref<16x101xf32, #tpu.memory_space<vmem>>, vector<16x101xf32>
    tpu.vector_store %arg52[%c0_585, %c0_586], %1225 {strides = array<i32>} : memref<16x101xf32, #tpu.memory_space<vmem>>, vector<16x101xf32>,
    %c0_587 = arith.constant 0 : index
    %c0_588 = arith.constant 0 : index
    %1227 = vector.load %arg47[%c0_587, %c0_588] : memref<32x17xbf16, #tpu.memory_space<vmem>>, vector<32x17xbf16>
    %1228 = arith.truncf %969 : vector<16x32xf32> to vector<16x32xbf16>
    %cst_589 = arith.constant dense<0.000000e+00> : vector<16x17xf32>
    %1229 = tpu.matmul %1228, %1227, %cst_589 {dimension_numbers = #tpu.dot_dimension_numbers<[1], [0], [0], [1], [0, 0, 1, 1], [], []>} : vector<16x32xbf16>, vector<32x17xbf16>, vector<16x17xf32> -> vector<16x17xf32>
    %c0_590 = arith.constant 0 : index
    %c0_591 = arith.constant 0 : index
    %1230 = vector.load %arg48[%c0_590, %c0_591] : memref<1x17xf32, #tpu.memory_space<vmem>>, vector<1x17xf32>
    %1231 = vector.broadcast %1230 : vector<1x17xf32> to vector<16x17xf32>
    %1232 = arith.addf %1229, %1231 : vector<16x17xf32>
    %c0_592 = arith.constant 0 : index
    %c0_593 = arith.constant 0 : index
    %1233 = vector.load %arg53[%c0_592, %c0_593] : memref<16x17xf32, #tpu.memory_space<vmem>>, vector<16x17xf32>
    tpu.vector_store %arg53[%c0_592, %c0_593], %1232 {strides = array<i32>} : memref<16x17xf32, #tpu.memory_space<vmem>>, vector<16x17xf32>,
    %c0_594 = arith.constant 0 : index
    %c0_595 = arith.constant 0 : index
    %1234 = vector.load %arg54[%c0_594, %c0_595] : memref<16x32xf32, #tpu.memory_space<vmem>>, vector<16x32xf32>
    tpu.vector_store %arg54[%c0_594, %c0_595], %969 {strides = array<i32>} : memref<16x32xf32, #tpu.memory_space<vmem>>, vector<16x32xf32>,
    return
  }
}

</mosaic_0001>

<bundles_post_ra>
// kernel: vilbert_for_retrieval_forward.1
= control target key start
LH: loop header
LB: loop body
LE: loop exit
PB: predicated region body
PF: predicated region fallthrough
CT: control target
= control target key end

     0   :  { %s10087_s6 = smov 1   ;;  %s10088_s10 = smov 2   ;;  %s11811_s0 = inlined_call_operand.smem [shape: u32[55], index: -1, kind: input, shape index: {}] }
   0x1   :  { %s10169_s5 = sld [smem:[%s11811_s0]]   ;;  %s10089_s14 = smov 3  }
   0x2   :  { %s10174_s9 = sld [smem:[%s11811_s0 + %s10087_s6]]   ;;  %s10090_s18 = smov 4  }
   0x3   :  { %s10179_s13 = sld [smem:[%s11811_s0 + %s10088_s10]]   ;;  %s10091_s22 = smov 5  }
   0x4   :  { %s10184_s17 = sld [smem:[%s11811_s0 + %s10089_s14]]   ;;  %s10092_s26 = smov 6  }
   0x5   :  { %s10189_s21 = sld [smem:[%s11811_s0 + %s10090_s18]]   ;;  %s10093_s30 = smov 7  }
   0x6   :  { %s10194_s25 = sld [smem:[%s11811_s0 + %s10091_s22]]   ;;  %s10094_s4 = smov 8  }
   0x7   :  { %s10199_s29 = sld [smem:[%s11811_s0 + %s10092_s26]]   ;;  %s10095_s10 = smov 9  }
   0x8   :  { %s10204_s3 = sld [smem:[%s11811_s0 + %s10093_s30]]   ;;  %s10096_s15 = smov 10  }
   0x9   :  { %s10209_s8 = sld [smem:[%s11811_s0 + %s10094_s4]]   ;;  %s10097_s20 = smov 11  }
   0xa   :  { %11839 = sst [smem:[#allocation19_spill]] %s10184_s17  ;;  %s10098_s26 = smov 12  }
   0xb   :  { %11840 = sst [smem:[#allocation20_spill]] %s10189_s21  ;;  %s10099_s1 = smov 13  }
   0xc   :  { %s10214_s14 = sld [smem:[%s11811_s0 + %s10095_s10]]   ;;  %s10100_s7 = smov 14  }
   0xd   :  { %s10219_s19 = sld [smem:[%s11811_s0 + %s10096_s15]]   ;;  %s10101_s15 = smov 15  }
   0xe   :  { %s10224_s24 = sld [smem:[%s11811_s0 + %s10097_s20]]   ;;  %s10102_s22 = smov 16  }
   0xf   :  { %11841 = sst [smem:[#allocation21_spill]] %s10209_s8  ;;  %s10103_s28 = smov 17  }
  0x10   :  { %s10229_s30 = sld [smem:[%s11811_s0 + %s10098_s26]]  }
  0x11   :  { %s10234_s6 = sld [smem:[%s11811_s0 + %s10099_s1]]  }
  0x12   :  { %s10239_s12 = sld [smem:[%s11811_s0 + %s10100_s7]]   ;;  %s10104_s7 = smov 18  }
  0x13   :  { %11842 = sst [smem:[#allocation22_spill]] %s10219_s19 }
  0x14   :  { %11843 = sst [smem:[#allocation23_spill]] %s10224_s24 }
  0x15   :  { %s10244_s20 = sld [smem:[%s11811_s0 + %s10101_s15]]   ;;  %s10105_s15 = smov 19  }
  0x16   :  { %11844 = sst [smem:[#allocation24_spill]] %s10229_s30 }
  0x17   :  { %s10249_s27 = sld [smem:[%s11811_s0 + %s10102_s22]]   ;;  %s10106_s22 = smov 20  }
  0x18   :  { %11845 = sst [smem:[#allocation25_spill]] %s10239_s12 }
  0x19   :  { %s10254_s4 = sld [smem:[%s11811_s0 + %s10103_s28]]   ;;  %s10107_s28 = smov 21  }
  0x1a   :  { %s10259_s21 = sld [smem:[%s11811_s0 + %s10104_s7]]   ;;  %s10108_s7 = smov 22  }
  0x1b   :  { %s10264_s30 = sld [smem:[%s11811_s0 + %s10105_s15]]   ;;  %s10109_s15 = smov 23  }
  0x1c   :  { %s10269_s24 = sld [smem:[%s11811_s0 + %s10106_s22]]   ;;  %s10110_s22 = smov 24  }
  0x1d   :  { %11846 = sst [smem:[#allocation26_spill]] %s10249_s27 }
  0x1e   :  { %s10274_s19 = sld [smem:[%s11811_s0 + %s10107_s28]]   ;;  %s10111_s28 = smov 25  }
  0x1f   :  { %s10279_s8 = sld [smem:[%s11811_s0 + %s10108_s7]]   ;;  %s10112_s7 = smov 26  }
  0x20   :  { %11847 = sst [smem:[#allocation27_spill]] %s10259_s21 }
  0x21   :  { %11848 = sst [smem:[#allocation28_spill]] %s10264_s30 }
  0x22   :  { %11849 = sst [smem:[#allocation29_spill]] %s10269_s24 }
  0x23   :  { %s10284_s30 = sld [smem:[%s11811_s0 + %s10109_s15]]   ;;  %s10113_s15 = smov 27  }
  0x24   :  { %11850 = sst [smem:[#allocation30_spill]] %s10274_s19 }
  0x25   :  { %11851 = sst [smem:[#allocation31_spill]] %s10279_s8 }
  0x26   :  { %s10289_s24 = sld [smem:[%s11811_s0 + %s10110_s22]]   ;;  %s10114_s22 = smov 28  }
  0x27   :  { %s10294_s19 = sld [smem:[%s11811_s0 + %s10111_s28]]   ;;  %s10115_s28 = smov 29  }
  0x28   :  { %s10299_s8 = sld [smem:[%s11811_s0 + %s10112_s7]]   ;;  %s10116_s7 = smov 30  }
  0x29   :  { %11852 = sst [smem:[#allocation32_spill]] %s10284_s30 }
  0x2a   :  { %s10304_s30 = sld [smem:[%s11811_s0 + %s10113_s15]]   ;;  %s10117_s15 = smov 31  }
  0x2c   :  { %11853 = sst [smem:[#allocation33_spill]] %s10289_s24 }
  0x2d   :  { %11854 = sst [smem:[#allocation34_spill]] %s10294_s19 }
  0x2e   :  { %11855 = sst [smem:[#allocation35_spill]] %s10299_s8 }
  0x2f   :  { %s10309_s24 = sld [smem:[%s11811_s0 + %s10114_s22]]   ;;  %s10118_s22 = smov 32  }
  0x30   :  { %11856 = sst [smem:[#allocation36_spill]] %s10304_s30 }
  0x31   :  { %s10314_s19 = sld [smem:[%s11811_s0 + %s10115_s28]]   ;;  %s10119_s28 = smov 33  }
  0x32   :  { %s10319_s8 = sld [smem:[%s11811_s0 + %s10116_s7]]   ;;  %s10120_s7 = smov 34  }
  0x33   :  { %s10324_s30 = sld [smem:[%s11811_s0 + %s10117_s15]]   ;;  %s10121_s15 = smov 35  }
  0x35   :  { %11857 = sst [smem:[#allocation37_spill]] %s10309_s24 }
  0x36   :  { %s10329_s24 = sld [smem:[%s11811_s0 + %s10118_s22]]   ;;  %s10122_s22 = smov 36  }
  0x37   :  { %11858 = sst [smem:[#allocation38_spill]] %s10314_s19 }
  0x38   :  { %11859 = sst [smem:[#allocation39_spill]] %s10319_s8 }
  0x39   :  { %11860 = sst [smem:[#allocation40_spill]] %s10324_s30 }
  0x3a   :  { %s10334_s19 = sld [smem:[%s11811_s0 + %s10119_s28]]   ;;  %s10123_s28 = smov 37  }
  0x3b   :  { %s10339_s8 = sld [smem:[%s11811_s0 + %s10120_s7]]   ;;  %s10124_s7 = smov 38  }
  0x3c   :  { %11861 = sst [smem:[#allocation41_spill]] %s10329_s24 }
  0x3d   :  { %s10344_s30 = sld [smem:[%s11811_s0 + %s10121_s15]]   ;;  %s10125_s15 = smov 39  }
  0x3e   :  { %s10349_s24 = sld [smem:[%s11811_s0 + %s10122_s22]]   ;;  %s10126_s22 = smov 40  }
  0x40   :  { %11862 = sst [smem:[#allocation42_spill]] %s10334_s19 }
  0x41   :  { %11863 = sst [smem:[#allocation43_spill]] %s10339_s8 }
  0x42   :  { %s10354_s19 = sld [smem:[%s11811_s0 + %s10123_s28]]   ;;  %s10127_s28 = smov 41  }
  0x43   :  { %11864 = sst [smem:[#allocation44_spill]] %s10344_s30 }
  0x44   :  { %11865 = sst [smem:[#allocation45_spill]] %s10349_s24 }
  0x45   :  { %s10359_s8 = sld [smem:[%s11811_s0 + %s10124_s7]]   ;;  %s10128_s7 = smov 42  }
  0x46   :  { %s10364_s30 = sld [smem:[%s11811_s0 + %s10125_s15]]   ;;  %s10129_s15 = smov 43  }
  0x47   :  { %s10369_s24 = sld [smem:[%s11811_s0 + %s10126_s22]]   ;;  %s10130_s22 = smov 44  }
  0x48   :  { %11866 = sst [smem:[#allocation46_spill]] %s10354_s19 }
  0x49   :  { %s10374_s19 = sld [smem:[%s11811_s0 + %s10127_s28]]   ;;  %s10131_s28 = smov 45  }
  0x4b   :  { %11867 = sst [smem:[#allocation47_spill]] %s10359_s8 }
  0x4c   :  { %11868 = sst [smem:[#allocation48_spill]] %s10364_s30 }
  0x4d   :  { %11869 = sst [smem:[#allocation49_spill]] %s10369_s24 }
  0x4e   :  { %s10379_s8 = sld [smem:[%s11811_s0 + %s10128_s7]]   ;;  %s10132_s7 = smov 46  }
  0x4f   :  { %11870 = sst [smem:[#allocation50_spill]] %s10374_s19 }
  0x50   :  { %s10384_s30 = sld [smem:[%s11811_s0 + %s10129_s15]]   ;;  %s10133_s15 = smov 47  }
  0x51   :  { %s10389_s24 = sld [smem:[%s11811_s0 + %s10130_s22]]   ;;  %s10134_s22 = smov 48  }
  0x52   :  { %s10394_s19 = sld [smem:[%s11811_s0 + %s10131_s28]]   ;;  %s10135_s28 = smov 49  }
  0x53   :  { %s10399_s17 = sld [smem:[%s11811_s0 + %s10132_s7]]   ;;  %s10136_s7 = smov 50  }
  0x54   :  { %s10409_s21 = sld [smem:[%s11811_s0 + %s10134_s22]]   ;;  %s10138_s22 = smov 52  }
  0x55   :  { %s10419_s12 = sld [smem:[%s11811_s0 + %s10136_s7]]   ;;  %s10140_s7 = smov 54  }
  0x56   :  { %11871 = sst [smem:[#allocation51_spill]] %s10384_s30 }
  0x57   :  { %s10404_s30 = sld [smem:[%s11811_s0 + %s10133_s15]]   ;;  %s10137_s15 = smov 51  }
  0x58   :  { %11872 = sst [smem:[#allocation52_spill]] %s10394_s19 }
  0x59   :  { %s10414_s19 = sld [smem:[%s11811_s0 + %s10135_s28]]   ;;  %s10139_s28 = smov 53  }
  0x5a   :  { %s10429_s27 = sld [smem:[%s11811_s0 + %s10138_s22]]  }
  0x5b   :  { %11875 = sst [smem:[#allocation55_spill]] %s10419_s12 }
  0x5c   :  { %s10439_s12 = sld [smem:[%s11811_s0 + %s10140_s7]]  }
  0x5d   :  { %11873 = sst [smem:[#allocation53_spill]] %s10404_s30 }
  0x5e   :  { %s10424_s30 = sld [smem:[%s11811_s0 + %s10137_s15]]  }
  0x5f   :  { %11874 = sst [smem:[#allocation54_spill]] %s10414_s19 }
  0x60   :  { %s10434_s19 = sld [smem:[%s11811_s0 + %s10139_s28]]  }
  0x61   :  { %115 = vsyncpa [#allocation3], 0 }
  0x62   :  { %116 = vsyncpa [#allocation6], 0 }
  0x63   :  { %117 = vsyncpa [#allocation9], 0 }
  0x64   :  { %118 = vsyncpa [#allocation4], 0 }
  0x65   :  { %119 = vsyncpa [#allocation12], 0  ;;  %s10141_s15 = smov [#allocation5]   ;;  %s10142_s18 = smov [#allocation2]  }
  0x66   :  { %s222_s16 = sshll.u32 %s10141_s15, 4  ;;  %s210_s22 = sshll.u32 %s10142_s18, 4  ;;  %s223_s16 = int_to_ptr.vmem [resolvable:$true] %s222_s16  ;;  %s211_s22 = int_to_ptr.vmem [resolvable:$true] %s210_s22 }
  0x67   :  { %s9923_s23 = scalar_lea.hbm %s10389_s24, 16 }
  0x68   :  { %p9924_p0 = scmp.ne.s32.totalorder %s10389_s24, %s9923_s23  ;;  %p9927_p1 = scmp.lt.u32.totalorder %s9923_s23, %s10389_s24 }
  0x6a   :  { %p9929_p2 = pnand %p9927_p1, %p9924_p0 }
  0x6c   :  { %9932 = shalt.err (!%p9929_p2)
}
  0x6d   :  { %s9933_s0 = scalar_lea.vmem %s223_s16, 16  ;;  %s9937_s26 = scalar_lea.vmem %s223_s16, 32 }
  0x6e   :  { %p9934_p3 = scmp.ne.s32.totalorder %s223_s16, %s9933_s0  ;;  %p9938_p4 = scmp.lt.s32.totalorder %s223_s16, %s223_s16 }
  0x6f   :  { %p9939_p5 = scmp.lt.s32.totalorder %s9937_s26, %s9933_s0 }
  0x71   :  { %p9940_p6 = por %p9939_p5, %p9938_p4 }
  0x73   :  { %p9941_p7 = pnand %p9940_p6, %p9934_p3 }
  0x75   :  { %9944 = shalt.err (!%p9941_p7)
}
  0x76   :  { %225 = dma.hbm_to_vmem [thread:$0]  %s10389_s24, 16, %s223_s16, [#allocation6]  }
  0x77   :  { %s9945_s28 = scalar_lea.hbm %s10379_s8, 16 }
  0x78   :  { %p9946_p8 = scmp.ne.s32.totalorder %s10379_s8, %s9945_s28  ;;  %p9949_p9 = scmp.lt.u32.totalorder %s9945_s28, %s10379_s8 }
  0x7a   :  { %p9951_p10 = pnand %p9949_p9, %p9946_p8 }
  0x7c   :  { %9954 = shalt.err (!%p9951_p10)
}
  0x7d   :  { %s9955_s1 = scalar_lea.vmem %s211_s22, 16  ;;  %s9959_s2 = scalar_lea.vmem %s211_s22, 32 }
  0x7e   :  { %p9956_p11 = scmp.ne.s32.totalorder %s211_s22, %s9955_s1  ;;  %p9960_p12 = scmp.lt.s32.totalorder %s211_s22, %s211_s22 }
  0x7f   :  { %p9961_p13 = scmp.lt.s32.totalorder %s9959_s2, %s9955_s1 }
  0x81   :  { %p9962_p0 = por %p9961_p13, %p9960_p12 }
  0x83   :  { %p9963_p1 = pnand %p9962_p0, %p9956_p11 }
  0x85   :  { %9966 = shalt.err (!%p9963_p1)
}
  0x86   :  { %213 = dma.hbm_to_vmem [thread:$0]  %s10379_s8, 16, %s211_s22, [#allocation3]  }
  0x87   :  { %s10143_s7 = smov [#allocation7]   ;;  %s10144_s10 = smov [#allocation8]  }
  0x88   :  { %s234_s24 = sshll.u32 %s10143_s7, 4  ;;  %s246_s11 = sshll.u32 %s10144_s10, 4  ;;  %s235_s24 = int_to_ptr.vmem [resolvable:$true] %s234_s24  ;;  %s247_s11 = int_to_ptr.vmem [resolvable:$true] %s246_s11 }
  0x89   :  { %s9967_s15 = scalar_lea.hbm %s10399_s17, 16 }
  0x8a   :  { %p9968_p2 = scmp.ne.s32.totalorder %s10399_s17, %s9967_s15  ;;  %p9971_p3 = scmp.lt.u32.totalorder %s9967_s15, %s10399_s17 }
  0x8c   :  { %p9973_p4 = pnand %p9971_p3, %p9968_p2 }
  0x8e   :  { %9976 = shalt.err (!%p9973_p4)
}
  0x8f   :  { %s9977_s16 = scalar_lea.vmem %s235_s24, 16  ;;  %s9981_s18 = scalar_lea.vmem %s235_s24, 32 }
  0x90   :  { %p9978_p5 = scmp.ne.s32.totalorder %s235_s24, %s9977_s16  ;;  %p9982_p6 = scmp.lt.s32.totalorder %s235_s24, %s235_s24 }
  0x91   :  { %p9983_p7 = scmp.lt.s32.totalorder %s9981_s18, %s9977_s16 }
  0x93   :  { %p9984_p8 = por %p9983_p7, %p9982_p6 }
  0x95   :  { %p9985_p9 = pnand %p9984_p8, %p9978_p5 }
  0x97   :  { %9988 = shalt.err (!%p9985_p9)
}
  0x98   :  { %237 = dma.hbm_to_vmem [thread:$0]  %s10399_s17, 16, %s235_s24, [#allocation6]  }
  0x99   :  { %s9989_s8 = scalar_lea.hbm %s10409_s21, 16 }
  0x9a   :  { %p9990_p10 = scmp.ne.s32.totalorder %s10409_s21, %s9989_s8  ;;  %p9993_p11 = scmp.lt.u32.totalorder %s9989_s8, %s10409_s21 }
  0x9c   :  { %p9995_p12 = pnand %p9993_p11, %p9990_p10 }
  0x9e   :  { %9998 = shalt.err (!%p9995_p12)
}
  0x9f   :  { %s9999_s22 = scalar_lea.vmem %s247_s11, 16  ;;  %s10003_s23 = scalar_lea.vmem %s247_s11, 32 }
  0xa0   :  { %p10000_p13 = scmp.ne.s32.totalorder %s247_s11, %s9999_s22  ;;  %p10004_p0 = scmp.lt.s32.totalorder %s247_s11, %s247_s11 }
  0xa1   :  { %p10005_p1 = scmp.lt.s32.totalorder %s10003_s23, %s9999_s22 }
  0xa3   :  { %p10006_p2 = por %p10005_p1, %p10004_p0 }
  0xa5   :  { %p10007_p3 = pnand %p10006_p2, %p10000_p13 }
  0xa7   :  { %10010 = shalt.err (!%p10007_p3)
}
  0xa8   :  { %249 = dma.hbm_to_vmem [thread:$0]  %s10409_s21, 16, %s247_s11, [#allocation9]  }
  0xa9   :  { %10077 = dma.done.wait [#allocation3], 16  }
  0xaa   :  { %10078 = vsyncadd [#allocation3], 4294967280 }
  0xab   :  { %10079 = dma.done.wait [#allocation6], 32  }
  0xac   :  { %10080 = vsyncadd [#allocation6], 4294967264 }
  0xad   :  { %10081 = dma.done.wait [#allocation9], 16  }
  0xae   :  { %10082 = vsyncadd [#allocation9], 4294967280  ;;  %vm267_vm0 = vcmask 261120   ;;  %v263_v0 = vld [vmem:[%s10169_s5] sm:$0xff]  ;;  %v264_v1 = vld [vmem:[%s10169_s5 + $0x8] sm:$0xff]  ;;  %v10145_v15 = vmov 0.0  }
  0xaf   :  { %v268_v2 = vsel %vm267_vm0, %v263_v0, 0.0  ;;  %v271_v3 = vsel %vm267_vm0, %v264_v1, 0.0  ;;  %v9634_v14 = vld [vmem:[%s10204_s3] sm:$0xff]   ;;  %8760 = vmatprep.subr.bf16.mxu0 %v10145_v15  ;;  %8772 = vmatprep.subr.bf16.mxu1 %v10145_v15  ;;  %v312_v17 = vld [vmem:[%s10174_s9 + $0x8] sm:$0xff]  ;;  %vm10146_vm1 = vmmov 0   ;;  %vm329_vm2 = vcmask 130048  }
  0xb0   :  { %269 = vadd.xlane.f32.xlu0 %v268_v2  ;;  %8761 = vmatpush3.bf16.msra.mxu0 %v9634_v14  ;;  %v311_v16 = vld [vmem:[%s10174_s9] sm:$0xff]  ;;  %vm389_vm3 = vcmask 1041408   ;;  %vm390_vm4 = vcmask 1042432   ;;  %v10147_v20 = vmov 65535   ;;  %v9637_v25 = vld [vmem:[%s10234_s6 + $0x8] sm:$0xff]   ;;  %vm385_vm5 = vcmask 39936  }
  0xb1   :  { %v315_v18 = vpack.c.bf16 %v312_v17, %v311_v16  ;;  %8766 = vmatprep.subr.bf16.mxu0 %v10145_v15  ;;  %8762 = vmatprep.mubr.msk.bf16.mxu0 %vm10146_vm1, %v10145_v15  ;;  %v376_v19 = vld [vmem:[%s10214_s14] sm:$0x7]  ;;  %v391_v21 = vsel %vm389_vm3, 4294967295, %v10147_v20  ;;  %v375_v27 = vld [vmem:[%s10179_s13 + $0x8] sm:$0xff]  ;;  %s11876_s5 = sld [smem:[#allocation26_spill]]  ;;  %s11877_s9 = sld [smem:[#allocation25_spill]] }
  0xb2   :  { %8776 = vmatprep.mubr.msk.bf16.mxu1 %vm10146_vm1, %v10145_v15  ;;  %v9635_v22 = vld [vmem:[%s10234_s6] sm:$0xff]   ;;  %v392_v23 = vsel %vm390_vm4, %v391_v21, 0  ;;  %v9638_v30 = vld [vmem:[%s10254_s4 + $0x8] sm:$0xff]   ;;  %vm724_vm6 = vcmask 64512   ;;  %vm846_vm7 = vcmask 1043456   ;;  %s11879_s17 = sld [smem:[#allocation19_spill]] }
  0xb3   :  { %8763 = vmatmul.mubr.msk.bf16.vlgmr.msra.gmra.mrb[0].mxu0 %vm329_vm2, %v315_v18  ;;  %v394_v24 = vand.u32 %v392_v23, %v376_v19  ;;  %8773 = vmatpush3.bf16.msra.mxu1 %v9635_v22  ;;  %v374_v26 = vld [vmem:[%s10179_s13] sm:$0xff]  ;;  %v9640_v49 = vld [vmem:[%s10244_s20 + $0x8] sm:$0xff]   ;;  %s11878_s13 = sld [smem:[#allocation27_spill]]  ;;  %s10149_s21 = smov 120   ;;  %vm1986_vm8 = vcmask 523264   ;;  %vm6817_vm9 = vcmask 1040384  }
  0xb4   :  { %272 = vadd.xlane.f32.xlu0 %v271_v3  ;;  %8768 = vmatprep.mubr.msk.bf16.mxu0 %vm10146_vm1, %v10145_v15  ;;  %v377_v28 = vpack.c.bf16 %v375_v27, %v374_v26  ;;  %v9636_v29 = vld [vmem:[%s10254_s4] sm:$0xff]   ;;  %v691_v26 = vlaneseq  ;;  %s10151_s3 = smov 104   ;;  %s11881_s14 = sld [smem:[#allocation21_spill]]  ;;  %vm6962_vm10 = vcmask 254976   ;;  %vm7051_vm11 = vcmask 517120  }
  0xb5   :  { %8774 = vmatprep.subr.bf16.mxu1 %v10145_v15  ;;  %8767 = vmatpush3.bf16.msra.mxu0 %v394_v24  ;;  %v8062_v39 = vld [vmem:[%s10194_s25] ss:$0 sm:$0xff]  ;;  %v10148_v24 = vmov 1966171168   ;;  %s10150_s25 = smov 112   ;;  %s11882_s0 = sld [smem:[#allocation22_spill]] }
  0xb6   :  { %8788 = vmatprep.subr.bf16.mxu0 %v10145_v15  ;;  %v8063_v43 = vld [vmem:[%s10199_s29] ss:$0 sm:$0xff]  ;;  %s11880_s29 = sld [smem:[#allocation28_spill]]  ;;  %s11883_s26 = sld [smem:[#allocation29_spill]]  ;;  %vm7874_vm12 = vcmask 826368   ;;  %vm7720_vm13 = vcmask 516096  }
  0xb7   :  { %8775 = vmatpush3.bf16.msra.mxu1 %v9637_v25  ;;  %v9639_v47 = vld [vmem:[%s10244_s20] sm:$0xff]   ;;  %v689_v25 = vunpack.c.l.s4 %v10148_v24  ;;  %s11884_s28 = sld [smem:[#allocation32_spill]]  ;;  %s11885_s1 = sld [smem:[#allocation30_spill]] }
  0xb8   :  { %8780 = vmatprep.subr.bf16.mxu1 %v10145_v15  ;;  %v8075_v62 = vld [vmem:[%s11876_s5] ss:$0 sm:$0xff]  ;;  %s11886_s2 = sld [smem:[#allocation31_spill]]  ;;  %s11888_s24 = sld [smem:[#allocation24_spill]] }
  0xb9   :  { %v8071_v63 = vld [vmem:[%s11877_s9] ss:$0 sm:$0xff]  ;;  %s11887_s7 = sld [smem:[#allocation23_spill]]  ;;  %s11889_s10 = sld [smem:[#allocation34_spill]] }
  0xba   :  { %v8079_v3 = vld [vmem:[%s11878_s13] ss:$0 sm:$0xff]  ;;  %s11890_s11 = sld [smem:[#allocation33_spill]]  ;;  %s11891_s15 = sld [smem:[#allocation20_spill]] }
  0xbb   :  { %v483_v27 = vld [vmem:[%s11879_s17] sm:$0x3]  ;;  %s11892_s16 = sld [smem:[#allocation35_spill]]  ;;  %s11893_s18 = sld [smem:[#allocation36_spill]] }
  0xbc   :  { %s11894_s8 = sld [smem:[#allocation37_spill]]  ;;  %s11898_s22 = sld [smem:[#allocation41_spill]] }
  0xbd   :  { %s11899_s23 = sld [smem:[#allocation44_spill]]  ;;  %s11902_s17 = sld [smem:[#allocation46_spill]] }
  0xbf   :  { %8769 = vmatmul.mubr.msk.bf16.vlgmr.msra.gmra.mrb[0].mxu0 %vm385_vm5, %v377_v28  ;;  %v484_v28 = vsub.f32 1.0, %v483_v27 }
  0xc0   :  { %8789 = vmatpush3.bf16.msra.mxu0 %v9636_v29  ;;  %8792 = vmatprep.mubr.msk.bf16.mxu0 %vm10146_vm1, %v10145_v15  ;;  %v690_v29 = vunpack.c.0.s8 %v689_v25 }
  0xc1   :  { %8790 = vmatprep.subr.bf16.mxu0 %v10145_v15 }
  0xc4   :  { %8791 = vmatpush3.bf16.msra.mxu0 %v9638_v30  ;;  %v692_v30 = vshrl.u32 %v691_v26, 7 }
  0xc5   :  { %8802 = vmatprep.subr.bf16.mxu0 %v10145_v15 }
 0x13d   :  { %v270_v4 = vpop.xlane.xlu0 %269 }
 0x13e   :  { %v275_v5 = vmul.f32 0.03125, %v270_v4 }
 0x140   :  { %v277_v6 = vsub.f32 %v263_v0, %v275_v5 }
 0x141   :  { %v273_v7 = vpop.xlane.xlu0 %272 }
 0x142   :  { %v276_v8 = vmul.f32 0.03125, %v273_v7  ;;  %v279_v9 = vmul.f32 %v277_v6, %v277_v6 }
 0x144   :  { %v278_v10 = vsub.f32 %v264_v1, %v276_v8  ;;  %v281_v11 = vsel %vm267_vm0, %v279_v9, 0.0 }
 0x145   :  { %282 = vadd.xlane.f32.xlu1 %v281_v11 }
 0x146   :  { %v280_v12 = vmul.f32 %v278_v10, %v278_v10 }
 0x148   :  { %v284_v13 = vsel %vm267_vm0, %v280_v12, 0.0 }
 0x149   :  { %285 = vadd.xlane.f32.xlu1 %v284_v13 }
 0x192   :  { %v10510_v50 = vpop.f32.mrb[0].mxu0 }
 0x193   :  { %v8770_v51 = vpop.f32.mrb[1].mxu0 }
 0x194   :  { %v10512_v52 = vpop.f32.mrb[2].mxu0 }
 0x195   :  { %v8771_v53 = vpop.f32.mrb[3].mxu0 }
 0x1d2   :  { %v283_v31 = vpop.xlane.xlu1 %282 }
 0x1d3   :  { %v287_v32 = vmul.f32 0.03125, %v283_v31  ;;  %v485_v31 = vmul.f32 -10000.0, %v484_v28 }
 0x1d5   :  { %v289_v33 = vadd.f32 1e-12, %v287_v32  ;;  %v10550_v32 = vsub.s32 %v690_v29, %v692_v30 }
 0x1d6   :  { %v286_v34 = vpop.xlane.xlu1 %285 }
 0x1d7   :  { %9719 = vrsqrt.f32 %v289_v33  ;;  %v288_v35 = vmul.f32 0.03125, %v286_v34  ;;  %v694_v33 = vrot.slane %v485_v31, %v10550_v32 }
 0x1d9   :  { %v290_v36 = vadd.f32 1e-12, %v288_v35  ;;  %v695_v34 = vcombine.high %v694_v33, %v694_v33  ;;  %v702_v35 = vrot.slane %v694_v33, %v10550_v32 }
 0x1db   :  { %9721 = vrsqrt.f32 %v290_v36  ;;  %v10554_v36 = vsub.s32 0, %v692_v30 }
 0x1e1   :  { %v9720_v37 = vpop.eup %9719 }
 0x1e2   :  { %v293_v38 = vmul.f32 %v9720_v37, %v277_v6  ;;  %v709_v37 = vrot.slane %v695_v34, %v10550_v32 }
 0x1e4   :  { %v301_v42 = vmul.f32 %v8062_v39, %v293_v38  ;;  %v10558_v38 = vrot.slane %v702_v35, %v10554_v36 }
 0x1e5   :  { %v9722_v40 = vpop.eup %9721 }
 0x1e6   :  { %v294_v41 = vmul.f32 %v9722_v40, %v278_v10  ;;  %v10491_v45 = vadd.f32 %v8063_v43, %v301_v42 }
 0x1e8   :  { %v302_v44 = vmul.f32 %v8062_v39, %v294_v41  ;;  %v10561_v39 = vrot.slane %v709_v37, %v10554_v36 }
 0x1ea   :  { %v10493_v46 = vadd.f32 %v8063_v43, %v302_v44 }
 0x1ec   :  { %v493_v48 = vpack.c.bf16 %v10493_v46, %v10491_v45 }
 0x1ee   :  { %8777 = vmatmul.mubr.msk.bf16.vlgmr.msra.gmra.mrb[0].mxu1 %vm267_vm0, %v493_v48  ;;  %8793 = vmatmul.mubr.msk.bf16.vlgmr.msra.gmra.mrb[4].mxu0 %vm267_vm0, %v493_v48 }
 0x1ef   :  { %8781 = vmatpush3.bf16.msra.mxu1 %v9639_v47  ;;  %8784 = vmatprep.mubr.msk.bf16.mxu1 %vm10146_vm1, %v10145_v15 }
 0x1f0   :  { %8782 = vmatprep.subr.bf16.mxu1 %v10145_v15  ;;  %8804 = vmatprep.mubr.msk.bf16.mxu0 %vm10146_vm1, %v10145_v15 }
 0x1f3   :  { %8783 = vmatpush3.bf16.msra.mxu1 %v9640_v49 }
 0x1f4   :  { %8796 = vmatprep.subr.bf16.mxu1 %v10145_v15 }
 0x1f6   :  { %8785 = vmatmul.mubr.msk.bf16.vlgmr.msra.gmra.mrb[4].mxu1 %vm267_vm0, %v493_v48 }
 0x1f7   :  { %8798 = vmatprep.mubr.msk.bf16.mxu1 %vm10146_vm1, %v10145_v15 }
 0x2c1   :  { %v550_v54 = vpop.f32.mrb[0].mxu1  ;;  %v678_v55 = vpop.f32.mrb[4].mxu0 }
 0x2c2   :  { %v8778_v56 = vpop.f32.mrb[1].mxu1  ;;  %v8794_v57 = vpop.f32.mrb[5].mxu0  ;;  %v551_v5 = vadd.f32 %v8071_v63, %v550_v54  ;;  %v679_v9 = vadd.f32 %v8079_v3, %v678_v55 }
 0x2c3   :  { %v553_v58 = vpop.f32.mrb[2].mxu1  ;;  %v681_v59 = vpop.f32.mrb[6].mxu0 }
 0x2c4   :  { %v8779_v60 = vpop.f32.mrb[3].mxu1  ;;  %v8795_v61 = vpop.f32.mrb[7].mxu0  ;;  %v554_v10 = vadd.f32 %v8071_v63, %v553_v58  ;;  %v685_v13 = vmul.f32 0.35355338, %v551_v5  ;;  %v682_v14 = vadd.f32 %v8079_v3, %v681_v59  ;;  %v10526_v17 = vpack.c.bf16 %v679_v9, %v679_v9 }
 0x2c6   :  { %v686_v18 = vmul.f32 0.35355338, %v554_v10  ;;  %v10529_v19 = vpack.c.bf16 %v685_v13, %v685_v13  ;;  %v10531_v20 = vpack.c.bf16 %v682_v14, %v682_v14  ;;  %v848_v22 = vsel %vm846_vm7, %v10526_v17, 0 }
 0x2c8   :  { %v10533_v21 = vpack.c.bf16 %v686_v18, %v686_v18  ;;  %v894_v23 = vsel %vm846_vm7, %v10531_v20, 0 }
 0x2c9   :  { %v614_v0 = vpop.f32.mrb[4].mxu1 }
 0x2ca   :  { %v615_v1 = vadd.f32 %v8075_v62, %v614_v0  ;;  %v8786_v2 = vpop.f32.mrb[5].mxu1 }
 0x2cb   :  { %v617_v4 = vpop.f32.mrb[6].mxu1 }
 0x2cc   :  { %v10517_v6 = vpack.c.bf16 %v615_v1, %v615_v1  ;;  %v618_v7 = vadd.f32 %v8075_v62, %v617_v4  ;;  %v8787_v8 = vpop.f32.mrb[7].mxu1 }
 0x2ce   :  { %v10519_v11 = vpack.c.bf16 %v618_v7, %v618_v7  ;;  %v729_v12 = vsel %vm724_vm6, %v10517_v6, 0 }
 0x2cf   :  { %8797 = vmatpush3.bf16.xpose.msra.mxu1 %v729_v12 }
 0x2d0   :  { %v775_v16 = vsel %vm724_vm6, %v10519_v11, 0  ;;  %8808 = vmatprep.subr.bf16.mxu1 %v10145_v15 }
 0x2d1   :  { %8803 = vmatpush3.bf16.xpose.msra.mxu0 %v775_v16 }
 0x2d2   :  { %8814 = vmatprep.subr.bf16.mxu0 %v10145_v15 }
 0x2d6   :  { %8799 = vmatmul.mubr.msk.bf16.vlgmr.msra.gmra.mrb[8].mxu1 %vm724_vm6, %v10529_v19 }
 0x2d7   :  { %8809 = vmatpush3.bf16.msra.mxu1 %v848_v22  ;;  %8810 = vmatprep.mubr.msk.bf16.mxu1 %vm10146_vm1, %v10145_v15 }
 0x2d8   :  { %8805 = vmatmul.mubr.msk.bf16.vlgmr.msra.gmra.mrb[8].mxu0 %vm724_vm6, %v10533_v21  ;;  %8820 = vmatprep.subr.bf16.mxu1 %v10145_v15 }
 0x2d9   :  { %8815 = vmatpush3.bf16.msra.mxu0 %v894_v23  ;;  %8816 = vmatprep.mubr.msk.bf16.mxu0 %vm10146_vm1, %v10145_v15 }
 0x2da   :  { %8826 = vmatprep.subr.bf16.mxu0 %v10145_v15 }
 0x3a9   :  { %v765_v40 = vpop.f32.mrb[8].mxu1 }
 0x3aa   :  { %v766_v41 = vadd.f32 %v765_v40, %v10558_v38  ;;  %v8800_v42 = vpop.f32.mrb[9].mxu1 }
 0x3ab   :  { %v768_v43 = vpop.f32.mrb[10].mxu1  ;;  %v811_v44 = vpop.f32.mrb[8].mxu0 }
 0x3ac   :  { %v812_v47 = vadd.f32 %v811_v44, %v10561_v39  ;;  %v8801_v48 = vpop.f32.mrb[11].mxu1  ;;  %v8806_v49 = vpop.f32.mrb[9].mxu0  ;;  %v817_v51 = vsel %vm724_vm6, %v766_v41, -inf }
 0x3ad   :  { %v814_v53 = vpop.f32.mrb[10].mxu0  ;;  %818 = vmax.xlane.f32.xlu0 %v817_v51 }
 0x3ae   :  { %v8807_v54 = vpop.f32.mrb[11].mxu0  ;;  %v820_v55 = vsel %vm724_vm6, %v812_v47, -inf }
 0x3af   :  { %821 = vmax.xlane.f32.xlu1 %v820_v55 }
 0x3c0   :  { %994 = vrot.lane.b32.xlu1 %v10519_v11, %s10149_s21 }
 0x43a   :  { %v819_v56 = vpop.xlane.xlu0 %818 }
 0x43b   :  { %v823_v57 = vsub.f32 %v766_v41, %v819_v56 }
 0x43c   :  { %v822_v58 = vpop.xlane.xlu1 %821 }
 0x43d   :  { %v825_v59 = vmul.f32 1.442695, %v823_v57  ;;  %v824_v60 = vsub.f32 %v812_v47, %v822_v58 }
 0x43f   :  { %9723 = vpow2.f32 %v825_v59  ;;  %v827_v61 = vmul.f32 1.442695, %v824_v60 }
 0x440   :  { %v995_v2 = vpop.permute.xlu1 %994 }
 0x441   :  { %9725 = vpow2.f32 %v827_v61  ;;  %v1000_v16 = vsel %vm724_vm6, %v995_v2, 0 }
 0x449   :  { %v9724_v62 = vpop.eup %9723 }
 0x44a   :  { %v829_v63 = vsel %vm724_vm6, %v9724_v62, 0.0 }
 0x44b   :  { %v9726_v0 = vpop.eup %9725  ;;  %830 = vadd.xlane.f32.xlu0 %v829_v63 }
 0x44c   :  { %v832_v1 = vsel %vm724_vm6, %v9726_v0, 0.0 }
 0x44d   :  { %833 = vadd.xlane.f32.xlu1 %v832_v1 }
 0x45e   :  { %939 = vrot.lane.b32.xlu1 %v10529_v19, %s10149_s21 }
 0x461   :  { %942 = vrot.lane.b32.xlu0 %v10517_v6, %s10149_s21 }
 0x462   :  { %991 = vrot.lane.b32.xlu1 %v10533_v21, %s10149_s21 }
 0x4d8   :  { %v831_v3 = vpop.xlane.xlu0 %830 }
 0x4d9   :  { %9727 = vrcp.f32 %v831_v3 }
 0x4da   :  { %v834_v4 = vpop.xlane.xlu1 %833 }
 0x4db   :  { %9729 = vrcp.f32 %v834_v4 }
 0x4dc   :  { %v943_v9 = vpop.permute.xlu0 %942 }
 0x4dd   :  { %v948_v13 = vsel %vm724_vm6, %v943_v9, 0 }
 0x4de   :  { %v940_v18 = vpop.permute.xlu1 %939 }
 0x4e2   :  { %v992_v22 = vpop.permute.xlu1 %991 }
 0x4e3   :  { %v9728_v5 = vpop.eup %9727 }
 0x4e4   :  { %v837_v7 = vmul.f32 %v9728_v5, %v9724_v62  ;;  %v8091_v5 = vld [vmem:[%s11880_s29 + $0x4] sm:$0xf] }
 0x4e5   :  { %v9730_v8 = vpop.eup %9729  ;;  %v1171_v9 = vsel %vm846_vm7, %v8091_v5, 0 }
 0x4e6   :  { %v839_v10 = vpack.c.bf16 %v837_v7, %v837_v7  ;;  %v838_v12 = vmul.f32 %v9730_v8, %v9726_v0 }
 0x4e8   :  { %8811 = vmatmul.mubr.msk.bf16.vlgmr.msra.gmra.mrb[12].mxu1 %vm724_vm6, %v839_v10  ;;  %v840_v14 = vpack.c.bf16 %v838_v12, %v838_v12  ;;  %v937_v12 = vld [vmem:[%s11880_s29] sm:$0xf] }
 0x4e9   :  { %8821 = vmatpush3.bf16.xpose.msra.mxu1 %v948_v13  ;;  %8822 = vmatprep.mubr.msk.bf16.mxu1 %vm10146_vm1, %v10145_v15 }
 0x4ea   :  { %8817 = vmatmul.mubr.msk.bf16.vlgmr.msra.gmra.mrb[12].mxu0 %vm724_vm6, %v840_v14  ;;  %8832 = vmatprep.subr.bf16.mxu1 %v10145_v15 }
 0x4eb   :  { %8827 = vmatpush3.bf16.xpose.msra.mxu0 %v1000_v16  ;;  %8828 = vmatprep.mubr.msk.bf16.mxu0 %vm10146_vm1, %v10145_v15  ;;  %v1218_v16 = vsel %vm846_vm7, %v937_v12, 0 }
 0x4ec   :  { %8838 = vmatprep.subr.bf16.mxu0 %v10145_v15 }
 0x4f0   :  { %8823 = vmatmul.mubr.msk.bf16.vlgmr.msra.gmra.mrb[16].mxu1 %vm724_vm6, %v940_v18 }
 0x4f1   :  { %8834 = vmatprep.mubr.msk.bf16.mxu1 %vm10146_vm1, %v10145_v15 }
 0x4f2   :  { %8829 = vmatmul.mubr.msk.bf16.vlgmr.msra.gmra.mrb[16].mxu0 %vm724_vm6, %v992_v22 }
 0x4f3   :  { %8840 = vmatprep.mubr.msk.bf16.mxu0 %vm10146_vm1, %v10145_v15 }
 0x5bb   :  { %v10593_v23 = vpop.f32.mrb[12].mxu1 }
 0x5bc   :  { %v8812_v24 = vpop.f32.mrb[13].mxu1 }
 0x5bd   :  { %v887_v25 = vpop.f32.mrb[14].mxu1  ;;  %v10595_v26 = vpop.f32.mrb[12].mxu0 }
 0x5be   :  { %v936_v27 = vpack.c.bf16 %v10595_v26, %v10593_v23  ;;  %v8813_v28 = vpop.f32.mrb[15].mxu1  ;;  %v8818_v29 = vpop.f32.mrb[13].mxu0 }
 0x5bf   :  { %v933_v30 = vpop.f32.mrb[14].mxu0 }
 0x5c0   :  { %v8819_v31 = vpop.f32.mrb[15].mxu0 }
 0x5c3   :  { %v984_v33 = vpop.f32.mrb[16].mxu1 }
 0x5c4   :  { %v985_v34 = vadd.f32 %v984_v33, %v10558_v38  ;;  %v8824_v35 = vpop.f32.mrb[17].mxu1 }
 0x5c5   :  { %v987_v37 = vpop.f32.mrb[18].mxu1  ;;  %v1036_v40 = vpop.f32.mrb[16].mxu0 }
 0x5c6   :  { %v1037_v41 = vadd.f32 %v1036_v40, %v10561_v39  ;;  %v8825_v42 = vpop.f32.mrb[19].mxu1  ;;  %v8830_v43 = vpop.f32.mrb[17].mxu0  ;;  %v1042_v44 = vsel %vm724_vm6, %v985_v34, -inf }
 0x5c7   :  { %v1039_v47 = vpop.f32.mrb[18].mxu0  ;;  %1043 = vmax.xlane.f32.xlu0 %v1042_v44 }
 0x5c8   :  { %v8831_v48 = vpop.f32.mrb[19].mxu0  ;;  %v1045_v49 = vsel %vm724_vm6, %v1037_v41, -inf }
 0x5c9   :  { %1046 = vmax.xlane.f32.xlu1 %v1045_v49 }
 0x5da   :  { %1116 = vrot.lane.b32.xlu1 %v10531_v20, %s10149_s21 }
 0x5de   :  { %1263 = vrot.lane.b32.xlu1 %v10517_v6, %s10150_s25 }
 0x5e2   :  { %1313 = vrot.lane.b32.xlu1 %v10519_v11, %s10150_s25 }
 0x5e6   :  { %1311 = vrot.lane.b32.xlu1 %v10533_v21, %s10150_s25 }
 0x654   :  { %v1044_v51 = vpop.xlane.xlu0 %1043 }
 0x655   :  { %v1048_v53 = vsub.f32 %v985_v34, %v1044_v51 }
 0x656   :  { %v1047_v54 = vpop.xlane.xlu1 %1046 }
 0x657   :  { %v1050_v55 = vmul.f32 1.442695, %v1048_v53  ;;  %v1049_v56 = vsub.f32 %v1037_v41, %v1047_v54 }
 0x659   :  { %9731 = vpow2.f32 %v1050_v55  ;;  %v1052_v57 = vmul.f32 1.442695, %v1049_v56 }
 0x65a   :  { %v1117_v58 = vpop.permute.xlu1 %1116 }
 0x65b   :  { %9733 = vpow2.f32 %v1052_v57  ;;  %v1122_v59 = vsel %vm846_vm7, %v1117_v58, 0 }
 0x65c   :  { %8839 = vmatpush3.bf16.msra.mxu0 %v1122_v59 }
 0x65d   :  { %8850 = vmatprep.subr.bf16.mxu0 %v10145_v15 }
 0x65e   :  { %v1264_v18 = vpop.permute.xlu1 %1263 }
 0x65f   :  { %v1269_v34 = vsel %vm724_vm6, %v1264_v18, 0 }
 0x662   :  { %v1314_v22 = vpop.permute.xlu1 %1313 }
 0x663   :  { %v9732_v60 = vpop.eup %9731  ;;  %v1319_v24 = vsel %vm724_vm6, %v1314_v22, 0 }
 0x664   :  { %v1054_v61 = vsel %vm724_vm6, %v9732_v60, 0.0 }
 0x665   :  { %v9734_v62 = vpop.eup %9733  ;;  %1055 = vadd.xlane.f32.xlu0 %v1054_v61 }
 0x666   :  { %v1057_v63 = vsel %vm724_vm6, %v9734_v62, 0.0  ;;  %v1312_v25 = vpop.permute.xlu1 %1311 }
 0x669   :  { %1058 = vadd.xlane.f32.xlu0 %v1057_v63 }
 0x67f   :  { %1067 = vrot.lane.b32.xlu0 %v10526_v17, %s10149_s21 }
 0x683   :  { %1261 = vrot.lane.b32.xlu0 %v10529_v19, %s10150_s25 }
 0x6f2   :  { %v1056_v0 = vpop.xlane.xlu0 %1055 }
 0x6f3   :  { %9735 = vrcp.f32 %v1056_v0 }
 0x6f6   :  { %v1059_v1 = vpop.xlane.xlu0 %1058 }
 0x6f7   :  { %9737 = vrcp.f32 %v1059_v1 }
 0x6fa   :  { %v1068_v2 = vpop.permute.xlu0 %1067 }
 0x6fb   :  { %v1073_v3 = vsel %vm846_vm7, %v1068_v2, 0 }
 0x6fc   :  { %8833 = vmatpush3.bf16.msra.mxu1 %v1073_v3 }
 0x6fd   :  { %v9736_v4 = vpop.eup %9735  ;;  %8844 = vmatprep.subr.bf16.mxu1 %v10145_v15 }
 0x6fe   :  { %v1062_v7 = vmul.f32 %v9736_v4, %v9732_v60  ;;  %v1262_v41 = vpop.permute.xlu0 %1261 }
 0x700   :  { %v1064_v8 = vpack.c.bf16 %v1062_v7, %v1062_v7 }
 0x701   :  { %v9738_v10 = vpop.eup %9737 }
 0x702   :  { %8835 = vmatmul.mubr.msk.bf16.vlgmr.msra.gmra.mrb[20].mxu1 %vm724_vm6, %v1064_v8  ;;  %v1063_v13 = vmul.f32 %v9738_v10, %v9734_v62 }
 0x703   :  { %8845 = vmatpush3.bf16.msra.mxu1 %v1171_v9  ;;  %8846 = vmatprep.mubr.msk.bf16.mxu1 %vm10146_vm1, %v10145_v15 }
 0x704   :  { %v1065_v14 = vpack.c.bf16 %v1063_v13, %v1063_v13  ;;  %8856 = vmatprep.subr.bf16.mxu1 %v10145_v15 }
 0x706   :  { %8841 = vmatmul.mubr.msk.bf16.vlgmr.msra.gmra.mrb[20].mxu0 %vm724_vm6, %v1065_v14 }
 0x707   :  { %8851 = vmatpush3.bf16.msra.mxu0 %v1218_v16  ;;  %8852 = vmatprep.mubr.msk.bf16.mxu0 %vm10146_vm1, %v10145_v15 }
 0x708   :  { %8862 = vmatprep.subr.bf16.mxu0 %v10145_v15 }
 0x70e   :  { %8853 = vmatmul.mubr.msk.bf16.vlgmr.msra.gmra.mrb[24].mxu0 %vm724_vm6, %v936_v27 }
 0x70f   :  { %8864 = vmatprep.mubr.msk.bf16.mxu0 %vm10146_vm1, %v10145_v15 }
 0x710   :  { %8863 = vmatpush3.bf16.xpose.msra.mxu0 %v1319_v24 }
 0x711   :  { %8874 = vmatprep.subr.bf16.mxu0 %v10145_v15 }
 0x717   :  { %8865 = vmatmul.mubr.msk.bf16.vlgmr.msra.gmra.mrb[28].mxu0 %vm724_vm6, %v1312_v25 }
 0x718   :  { %8876 = vmatprep.mubr.msk.bf16.mxu0 %vm10146_vm1, %v10145_v15 }
 0x7d5   :  { %v1109_v28 = vpop.f32.mrb[20].mxu1 }
 0x7d6   :  { %v8836_v29 = vpop.f32.mrb[21].mxu1 }
 0x7d7   :  { %v1112_v30 = vpop.f32.mrb[22].mxu1 }
 0x7d8   :  { %v8837_v23 = vpop.f32.mrb[23].mxu1 }
 0x7d9   :  { %v1158_v26 = vpop.f32.mrb[20].mxu0 }
 0x7da   :  { %v1164_v27 = vpack.c.bf16 %v1158_v26, %v1109_v28  ;;  %v8842_v31 = vpop.f32.mrb[21].mxu0 }
 0x7db   :  { %v1161_v33 = vpop.f32.mrb[22].mxu0 }
 0x7dc   :  { %v8843_v35 = vpop.f32.mrb[23].mxu0  ;;  %8847 = vmatmul.mubr.msk.bf16.vlgmr.msra.gmra.mrb[24].mxu1 %vm724_vm6, %v1164_v27 }
 0x7dd   :  { %8857 = vmatpush3.bf16.xpose.msra.mxu1 %v1269_v34  ;;  %8858 = vmatprep.mubr.msk.bf16.mxu1 %vm10146_vm1, %v10145_v15  ;;  %v8098_v35 = vld [vmem:[%s11880_s29 + $0x8] sm:$0xf] }
 0x7de   :  { %8868 = vmatprep.subr.bf16.mxu1 %v10145_v15 }
 0x7e1   :  { %v1254_v37 = vpop.f32.mrb[24].mxu0 }
 0x7e2   :  { %v8854_v40 = vpop.f32.mrb[25].mxu0 }
 0x7e3   :  { %v1257_v42 = vpop.f32.mrb[26].mxu0 }
 0x7e4   :  { %v8855_v43 = vpop.f32.mrb[27].mxu0  ;;  %8859 = vmatmul.mubr.msk.bf16.vlgmr.msra.gmra.mrb[28].mxu1 %vm724_vm6, %v1262_v41 }
 0x7e5   :  { %8870 = vmatprep.mubr.msk.bf16.mxu1 %vm10146_vm1, %v10145_v15 }
 0x7ea   :  { %v1355_v44 = vpop.f32.mrb[28].mxu0 }
 0x7eb   :  { %v1356_v47 = vadd.f32 %v1355_v44, %v10561_v39  ;;  %v8866_v48 = vpop.f32.mrb[29].mxu0 }
 0x7ec   :  { %v1358_v49 = vpop.f32.mrb[30].mxu0 }
 0x7ed   :  { %v8867_v51 = vpop.f32.mrb[31].mxu0  ;;  %v1364_v53 = vsel %vm724_vm6, %v1356_v47, -inf }
 0x7ee   :  { %1365 = vmax.xlane.f32.xlu1 %v1364_v53 }
 0x7ff   :  { %1433 = vrot.lane.b32.xlu1 %v10531_v20, %s10150_s25 }
 0x803   :  { %1535 = vrot.lane.b32.xlu1 %v10517_v6, %s10151_s3 }
 0x807   :  { %1585 = vrot.lane.b32.xlu1 %v10519_v11, %s10151_s3 }
 0x80b   :  { %1583 = vrot.lane.b32.xlu1 %v10533_v21, %s10151_s3 }
 0x87b   :  { %v1366_v54 = vpop.xlane.xlu1 %1365 }
 0x87c   :  { %v1368_v57 = vsub.f32 %v1356_v47, %v1366_v54 }
 0x87e   :  { %v1371_v58 = vmul.f32 1.442695, %v1368_v57 }
 0x87f   :  { %v1434_v55 = vpop.permute.xlu1 %1433 }
 0x880   :  { %v1439_v56 = vsel %vm846_vm7, %v1434_v55, 0  ;;  %9739 = vpow2.f32 %v1371_v58 }
 0x881   :  { %8875 = vmatpush3.bf16.msra.mxu0 %v1439_v56 }
 0x882   :  { %8886 = vmatprep.subr.bf16.mxu0 %v10145_v15 }
 0x883   :  { %v1536_v18 = vpop.permute.xlu1 %1535 }
 0x884   :  { %v1541_v24 = vsel %vm724_vm6, %v1536_v18, 0 }
 0x887   :  { %v1586_v48 = vpop.permute.xlu1 %1585 }
 0x888   :  { %v1591_v55 = vsel %vm724_vm6, %v1586_v48, 0 }
 0x88a   :  { %v9740_v4 = vpop.eup %9739 }
 0x88b   :  { %v1376_v5 = vsel %vm724_vm6, %v9740_v4, 0.0  ;;  %v1584_v57 = vpop.permute.xlu1 %1583 }
 0x8af   :  { %v1207_v59 = vpop.f32.mrb[24].mxu1 }
 0x8b0   :  { %v10664_v60 = vadd.f32 %v1254_v37, %v1207_v59  ;;  %v8848_v61 = vpop.f32.mrb[25].mxu1  ;;  %v1488_v37 = vsel %vm846_vm7, %v8098_v35, 0 }
 0x8b1   :  { %v1210_v6 = vpop.f32.mrb[26].mxu1 }
 0x8b2   :  { %v10666_v62 = vadd.f32 %v1257_v42, %v1210_v6  ;;  %v8849_v11 = vpop.f32.mrb[27].mxu1 }
 0x8b7   :  { %v1305_v63 = vpop.f32.mrb[28].mxu1 }
 0x8b8   :  { %v1306_v21 = vadd.f32 %v1305_v63, %v10558_v38  ;;  %v8860_v0 = vpop.f32.mrb[29].mxu1 }
 0x8b9   :  { %v1308_v1 = vpop.f32.mrb[30].mxu1 }
 0x8ba   :  { %v8861_v2 = vpop.f32.mrb[31].mxu1  ;;  %v1361_v3 = vsel %vm724_vm6, %v1306_v21, -inf }
 0x8bb   :  { %1362 = vmax.xlane.f32.xlu0 %v1361_v3 }
 0x8bf   :  { %1377 = vadd.xlane.f32.xlu0 %v1376_v5 }
 0x948   :  { %v1363_v7 = vpop.xlane.xlu0 %1362 }
 0x949   :  { %v1367_v8 = vsub.f32 %v1306_v21, %v1363_v7 }
 0x94b   :  { %v1369_v9 = vmul.f32 1.442695, %v1367_v8 }
 0x94c   :  { %v1378_v10 = vpop.xlane.xlu0 %1377 }
 0x94d   :  { %9741 = vpow2.f32 %v1369_v9 }
 0x94e   :  { %9743 = vrcp.f32 %v1378_v10 }
 0x957   :  { %v9742_v12 = vpop.eup %9741 }
 0x958   :  { %v9744_v13 = vpop.eup %9743  ;;  %v1373_v14 = vsel %vm724_vm6, %v9742_v12, 0.0 }
 0x959   :  { %1374 = vadd.xlane.f32.xlu0 %v1373_v14  ;;  %v1382_v16 = vmul.f32 %v9744_v13, %v9740_v4 }
 0x95b   :  { %v1384_v22 = vpack.c.bf16 %v1382_v16, %v1382_v16 }
 0x95d   :  { %8877 = vmatmul.mubr.msk.bf16.vlgmr.msra.gmra.mrb[32].mxu0 %vm724_vm6, %v1384_v22 }
 0x95e   :  { %8887 = vmatpush3.bf16.xpose.msra.mxu0 %v1541_v24  ;;  %8888 = vmatprep.mubr.msk.bf16.mxu0 %vm10146_vm1, %v10145_v15 }
 0x95f   :  { %8898 = vmatprep.subr.bf16.mxu0 %v10145_v15 }
 0x96f   :  { %1385 = vrot.lane.b32.xlu0 %v10526_v17, %s10150_s25 }
 0x973   :  { %1533 = vrot.lane.b32.xlu0 %v10529_v19, %s10151_s3 }
 0x9e6   :  { %v1375_v25 = vpop.xlane.xlu0 %1374 }
 0x9e7   :  { %9745 = vrcp.f32 %v1375_v25 }
 0x9ea   :  { %v1386_v28 = vpop.permute.xlu0 %1385 }
 0x9eb   :  { %v1391_v29 = vsel %vm846_vm7, %v1386_v28, 0 }
 0x9ec   :  { %8869 = vmatpush3.bf16.msra.mxu1 %v1391_v29 }
 0x9ed   :  { %8880 = vmatprep.subr.bf16.mxu1 %v10145_v15 }
 0x9ee   :  { %v1534_v30 = vpop.permute.xlu0 %1533 }
 0x9ef   :  { %8889 = vmatmul.mubr.msk.bf16.vlgmr.msra.gmra.mrb[36].mxu0 %vm724_vm6, %v1534_v30 }
 0x9f0   :  { %8900 = vmatprep.mubr.msk.bf16.mxu0 %vm10146_vm1, %v10145_v15 }
 0x9f1   :  { %v9746_v23 = vpop.eup %9745 }
 0x9f2   :  { %v1381_v26 = vmul.f32 %v9746_v23, %v9742_v12 }
 0x9f4   :  { %v1383_v27 = vpack.c.bf16 %v1381_v26, %v1381_v26 }
 0x9f6   :  { %8871 = vmatmul.mubr.msk.bf16.vlgmr.msra.gmra.mrb[32].mxu1 %vm724_vm6, %v1383_v27  ;;  %v8104_v27 = vld [vmem:[%s11880_s29 + $0xc] sm:$0xf] }
 0x9f7   :  { %8882 = vmatprep.mubr.msk.bf16.mxu1 %vm10146_vm1, %v10145_v15  ;;  %8881 = vmatpush3.bf16.msra.mxu1 %v1488_v37 }
 0x9f8   :  { %8892 = vmatprep.subr.bf16.mxu1 %v10145_v15 }
 0xa30   :  { %v1475_v19 = vpop.f32.mrb[32].mxu0 }
 0xa31   :  { %v8878_v31 = vpop.f32.mrb[33].mxu0 }
 0xa32   :  { %v1478_v33 = vpop.f32.mrb[34].mxu0 }
 0xa33   :  { %v8879_v34 = vpop.f32.mrb[35].mxu0 }
 0xac2   :  { %v1577_v40 = vpop.f32.mrb[36].mxu0 }
 0xac3   :  { %v1578_v41 = vadd.f32 %v1577_v40, %v10558_v38  ;;  %v8890_v42 = vpop.f32.mrb[37].mxu0 }
 0xac4   :  { %v1580_v43 = vpop.f32.mrb[38].mxu0 }
 0xac5   :  { %v8891_v44 = vpop.f32.mrb[39].mxu0  ;;  %v1633_v47 = vsel %vm724_vm6, %v1578_v41, -inf }
 0xac6   :  { %1634 = vmax.xlane.f32.xlu0 %v1633_v47  ;;  %v8064_v44 = vld [vmem:[%s11881_s14] ss:$0 sm:$0xff]  ;;  %s10153_s14 = smov 9  }
 0xac7   :  { %v8067_v47 = vld [vmem:[%s11882_s0] ss:$0 sm:$0xff]  ;;  %s11908_s0 = sld [smem:[#allocation51_spill]] }
 0xac9   :  { %v1427_v49 = vpop.f32.mrb[32].mxu1 }
 0xaca   :  { %v1481_v51 = vpack.c.bf16 %v1475_v19, %v1427_v49  ;;  %v8872_v53 = vpop.f32.mrb[33].mxu1  ;;  %v1760_v19 = vsel %vm846_vm7, %v8104_v27, 0  ;;  %v8106_v49 = vld [vmem:[%s11883_s26] ss:$0 sm:$0xff] }
 0xacb   :  { %v1430_v54 = vpop.f32.mrb[34].mxu1 }
 0xacc   :  { %v8873_v56 = vpop.f32.mrb[35].mxu1  ;;  %8883 = vmatmul.mubr.msk.bf16.vlgmr.msra.gmra.mrb[36].mxu1 %vm724_vm6, %v1481_v51 }
 0xacd   :  { %8893 = vmatpush3.bf16.xpose.msra.mxu1 %v1591_v55  ;;  %8894 = vmatprep.mubr.msk.bf16.mxu1 %vm10146_vm1, %v10145_v15  ;;  %v9552_v55 = vadd.f32 %v8067_v47, %v8064_v44  ;;  %v8108_v47 = vld [vmem:[%s11886_s2] ss:$0 sm:$0xff] }
 0xace   :  { %8904 = vmatprep.subr.bf16.mxu1 %v10145_v15 }
 0xad4   :  { %8895 = vmatmul.mubr.msk.bf16.vlgmr.msra.gmra.mrb[40].mxu1 %vm724_vm6, %v1584_v57 }
 0xad5   :  { %8906 = vmatprep.mubr.msk.bf16.mxu1 %vm10146_vm1, %v10145_v15 }
 0xb53   :  { %v1635_v58 = vpop.xlane.xlu0 %1634 }
 0xb54   :  { %v1639_v59 = vsub.f32 %v1578_v41, %v1635_v58 }
 0xb56   :  { %v1641_v61 = vmul.f32 1.442695, %v1639_v59 }
 0xb58   :  { %9747 = vpow2.f32 %v1641_v61 }
 0xb62   :  { %v9748_v6 = vpop.eup %9747 }
 0xb63   :  { %v1645_v11 = vsel %vm724_vm6, %v9748_v6, 0.0 }
 0xb64   :  { %1646 = vadd.xlane.f32.xlu0 %v1645_v11 }
 0xb9f   :  { %v1524_v63 = vpop.f32.mrb[36].mxu1 }
 0xba0   :  { %v1531_v21 = vadd.f32 %v1524_v63, %v10664_v60  ;;  %v8884_v0 = vpop.f32.mrb[37].mxu1 }
 0xba1   :  { %v1527_v1 = vpop.f32.mrb[38].mxu1  ;;  %v9553_v0 = vadd.f32 %v9552_v55, %v10510_v50 }
 0xba2   :  { %v10705_v2 = vadd.f32 %v1527_v1, %v10666_v62  ;;  %v8885_v3 = vpop.f32.mrb[39].mxu1 }
 0xba7   :  { %v1627_v4 = vpop.f32.mrb[40].mxu1 }
 0xba8   :  { %v1628_v5 = vadd.f32 %v1627_v4, %v10561_v39  ;;  %v8896_v7 = vpop.f32.mrb[41].mxu1 }
 0xba9   :  { %v1630_v8 = vpop.f32.mrb[42].mxu1 }
 0xbaa   :  { %v8897_v9 = vpop.f32.mrb[43].mxu1  ;;  %v1636_v10 = vsel %vm724_vm6, %v1628_v5, -inf }
 0xbab   :  { %1637 = vmax.xlane.f32.xlu1 %v1636_v10 }
 0xbbc   :  { %1705 = vrot.lane.b32.xlu1 %v10531_v20, %s10151_s3 }
 0xbf1   :  { %v1647_v22 = vpop.xlane.xlu0 %1646 }
 0xc38   :  { %v1638_v12 = vpop.xlane.xlu1 %1637 }
 0xc39   :  { %v1640_v60 = vsub.f32 %v1628_v5, %v1638_v12 }
 0xc3b   :  { %v1643_v13 = vmul.f32 1.442695, %v1640_v60 }
 0xc3c   :  { %v1706_v14 = vpop.permute.xlu1 %1705 }
 0xc3d   :  { %9749 = vpow2.f32 %v1643_v13  ;;  %v1711_v62 = vsel %vm846_vm7, %v1706_v14, 0 }
 0xc3e   :  { %8905 = vmatpush3.bf16.msra.mxu1 %v1711_v62  ;;  %9751 = vrcp.f32 %v1647_v22 }
 0xc3f   :  { %8916 = vmatprep.subr.bf16.mxu1 %v10145_v15 }
 0xc47   :  { %v9750_v16 = vpop.eup %9749 }
 0xc48   :  { %v1648_v18 = vsel %vm724_vm6, %v9750_v16, 0.0  ;;  %v9752_v20 = vpop.eup %9751 }
 0xc49   :  { %1649 = vadd.xlane.f32.xlu0 %v1648_v18  ;;  %v1653_v25 = vmul.f32 %v9752_v20, %v9748_v6  ;;  %v9555_v6 = vadd.f32 %v9552_v55, %v10512_v52 }
 0xc4b   :  { %v1655_v30 = vpack.c.bf16 %v1653_v25, %v1653_v25  ;;  %v444_v1 = vsel %vm267_vm0, %v9555_v6, 0.0  ;;  %v9642_v25 = vld [vmem:[%s11884_s28 + $0x8] sm:$0xff]  }
 0xc5f   :  { %1657 = vrot.lane.b32.xlu0 %v10526_v17, %s10151_s3 }
 0xcd6   :  { %v1650_v24 = vpop.xlane.xlu0 %1649 }
 0xcd7   :  { %9753 = vrcp.f32 %v1650_v24  ;;  %v9641_v24 = vld [vmem:[%s11884_s28] sm:$0xff]  }
 0xcda   :  { %v1658_v28 = vpop.permute.xlu0 %1657 }
 0xcdb   :  { %v1663_v29 = vsel %vm846_vm7, %v1658_v28, 0 }
 0xcdc   :  { %8899 = vmatpush3.bf16.msra.mxu0 %v1663_v29 }
 0xcdd   :  { %8910 = vmatprep.subr.bf16.mxu0 %v10145_v15 }
 0xcdf   :  { %8901 = vmatmul.mubr.msk.bf16.vlgmr.msra.gmra.mrb[40].mxu0 %vm724_vm6, %v1655_v30 }
 0xce0   :  { %8912 = vmatprep.mubr.msk.bf16.mxu0 %vm10146_vm1, %v10145_v15  ;;  %8911 = vmatpush3.bf16.msra.mxu0 %v1760_v19 }
 0xce1   :  { %v9754_v17 = vpop.eup %9753  ;;  %8924 = vmatprep.subr.bf16.mxu0 %v10145_v15 }
 0xce2   :  { %v1654_v23 = vmul.f32 %v9754_v17, %v9750_v16 }
 0xce4   :  { %v1656_v26 = vpack.c.bf16 %v1654_v23, %v1654_v23 }
 0xce6   :  { %8907 = vmatmul.mubr.msk.bf16.vlgmr.msra.gmra.mrb[44].mxu1 %vm724_vm6, %v1656_v26 }
 0xce7   :  { %8920 = vmatprep.mubr.msk.bf16.mxu1 %vm10146_vm1, %v10145_v15  ;;  %8917 = vmatpush3.bf16.msra.mxu1 %v9641_v24 }
 0xce8   :  { %8918 = vmatprep.subr.bf16.mxu1 %v10145_v15 }
 0xceb   :  { %8919 = vmatpush3.bf16.msra.mxu1 %v9642_v25 }
 0xcec   :  { %8936 = vmatprep.subr.bf16.mxu1 %v10145_v15 }
 0xdb2   :  { %v1699_v31 = vpop.f32.mrb[40].mxu0 }
 0xdb3   :  { %v8902_v33 = vpop.f32.mrb[41].mxu0 }
 0xdb4   :  { %v1702_v34 = vpop.f32.mrb[42].mxu0 }
 0xdb5   :  { %v8903_v35 = vpop.f32.mrb[43].mxu0 }
 0xdb9   :  { %v1747_v37 = vpop.f32.mrb[44].mxu1 }
 0xdba   :  { %v1753_v40 = vpack.c.bf16 %v1747_v37, %v1699_v31  ;;  %v8908_v41 = vpop.f32.mrb[45].mxu1 }
 0xdbb   :  { %v1750_v42 = vpop.f32.mrb[46].mxu1 }
 0xdbc   :  { %v8909_v43 = vpop.f32.mrb[47].mxu1  ;;  %8913 = vmatmul.mubr.msk.bf16.vlgmr.msra.gmra.mrb[44].mxu0 %vm724_vm6, %v1753_v40  ;;  %v8107_v40 = vld [vmem:[%s11885_s1] ss:$0 sm:$0xff] }
 0xdbd   :  { %8932 = vmatprep.mubr.msk.bf16.mxu0 %vm10146_vm1, %v10145_v15 }
 0xe8f   :  { %v1796_v48 = vpop.f32.mrb[44].mxu0 }
 0xe90   :  { %v1803_v51 = vadd.f32 %v1796_v48, %v1531_v21  ;;  %v8914_v53 = vpop.f32.mrb[45].mxu0 }
 0xe91   :  { %v1799_v54 = vpop.f32.mrb[46].mxu0 }
 0xe92   :  { %v1812_v56 = vadd.f32 %v8106_v49, %v1803_v51  ;;  %v1804_v57 = vadd.f32 %v1799_v54, %v10705_v2  ;;  %v8915_v58 = vpop.f32.mrb[47].mxu0  ;;  %v441_v2 = vsel %vm267_vm0, %v9553_v0, 0.0  ;;  %v8069_v51 = vld [vmem:[%s11887_s7] ss:$0 sm:$0xff] }
 0xe93   :  { %v9643_v58 = vld [vmem:[%s10234_s6 + $0x10] sm:$0xff]  }
 0xe94   :  { %v1813_v59 = vadd.f32 %v8106_v49, %v1804_v57  ;;  %v1814_v61 = vadd.f32 %v1812_v56, %v10491_v45 }
 0xe96   :  { %v1818_v11 = vsel %vm267_vm0, %v1814_v61, 0.0  ;;  %v1815_v63 = vadd.f32 %v1813_v59, %v10493_v46 }
 0xe97   :  { %1819 = vadd.xlane.f32.xlu1 %v1818_v11  ;;  %v8070_v11 = vld [vmem:[%s11888_s24] ss:$0 sm:$0xff] }
 0xe98   :  { %v1821_v21 = vsel %vm267_vm0, %v1815_v63, 0.0 }
 0xe99   :  { %1822 = vadd.xlane.f32.xlu0 %v1821_v21 }
 0xe9b   :  { %445 = vadd.xlane.f32.xlu1 %v444_v1  ;;  %v9645_v1 = vld [vmem:[%s10244_s20 + $0x10] sm:$0xff]  }
 0xe9d   :  { %442 = vadd.xlane.f32.xlu0 %v441_v2 }
 0xf24   :  { %v1820_v3 = vpop.xlane.xlu1 %1819 }
 0xf25   :  { %v1824_v45 = vmul.f32 0.03125, %v1820_v3  ;;  %v9646_v3 = vld [vmem:[%s10244_s20 + $0x18] sm:$0xff]  }
 0xf26   :  { %v1823_v4 = vpop.xlane.xlu0 %1822 }
 0xf27   :  { %v1826_v52 = vsub.f32 %v1814_v61, %v1824_v45  ;;  %v1825_v5 = vmul.f32 0.03125, %v1823_v4  ;;  %v9647_v45 = vld [vmem:[%s11889_s10] sm:$0xff]   ;;  %v9648_v4 = vld [vmem:[%s11889_s10 + $0x8] sm:$0xff]  }
 0xf28   :  { %v446_v7 = vpop.xlane.xlu1 %445  ;;  %8925 = vmatpush3.bf16.msra.mxu0 %v9647_v45 }
 0xf29   :  { %v1827_v8 = vsub.f32 %v1815_v63, %v1825_v5  ;;  %v448_v46 = vmul.f32 0.03125, %v446_v7  ;;  %v1828_v9 = vmul.f32 %v1826_v52, %v1826_v52  ;;  %v9644_v63 = vld [vmem:[%s10234_s6 + $0x18] sm:$0xff]   ;;  %8926 = vmatprep.subr.bf16.mxu0 %v10145_v15  ;;  %v8109_v7 = vld [vmem:[%s11890_s11] ss:$0 sm:$0xff] }
 0xf2a   :  { %v443_v50 = vpop.xlane.xlu0 %442  ;;  %v9650_v5 = vld [vmem:[%s11889_s10 + $0x18] sm:$0xff]  }
 0xf2b   :  { %v450_v10 = vsub.f32 %v9555_v6, %v448_v46  ;;  %v447_v12 = vmul.f32 0.03125, %v443_v50  ;;  %v1830_v60 = vsel %vm267_vm0, %v1828_v9, 0.0  ;;  %v1829_v13 = vmul.f32 %v1827_v8, %v1827_v8 }
 0xf2c   :  { %1831 = vadd.xlane.f32.xlu0 %v1830_v60  ;;  %8927 = vmatpush3.bf16.msra.mxu0 %v9648_v4 }
 0xf2d   :  { %v449_v14 = vsub.f32 %v9553_v0, %v447_v12  ;;  %v1833_v62 = vsel %vm267_vm0, %v1829_v13, 0.0  ;;  %v452_v16 = vmul.f32 %v450_v10, %v450_v10  ;;  %8928 = vmatprep.subr.bf16.mxu0 %v10145_v15 }
 0xf2e   :  { %1834 = vadd.xlane.f32.xlu1 %v1833_v62 }
 0xf2f   :  { %v451_v18 = vmul.f32 %v449_v14, %v449_v14  ;;  %v456_v22 = vsel %vm267_vm0, %v452_v16, 0.0 }
 0xf31   :  { %v453_v20 = vsel %vm267_vm0, %v451_v18, 0.0 }
 0xf32   :  { %457 = vadd.xlane.f32.xlu1 %v456_v22  ;;  %454 = vadd.xlane.f32.xlu0 %v453_v20 }
 0xfb9   :  { %v1832_v28 = vpop.xlane.xlu0 %1831 }
 0xfba   :  { %v1836_v29 = vmul.f32 0.03125, %v1832_v28 }
 0xfbb   :  { %v1835_v30 = vpop.xlane.xlu1 %1834 }
 0xfbc   :  { %v1838_v17 = vadd.f32 1e-12, %v1836_v29  ;;  %v1837_v23 = vmul.f32 0.03125, %v1835_v30 }
 0xfbe   :  { %9755 = vrsqrt.f32 %v1838_v17  ;;  %v1839_v26 = vadd.f32 1e-12, %v1837_v23  ;;  %v8135_v23 = vld [vmem:[%s11876_s5 + $0x1] ss:$0 sm:$0xff] }
 0xfbf   :  { %v458_v27 = vpop.xlane.xlu1 %457  ;;  %v455_v19 = vpop.xlane.xlu0 %454 }
 0xfc0   :  { %9757 = vrsqrt.f32 %v1839_v26  ;;  %v460_v31 = vmul.f32 0.03125, %v458_v27  ;;  %v459_v33 = vmul.f32 0.03125, %v455_v19  ;;  %v8126_v26 = vld [vmem:[%s11877_s9 + $0x1] ss:$0 sm:$0xff] }
 0xfc2   :  { %v462_v34 = vadd.f32 1e-12, %v460_v31  ;;  %v461_v35 = vadd.f32 1e-12, %v459_v33 }
 0xfc4   :  { %9759 = vrsqrt.f32 %v462_v34 }
 0xfc5   :  { %9761 = vrsqrt.f32 %v461_v35 }
 0xfc8   :  { %v9756_v37 = vpop.eup %9755 }
 0xfc9   :  { %v1842_v41 = vmul.f32 %v9756_v37, %v1826_v52  ;;  %v9649_v52 = vld [vmem:[%s11889_s10 + $0x10] sm:$0xff]  }
 0xfca   :  { %v9758_v42 = vpop.eup %9757  ;;  %8929 = vmatpush3.bf16.msra.mxu0 %v9649_v52 }
 0xfcb   :  { %v1850_v43 = vmul.f32 %v8107_v40, %v1842_v41  ;;  %v1843_v44 = vmul.f32 %v9758_v42, %v1827_v8  ;;  %8930 = vmatprep.subr.bf16.mxu0 %v10145_v15 }
 0xfcd   :  { %v1851_v48 = vmul.f32 %v8107_v40, %v1843_v44  ;;  %v10753_v55 = vadd.f32 %v8108_v47, %v1850_v43 }
 0xfce   :  { %v9760_v49 = vpop.eup %9759  ;;  %8931 = vmatpush3.bf16.msra.mxu0 %v9650_v5 }
 0xfcf   :  { %v9762_v53 = vpop.eup %9761  ;;  %v466_v54 = vmul.f32 %v9760_v49, %v450_v10  ;;  %v10755_v56 = vadd.f32 %v8108_v47, %v1851_v48  ;;  %8952 = vmatprep.subr.bf16.mxu0 %v10145_v15 }
 0xfd0   :  { %v465_v57 = vmul.f32 %v9762_v53, %v449_v14 }
 0xfd1   :  { %v474_v59 = vmul.f32 %v8069_v51, %v466_v54  ;;  %v1864_v61 = vpack.c.bf16 %v10755_v56, %v10753_v55 }
 0xfd2   :  { %v473_v6 = vmul.f32 %v8069_v51, %v465_v57  ;;  %v9651_v57 = vld [vmem:[%s10254_s4 + $0x10] sm:$0xff]  }
 0xfd3   :  { %8921 = vmatmul.mubr.msk.bf16.vlgmr.msra.gmra.mrb[48].mxu1 %vm267_vm0, %v1864_v61  ;;  %v10768_v21 = vadd.f32 %v8070_v11, %v474_v59  ;;  %v9652_v59 = vld [vmem:[%s10254_s4 + $0x18] sm:$0xff]  }
 0xfd4   :  { %8937 = vmatpush3.bf16.msra.mxu1 %v9643_v58  ;;  %8940 = vmatprep.mubr.msk.bf16.mxu1 %vm10146_vm1, %v10145_v15  ;;  %v10766_v0 = vadd.f32 %v8070_v11, %v473_v6 }
 0xfd5   :  { %8938 = vmatprep.subr.bf16.mxu1 %v10145_v15 }
 0xfd6   :  { %v10773_v2 = vpack.c.bf16 %v10768_v21, %v10766_v0 }
 0xfd8   :  { %8939 = vmatpush3.bf16.msra.mxu1 %v9644_v63 }
 0xfd9   :  { %8944 = vmatprep.subr.bf16.mxu1 %v10145_v15 }
 0xfdb   :  { %8941 = vmatmul.mubr.msk.bf16.vlgmr.msra.gmra.mrb[52].mxu1 %vm267_vm0, %v10773_v2 }
 0xfdc   :  { %8945 = vmatpush3.bf16.msra.mxu1 %v9645_v1  ;;  %8948 = vmatprep.mubr.msk.bf16.mxu1 %vm10146_vm1, %v10145_v15 }
 0xfdd   :  { %8946 = vmatprep.subr.bf16.mxu1 %v10145_v15 }
 0xfe0   :  { %8947 = vmatpush3.bf16.msra.mxu1 %v9646_v3 }
 0xfe1   :  { %8960 = vmatprep.subr.bf16.mxu1 %v10145_v15 }
 0xfe3   :  { %8949 = vmatmul.mubr.msk.bf16.vlgmr.msra.gmra.mrb[56].mxu1 %vm267_vm0, %v10773_v2 }
 0xfe4   :  { %8962 = vmatprep.mubr.msk.bf16.mxu1 %vm10146_vm1, %v10145_v15 }
0x10a6   :  { %v1921_v8 = vpop.f32.mrb[48].mxu1 }
0x10a7   :  { %v1922_v46 = vadd.f32 %v8109_v7, %v1921_v8  ;;  %v8922_v9 = vpop.f32.mrb[49].mxu1 }
0x10a8   :  { %v1924_v50 = vpop.f32.mrb[50].mxu1 }
0x10a9   :  { %v1930_v10 = vmul.f32 0.044715, %v1922_v46  ;;  %v1925_v12 = vadd.f32 %v8109_v7, %v1924_v50  ;;  %v8923_v60 = vpop.f32.mrb[51].mxu1  ;;  %v1928_v47 = vmul.f32 0.5, %v1922_v46 }
0x10ab   :  { %v1932_v13 = vmul.f32 %v1930_v10, %v1922_v46  ;;  %v1931_v14 = vmul.f32 0.044715, %v1925_v12  ;;  %v1929_v48 = vmul.f32 0.5, %v1925_v12 }
0x10ad   :  { %v1934_v62 = vmul.f32 %v1932_v13, %v1922_v46  ;;  %v1933_v16 = vmul.f32 %v1931_v14, %v1925_v12 }
0x10ae   :  { %v2140_v18 = vpop.f32.mrb[52].mxu1 }
0x10af   :  { %v1936_v22 = vadd.f32 %v1934_v62, %v1922_v46  ;;  %v1935_v20 = vmul.f32 %v1933_v16, %v1925_v12  ;;  %v8942_v24 = vpop.f32.mrb[53].mxu1  ;;  %v2141_v34 = vadd.f32 %v8126_v26, %v2140_v18  ;;  %v8144_v16 = vld [vmem:[%s11878_s13 + $0x1] ss:$0 sm:$0xff] }
0x10b0   :  { %v2143_v25 = vpop.f32.mrb[54].mxu1 }
0x10b1   :  { %v1938_v28 = vmul.f32 0.7978846, %v1936_v22  ;;  %v1937_v29 = vadd.f32 %v1935_v20, %v1925_v12  ;;  %v8943_v30 = vpop.f32.mrb[55].mxu1  ;;  %v2279_v42 = vmul.f32 0.35355338, %v2141_v34  ;;  %v2144_v11 = vadd.f32 %v8126_v26, %v2143_v25 }
0x10b3   :  { %9763 = vtanh.f32 %v1938_v28  ;;  %v1939_v17 = vmul.f32 0.7978846, %v1937_v29  ;;  %v10803_v51 = vpack.c.bf16 %v2279_v42, %v2279_v42  ;;  %v2280_v1 = vmul.f32 0.35355338, %v2144_v11 }
0x10b5   :  { %9765 = vtanh.f32 %v1939_v17  ;;  %v10825_v3 = vpack.c.bf16 %v2280_v1, %v2280_v1 }
0x10b6   :  { %v2206_v27 = vpop.f32.mrb[56].mxu1 }
0x10b7   :  { %v2207_v19 = vadd.f32 %v8135_v23, %v2206_v27  ;;  %v8950_v31 = vpop.f32.mrb[57].mxu1 }
0x10b8   :  { %v2209_v33 = vpop.f32.mrb[58].mxu1 }
0x10b9   :  { %v10798_v35 = vpack.c.bf16 %v2207_v19, %v2207_v19  ;;  %v8951_v37 = vpop.f32.mrb[59].mxu1  ;;  %v2210_v61 = vadd.f32 %v8135_v23, %v2209_v33 }
0x10bb   :  { %v2322_v40 = vsel %vm724_vm6, %v10798_v35, 0  ;;  %v10818_v6 = vpack.c.bf16 %v2210_v61, %v2210_v61 }
0x10bc   :  { %8961 = vmatpush3.bf16.xpose.msra.mxu1 %v2322_v40 }
0x10bd   :  { %v9764_v41 = vpop.eup %9763  ;;  %8972 = vmatprep.subr.bf16.mxu1 %v10145_v15  ;;  %v2368_v63 = vsel %vm724_vm6, %v10818_v6, 0 }
0x10be   :  { %v1942_v43 = vadd.f32 1.0, %v9764_v41 }
0x10bf   :  { %v9766_v44 = vpop.eup %9765 }
0x10c0   :  { %v1943_v49 = vadd.f32 1.0, %v9766_v44  ;;  %v1944_v53 = vmul.f32 %v1942_v43, %v1928_v47 }
0x10c2   :  { %v1945_v54 = vmul.f32 %v1943_v49, %v1929_v48 }
0x10c3   :  { %8963 = vmatmul.mubr.msk.bf16.vlgmr.msra.gmra.mrb[60].mxu1 %vm724_vm6, %v10803_v51 }
0x10c4   :  { %v1954_v58 = vpack.c.bf16 %v1945_v54, %v1944_v53  ;;  %8974 = vmatprep.mubr.msk.bf16.mxu1 %vm10146_vm1, %v10145_v15 }
0x10c6   :  { %8933 = vmatmul.mubr.msk.bf16.vlgmr.msra.gmra.mrb[48].mxu0 %vm1986_vm8, %v1954_v58 }
0x10c7   :  { %8953 = vmatpush3.bf16.msra.mxu0 %v9651_v57  ;;  %8956 = vmatprep.mubr.msk.bf16.mxu0 %vm10146_vm1, %v10145_v15 }
0x10c8   :  { %8954 = vmatprep.subr.bf16.mxu0 %v10145_v15 }
0x10cb   :  { %8955 = vmatpush3.bf16.msra.mxu0 %v9652_v59 }
0x10cc   :  { %8966 = vmatprep.subr.bf16.mxu0 %v10145_v15 }
0x10ce   :  { %8957 = vmatmul.mubr.msk.bf16.vlgmr.msra.gmra.mrb[52].mxu0 %vm267_vm0, %v10773_v2  ;;  %v486_v2 = vld [vmem:[%s11891_s15] sm:$0x3] }
0x10cf   :  { %8968 = vmatprep.mubr.msk.bf16.mxu0 %vm10146_vm1, %v10145_v15  ;;  %v487_v45 = vsub.f32 1.0, %v486_v2 }
0x10d1   :  { %v488_v4 = vmul.f32 -10000.0, %v487_v45 }
0x10d3   :  { %v2288_v52 = vrot.slane %v488_v4, %v10550_v32 }
0x10d4   :  { %8967 = vmatpush3.bf16.xpose.msra.mxu0 %v2368_v63 }
0x10d5   :  { %8978 = vmatprep.subr.bf16.mxu0 %v10145_v15  ;;  %v2296_v5 = vrot.slane %v2288_v52, %v10550_v32  ;;  %v2289_v25 = vcombine.high %v2288_v52, %v2288_v52 }
0x10d7   :  { %v10835_v7 = vrot.slane %v2296_v5, %v10554_v36  ;;  %v2303_v26 = vrot.slane %v2289_v25, %v10550_v32 }
0x10d9   :  { %v10856_v19 = vrot.slane %v2303_v26, %v10554_v36 }
0x10db   :  { %8969 = vmatmul.mubr.msk.bf16.vlgmr.msra.gmra.mrb[56].mxu0 %vm724_vm6, %v10825_v3 }
0x10dc   :  { %8980 = vmatprep.mubr.msk.bf16.mxu0 %vm10146_vm1, %v10145_v15 }
0x1196   :  { %v2358_v8 = vpop.f32.mrb[60].mxu1 }
0x1197   :  { %v2359_v46 = vadd.f32 %v2358_v8, %v10835_v7  ;;  %v8964_v9 = vpop.f32.mrb[61].mxu1 }
0x1198   :  { %v2361_v50 = vpop.f32.mrb[62].mxu1 }
0x1199   :  { %v10838_v10 = vpop.f32.mrb[48].mxu0  ;;  %v8965_v12 = vpop.f32.mrb[63].mxu1  ;;  %v2410_v60 = vsel %vm724_vm6, %v2359_v46, -inf }
0x119a   :  { %v8934_v13 = vpop.f32.mrb[49].mxu0  ;;  %2411 = vmax.xlane.f32.xlu0 %v2410_v60 }
0x119b   :  { %v10841_v14 = vpop.f32.mrb[50].mxu0 }
0x119c   :  { %v8935_v62 = vpop.f32.mrb[51].mxu0 }
0x11a1   :  { %v2272_v18 = vpop.f32.mrb[52].mxu0 }
0x11a2   :  { %v2273_v22 = vadd.f32 %v8144_v16, %v2272_v18  ;;  %v8958_v20 = vpop.f32.mrb[53].mxu0 }
0x11a3   :  { %v2275_v24 = vpop.f32.mrb[54].mxu0 }
0x11a4   :  { %v10844_v28 = vpack.c.bf16 %v2273_v22, %v2273_v22  ;;  %v2276_v29 = vadd.f32 %v8144_v16, %v2275_v24  ;;  %v8959_v30 = vpop.f32.mrb[55].mxu0 }
0x11a6   :  { %v10846_v17 = vpack.c.bf16 %v2276_v29, %v2276_v29  ;;  %v2440_v23 = vsel %vm846_vm7, %v10844_v28, 0 }
0x11a7   :  { %8973 = vmatpush3.bf16.msra.mxu1 %v2440_v23 }
0x11a8   :  { %v2486_v27 = vsel %vm846_vm7, %v10846_v17, 0  ;;  %8984 = vmatprep.subr.bf16.mxu1 %v10145_v15 }
0x11a9   :  { %8979 = vmatpush3.bf16.msra.mxu0 %v2486_v27 }
0x11aa   :  { %8990 = vmatprep.subr.bf16.mxu0 %v10145_v15 }
0x11ae   :  { %v2404_v31 = vpop.f32.mrb[56].mxu0 }
0x11af   :  { %v2405_v33 = vadd.f32 %v2404_v31, %v10856_v19  ;;  %v8970_v34 = vpop.f32.mrb[57].mxu0 }
0x11b0   :  { %v2407_v37 = vpop.f32.mrb[58].mxu0 }
0x11b1   :  { %v8971_v40 = vpop.f32.mrb[59].mxu0  ;;  %v2413_v41 = vsel %vm724_vm6, %v2405_v33, -inf }
0x11b2   :  { %2414 = vmax.xlane.f32.xlu1 %v2413_v41 }
0x11c3   :  { %2587 = vrot.lane.b32.xlu1 %v10818_v6, %s10149_s21 }
0x1227   :  { %v2412_v32 = vpop.xlane.xlu0 %2411 }
0x1228   :  { %v2416_v42 = vsub.f32 %v2359_v46, %v2412_v32 }
0x122a   :  { %v2418_v43 = vmul.f32 1.442695, %v2416_v42 }
0x122c   :  { %9767 = vpow2.f32 %v2418_v43 }
0x1236   :  { %v9768_v44 = vpop.eup %9767 }
0x1237   :  { %v2422_v36 = vsel %vm724_vm6, %v9768_v44, 0.0 }
0x1238   :  { %2423 = vadd.xlane.f32.xlu0 %v2422_v36 }
0x123f   :  { %v2415_v47 = vpop.xlane.xlu1 %2414 }
0x1240   :  { %v2417_v48 = vsub.f32 %v2405_v33, %v2415_v47 }
0x1242   :  { %v2420_v49 = vmul.f32 1.442695, %v2417_v48 }
0x1243   :  { %v2588_v1 = vpop.permute.xlu1 %2587 }
0x1244   :  { %9769 = vpow2.f32 %v2420_v49  ;;  %v2593_v8 = vsel %vm724_vm6, %v2588_v1, 0 }
0x124e   :  { %v9770_v53 = vpop.eup %9769  ;;  %2535 = vrot.lane.b32.xlu0 %v10798_v35, %s10149_s21 }
0x124f   :  { %v2425_v54 = vsel %vm724_vm6, %v9770_v53, 0.0 }
0x1250   :  { %2426 = vadd.xlane.f32.xlu1 %v2425_v54 }
0x1261   :  { %2532 = vrot.lane.b32.xlu1 %v10803_v51, %s10149_s21 }
0x1265   :  { %2584 = vrot.lane.b32.xlu1 %v10825_v3, %s10149_s21 }
0x12c5   :  { %v2424_v57 = vpop.xlane.xlu0 %2423 }
0x12c6   :  { %9771 = vrcp.f32 %v2424_v57 }
0x12c9   :  { %v2536_v61 = vpop.permute.xlu0 %2535 }
0x12ca   :  { %v2541_v63 = vsel %vm724_vm6, %v2536_v61, 0 }
0x12d0   :  { %v9772_v58 = vpop.eup %9771 }
0x12d1   :  { %v2430_v59 = vmul.f32 %v9772_v58, %v9768_v44 }
0x12d3   :  { %v2432_v11 = vpack.c.bf16 %v2430_v59, %v2430_v59 }
0x12d5   :  { %8975 = vmatmul.mubr.msk.bf16.vlgmr.msra.gmra.mrb[64].mxu1 %vm724_vm6, %v2432_v11 }
0x12d6   :  { %8985 = vmatpush3.bf16.xpose.msra.mxu1 %v2541_v63  ;;  %8986 = vmatprep.mubr.msk.bf16.mxu1 %vm10146_vm1, %v10145_v15 }
0x12d7   :  { %8996 = vmatprep.subr.bf16.mxu1 %v10145_v15 }
0x12dd   :  { %v2427_v2 = vpop.xlane.xlu1 %2426 }
0x12de   :  { %9773 = vrcp.f32 %v2427_v2 }
0x12e1   :  { %v2533_v45 = vpop.permute.xlu1 %2532 }
0x12e2   :  { %8987 = vmatmul.mubr.msk.bf16.vlgmr.msra.gmra.mrb[68].mxu1 %vm724_vm6, %v2533_v45  ;;  %v8152_v45 = vld [vmem:[%s11880_s29 + $0x10] sm:$0xf] }
0x12e3   :  { %8998 = vmatprep.mubr.msk.bf16.mxu1 %vm10146_vm1, %v10145_v15 }
0x12e5   :  { %v2585_v46 = vpop.permute.xlu1 %2584 }
0x12e8   :  { %v9774_v4 = vpop.eup %9773 }
0x12e9   :  { %v2431_v52 = vmul.f32 %v9774_v4, %v9770_v53 }
0x12eb   :  { %v2433_v5 = vpack.c.bf16 %v2431_v52, %v2431_v52 }
0x12ed   :  { %8981 = vmatmul.mubr.msk.bf16.vlgmr.msra.gmra.mrb[60].mxu0 %vm724_vm6, %v2433_v5  ;;  %v2811_v5 = vsel %vm846_vm7, %v8152_v45, 0 }
0x12ee   :  { %8991 = vmatpush3.bf16.xpose.msra.mxu0 %v2593_v8  ;;  %8992 = vmatprep.mubr.msk.bf16.mxu0 %vm10146_vm1, %v10145_v15 }
0x12ef   :  { %9002 = vmatprep.subr.bf16.mxu0 %v10145_v15 }
0x12f5   :  { %8993 = vmatmul.mubr.msk.bf16.vlgmr.msra.gmra.mrb[64].mxu0 %vm724_vm6, %v2585_v46 }
0x12f6   :  { %9004 = vmatprep.mubr.msk.bf16.mxu0 %vm10146_vm1, %v10145_v15 }
0x13a8   :  { %v10886_v9 = vpop.f32.mrb[64].mxu1 }
0x13a9   :  { %v8976_v50 = vpop.f32.mrb[65].mxu1 }
0x13aa   :  { %v2479_v12 = vpop.f32.mrb[66].mxu1 }
0x13ab   :  { %v8977_v60 = vpop.f32.mrb[67].mxu1  ;;  %v8157_v12 = vld [vmem:[%s11880_s29 + $0x14] sm:$0xf] }
0x13ac   :  { %v2764_v60 = vsel %vm846_vm7, %v8157_v12, 0 }
0x13b5   :  { %v2577_v13 = vpop.f32.mrb[68].mxu1 }
0x13b6   :  { %v2578_v62 = vadd.f32 %v2577_v13, %v10835_v7  ;;  %v8988_v16 = vpop.f32.mrb[69].mxu1 }
0x13b7   :  { %v2580_v18 = vpop.f32.mrb[70].mxu1 }
0x13b8   :  { %v8989_v22 = vpop.f32.mrb[71].mxu1  ;;  %v2635_v20 = vsel %vm724_vm6, %v2578_v62, -inf }
0x13b9   :  { %2636 = vmax.xlane.f32.xlu0 %v2635_v20 }
0x13c0   :  { %v2522_v24 = vpop.f32.mrb[60].mxu0 }
0x13c1   :  { %v2528_v25 = vpack.c.bf16 %v2522_v24, %v10886_v9  ;;  %v8982_v29 = vpop.f32.mrb[61].mxu0 }
0x13c2   :  { %v2525_v30 = vpop.f32.mrb[62].mxu0 }
0x13c3   :  { %v8983_v23 = vpop.f32.mrb[63].mxu0 }
0x13c8   :  { %v2629_v26 = vpop.f32.mrb[64].mxu0 }
0x13c9   :  { %v2630_v27 = vadd.f32 %v2629_v26, %v10856_v19  ;;  %v8994_v31 = vpop.f32.mrb[65].mxu0 }
0x13ca   :  { %v2632_v33 = vpop.f32.mrb[66].mxu0 }
0x13cb   :  { %v8995_v34 = vpop.f32.mrb[67].mxu0  ;;  %v2638_v37 = vsel %vm724_vm6, %v2630_v27, -inf }
0x13cc   :  { %2639 = vmax.xlane.f32.xlu1 %v2638_v37 }
0x13dd   :  { %2709 = vrot.lane.b32.xlu1 %v10846_v17, %s10149_s21 }
0x13e1   :  { %2856 = vrot.lane.b32.xlu1 %v10798_v35, %s10150_s25 }
0x13e5   :  { %2906 = vrot.lane.b32.xlu1 %v10818_v6, %s10150_s25 }
0x13e9   :  { %2904 = vrot.lane.b32.xlu1 %v10825_v3, %s10150_s25 }
0x1446   :  { %v2637_v40 = vpop.xlane.xlu0 %2636 }
0x1447   :  { %v2641_v41 = vsub.f32 %v2578_v62, %v2637_v40 }
0x1449   :  { %v2643_v32 = vmul.f32 1.442695, %v2641_v41 }
0x144b   :  { %9775 = vpow2.f32 %v2643_v32 }
0x1455   :  { %v9776_v42 = vpop.eup %9775 }
0x1456   :  { %v2647_v43 = vsel %vm724_vm6, %v9776_v42, 0.0 }
0x1457   :  { %2648 = vadd.xlane.f32.xlu0 %v2647_v43 }
0x1459   :  { %v2640_v44 = vpop.xlane.xlu1 %2639 }
0x145a   :  { %v2642_v36 = vsub.f32 %v2630_v27, %v2640_v44 }
0x145c   :  { %v2645_v47 = vmul.f32 1.442695, %v2642_v36 }
0x145d   :  { %v2710_v48 = vpop.permute.xlu1 %2709 }
0x145e   :  { %9777 = vpow2.f32 %v2645_v47  ;;  %v2715_v49 = vsel %vm846_vm7, %v2710_v48, 0 }
0x145f   :  { %9003 = vmatpush3.bf16.msra.mxu0 %v2715_v49 }
0x1460   :  { %9014 = vmatprep.subr.bf16.mxu0 %v10145_v15 }
0x1461   :  { %v2857_v8 = vpop.permute.xlu1 %2856 }
0x1462   :  { %v2862_v29 = vsel %vm724_vm6, %v2857_v8, 0 }
0x1465   :  { %v2907_v46 = vpop.permute.xlu1 %2906 }
0x1466   :  { %v2912_v9 = vsel %vm724_vm6, %v2907_v46, 0 }
0x1468   :  { %v9778_v53 = vpop.eup %9777 }
0x1469   :  { %v2650_v54 = vsel %vm724_vm6, %v9778_v53, 0.0  ;;  %v2905_v50 = vpop.permute.xlu1 %2904 }
0x146a   :  { %2651 = vadd.xlane.f32.xlu0 %v2650_v54 }
0x1480   :  { %2660 = vrot.lane.b32.xlu0 %v10844_v28, %s10149_s21 }
0x1484   :  { %2854 = vrot.lane.b32.xlu0 %v10803_v51, %s10150_s25 }
0x14e4   :  { %v2649_v57 = vpop.xlane.xlu0 %2648 }
0x14e5   :  { %9779 = vrcp.f32 %v2649_v57 }
0x14ef   :  { %v9780_v58 = vpop.eup %9779 }
0x14f0   :  { %v2655_v61 = vmul.f32 %v9780_v58, %v9776_v42 }
0x14f2   :  { %v2657_v1 = vpack.c.bf16 %v2655_v61, %v2655_v61 }
0x14f7   :  { %v2652_v59 = vpop.xlane.xlu0 %2651 }
0x14f8   :  { %9781 = vrcp.f32 %v2652_v59 }
0x14fb   :  { %v2661_v11 = vpop.permute.xlu0 %2660 }
0x14fc   :  { %v2666_v63 = vsel %vm846_vm7, %v2661_v11, 0 }
0x14fd   :  { %8997 = vmatpush3.bf16.msra.mxu1 %v2666_v63 }
0x14fe   :  { %9008 = vmatprep.subr.bf16.mxu1 %v10145_v15 }
0x14ff   :  { %v2855_v27 = vpop.permute.xlu0 %2854 }
0x1500   :  { %8999 = vmatmul.mubr.msk.bf16.vlgmr.msra.gmra.mrb[72].mxu1 %vm724_vm6, %v2657_v1 }
0x1501   :  { %9010 = vmatprep.mubr.msk.bf16.mxu1 %vm10146_vm1, %v10145_v15  ;;  %9009 = vmatpush3.bf16.msra.mxu1 %v2764_v60 }
0x1502   :  { %v9782_v2 = vpop.eup %9781  ;;  %9020 = vmatprep.subr.bf16.mxu1 %v10145_v15 }
0x1503   :  { %v2656_v4 = vmul.f32 %v9782_v2, %v9778_v53 }
0x1505   :  { %v2658_v52 = vpack.c.bf16 %v2656_v4, %v2656_v4 }
0x1507   :  { %9005 = vmatmul.mubr.msk.bf16.vlgmr.msra.gmra.mrb[68].mxu0 %vm724_vm6, %v2658_v52 }
0x1508   :  { %9015 = vmatpush3.bf16.msra.mxu0 %v2811_v5  ;;  %9016 = vmatprep.mubr.msk.bf16.mxu0 %vm10146_vm1, %v10145_v15 }
0x1509   :  { %9026 = vmatprep.subr.bf16.mxu0 %v10145_v15 }
0x150f   :  { %9017 = vmatmul.mubr.msk.bf16.vlgmr.msra.gmra.mrb[72].mxu0 %vm724_vm6, %v2528_v25 }
0x1510   :  { %9028 = vmatprep.mubr.msk.bf16.mxu0 %vm10146_vm1, %v10145_v15 }
0x1511   :  { %9027 = vmatpush3.bf16.xpose.msra.mxu0 %v2912_v9 }
0x1512   :  { %9038 = vmatprep.subr.bf16.mxu0 %v10145_v15 }
0x1518   :  { %9029 = vmatmul.mubr.msk.bf16.vlgmr.msra.gmra.mrb[76].mxu0 %vm724_vm6, %v2905_v50 }
0x1519   :  { %9040 = vmatprep.mubr.msk.bf16.mxu0 %vm10146_vm1, %v10145_v15 }
0x15d3   :  { %v2702_v13 = vpop.f32.mrb[72].mxu1 }
0x15d4   :  { %v9000_v62 = vpop.f32.mrb[73].mxu1 }
0x15d5   :  { %v2705_v16 = vpop.f32.mrb[74].mxu1 }
0x15d6   :  { %v9001_v18 = vpop.f32.mrb[75].mxu1 }
0x15da   :  { %v2751_v22 = vpop.f32.mrb[68].mxu0 }
0x15db   :  { %v2757_v20 = vpack.c.bf16 %v2751_v22, %v2702_v13  ;;  %v9006_v24 = vpop.f32.mrb[69].mxu0 }
0x15dc   :  { %v2754_v25 = vpop.f32.mrb[70].mxu0 }
0x15dd   :  { %v9007_v30 = vpop.f32.mrb[71].mxu0  ;;  %9011 = vmatmul.mubr.msk.bf16.vlgmr.msra.gmra.mrb[76].mxu1 %vm724_vm6, %v2757_v20 }
0x15de   :  { %9021 = vmatpush3.bf16.xpose.msra.mxu1 %v2862_v29  ;;  %9022 = vmatprep.mubr.msk.bf16.mxu1 %vm10146_vm1, %v10145_v15 }
0x15df   :  { %9032 = vmatprep.subr.bf16.mxu1 %v10145_v15 }
0x15e2   :  { %v2847_v23 = vpop.f32.mrb[72].mxu0 }
0x15e3   :  { %v9018_v26 = vpop.f32.mrb[73].mxu0 }
0x15e4   :  { %v2850_v31 = vpop.f32.mrb[74].mxu0  ;;  %v8164_v26 = vld [vmem:[%s11880_s29 + $0x18] sm:$0xf] }
0x15e5   :  { %v9019_v33 = vpop.f32.mrb[75].mxu0  ;;  %9023 = vmatmul.mubr.msk.bf16.vlgmr.msra.gmra.mrb[80].mxu1 %vm724_vm6, %v2855_v27  ;;  %v3081_v27 = vsel %vm846_vm7, %v8164_v26, 0 }
0x15e6   :  { %9034 = vmatprep.mubr.msk.bf16.mxu1 %vm10146_vm1, %v10145_v15 }
0x15eb   :  { %v2948_v34 = vpop.f32.mrb[76].mxu0 }
0x15ec   :  { %v2949_v37 = vadd.f32 %v2948_v34, %v10856_v19  ;;  %v9030_v40 = vpop.f32.mrb[77].mxu0 }
0x15ed   :  { %v2951_v41 = vpop.f32.mrb[78].mxu0 }
0x15ee   :  { %v9031_v32 = vpop.f32.mrb[79].mxu0  ;;  %v2957_v42 = vsel %vm724_vm6, %v2949_v37, -inf }
0x15ef   :  { %2958 = vmax.xlane.f32.xlu1 %v2957_v42 }
0x1600   :  { %3026 = vrot.lane.b32.xlu1 %v10846_v17, %s10150_s25 }
0x1604   :  { %3128 = vrot.lane.b32.xlu1 %v10798_v35, %s10151_s3 }
0x1608   :  { %3178 = vrot.lane.b32.xlu1 %v10818_v6, %s10151_s3 }
0x160c   :  { %3176 = vrot.lane.b32.xlu1 %v10825_v3, %s10151_s3 }
0x167c   :  { %v2959_v43 = vpop.xlane.xlu1 %2958 }
0x167d   :  { %v2961_v47 = vsub.f32 %v2949_v37, %v2959_v43 }
0x167f   :  { %v2964_v48 = vmul.f32 1.442695, %v2961_v47 }
0x1680   :  { %v3027_v44 = vpop.permute.xlu1 %3026 }
0x1681   :  { %v3032_v36 = vsel %vm846_vm7, %v3027_v44, 0  ;;  %9783 = vpow2.f32 %v2964_v48 }
0x1682   :  { %9039 = vmatpush3.bf16.msra.mxu0 %v3032_v36 }
0x1683   :  { %9050 = vmatprep.subr.bf16.mxu0 %v10145_v15 }
0x1684   :  { %v3129_v12 = vpop.permute.xlu1 %3128 }
0x1685   :  { %v3134_v13 = vsel %vm724_vm6, %v3129_v12, 0 }
0x1688   :  { %v3179_v32 = vpop.permute.xlu1 %3178 }
0x1689   :  { %v3184_v47 = vsel %vm724_vm6, %v3179_v32, 0 }
0x168b   :  { %v9784_v1 = vpop.eup %9783 }
0x168c   :  { %v2969_v2 = vsel %vm724_vm6, %v9784_v1, 0.0 }
0x16b0   :  { %v2800_v49 = vpop.f32.mrb[76].mxu1 }
0x16b1   :  { %v10951_v53 = vadd.f32 %v2847_v23, %v2800_v49  ;;  %v9012_v54 = vpop.f32.mrb[77].mxu1  ;;  %v3177_v49 = vpop.permute.xlu1 %3176 }
0x16b2   :  { %v2803_v35 = vpop.f32.mrb[78].mxu1 }
0x16b3   :  { %v10953_v57 = vadd.f32 %v2850_v31, %v2803_v35  ;;  %v9013_v6 = vpop.f32.mrb[79].mxu1 }
0x16b8   :  { %v2898_v58 = vpop.f32.mrb[80].mxu1 }
0x16b9   :  { %v2899_v3 = vadd.f32 %v2898_v58, %v10835_v7  ;;  %v9024_v59 = vpop.f32.mrb[81].mxu1 }
0x16ba   :  { %v2901_v61 = vpop.f32.mrb[82].mxu1 }
0x16bb   :  { %v9025_v11 = vpop.f32.mrb[83].mxu1  ;;  %v2954_v63 = vsel %vm724_vm6, %v2899_v3, -inf }
0x16bc   :  { %2955 = vmax.xlane.f32.xlu0 %v2954_v63 }
0x16c0   :  { %2970 = vadd.xlane.f32.xlu0 %v2969_v2 }
0x1749   :  { %v2956_v45 = vpop.xlane.xlu0 %2955 }
0x174a   :  { %v2960_v4 = vsub.f32 %v2899_v3, %v2956_v45 }
0x174c   :  { %v2962_v52 = vmul.f32 1.442695, %v2960_v4 }
0x174d   :  { %v2971_v5 = vpop.xlane.xlu0 %2970 }
0x174e   :  { %9785 = vpow2.f32 %v2962_v52 }
0x174f   :  { %9787 = vrcp.f32 %v2971_v5 }
0x1758   :  { %v9786_v8 = vpop.eup %9785 }
0x1759   :  { %v9788_v46 = vpop.eup %9787  ;;  %v2966_v9 = vsel %vm724_vm6, %v9786_v8, 0.0 }
0x175a   :  { %2967 = vadd.xlane.f32.xlu0 %v2966_v9  ;;  %v2975_v50 = vmul.f32 %v9788_v46, %v9784_v1 }
0x175c   :  { %v2977_v60 = vpack.c.bf16 %v2975_v50, %v2975_v50 }
0x175e   :  { %9041 = vmatmul.mubr.msk.bf16.vlgmr.msra.gmra.mrb[80].mxu0 %vm724_vm6, %v2977_v60 }
0x175f   :  { %9051 = vmatpush3.bf16.xpose.msra.mxu0 %v3134_v13  ;;  %9052 = vmatprep.mubr.msk.bf16.mxu0 %vm10146_vm1, %v10145_v15 }
0x1760   :  { %9062 = vmatprep.subr.bf16.mxu0 %v10145_v15 }
0x1770   :  { %2978 = vrot.lane.b32.xlu0 %v10844_v28, %s10150_s25 }
0x1774   :  { %3126 = vrot.lane.b32.xlu0 %v10803_v51, %s10151_s3 }
0x17e7   :  { %v2968_v62 = vpop.xlane.xlu0 %2967 }
0x17e8   :  { %9789 = vrcp.f32 %v2968_v62 }
0x17eb   :  { %v2979_v16 = vpop.permute.xlu0 %2978 }
0x17ec   :  { %v2984_v18 = vsel %vm846_vm7, %v2979_v16, 0 }
0x17ed   :  { %9033 = vmatpush3.bf16.msra.mxu1 %v2984_v18 }
0x17ee   :  { %9044 = vmatprep.subr.bf16.mxu1 %v10145_v15 }
0x17ef   :  { %v3127_v22 = vpop.permute.xlu0 %3126 }
0x17f0   :  { %9053 = vmatmul.mubr.msk.bf16.vlgmr.msra.gmra.mrb[84].mxu0 %vm724_vm6, %v3127_v22 }
0x17f1   :  { %9064 = vmatprep.mubr.msk.bf16.mxu0 %vm10146_vm1, %v10145_v15 }
0x17f2   :  { %v9790_v20 = vpop.eup %9789 }
0x17f3   :  { %v2974_v24 = vmul.f32 %v9790_v20, %v9786_v8 }
0x17f5   :  { %v2976_v25 = vpack.c.bf16 %v2974_v24, %v2974_v24 }
0x17f7   :  { %9035 = vmatmul.mubr.msk.bf16.vlgmr.msra.gmra.mrb[84].mxu1 %vm724_vm6, %v2976_v25 }
0x17f8   :  { %9046 = vmatprep.mubr.msk.bf16.mxu1 %vm10146_vm1, %v10145_v15  ;;  %9045 = vmatpush3.bf16.msra.mxu1 %v3081_v27 }
0x17f9   :  { %9056 = vmatprep.subr.bf16.mxu1 %v10145_v15 }
0x1831   :  { %v3068_v51 = vpop.f32.mrb[80].mxu0 }
0x1832   :  { %v9042_v29 = vpop.f32.mrb[81].mxu0 }
0x1833   :  { %v3071_v30 = vpop.f32.mrb[82].mxu0  ;;  %v8170_v29 = vld [vmem:[%s11880_s29 + $0x1c] sm:$0xf] }
0x1834   :  { %v9043_v23 = vpop.f32.mrb[83].mxu0  ;;  %v3353_v30 = vsel %vm846_vm7, %v8170_v29, 0 }
0x18c3   :  { %v3170_v31 = vpop.f32.mrb[84].mxu0 }
0x18c4   :  { %v3171_v33 = vadd.f32 %v3170_v31, %v10835_v7  ;;  %v9054_v34 = vpop.f32.mrb[85].mxu0 }
0x18c5   :  { %v3173_v37 = vpop.f32.mrb[86].mxu0 }
0x18c6   :  { %v9055_v40 = vpop.f32.mrb[87].mxu0  ;;  %v3226_v41 = vsel %vm724_vm6, %v3171_v33, -inf }
0x18c7   :  { %3227 = vmax.xlane.f32.xlu0 %v3226_v41 }
0x18ca   :  { %v3020_v42 = vpop.f32.mrb[84].mxu1 }
0x18cb   :  { %v3074_v43 = vpack.c.bf16 %v3068_v51, %v3020_v42  ;;  %v9036_v44 = vpop.f32.mrb[85].mxu1  ;;  %v8173_v42 = vld [vmem:[%s11883_s26 + $0x1] ss:$0 sm:$0xff] }
0x18cc   :  { %v3023_v36 = vpop.f32.mrb[86].mxu1 }
0x18cd   :  { %v9037_v48 = vpop.f32.mrb[87].mxu1  ;;  %9047 = vmatmul.mubr.msk.bf16.vlgmr.msra.gmra.mrb[88].mxu1 %vm724_vm6, %v3074_v43 }
0x18ce   :  { %9057 = vmatpush3.bf16.xpose.msra.mxu1 %v3184_v47  ;;  %9058 = vmatprep.mubr.msk.bf16.mxu1 %vm10146_vm1, %v10145_v15 }
0x18cf   :  { %9068 = vmatprep.subr.bf16.mxu1 %v10145_v15 }
0x18d5   :  { %9059 = vmatmul.mubr.msk.bf16.vlgmr.msra.gmra.mrb[92].mxu1 %vm724_vm6, %v3177_v49 }
0x18d6   :  { %9070 = vmatprep.mubr.msk.bf16.mxu1 %vm10146_vm1, %v10145_v15 }
0x1954   :  { %v3228_v54 = vpop.xlane.xlu0 %3227 }
0x1955   :  { %v3232_v35 = vsub.f32 %v3171_v33, %v3228_v54 }
0x1957   :  { %v3234_v6 = vmul.f32 1.442695, %v3232_v35 }
0x1959   :  { %9791 = vpow2.f32 %v3234_v6 }
0x1963   :  { %v9792_v58 = vpop.eup %9791 }
0x1964   :  { %v3238_v3 = vsel %vm724_vm6, %v9792_v58, 0.0 }
0x1965   :  { %3239 = vadd.xlane.f32.xlu0 %v3238_v3 }
0x19a0   :  { %v3117_v59 = vpop.f32.mrb[88].mxu1 }
0x19a1   :  { %v3124_v61 = vadd.f32 %v3117_v59, %v10951_v53  ;;  %v9048_v11 = vpop.f32.mrb[89].mxu1  ;;  %v8113_v59 = vld [vmem:[%s11892_s16] ss:$0 sm:$0xff] }
0x19a2   :  { %v3120_v63 = vpop.f32.mrb[90].mxu1 }
0x19a3   :  { %v3125_v1 = vadd.f32 %v3120_v63, %v10953_v57  ;;  %v9049_v2 = vpop.f32.mrb[91].mxu1 }
0x19a4   :  { %v2025_v2 = vadd.f32 %v8113_v59, %v10838_v10 }
0x19a8   :  { %v3220_v45 = vpop.f32.mrb[92].mxu1 }
0x19a9   :  { %v3221_v4 = vadd.f32 %v3220_v45, %v10856_v19  ;;  %v9060_v52 = vpop.f32.mrb[93].mxu1 }
0x19aa   :  { %v3223_v5 = vpop.f32.mrb[94].mxu1 }
0x19ab   :  { %v9061_v8 = vpop.f32.mrb[95].mxu1  ;;  %v3229_v46 = vsel %vm724_vm6, %v3221_v4, -inf }
0x19ac   :  { %3230 = vmax.xlane.f32.xlu1 %v3229_v46  ;;  %v11025_v8 = vadd.f32 %v2025_v2, %v10753_v55  ;;  %v9654_v55 = vld [vmem:[%s11884_s28 + $0x18] sm:$0xff]  }
0x19ae   :  { %v2035_v10 = vsel %vm267_vm0, %v11025_v8, 0.0 }
0x19bd   :  { %3298 = vrot.lane.b32.xlu1 %v10846_v17, %s10151_s3 }
0x19f2   :  { %v3240_v62 = vpop.xlane.xlu0 %3239 }
0x1a39   :  { %v3231_v9 = vpop.xlane.xlu1 %3230 }
0x1a3a   :  { %v3233_v50 = vsub.f32 %v3221_v4, %v3231_v9  ;;  %v2028_v4 = vadd.f32 %v8113_v59, %v10841_v14 }
0x1a3c   :  { %v3236_v53 = vmul.f32 1.442695, %v3233_v50  ;;  %v11029_v9 = vadd.f32 %v2028_v4, %v10755_v56  ;;  %v9653_v50 = vld [vmem:[%s11884_s28 + $0x10] sm:$0xff]  }
0x1a3d   :  { %v3299_v12 = vpop.permute.xlu1 %3298 }
0x1a3e   :  { %9793 = vpow2.f32 %v3236_v53  ;;  %v3304_v57 = vsel %vm846_vm7, %v3299_v12, 0  ;;  %v2038_v14 = vsel %vm267_vm0, %v11029_v9, 0.0 }
0x1a3f   :  { %9069 = vmatpush3.bf16.msra.mxu1 %v3304_v57  ;;  %9795 = vrcp.f32 %v3240_v62 }
0x1a40   :  { %9080 = vmatprep.subr.bf16.mxu1 %v10145_v15 }
0x1a48   :  { %v9794_v60 = vpop.eup %9793 }
0x1a49   :  { %v3241_v13 = vsel %vm724_vm6, %v9794_v60, 0.0  ;;  %v9796_v17 = vpop.eup %9795 }
0x1a4a   :  { %3242 = vadd.xlane.f32.xlu0 %v3241_v13  ;;  %v3246_v18 = vmul.f32 %v9796_v17, %v9792_v58  ;;  %v8176_v17 = vld [vmem:[%s11885_s1 + $0x1] ss:$0 sm:$0xff] }
0x1a4c   :  { %v3248_v24 = vpack.c.bf16 %v3246_v18, %v3246_v18 }
0x1a60   :  { %3250 = vrot.lane.b32.xlu0 %v10844_v28, %s10151_s3 }
0x1ad7   :  { %v3243_v16 = vpop.xlane.xlu0 %3242 }
0x1ad8   :  { %9797 = vrcp.f32 %v3243_v16 }
0x1adb   :  { %v3251_v22 = vpop.permute.xlu0 %3250 }
0x1adc   :  { %v3256_v20 = vsel %vm846_vm7, %v3251_v22, 0 }
0x1add   :  { %9063 = vmatpush3.bf16.msra.mxu0 %v3256_v20 }
0x1ade   :  { %9074 = vmatprep.subr.bf16.mxu0 %v10145_v15 }
0x1ae0   :  { %9065 = vmatmul.mubr.msk.bf16.vlgmr.msra.gmra.mrb[88].mxu0 %vm724_vm6, %v3248_v24  ;;  %v8177_v24 = vld [vmem:[%s11886_s2 + $0x1] ss:$0 sm:$0xff] }
0x1ae1   :  { %9076 = vmatprep.mubr.msk.bf16.mxu0 %vm10146_vm1, %v10145_v15  ;;  %9075 = vmatpush3.bf16.msra.mxu0 %v3353_v30  ;;  %v9655_v30 = vld [vmem:[%s11889_s10 + $0x20] sm:$0xff]  }
0x1ae2   :  { %v9798_v28 = vpop.eup %9797  ;;  %9088 = vmatprep.subr.bf16.mxu0 %v10145_v15 }
0x1ae3   :  { %v3247_v25 = vmul.f32 %v9798_v28, %v9794_v60 }
0x1ae5   :  { %v3249_v51 = vpack.c.bf16 %v3247_v25, %v3247_v25 }
0x1ae7   :  { %9071 = vmatmul.mubr.msk.bf16.vlgmr.msra.gmra.mrb[96].mxu1 %vm724_vm6, %v3249_v51 }
0x1ae8   :  { %9084 = vmatprep.mubr.msk.bf16.mxu1 %vm10146_vm1, %v10145_v15  ;;  %9081 = vmatpush3.bf16.msra.mxu1 %v9653_v50 }
0x1ae9   :  { %9082 = vmatprep.subr.bf16.mxu1 %v10145_v15 }
0x1aec   :  { %9083 = vmatpush3.bf16.msra.mxu1 %v9654_v55 }
0x1aed   :  { %9100 = vmatprep.subr.bf16.mxu1 %v10145_v15 }
0x1bb3   :  { %v3292_v23 = vpop.f32.mrb[88].mxu0 }
0x1bb4   :  { %v9066_v26 = vpop.f32.mrb[89].mxu0 }
0x1bb5   :  { %v3295_v27 = vpop.f32.mrb[90].mxu0  ;;  %v9657_v26 = vld [vmem:[%s11889_s10 + $0x30] sm:$0xff]  }
0x1bb6   :  { %v9067_v31 = vpop.f32.mrb[91].mxu0  ;;  %v9658_v27 = vld [vmem:[%s11889_s10 + $0x38] sm:$0xff]  }
0x1bb7   :  { %v8183_v31 = vld [vmem:[%s11890_s11 + $0x1] ss:$0 sm:$0xff] }
0x1bba   :  { %v3340_v33 = vpop.f32.mrb[96].mxu1 }
0x1bbb   :  { %v3346_v34 = vpack.c.bf16 %v3340_v33, %v3292_v23  ;;  %v9072_v37 = vpop.f32.mrb[97].mxu1  ;;  %v9656_v23 = vld [vmem:[%s11889_s10 + $0x28] sm:$0xff]  }
0x1bbc   :  { %v3343_v40 = vpop.f32.mrb[98].mxu1 }
0x1bbd   :  { %v9073_v41 = vpop.f32.mrb[99].mxu1  ;;  %9077 = vmatmul.mubr.msk.bf16.vlgmr.msra.gmra.mrb[92].mxu0 %vm724_vm6, %v3346_v34 }
0x1bbe   :  { %9096 = vmatprep.mubr.msk.bf16.mxu0 %vm10146_vm1, %v10145_v15  ;;  %9089 = vmatpush3.bf16.msra.mxu0 %v9655_v30 }
0x1bbf   :  { %9090 = vmatprep.subr.bf16.mxu0 %v10145_v15 }
0x1bc2   :  { %9091 = vmatpush3.bf16.msra.mxu0 %v9656_v23 }
0x1bc3   :  { %9092 = vmatprep.subr.bf16.mxu0 %v10145_v15 }
0x1bc6   :  { %9093 = vmatpush3.bf16.msra.mxu0 %v9657_v26 }
0x1bc7   :  { %9094 = vmatprep.subr.bf16.mxu0 %v10145_v15 }
0x1bca   :  { %9095 = vmatpush3.bf16.msra.mxu0 %v9658_v27 }
0x1bcb   :  { %9116 = vmatprep.subr.bf16.mxu0 %v10145_v15 }
0x1c90   :  { %v3389_v32 = vpop.f32.mrb[92].mxu0 }
0x1c91   :  { %v3396_v43 = vadd.f32 %v3389_v32, %v3124_v61  ;;  %v9078_v44 = vpop.f32.mrb[93].mxu0 }
0x1c92   :  { %v3392_v36 = vpop.f32.mrb[94].mxu0 }
0x1c93   :  { %v3406_v47 = vadd.f32 %v8173_v42, %v3396_v43  ;;  %v3397_v48 = vadd.f32 %v3392_v36, %v3125_v1  ;;  %v9079_v49 = vpop.f32.mrb[95].mxu0 }
0x1c95   :  { %v3407_v54 = vadd.f32 %v8173_v42, %v3397_v48  ;;  %v3408_v35 = vadd.f32 %v3406_v47, %v10766_v0 }
0x1c97   :  { %v3414_v6 = vsel %vm267_vm0, %v3408_v35, 0.0  ;;  %v3409_v58 = vadd.f32 %v3407_v54, %v10768_v21 }
0x1c98   :  { %3415 = vadd.xlane.f32.xlu1 %v3414_v6 }
0x1c99   :  { %v3417_v3 = vsel %vm267_vm0, %v3409_v58, 0.0 }
0x1c9a   :  { %3418 = vadd.xlane.f32.xlu0 %v3417_v3 }
0x1d25   :  { %v3416_v11 = vpop.xlane.xlu1 %3415 }
0x1d26   :  { %v3420_v63 = vmul.f32 0.03125, %v3416_v11 }
0x1d27   :  { %v3419_v61 = vpop.xlane.xlu0 %3418 }
0x1d28   :  { %v3422_v45 = vsub.f32 %v3408_v35, %v3420_v63  ;;  %v3421_v1 = vmul.f32 0.03125, %v3419_v61 }
0x1d2a   :  { %v3423_v0 = vsub.f32 %v3409_v58, %v3421_v1  ;;  %v3424_v52 = vmul.f32 %v3422_v45, %v3422_v45 }
0x1d2c   :  { %v3426_v21 = vsel %vm267_vm0, %v3424_v52, 0.0  ;;  %v3425_v5 = vmul.f32 %v3423_v0, %v3423_v0 }
0x1d2d   :  { %3427 = vadd.xlane.f32.xlu0 %v3426_v21  ;;  %v8196_v21 = vld [vmem:[%s11892_s16 + $0x1] ss:$0 sm:$0xff] }
0x1d2e   :  { %v3429_v46 = vsel %vm267_vm0, %v3425_v5, 0.0 }
0x1d2f   :  { %3430 = vadd.xlane.f32.xlu1 %v3429_v46 }
0x1d31   :  { %2036 = vadd.xlane.f32.xlu0 %v2035_v10 }
0x1d33   :  { %2039 = vadd.xlane.f32.xlu1 %v2038_v14 }
0x1dba   :  { %v3428_v56 = vpop.xlane.xlu0 %3427 }
0x1dbb   :  { %v3432_v53 = vmul.f32 0.03125, %v3428_v56 }
0x1dbc   :  { %v3431_v12 = vpop.xlane.xlu1 %3430 }
0x1dbd   :  { %v3434_v57 = vadd.f32 1e-12, %v3432_v53  ;;  %v3433_v60 = vmul.f32 0.03125, %v3431_v12 }
0x1dbe   :  { %v2037_v4 = vpop.xlane.xlu0 %2036 }
0x1dbf   :  { %9799 = vrsqrt.f32 %v3434_v57  ;;  %v3435_v13 = vadd.f32 1e-12, %v3433_v60  ;;  %v2041_v52 = vmul.f32 0.03125, %v2037_v4 }
0x1dc1   :  { %9801 = vrsqrt.f32 %v3435_v13  ;;  %v2043_v10 = vsub.f32 %v11025_v8, %v2041_v52  ;;  %v8204_v52 = vld [vmem:[%s11893_s18 + $0x1] ss:$0 sm:$0xff] }
0x1dc9   :  { %v9800_v62 = vpop.eup %9799 }
0x1dca   :  { %v3438_v16 = vmul.f32 %v9800_v62, %v3422_v45  ;;  %v2045_v62 = vmul.f32 %v2043_v10, %v2043_v10 }
0x1dcb   :  { %v9802_v18 = vpop.eup %9801 }
0x1dcc   :  { %v3446_v22 = vmul.f32 %v8176_v17, %v3438_v16  ;;  %v3439_v20 = vmul.f32 %v9802_v18, %v3423_v0  ;;  %v2040_v0 = vpop.xlane.xlu1 %2039  ;;  %v2047_v8 = vsel %vm267_vm0, %v2045_v62, 0.0  ;;  %v8220_v62 = vld [vmem:[%s11876_s5 + $0x2] ss:$0 sm:$0xff] }
0x1dcd   :  { %v2042_v5 = vmul.f32 0.03125, %v2040_v0 }
0x1dce   :  { %v3447_v28 = vmul.f32 %v8176_v17, %v3439_v20  ;;  %v3454_v25 = vadd.f32 %v8177_v24, %v3446_v22  ;;  %v9660_v22 = vld [vmem:[%s10234_s6 + $0x28] sm:$0xff]  }
0x1dcf   :  { %v2044_v56 = vsub.f32 %v11029_v9, %v2042_v5  ;;  %v9659_v9 = vld [vmem:[%s10234_s6 + $0x20] sm:$0xff]  }
0x1dd0   :  { %v3455_v51 = vadd.f32 %v8177_v24, %v3447_v28 }
0x1dd1   :  { %v2046_v16 = vmul.f32 %v2044_v56, %v2044_v56 }
0x1dd2   :  { %v3461_v29 = vpack.c.bf16 %v3455_v51, %v3454_v25 }
0x1dd3   :  { %v2050_v18 = vsel %vm267_vm0, %v2046_v16, 0.0 }
0x1dd4   :  { %9085 = vmatmul.mubr.msk.bf16.vlgmr.msra.gmra.mrb[100].mxu1 %vm267_vm0, %v3461_v29 }
0x1dd5   :  { %9104 = vmatprep.mubr.msk.bf16.mxu1 %vm10146_vm1, %v10145_v15  ;;  %9101 = vmatpush3.bf16.msra.mxu1 %v9659_v9 }
0x1dd6   :  { %9102 = vmatprep.subr.bf16.mxu1 %v10145_v15 }
0x1dd9   :  { %9103 = vmatpush3.bf16.msra.mxu1 %v9660_v22 }
0x1dda   :  { %9108 = vmatprep.subr.bf16.mxu1 %v10145_v15 }
0x1ea7   :  { %v3519_v33 = vpop.f32.mrb[100].mxu1 }
0x1ea8   :  { %v3520_v34 = vadd.f32 %v8183_v31, %v3519_v33  ;;  %v9086_v37 = vpop.f32.mrb[101].mxu1 }
0x1ea9   :  { %v3522_v40 = vpop.f32.mrb[102].mxu1 }
0x1eaa   :  { %v3528_v41 = vmul.f32 0.044715, %v3520_v34  ;;  %v3523_v32 = vadd.f32 %v8183_v31, %v3522_v40  ;;  %v9087_v42 = vpop.f32.mrb[103].mxu1  ;;  %v3526_v11 = vmul.f32 0.5, %v3520_v34 }
0x1eab   :  { %v8119_v42 = vld [vmem:[%s11893_s18] ss:$0 sm:$0xff] }
0x1eac   :  { %v3530_v43 = vmul.f32 %v3528_v41, %v3520_v34  ;;  %v3529_v44 = vmul.f32 0.044715, %v3523_v32  ;;  %v3527_v63 = vmul.f32 0.5, %v3523_v32 }
0x1eae   :  { %v3532_v36 = vmul.f32 %v3530_v43, %v3520_v34  ;;  %v3531_v47 = vmul.f32 %v3529_v44, %v3523_v32 }
0x1eb0   :  { %v3534_v48 = vadd.f32 %v3532_v36, %v3520_v34  ;;  %v3533_v49 = vmul.f32 %v3531_v47, %v3523_v32 }
0x1eb2   :  { %v3536_v54 = vmul.f32 0.7978846, %v3534_v48  ;;  %v3535_v35 = vadd.f32 %v3533_v49, %v3523_v32  ;;  %v8120_v48 = vld [vmem:[%s11894_s8] ss:$0 sm:$0xff] }
0x1eb4   :  { %9803 = vtanh.f32 %v3536_v54  ;;  %v3537_v6 = vmul.f32 0.7978846, %v3535_v35 }
0x1eb6   :  { %9805 = vtanh.f32 %v3537_v6 }
0x1ebe   :  { %v9804_v58 = vpop.eup %9803 }
0x1ebf   :  { %v3540_v3 = vadd.f32 1.0, %v9804_v58  ;;  %v9661_v58 = vld [vmem:[%s10244_s20 + $0x20] sm:$0xff]  }
0x1ec0   :  { %v9806_v59 = vpop.eup %9805 }
0x1ec1   :  { %v3541_v61 = vadd.f32 1.0, %v9806_v59  ;;  %v3542_v2 = vmul.f32 %v3540_v3, %v3526_v11  ;;  %v9662_v3 = vld [vmem:[%s10254_s4 + $0x20] sm:$0xff]   ;;  %v9663_v59 = vld [vmem:[%s10244_s20 + $0x28] sm:$0xff]  }
0x1ec2   :  { %v9664_v11 = vld [vmem:[%s10254_s4 + $0x28] sm:$0xff]  }
0x1ec3   :  { %v3543_v45 = vmul.f32 %v3541_v61, %v3527_v63 }
0x1ec5   :  { %v3553_v1 = vpack.c.bf16 %v3543_v45, %v3542_v2 }
0x1ec7   :  { %9097 = vmatmul.mubr.msk.bf16.vlgmr.msra.gmra.mrb[96].mxu0 %vm1986_vm8, %v3553_v1 }
0x1ec8   :  { %9120 = vmatprep.mubr.msk.bf16.mxu0 %vm10146_vm1, %v10145_v15  ;;  %9117 = vmatpush3.bf16.msra.mxu0 %v9662_v3 }
0x1ec9   :  { %9118 = vmatprep.subr.bf16.mxu0 %v10145_v15 }
0x1ecc   :  { %9119 = vmatpush3.bf16.msra.mxu0 %v9664_v11 }
0x1ecd   :  { %9130 = vmatprep.subr.bf16.mxu0 %v10145_v15 }
0x1f9a   :  { %v3623_v46 = vpop.f32.mrb[96].mxu0 }
0x1f9b   :  { %v3624_v14 = vadd.f32 %v8196_v21, %v3623_v46  ;;  %v9098_v50 = vpop.f32.mrb[97].mxu0 }
0x1f9c   :  { %v3626_v55 = vpop.f32.mrb[98].mxu0 }
0x1f9d   :  { %v3627_v53 = vadd.f32 %v8196_v21, %v3626_v55  ;;  %v9099_v12 = vpop.f32.mrb[99].mxu0  ;;  %v3630_v57 = vadd.f32 %v3624_v14, %v3454_v25  ;;  %v8205_v14 = vld [vmem:[%s11894_s8 + $0x1] ss:$0 sm:$0xff] }
0x1f9f   :  { %v3636_v60 = vsel %vm267_vm0, %v3630_v57, 0.0  ;;  %v3631_v13 = vadd.f32 %v3627_v53, %v3455_v51 }
0x1fa0   :  { %3637 = vadd.xlane.f32.xlu0 %v3636_v60 }
0x1fa1   :  { %v3639_v17 = vsel %vm267_vm0, %v3631_v13, 0.0 }
0x1fa2   :  { %3640 = vadd.xlane.f32.xlu1 %v3639_v17  ;;  %v8211_v17 = vld [vmem:[%s11877_s9 + $0x2] ss:$0 sm:$0xff] }
0x1fa4   :  { %2048 = vadd.xlane.f32.xlu0 %v2047_v8 }
0x1fa6   :  { %2051 = vadd.xlane.f32.xlu1 %v2050_v18 }
0x202d   :  { %v3638_v20 = vpop.xlane.xlu0 %3637 }
0x202e   :  { %v3642_v24 = vmul.f32 0.03125, %v3638_v20  ;;  %v8229_v20 = vld [vmem:[%s11878_s13 + $0x2] ss:$0 sm:$0xff] }
0x202f   :  { %v3641_v28 = vpop.xlane.xlu1 %3640 }
0x2030   :  { %v3644_v25 = vsub.f32 %v3630_v57, %v3642_v24  ;;  %v3643_v51 = vmul.f32 0.03125, %v3641_v28 }
0x2031   :  { %v2049_v29 = vpop.xlane.xlu0 %2048 }
0x2032   :  { %v3645_v30 = vsub.f32 %v3631_v13, %v3643_v51  ;;  %v2053_v23 = vmul.f32 0.03125, %v2049_v29  ;;  %v3646_v26 = vmul.f32 %v3644_v25, %v3644_v25 }
0x2033   :  { %v2052_v27 = vpop.xlane.xlu1 %2051 }
0x2034   :  { %v2055_v31 = vadd.f32 1e-12, %v2053_v23  ;;  %v2054_v33 = vmul.f32 0.03125, %v2052_v27  ;;  %v3648_v34 = vsel %vm267_vm0, %v3646_v26, 0.0  ;;  %v3647_v37 = vmul.f32 %v3645_v30, %v3645_v30 }
0x2035   :  { %3649 = vadd.xlane.f32.xlu0 %v3648_v34 }
0x2036   :  { %9807 = vrsqrt.f32 %v2055_v31  ;;  %v2056_v40 = vadd.f32 1e-12, %v2054_v33  ;;  %v3651_v41 = vsel %vm267_vm0, %v3647_v37, 0.0 }
0x2037   :  { %3652 = vadd.xlane.f32.xlu1 %v3651_v41 }
0x2038   :  { %9809 = vrsqrt.f32 %v2056_v40 }
0x2040   :  { %v9808_v32 = vpop.eup %9807 }
0x2041   :  { %v2059_v43 = vmul.f32 %v9808_v32, %v2043_v10 }
0x2042   :  { %v9810_v44 = vpop.eup %9809 }
0x2043   :  { %v2067_v36 = vmul.f32 %v8119_v42, %v2059_v43  ;;  %v2060_v47 = vmul.f32 %v9810_v44, %v2044_v56 }
0x2045   :  { %v2068_v49 = vmul.f32 %v8119_v42, %v2060_v47  ;;  %v11071_v54 = vadd.f32 %v8120_v48, %v2067_v36 }
0x2047   :  { %v11073_v35 = vadd.f32 %v8120_v48, %v2068_v49 }
0x2049   :  { %v11077_v6 = vpack.c.bf16 %v11073_v35, %v11071_v54 }
0x204b   :  { %9105 = vmatmul.mubr.msk.bf16.vlgmr.msra.gmra.mrb[104].mxu1 %vm267_vm0, %v11077_v6 }
0x204c   :  { %9112 = vmatprep.mubr.msk.bf16.mxu1 %vm10146_vm1, %v10145_v15  ;;  %9109 = vmatpush3.bf16.msra.mxu1 %v9661_v58 }
0x204d   :  { %9110 = vmatprep.subr.bf16.mxu1 %v10145_v15 }
0x2050   :  { %9111 = vmatpush3.bf16.msra.mxu1 %v9663_v59 }
0x2051   :  { %9124 = vmatprep.subr.bf16.mxu1 %v10145_v15 }
0x20c2   :  { %v3650_v63 = vpop.xlane.xlu0 %3649 }
0x20c3   :  { %v3654_v61 = vmul.f32 0.03125, %v3650_v63 }
0x20c4   :  { %v3653_v2 = vpop.xlane.xlu1 %3652 }
0x20c5   :  { %v3656_v45 = vadd.f32 1e-12, %v3654_v61  ;;  %v3655_v1 = vmul.f32 0.03125, %v3653_v2 }
0x20c7   :  { %9811 = vrsqrt.f32 %v3656_v45  ;;  %v3657_v4 = vadd.f32 1e-12, %v3655_v1 }
0x20c9   :  { %9813 = vrsqrt.f32 %v3657_v4 }
0x20d1   :  { %v9812_v0 = vpop.eup %9811 }
0x20d2   :  { %v3660_v21 = vmul.f32 %v9812_v0, %v3644_v25 }
0x20d3   :  { %v9814_v5 = vpop.eup %9813 }
0x20d4   :  { %v3668_v46 = vmul.f32 %v8204_v52, %v3660_v21  ;;  %v3661_v10 = vmul.f32 %v9814_v5, %v3645_v30 }
0x20d6   :  { %v3669_v50 = vmul.f32 %v8204_v52, %v3661_v10  ;;  %v11093_v55 = vadd.f32 %v8205_v14, %v3668_v46 }
0x20d8   :  { %v11095_v56 = vadd.f32 %v8205_v14, %v3669_v50 }
0x20da   :  { %v11099_v53 = vpack.c.bf16 %v11095_v56, %v11093_v55 }
0x20dc   :  { %9113 = vmatmul.mubr.msk.bf16.vlgmr.msra.gmra.mrb[108].mxu1 %vm267_vm0, %v11099_v53  ;;  %9121 = vmatmul.mubr.msk.bf16.vlgmr.msra.gmra.mrb[100].mxu0 %vm267_vm0, %v11099_v53 }
0x20dd   :  { %9126 = vmatprep.mubr.msk.bf16.mxu1 %vm10146_vm1, %v10145_v15  ;;  %9132 = vmatprep.mubr.msk.bf16.mxu0 %vm10146_vm1, %v10145_v15 }
0x211e   :  { %v3741_v12 = vpop.f32.mrb[104].mxu1 }
0x211f   :  { %v9106_v57 = vpop.f32.mrb[105].mxu1  ;;  %v3742_v25 = vadd.f32 %v8211_v17, %v3741_v12 }
0x2120   :  { %v3744_v60 = vpop.f32.mrb[106].mxu1 }
0x2121   :  { %v9107_v13 = vpop.f32.mrb[107].mxu1  ;;  %v3745_v26 = vadd.f32 %v8211_v17, %v3744_v60  ;;  %v3884_v34 = vmul.f32 0.35355338, %v3742_v25 }
0x2123   :  { %v3885_v41 = vmul.f32 0.35355338, %v3745_v26  ;;  %v11124_v42 = vpack.c.bf16 %v3884_v34, %v3884_v34 }
0x2125   :  { %v11128_v44 = vpack.c.bf16 %v3885_v41, %v3885_v41 }
0x21af   :  { %v3811_v16 = vpop.f32.mrb[108].mxu1  ;;  %v3877_v8 = vpop.f32.mrb[100].mxu0 }
0x21b0   :  { %v3812_v18 = vadd.f32 %v8220_v62, %v3811_v16  ;;  %v9114_v9 = vpop.f32.mrb[109].mxu1  ;;  %v9122_v22 = vpop.f32.mrb[101].mxu0  ;;  %v3878_v27 = vadd.f32 %v8229_v20, %v3877_v8 }
0x21b1   :  { %v3814_v24 = vpop.f32.mrb[110].mxu1  ;;  %v3880_v28 = vpop.f32.mrb[102].mxu0 }
0x21b2   :  { %v11112_v51 = vpack.c.bf16 %v3812_v18, %v3812_v18  ;;  %v3815_v29 = vadd.f32 %v8220_v62, %v3814_v24  ;;  %v9115_v30 = vpop.f32.mrb[111].mxu1  ;;  %v9123_v23 = vpop.f32.mrb[103].mxu0  ;;  %v3881_v37 = vadd.f32 %v8229_v20, %v3880_v28  ;;  %v11121_v32 = vpack.c.bf16 %v3878_v27, %v3878_v27 }
0x21b4   :  { %v11114_v31 = vpack.c.bf16 %v3815_v29, %v3815_v29  ;;  %v3894_v33 = vsel %vm724_vm6, %v11112_v51, 0  ;;  %v11126_v43 = vpack.c.bf16 %v3881_v37, %v3881_v37  ;;  %v4012_v36 = vsel %vm846_vm7, %v11121_v32, 0 }
0x21b5   :  { %9125 = vmatpush3.bf16.xpose.msra.mxu1 %v3894_v33 }
0x21b6   :  { %v3940_v40 = vsel %vm724_vm6, %v11114_v31, 0  ;;  %9136 = vmatprep.subr.bf16.mxu1 %v10145_v15  ;;  %v4058_v47 = vsel %vm846_vm7, %v11126_v43, 0 }
0x21b7   :  { %9131 = vmatpush3.bf16.xpose.msra.mxu0 %v3940_v40 }
0x21b8   :  { %9142 = vmatprep.subr.bf16.mxu0 %v10145_v15 }
0x21bc   :  { %9127 = vmatmul.mubr.msk.bf16.vlgmr.msra.gmra.mrb[112].mxu1 %vm724_vm6, %v11124_v42 }
0x21bd   :  { %9137 = vmatpush3.bf16.msra.mxu1 %v4012_v36  ;;  %9138 = vmatprep.mubr.msk.bf16.mxu1 %vm10146_vm1, %v10145_v15 }
0x21be   :  { %9133 = vmatmul.mubr.msk.bf16.vlgmr.msra.gmra.mrb[104].mxu0 %vm724_vm6, %v11128_v44  ;;  %9148 = vmatprep.subr.bf16.mxu1 %v10145_v15 }
0x21bf   :  { %9143 = vmatpush3.bf16.msra.mxu0 %v4058_v47  ;;  %9144 = vmatprep.mubr.msk.bf16.mxu0 %vm10146_vm1, %v10145_v15 }
0x21c0   :  { %9154 = vmatprep.subr.bf16.mxu0 %v10145_v15 }
0x228f   :  { %v3930_v48 = vpop.f32.mrb[112].mxu1 }
0x2290   :  { %v3931_v49 = vadd.f32 %v3930_v48, %v10835_v7  ;;  %v9128_v58 = vpop.f32.mrb[113].mxu1 }
0x2291   :  { %v3933_v3 = vpop.f32.mrb[114].mxu1  ;;  %v3976_v59 = vpop.f32.mrb[104].mxu0 }
0x2292   :  { %v3977_v11 = vadd.f32 %v3976_v59, %v10856_v19  ;;  %v9129_v63 = vpop.f32.mrb[115].mxu1  ;;  %v9134_v61 = vpop.f32.mrb[105].mxu0  ;;  %v3982_v2 = vsel %vm724_vm6, %v3931_v49, -inf }
0x2293   :  { %v3979_v45 = vpop.f32.mrb[106].mxu0  ;;  %3983 = vmax.xlane.f32.xlu0 %v3982_v2 }
0x2294   :  { %v9135_v1 = vpop.f32.mrb[107].mxu0  ;;  %v3985_v4 = vsel %vm724_vm6, %v3977_v11, -inf }
0x2295   :  { %3986 = vmax.xlane.f32.xlu1 %v3985_v4 }
0x22a6   :  { %4159 = vrot.lane.b32.xlu1 %v11114_v31, %s10149_s21 }
0x2320   :  { %v3984_v0 = vpop.xlane.xlu0 %3983 }
0x2321   :  { %v3988_v52 = vsub.f32 %v3931_v49, %v3984_v0 }
0x2322   :  { %v3987_v21 = vpop.xlane.xlu1 %3986 }
0x2323   :  { %v3990_v5 = vmul.f32 1.442695, %v3988_v52  ;;  %v3989_v46 = vsub.f32 %v3977_v11, %v3987_v21 }
0x2325   :  { %9815 = vpow2.f32 %v3990_v5  ;;  %v3992_v10 = vmul.f32 1.442695, %v3989_v46 }
0x2326   :  { %v4160_v60 = vpop.permute.xlu1 %4159 }
0x2327   :  { %9817 = vpow2.f32 %v3992_v10  ;;  %v4165_v28 = vsel %vm724_vm6, %v4160_v60, 0 }
0x232f   :  { %v9816_v14 = vpop.eup %9815 }
0x2330   :  { %v3994_v50 = vsel %vm724_vm6, %v9816_v14, 0.0 }
0x2331   :  { %v9818_v12 = vpop.eup %9817  ;;  %3995 = vadd.xlane.f32.xlu0 %v3994_v50 }
0x2332   :  { %v3997_v57 = vsel %vm724_vm6, %v9818_v12, 0.0 }
0x2333   :  { %3998 = vadd.xlane.f32.xlu1 %v3997_v57 }
0x2344   :  { %4104 = vrot.lane.b32.xlu1 %v11124_v42, %s10149_s21 }
0x2347   :  { %4107 = vrot.lane.b32.xlu0 %v11112_v51, %s10149_s21 }
0x2348   :  { %4156 = vrot.lane.b32.xlu1 %v11128_v44, %s10149_s21 }
0x23be   :  { %v3996_v13 = vpop.xlane.xlu0 %3995 }
0x23bf   :  { %9819 = vrcp.f32 %v3996_v13 }
0x23c0   :  { %v3999_v62 = vpop.xlane.xlu1 %3998 }
0x23c1   :  { %9821 = vrcp.f32 %v3999_v62 }
0x23c2   :  { %v4108_v18 = vpop.permute.xlu0 %4107 }
0x23c3   :  { %v4113_v20 = vsel %vm724_vm6, %v4108_v18, 0 }
0x23c4   :  { %v4105_v25 = vpop.permute.xlu1 %4104 }
0x23c8   :  { %v4157_v29 = vpop.permute.xlu1 %4156 }
0x23c9   :  { %v9820_v17 = vpop.eup %9819 }
0x23ca   :  { %v4002_v16 = vmul.f32 %v9820_v17, %v9816_v14 }
0x23cb   :  { %v9822_v8 = vpop.eup %9821 }
0x23cc   :  { %v4003_v9 = vmul.f32 %v9822_v8, %v9818_v12  ;;  %v4004_v22 = vpack.c.bf16 %v4002_v16, %v4002_v16  ;;  %v8242_v8 = vld [vmem:[%s11880_s29 + $0x24] sm:$0xf] }
0x23ce   :  { %9139 = vmatmul.mubr.msk.bf16.vlgmr.msra.gmra.mrb[116].mxu1 %vm724_vm6, %v4004_v22  ;;  %v4005_v24 = vpack.c.bf16 %v4003_v9, %v4003_v9  ;;  %v4336_v22 = vsel %vm846_vm7, %v8242_v8, 0 }
0x23cf   :  { %9149 = vmatpush3.bf16.xpose.msra.mxu1 %v4113_v20  ;;  %9150 = vmatprep.mubr.msk.bf16.mxu1 %vm10146_vm1, %v10145_v15 }
0x23d0   :  { %9145 = vmatmul.mubr.msk.bf16.vlgmr.msra.gmra.mrb[108].mxu0 %vm724_vm6, %v4005_v24  ;;  %9160 = vmatprep.subr.bf16.mxu1 %v10145_v15  ;;  %v8237_v24 = vld [vmem:[%s11880_s29 + $0x20] sm:$0xf] }
0x23d1   :  { %9155 = vmatpush3.bf16.xpose.msra.mxu0 %v4165_v28  ;;  %9156 = vmatprep.mubr.msk.bf16.mxu0 %vm10146_vm1, %v10145_v15 }
0x23d2   :  { %9166 = vmatprep.subr.bf16.mxu0 %v10145_v15 }
0x23d6   :  { %9151 = vmatmul.mubr.msk.bf16.vlgmr.msra.gmra.mrb[120].mxu1 %vm724_vm6, %v4105_v25 }
0x23d7   :  { %9162 = vmatprep.mubr.msk.bf16.mxu1 %vm10146_vm1, %v10145_v15 }
0x23d8   :  { %9157 = vmatmul.mubr.msk.bf16.vlgmr.msra.gmra.mrb[112].mxu0 %vm724_vm6, %v4157_v29  ;;  %v4383_v29 = vsel %vm846_vm7, %v8237_v24, 0 }
0x23d9   :  { %9168 = vmatprep.mubr.msk.bf16.mxu0 %vm10146_vm1, %v10145_v15 }
0x24a1   :  { %v11174_v30 = vpop.f32.mrb[116].mxu1 }
0x24a2   :  { %v9140_v23 = vpop.f32.mrb[117].mxu1 }
0x24a3   :  { %v4051_v26 = vpop.f32.mrb[118].mxu1  ;;  %v11176_v27 = vpop.f32.mrb[108].mxu0 }
0x24a4   :  { %v4100_v33 = vpack.c.bf16 %v11176_v27, %v11174_v30  ;;  %v9141_v34 = vpop.f32.mrb[119].mxu1  ;;  %v9146_v37 = vpop.f32.mrb[109].mxu0 }
0x24a5   :  { %v4097_v40 = vpop.f32.mrb[110].mxu0 }
0x24a6   :  { %v9147_v41 = vpop.f32.mrb[111].mxu0 }
0x24a9   :  { %v4149_v36 = vpop.f32.mrb[120].mxu1 }
0x24aa   :  { %v4150_v47 = vadd.f32 %v4149_v36, %v10835_v7  ;;  %v9152_v48 = vpop.f32.mrb[121].mxu1 }
0x24ab   :  { %v4152_v49 = vpop.f32.mrb[122].mxu1  ;;  %v4201_v58 = vpop.f32.mrb[112].mxu0 }
0x24ac   :  { %v4202_v3 = vadd.f32 %v4201_v58, %v10856_v19  ;;  %v9153_v59 = vpop.f32.mrb[123].mxu1  ;;  %v9158_v11 = vpop.f32.mrb[113].mxu0  ;;  %v4207_v63 = vsel %vm724_vm6, %v4150_v47, -inf }
0x24ad   :  { %v4204_v61 = vpop.f32.mrb[114].mxu0  ;;  %4208 = vmax.xlane.f32.xlu0 %v4207_v63 }
0x24ae   :  { %v9159_v2 = vpop.f32.mrb[115].mxu0  ;;  %v4210_v45 = vsel %vm724_vm6, %v4202_v3, -inf }
0x24af   :  { %4211 = vmax.xlane.f32.xlu1 %v4210_v45 }
0x24c0   :  { %4281 = vrot.lane.b32.xlu1 %v11126_v43, %s10149_s21 }
0x24c4   :  { %4428 = vrot.lane.b32.xlu1 %v11112_v51, %s10150_s25 }
0x24c8   :  { %4478 = vrot.lane.b32.xlu1 %v11114_v31, %s10150_s25 }
0x24cc   :  { %4476 = vrot.lane.b32.xlu1 %v11128_v44, %s10150_s25 }
0x253a   :  { %v4209_v1 = vpop.xlane.xlu0 %4208 }
0x253b   :  { %v4213_v4 = vsub.f32 %v4150_v47, %v4209_v1 }
0x253c   :  { %v4212_v0 = vpop.xlane.xlu1 %4211 }
0x253d   :  { %v4215_v52 = vmul.f32 1.442695, %v4213_v4  ;;  %v4214_v21 = vsub.f32 %v4202_v3, %v4212_v0 }
0x253f   :  { %9823 = vpow2.f32 %v4215_v52  ;;  %v4217_v5 = vmul.f32 1.442695, %v4214_v21 }
0x2540   :  { %v4282_v46 = vpop.permute.xlu1 %4281 }
0x2541   :  { %9825 = vpow2.f32 %v4217_v5  ;;  %v4287_v10 = vsel %vm846_vm7, %v4282_v46, 0 }
0x2542   :  { %9167 = vmatpush3.bf16.msra.mxu0 %v4287_v10 }
0x2543   :  { %9178 = vmatprep.subr.bf16.mxu0 %v10145_v15 }
0x2544   :  { %v4429_v23 = vpop.permute.xlu1 %4428 }
0x2545   :  { %v4434_v49 = vsel %vm724_vm6, %v4429_v23, 0 }
0x2548   :  { %v4479_v26 = vpop.permute.xlu1 %4478 }
0x2549   :  { %v9824_v14 = vpop.eup %9823  ;;  %v4484_v34 = vsel %vm724_vm6, %v4479_v26, 0 }
0x254a   :  { %v4219_v50 = vsel %vm724_vm6, %v9824_v14, 0.0 }
0x254b   :  { %v9826_v12 = vpop.eup %9825  ;;  %4220 = vadd.xlane.f32.xlu0 %v4219_v50 }
0x254c   :  { %v4222_v57 = vsel %vm724_vm6, %v9826_v12, 0.0  ;;  %v4477_v37 = vpop.permute.xlu1 %4476 }
0x254f   :  { %4223 = vadd.xlane.f32.xlu0 %v4222_v57 }
0x2565   :  { %4232 = vrot.lane.b32.xlu0 %v11121_v32, %s10149_s21 }
0x2569   :  { %4426 = vrot.lane.b32.xlu0 %v11124_v42, %s10150_s25 }
0x25d8   :  { %v4221_v60 = vpop.xlane.xlu0 %4220 }
0x25d9   :  { %9827 = vrcp.f32 %v4221_v60 }
0x25dc   :  { %v4224_v13 = vpop.xlane.xlu0 %4223 }
0x25dd   :  { %9829 = vrcp.f32 %v4224_v13 }
0x25e0   :  { %v4233_v62 = vpop.permute.xlu0 %4232 }
0x25e1   :  { %v4238_v17 = vsel %vm846_vm7, %v4233_v62, 0 }
0x25e2   :  { %9161 = vmatpush3.bf16.msra.mxu1 %v4238_v17 }
0x25e3   :  { %v9828_v16 = vpop.eup %9827  ;;  %9172 = vmatprep.subr.bf16.mxu1 %v10145_v15 }
0x25e4   :  { %v4227_v18 = vmul.f32 %v9828_v16, %v9824_v14  ;;  %v4427_v11 = vpop.permute.xlu0 %4426 }
0x25e6   :  { %v4229_v9 = vpack.c.bf16 %v4227_v18, %v4227_v18 }
0x25e7   :  { %v9830_v20 = vpop.eup %9829 }
0x25e8   :  { %v4228_v28 = vmul.f32 %v9830_v20, %v9826_v12  ;;  %9163 = vmatmul.mubr.msk.bf16.vlgmr.msra.gmra.mrb[124].mxu1 %vm724_vm6, %v4229_v9 }
0x25e9   :  { %9173 = vmatpush3.bf16.msra.mxu1 %v4336_v22  ;;  %9174 = vmatprep.mubr.msk.bf16.mxu1 %vm10146_vm1, %v10145_v15 }
0x25ea   :  { %v4230_v25 = vpack.c.bf16 %v4228_v28, %v4228_v28  ;;  %9184 = vmatprep.subr.bf16.mxu1 %v10145_v15 }
0x25ec   :  { %9169 = vmatmul.mubr.msk.bf16.vlgmr.msra.gmra.mrb[116].mxu0 %vm724_vm6, %v4230_v25 }
0x25ed   :  { %9179 = vmatpush3.bf16.msra.mxu0 %v4383_v29  ;;  %9180 = vmatprep.mubr.msk.bf16.mxu0 %vm10146_vm1, %v10145_v15 }
0x25ee   :  { %9190 = vmatprep.subr.bf16.mxu0 %v10145_v15 }
0x25f4   :  { %9181 = vmatmul.mubr.msk.bf16.vlgmr.msra.gmra.mrb[120].mxu0 %vm724_vm6, %v4100_v33 }
0x25f5   :  { %9192 = vmatprep.mubr.msk.bf16.mxu0 %vm10146_vm1, %v10145_v15 }
0x25f6   :  { %9191 = vmatpush3.bf16.xpose.msra.mxu0 %v4484_v34 }
0x25f7   :  { %9202 = vmatprep.subr.bf16.mxu0 %v10145_v15 }
0x25fd   :  { %9193 = vmatmul.mubr.msk.bf16.vlgmr.msra.gmra.mrb[124].mxu0 %vm724_vm6, %v4477_v37 }
0x25fe   :  { %9204 = vmatprep.mubr.msk.bf16.mxu0 %vm10146_vm1, %v10145_v15 }
0x26bb   :  { %v4274_v40 = vpop.f32.mrb[124].mxu1 }
0x26bc   :  { %v9164_v41 = vpop.f32.mrb[125].mxu1 }
0x26bd   :  { %v4277_v36 = vpop.f32.mrb[126].mxu1 }
0x26be   :  { %v9165_v30 = vpop.f32.mrb[127].mxu1 }
0x26bf   :  { %v4323_v27 = vpop.f32.mrb[116].mxu0 }
0x26c0   :  { %v4329_v33 = vpack.c.bf16 %v4323_v27, %v4274_v40  ;;  %v9170_v47 = vpop.f32.mrb[117].mxu0 }
0x26c1   :  { %v4326_v48 = vpop.f32.mrb[118].mxu0 }
0x26c2   :  { %v9171_v58 = vpop.f32.mrb[119].mxu0  ;;  %9175 = vmatmul.mubr.msk.bf16.vlgmr.msra.gmra.mrb[128].mxu1 %vm724_vm6, %v4329_v33 }
0x26c3   :  { %9185 = vmatpush3.bf16.xpose.msra.mxu1 %v4434_v49  ;;  %9186 = vmatprep.mubr.msk.bf16.mxu1 %vm10146_vm1, %v10145_v15 }
0x26c4   :  { %9196 = vmatprep.subr.bf16.mxu1 %v10145_v15 }
0x26c7   :  { %v4419_v3 = vpop.f32.mrb[120].mxu0 }
0x26c8   :  { %v9182_v59 = vpop.f32.mrb[121].mxu0 }
0x26c9   :  { %v4422_v63 = vpop.f32.mrb[122].mxu0  ;;  %v8249_v59 = vld [vmem:[%s11880_s29 + $0x28] sm:$0xf] }
0x26ca   :  { %v9183_v61 = vpop.f32.mrb[123].mxu0  ;;  %9187 = vmatmul.mubr.msk.bf16.vlgmr.msra.gmra.mrb[132].mxu1 %vm724_vm6, %v4427_v11  ;;  %v4653_v11 = vsel %vm846_vm7, %v8249_v59, 0 }
0x26cb   :  { %9198 = vmatprep.mubr.msk.bf16.mxu1 %vm10146_vm1, %v10145_v15 }
0x26d0   :  { %v4520_v2 = vpop.f32.mrb[124].mxu0 }
0x26d1   :  { %v4521_v45 = vadd.f32 %v4520_v2, %v10856_v19  ;;  %v9194_v1 = vpop.f32.mrb[125].mxu0 }
0x26d2   :  { %v4523_v4 = vpop.f32.mrb[126].mxu0 }
0x26d3   :  { %v9195_v0 = vpop.f32.mrb[127].mxu0  ;;  %v4529_v52 = vsel %vm724_vm6, %v4521_v45, -inf }
0x26d4   :  { %4530 = vmax.xlane.f32.xlu1 %v4529_v52 }
0x26e5   :  { %4598 = vrot.lane.b32.xlu1 %v11126_v43, %s10150_s25 }
0x26e9   :  { %4700 = vrot.lane.b32.xlu1 %v11112_v51, %s10151_s3 }
0x26ed   :  { %4750 = vrot.lane.b32.xlu1 %v11114_v31, %s10151_s3 }
0x26f1   :  { %4748 = vrot.lane.b32.xlu1 %v11128_v44, %s10151_s3 }
0x2761   :  { %v4531_v21 = vpop.xlane.xlu1 %4530 }
0x2762   :  { %v4533_v10 = vsub.f32 %v4521_v45, %v4531_v21 }
0x2764   :  { %v4536_v14 = vmul.f32 1.442695, %v4533_v10 }
0x2765   :  { %v4599_v5 = vpop.permute.xlu1 %4598 }
0x2766   :  { %v4604_v46 = vsel %vm846_vm7, %v4599_v5, 0  ;;  %9831 = vpow2.f32 %v4536_v14 }
0x2767   :  { %9203 = vmatpush3.bf16.msra.mxu0 %v4604_v46 }
0x2768   :  { %9214 = vmatprep.subr.bf16.mxu0 %v10145_v15 }
0x2769   :  { %v4701_v34 = vpop.permute.xlu1 %4700 }
0x276a   :  { %v4706_v40 = vsel %vm724_vm6, %v4701_v34, 0 }
0x276d   :  { %v4751_v0 = vpop.permute.xlu1 %4750 }
0x276e   :  { %v4756_v10 = vsel %vm724_vm6, %v4751_v0, 0 }
0x2770   :  { %v9832_v18 = vpop.eup %9831 }
0x2771   :  { %v4541_v9 = vsel %vm724_vm6, %v9832_v18, 0.0 }
0x2795   :  { %v4372_v50 = vpop.f32.mrb[128].mxu1 }
0x2796   :  { %v11245_v12 = vadd.f32 %v4419_v3, %v4372_v50  ;;  %v9176_v57 = vpop.f32.mrb[129].mxu1 }
0x2797   :  { %v4375_v51 = vpop.f32.mrb[130].mxu1 }
0x2798   :  { %v11247_v60 = vadd.f32 %v4422_v63, %v4375_v51  ;;  %v9177_v31 = vpop.f32.mrb[131].mxu1 }
0x279d   :  { %v4470_v13 = vpop.f32.mrb[132].mxu1 }
0x279e   :  { %v4471_v44 = vadd.f32 %v4470_v13, %v10835_v7  ;;  %v9188_v62 = vpop.f32.mrb[133].mxu1 }
0x279f   :  { %v4473_v17 = vpop.f32.mrb[134].mxu1 }
0x27a0   :  { %v9189_v16 = vpop.f32.mrb[135].mxu1  ;;  %v4526_v8 = vsel %vm724_vm6, %v4471_v44, -inf }
0x27a1   :  { %4527 = vmax.xlane.f32.xlu0 %v4526_v8 }
0x27a5   :  { %4542 = vadd.xlane.f32.xlu0 %v4541_v9 }
0x282e   :  { %v4528_v22 = vpop.xlane.xlu0 %4527 }
0x282f   :  { %v4532_v20 = vsub.f32 %v4471_v44, %v4528_v22 }
0x2831   :  { %v4534_v24 = vmul.f32 1.442695, %v4532_v20 }
0x2832   :  { %v4543_v28 = vpop.xlane.xlu0 %4542 }
0x2833   :  { %9833 = vpow2.f32 %v4534_v24 }
0x2834   :  { %9835 = vrcp.f32 %v4543_v28 }
0x283d   :  { %v9834_v25 = vpop.eup %9833 }
0x283e   :  { %v9836_v29 = vpop.eup %9835  ;;  %v4538_v23 = vsel %vm724_vm6, %v9834_v25, 0.0 }
0x283f   :  { %v4547_v26 = vmul.f32 %v9836_v29, %v9832_v18  ;;  %4539 = vadd.xlane.f32.xlu0 %v4538_v23 }
0x2841   :  { %v4549_v37 = vpack.c.bf16 %v4547_v26, %v4547_v26 }
0x2843   :  { %9205 = vmatmul.mubr.msk.bf16.vlgmr.msra.gmra.mrb[128].mxu0 %vm724_vm6, %v4549_v37 }
0x2844   :  { %9215 = vmatpush3.bf16.xpose.msra.mxu0 %v4706_v40  ;;  %9216 = vmatprep.mubr.msk.bf16.mxu0 %vm10146_vm1, %v10145_v15 }
0x2845   :  { %9226 = vmatprep.subr.bf16.mxu0 %v10145_v15 }
0x2855   :  { %4550 = vrot.lane.b32.xlu0 %v11121_v32, %s10150_s25 }
0x2859   :  { %4698 = vrot.lane.b32.xlu0 %v11124_v42, %s10151_s3 }
0x28cc   :  { %v4540_v41 = vpop.xlane.xlu0 %4539 }
0x28cd   :  { %9837 = vrcp.f32 %v4540_v41 }
0x28d0   :  { %v4551_v36 = vpop.permute.xlu0 %4550 }
0x28d1   :  { %v4556_v30 = vsel %vm846_vm7, %v4551_v36, 0 }
0x28d2   :  { %9197 = vmatpush3.bf16.msra.mxu1 %v4556_v30 }
0x28d3   :  { %9208 = vmatprep.subr.bf16.mxu1 %v10145_v15 }
0x28d4   :  { %v4699_v27 = vpop.permute.xlu0 %4698 }
0x28d5   :  { %9217 = vmatmul.mubr.msk.bf16.vlgmr.msra.gmra.mrb[132].mxu0 %vm724_vm6, %v4699_v27 }
0x28d6   :  { %9228 = vmatprep.mubr.msk.bf16.mxu0 %vm10146_vm1, %v10145_v15 }
0x28d7   :  { %v9838_v33 = vpop.eup %9837 }
0x28d8   :  { %v4546_v47 = vmul.f32 %v9838_v33, %v9834_v25 }
0x28da   :  { %v4548_v48 = vpack.c.bf16 %v4546_v47, %v4546_v47 }
0x28dc   :  { %9199 = vmatmul.mubr.msk.bf16.vlgmr.msra.gmra.mrb[136].mxu1 %vm724_vm6, %v4548_v48  ;;  %v8255_v48 = vld [vmem:[%s11880_s29 + $0x2c] sm:$0xf] }
0x28dd   :  { %9210 = vmatprep.mubr.msk.bf16.mxu1 %vm10146_vm1, %v10145_v15  ;;  %9209 = vmatpush3.bf16.msra.mxu1 %v4653_v11 }
0x28de   :  { %9220 = vmatprep.subr.bf16.mxu1 %v10145_v15 }
0x2916   :  { %v4640_v42 = vpop.f32.mrb[128].mxu0 }
0x2917   :  { %v9206_v49 = vpop.f32.mrb[129].mxu0 }
0x2918   :  { %v4643_v58 = vpop.f32.mrb[130].mxu0 }
0x2919   :  { %v9207_v3 = vpop.f32.mrb[131].mxu0 }
0x29a8   :  { %v4742_v63 = vpop.f32.mrb[132].mxu0 }
0x29a9   :  { %v4743_v61 = vadd.f32 %v4742_v63, %v10835_v7  ;;  %v9218_v2 = vpop.f32.mrb[133].mxu0  ;;  %v4749_v7 = vpop.permute.xlu1 %4748 }
0x29aa   :  { %v4745_v45 = vpop.f32.mrb[134].mxu0 }
0x29ab   :  { %v9219_v1 = vpop.f32.mrb[135].mxu0  ;;  %v4798_v4 = vsel %vm724_vm6, %v4743_v61, -inf }
0x29ac   :  { %4799 = vmax.xlane.f32.xlu0 %v4798_v4  ;;  %v8258_v4 = vld [vmem:[%s11883_s26 + $0x2] ss:$0 sm:$0xff] }
0x29af   :  { %v4592_v52 = vpop.f32.mrb[136].mxu1 }
0x29b0   :  { %v4646_v21 = vpack.c.bf16 %v4640_v42, %v4592_v52  ;;  %v9200_v5 = vpop.f32.mrb[137].mxu1  ;;  %v4925_v42 = vsel %vm846_vm7, %v8255_v48, 0  ;;  %v9671_v48 = vld [vmem:[%s11889_s10 + $0x40] sm:$0xff]  }
0x29b1   :  { %v4595_v46 = vpop.f32.mrb[138].mxu1 }
0x29b2   :  { %v9201_v14 = vpop.f32.mrb[139].mxu1  ;;  %9211 = vmatmul.mubr.msk.bf16.vlgmr.msra.gmra.mrb[140].mxu1 %vm724_vm6, %v4646_v21 }
0x29b3   :  { %9221 = vmatpush3.bf16.xpose.msra.mxu1 %v4756_v10  ;;  %9222 = vmatprep.mubr.msk.bf16.mxu1 %vm10146_vm1, %v10145_v15 }
0x29b4   :  { %9232 = vmatprep.subr.bf16.mxu1 %v10145_v15 }
0x29ba   :  { %9223 = vmatmul.mubr.msk.bf16.vlgmr.msra.gmra.mrb[144].mxu1 %vm724_vm6, %v4749_v7 }
0x29bb   :  { %9234 = vmatprep.mubr.msk.bf16.mxu1 %vm10146_vm1, %v10145_v15 }
0x2a39   :  { %v4800_v50 = vpop.xlane.xlu0 %4799 }
0x2a3a   :  { %v4804_v57 = vsub.f32 %v4743_v61, %v4800_v50 }
0x2a3c   :  { %v4806_v51 = vmul.f32 1.442695, %v4804_v57 }
0x2a3e   :  { %9839 = vpow2.f32 %v4806_v51 }
0x2a48   :  { %v9840_v31 = vpop.eup %9839 }
0x2a49   :  { %v4810_v13 = vsel %vm724_vm6, %v9840_v31, 0.0 }
0x2a4a   :  { %4811 = vadd.xlane.f32.xlu0 %v4810_v13 }
0x2a85   :  { %v4689_v44 = vpop.f32.mrb[140].mxu1 }
0x2a86   :  { %v4696_v62 = vadd.f32 %v4689_v44, %v11245_v12  ;;  %v9212_v17 = vpop.f32.mrb[141].mxu1 }
0x2a87   :  { %v4692_v16 = vpop.f32.mrb[142].mxu1 }
0x2a88   :  { %v4697_v8 = vadd.f32 %v4692_v16, %v11247_v60  ;;  %v9213_v18 = vpop.f32.mrb[143].mxu1 }
0x2a8d   :  { %v4792_v9 = vpop.f32.mrb[144].mxu1 }
0x2a8e   :  { %v4793_v22 = vadd.f32 %v4792_v9, %v10856_v19  ;;  %v9224_v20 = vpop.f32.mrb[145].mxu1 }
0x2a8f   :  { %v4795_v24 = vpop.f32.mrb[146].mxu1 }
0x2a90   :  { %v9225_v28 = vpop.f32.mrb[147].mxu1  ;;  %v4801_v25 = vsel %vm724_vm6, %v4793_v22, -inf }
0x2a91   :  { %4802 = vmax.xlane.f32.xlu1 %v4801_v25 }
0x2aa2   :  { %4870 = vrot.lane.b32.xlu1 %v11126_v43, %s10151_s3 }
0x2ad7   :  { %v4812_v37 = vpop.xlane.xlu0 %4811 }
0x2b1e   :  { %v4803_v29 = vpop.xlane.xlu1 %4802 }
0x2b1f   :  { %v4805_v23 = vsub.f32 %v4793_v22, %v4803_v29  ;;  %v9666_v22 = vld [vmem:[%s11884_s28 + $0x28] sm:$0xff]  }
0x2b21   :  { %v4808_v12 = vmul.f32 1.442695, %v4805_v23 }
0x2b22   :  { %v4871_v26 = vpop.permute.xlu1 %4870 }
0x2b23   :  { %9841 = vpow2.f32 %v4808_v12  ;;  %v4876_v60 = vsel %vm846_vm7, %v4871_v26, 0  ;;  %v8261_v26 = vld [vmem:[%s11885_s1 + $0x2] ss:$0 sm:$0xff] }
0x2b24   :  { %9233 = vmatpush3.bf16.msra.mxu1 %v4876_v60  ;;  %9843 = vrcp.f32 %v4812_v37 }
0x2b25   :  { %9244 = vmatprep.subr.bf16.mxu1 %v10145_v15 }
0x2b2d   :  { %v9842_v19 = vpop.eup %9841 }
0x2b2e   :  { %v4813_v34 = vsel %vm724_vm6, %v9842_v19, 0.0  ;;  %v9844_v43 = vpop.eup %9843 }
0x2b2f   :  { %4814 = vadd.xlane.f32.xlu0 %v4813_v34  ;;  %v4818_v41 = vmul.f32 %v9844_v43, %v9840_v31  ;;  %v8262_v43 = vld [vmem:[%s11886_s2 + $0x2] ss:$0 sm:$0xff] }
0x2b31   :  { %v4820_v27 = vpack.c.bf16 %v4818_v41, %v4818_v41 }
0x2b45   :  { %4822 = vrot.lane.b32.xlu0 %v11121_v32, %s10151_s3 }
0x2bbc   :  { %v4815_v40 = vpop.xlane.xlu0 %4814 }
0x2bbd   :  { %9845 = vrcp.f32 %v4815_v40 }
0x2bc0   :  { %v4823_v36 = vpop.permute.xlu0 %4822 }
0x2bc1   :  { %v4828_v30 = vsel %vm846_vm7, %v4823_v36, 0 }
0x2bc2   :  { %9227 = vmatpush3.bf16.msra.mxu0 %v4828_v30  ;;  %v9667_v30 = vld [vmem:[%s10234_s6 + $0x30] sm:$0xff]  }
0x2bc3   :  { %9238 = vmatprep.subr.bf16.mxu0 %v10145_v15 }
0x2bc5   :  { %9229 = vmatmul.mubr.msk.bf16.vlgmr.msra.gmra.mrb[136].mxu0 %vm724_vm6, %v4820_v27 }
0x2bc6   :  { %9240 = vmatprep.mubr.msk.bf16.mxu0 %vm10146_vm1, %v10145_v15  ;;  %9239 = vmatpush3.bf16.msra.mxu0 %v4925_v42  ;;  %v9673_v42 = vld [vmem:[%s11889_s10 + $0x50] sm:$0xff]  }
0x2bc7   :  { %v9846_v32 = vpop.eup %9845  ;;  %9252 = vmatprep.subr.bf16.mxu0 %v10145_v15 }
0x2bc8   :  { %v4819_v33 = vmul.f32 %v9846_v32, %v9842_v19  ;;  %v9668_v32 = vld [vmem:[%s10234_s6 + $0x38] sm:$0xff]   ;;  %s11895_s6 = sld [smem:[#allocation38_spill]] }
0x2bca   :  { %v4821_v47 = vpack.c.bf16 %v4819_v33, %v4819_v33  ;;  %v9669_v33 = vld [vmem:[%s10244_s20 + $0x30] sm:$0xff]  }
0x2bcc   :  { %9235 = vmatmul.mubr.msk.bf16.vlgmr.msra.gmra.mrb[148].mxu1 %vm724_vm6, %v4821_v47  ;;  %v9670_v47 = vld [vmem:[%s10244_s20 + $0x38] sm:$0xff]   ;;  %s11896_s20 = sld [smem:[#allocation40_spill]] }
0x2bcd   :  { %9248 = vmatprep.mubr.msk.bf16.mxu1 %vm10146_vm1, %v10145_v15 }
0x2c98   :  { %v4864_v49 = vpop.f32.mrb[136].mxu0 }
0x2c99   :  { %v9230_v58 = vpop.f32.mrb[137].mxu0 }
0x2c9a   :  { %v4867_v3 = vpop.f32.mrb[138].mxu0  ;;  %v8268_v58 = vld [vmem:[%s11890_s11 + $0x2] ss:$0 sm:$0xff] }
0x2c9b   :  { %v9231_v59 = vpop.f32.mrb[139].mxu0 }
0x2c9f   :  { %v4912_v11 = vpop.f32.mrb[148].mxu1 }
0x2ca0   :  { %v4918_v63 = vpack.c.bf16 %v4912_v11, %v4864_v49  ;;  %v9236_v61 = vpop.f32.mrb[149].mxu1  ;;  %v9674_v49 = vld [vmem:[%s11889_s10 + $0x58] sm:$0xff]  }
0x2ca1   :  { %v4915_v2 = vpop.f32.mrb[150].mxu1 }
0x2ca2   :  { %v9237_v45 = vpop.f32.mrb[151].mxu1  ;;  %9241 = vmatmul.mubr.msk.bf16.vlgmr.msra.gmra.mrb[140].mxu0 %vm724_vm6, %v4918_v63 }
0x2ca3   :  { %9260 = vmatprep.mubr.msk.bf16.mxu0 %vm10146_vm1, %v10145_v15  ;;  %9253 = vmatpush3.bf16.msra.mxu0 %v9671_v48 }
0x2ca4   :  { %9254 = vmatprep.subr.bf16.mxu0 %v10145_v15 }
0x2d75   :  { %v4961_v1 = vpop.f32.mrb[140].mxu0 }
0x2d76   :  { %v4968_v0 = vadd.f32 %v4961_v1, %v4696_v62  ;;  %v9242_v52 = vpop.f32.mrb[141].mxu0 }
0x2d77   :  { %v4964_v21 = vpop.f32.mrb[142].mxu0 }
0x2d78   :  { %v4978_v5 = vadd.f32 %v8258_v4, %v4968_v0  ;;  %v4969_v46 = vadd.f32 %v4964_v21, %v4697_v8  ;;  %v9243_v10 = vpop.f32.mrb[143].mxu0 }
0x2d7a   :  { %v4979_v14 = vadd.f32 %v8258_v4, %v4969_v46  ;;  %v4980_v7 = vadd.f32 %v4978_v5, %v11071_v54 }
0x2d7c   :  { %v4986_v50 = vsel %vm267_vm0, %v4980_v7, 0.0  ;;  %v4981_v57 = vadd.f32 %v4979_v14, %v11073_v35  ;;  %v9665_v35 = vld [vmem:[%s11884_s28 + $0x20] sm:$0xff]  }
0x2d7d   :  { %4987 = vadd.xlane.f32.xlu1 %v4986_v50  ;;  %9245 = vmatpush3.bf16.msra.mxu1 %v9665_v35 }
0x2d7e   :  { %v4989_v51 = vsel %vm267_vm0, %v4981_v57, 0.0  ;;  %9246 = vmatprep.subr.bf16.mxu1 %v10145_v15 }
0x2d7f   :  { %4990 = vadd.xlane.f32.xlu0 %v4989_v51 }
0x2d81   :  { %9247 = vmatpush3.bf16.msra.mxu1 %v9666_v22 }
0x2d82   :  { %9264 = vmatprep.subr.bf16.mxu1 %v10145_v15 }
0x2e0a   :  { %v4988_v31 = vpop.xlane.xlu1 %4987 }
0x2e0b   :  { %v4992_v13 = vmul.f32 0.03125, %v4988_v31  ;;  %v8305_v31 = vld [vmem:[%s11876_s5 + $0x3] ss:$0 sm:$0xff]  ;;  %s10152_s5 = smov 32  }
0x2e0c   :  { %v4991_v44 = vpop.xlane.xlu0 %4990 }
0x2e0d   :  { %v4994_v62 = vsub.f32 %v4980_v7, %v4992_v13  ;;  %v4993_v17 = vmul.f32 0.03125, %v4991_v44  ;;  %v8296_v13 = vld [vmem:[%s11877_s9 + $0x3] ss:$0 sm:$0xff]  ;;  %s11900_s9 = sld [smem:[#allocation42_spill]] }
0x2e0f   :  { %v4995_v16 = vsub.f32 %v4981_v57, %v4993_v17  ;;  %v4996_v8 = vmul.f32 %v4994_v62, %v4994_v62 }
0x2e11   :  { %v4998_v18 = vsel %vm267_vm0, %v4996_v8, 0.0  ;;  %v4997_v54 = vmul.f32 %v4995_v16, %v4995_v16 }
0x2e12   :  { %4999 = vadd.xlane.f32.xlu0 %v4998_v18 }
0x2e13   :  { %v5001_v9 = vsel %vm267_vm0, %v4997_v54, 0.0 }
0x2e14   :  { %5002 = vadd.xlane.f32.xlu1 %v5001_v9 }
0x2e9f   :  { %v5000_v20 = vpop.xlane.xlu0 %4999 }
0x2ea0   :  { %v5004_v24 = vmul.f32 0.03125, %v5000_v20 }
0x2ea1   :  { %v5003_v28 = vpop.xlane.xlu1 %5002 }
0x2ea2   :  { %v5006_v25 = vadd.f32 1e-12, %v5004_v24  ;;  %v5005_v29 = vmul.f32 0.03125, %v5003_v28 }
0x2ea4   :  { %9847 = vrsqrt.f32 %v5006_v25  ;;  %v5007_v23 = vadd.f32 1e-12, %v5005_v29 }
0x2ea6   :  { %9849 = vrsqrt.f32 %v5007_v23 }
0x2eae   :  { %v9848_v12 = vpop.eup %9847 }
0x2eaf   :  { %v5010_v60 = vmul.f32 %v9848_v12, %v4994_v62 }
0x2eb0   :  { %v9850_v19 = vpop.eup %9849 }
0x2eb1   :  { %v5018_v34 = vmul.f32 %v8261_v26, %v5010_v60  ;;  %v5011_v37 = vmul.f32 %v9850_v19, %v4995_v16  ;;  %v9675_v60 = vld [vmem:[%s10254_s4 + $0x30] sm:$0xff]  }
0x2eb3   :  { %v5019_v40 = vmul.f32 %v8261_v26, %v5011_v37  ;;  %v11322_v41 = vadd.f32 %v8262_v43, %v5018_v34  ;;  %v9676_v34 = vld [vmem:[%s10254_s4 + $0x38] sm:$0xff]   ;;  %s11897_s4 = sld [smem:[#allocation39_spill]] }
0x2eb5   :  { %v11324_v36 = vadd.f32 %v8262_v43, %v5019_v40 }
0x2eb7   :  { %v5033_v27 = vpack.c.bf16 %v11324_v36, %v11322_v41 }
0x2eb9   :  { %9249 = vmatmul.mubr.msk.bf16.vlgmr.msra.gmra.mrb[152].mxu1 %vm267_vm0, %v5033_v27 }
0x2eba   :  { %9265 = vmatpush3.bf16.msra.mxu1 %v9667_v30  ;;  %9268 = vmatprep.mubr.msk.bf16.mxu1 %vm10146_vm1, %v10145_v15 }
0x2ebb   :  { %9266 = vmatprep.subr.bf16.mxu1 %v10145_v15 }
0x2ebe   :  { %9267 = vmatpush3.bf16.msra.mxu1 %v9668_v32 }
0x2ebf   :  { %9272 = vmatprep.subr.bf16.mxu1 %v10145_v15 }
0x2ec1   :  { %9269 = vmatmul.mubr.msk.bf16.vlgmr.msra.gmra.mrb[156].mxu1 %vm267_vm0, %v11099_v53  ;;  %v9672_v53 = vld [vmem:[%s11889_s10 + $0x48] sm:$0xff]  }
0x2ec2   :  { %9273 = vmatpush3.bf16.msra.mxu1 %v9669_v33  ;;  %9276 = vmatprep.mubr.msk.bf16.mxu1 %vm10146_vm1, %v10145_v15 }
0x2ec3   :  { %9274 = vmatprep.subr.bf16.mxu1 %v10145_v15  ;;  %9255 = vmatpush3.bf16.msra.mxu0 %v9672_v53 }
0x2ec4   :  { %9256 = vmatprep.subr.bf16.mxu0 %v10145_v15 }
0x2ec6   :  { %9275 = vmatpush3.bf16.msra.mxu1 %v9670_v47 }
0x2ec7   :  { %9288 = vmatprep.subr.bf16.mxu1 %v10145_v15  ;;  %9257 = vmatpush3.bf16.msra.mxu0 %v9673_v42 }
0x2ec8   :  { %9258 = vmatprep.subr.bf16.mxu0 %v10145_v15 }
0x2ec9   :  { %9277 = vmatmul.mubr.msk.bf16.vlgmr.msra.gmra.mrb[160].mxu1 %vm267_vm0, %v11077_v6 }
0x2eca   :  { %9290 = vmatprep.mubr.msk.bf16.mxu1 %vm10146_vm1, %v10145_v15 }
0x2ecb   :  { %9259 = vmatpush3.bf16.msra.mxu0 %v9674_v49 }
0x2ecc   :  { %9280 = vmatprep.subr.bf16.mxu0 %v10145_v15 }
0x2f8c   :  { %v5091_v3 = vpop.f32.mrb[152].mxu1 }
0x2f8d   :  { %v5092_v59 = vadd.f32 %v8268_v58, %v5091_v3  ;;  %v9250_v11 = vpop.f32.mrb[153].mxu1 }
0x2f8e   :  { %v5094_v63 = vpop.f32.mrb[154].mxu1  ;;  %v8314_v11 = vld [vmem:[%s11878_s13 + $0x3] ss:$0 sm:$0xff]  ;;  %s11901_s13 = sld [smem:[#allocation43_spill]] }
0x2f8f   :  { %v5100_v61 = vmul.f32 0.044715, %v5092_v59  ;;  %v5095_v2 = vadd.f32 %v8268_v58, %v5094_v63  ;;  %v9251_v45 = vpop.f32.mrb[155].mxu1  ;;  %v5098_v28 = vmul.f32 0.5, %v5092_v59 }
0x2f91   :  { %v5102_v1 = vmul.f32 %v5100_v61, %v5092_v59  ;;  %v5101_v4 = vmul.f32 0.044715, %v5095_v2  ;;  %v5099_v25 = vmul.f32 0.5, %v5095_v2 }
0x2f93   :  { %v5104_v0 = vmul.f32 %v5102_v1, %v5092_v59  ;;  %v5103_v52 = vmul.f32 %v5101_v4, %v5095_v2 }
0x2f94   :  { %v5309_v21 = vpop.f32.mrb[156].mxu1 }
0x2f95   :  { %v5106_v5 = vadd.f32 %v5104_v0, %v5092_v59  ;;  %v5105_v46 = vmul.f32 %v5103_v52, %v5095_v2  ;;  %v9270_v10 = vpop.f32.mrb[157].mxu1  ;;  %v5310_v8 = vadd.f32 %v8296_v13, %v5309_v21 }
0x2f96   :  { %v5312_v14 = vpop.f32.mrb[158].mxu1 }
0x2f97   :  { %v5108_v7 = vmul.f32 0.7978846, %v5106_v5  ;;  %v5107_v50 = vadd.f32 %v5105_v46, %v5095_v2  ;;  %v9271_v57 = vpop.f32.mrb[159].mxu1  ;;  %v5448_v22 = vmul.f32 0.35355338, %v5310_v8  ;;  %v5313_v40 = vadd.f32 %v8296_v13, %v5312_v14 }
0x2f99   :  { %9851 = vtanh.f32 %v5108_v7  ;;  %v5109_v51 = vmul.f32 0.7978846, %v5107_v50  ;;  %v11363_v23 = vpack.c.bf16 %v5448_v22, %v5448_v22  ;;  %v5449_v27 = vmul.f32 0.35355338, %v5313_v40 }
0x2f9b   :  { %9853 = vtanh.f32 %v5109_v51  ;;  %v11385_v32 = vpack.c.bf16 %v5449_v27, %v5449_v27 }
0x2f9c   :  { %v5375_v44 = vpop.f32.mrb[160].mxu1 }
0x2f9d   :  { %v5376_v62 = vadd.f32 %v8305_v31, %v5375_v44  ;;  %v9278_v17 = vpop.f32.mrb[161].mxu1 }
0x2f9e   :  { %v5378_v16 = vpop.f32.mrb[162].mxu1 }
0x2f9f   :  { %v11358_v18 = vpack.c.bf16 %v5376_v62, %v5376_v62  ;;  %v9279_v54 = vpop.f32.mrb[163].mxu1  ;;  %v5379_v37 = vadd.f32 %v8305_v31, %v5378_v16 }
0x2fa1   :  { %v5458_v9 = vsel %vm724_vm6, %v11358_v18, 0  ;;  %v11378_v43 = vpack.c.bf16 %v5379_v37, %v5379_v37 }
0x2fa2   :  { %9289 = vmatpush3.bf16.xpose.msra.mxu1 %v5458_v9 }
0x2fa3   :  { %v9852_v35 = vpop.eup %9851  ;;  %9300 = vmatprep.subr.bf16.mxu1 %v10145_v15  ;;  %v5504_v30 = vsel %vm724_vm6, %v11378_v43, 0 }
0x2fa4   :  { %v5112_v20 = vadd.f32 1.0, %v9852_v35 }
0x2fa5   :  { %v9854_v24 = vpop.eup %9853 }
0x2fa6   :  { %v5113_v29 = vadd.f32 1.0, %v9854_v24  ;;  %v5114_v12 = vmul.f32 %v5112_v20, %v5098_v28 }
0x2fa8   :  { %v5115_v26 = vmul.f32 %v5113_v29, %v5099_v25 }
0x2fa9   :  { %9291 = vmatmul.mubr.msk.bf16.vlgmr.msra.gmra.mrb[164].mxu1 %vm724_vm6, %v11363_v23 }
0x2faa   :  { %v5125_v19 = vpack.c.bf16 %v5115_v26, %v5114_v12  ;;  %9302 = vmatprep.mubr.msk.bf16.mxu1 %vm10146_vm1, %v10145_v15 }
0x2fac   :  { %9261 = vmatmul.mubr.msk.bf16.vlgmr.msra.gmra.mrb[144].mxu0 %vm1986_vm8, %v5125_v19 }
0x2fad   :  { %9281 = vmatpush3.bf16.msra.mxu0 %v9675_v60  ;;  %9284 = vmatprep.mubr.msk.bf16.mxu0 %vm10146_vm1, %v10145_v15 }
0x2fae   :  { %9282 = vmatprep.subr.bf16.mxu0 %v10145_v15 }
0x2fb1   :  { %9283 = vmatpush3.bf16.msra.mxu0 %v9676_v34 }
0x2fb2   :  { %9294 = vmatprep.subr.bf16.mxu0 %v10145_v15 }
0x2fb4   :  { %9285 = vmatmul.mubr.msk.bf16.vlgmr.msra.gmra.mrb[148].mxu0 %vm267_vm0, %v11077_v6 }
0x2fb5   :  { %9296 = vmatprep.mubr.msk.bf16.mxu0 %vm10146_vm1, %v10145_v15 }
0x2fba   :  { %9295 = vmatpush3.bf16.xpose.msra.mxu0 %v5504_v30 }
0x2fbb   :  { %9306 = vmatprep.subr.bf16.mxu0 %v10145_v15 }
0x2fc1   :  { %9297 = vmatmul.mubr.msk.bf16.vlgmr.msra.gmra.mrb[152].mxu0 %vm724_vm6, %v11385_v32 }
0x2fc2   :  { %9308 = vmatprep.mubr.msk.bf16.mxu0 %vm10146_vm1, %v10145_v15 }
0x307c   :  { %v5494_v6 = vpop.f32.mrb[164].mxu1 }
0x307d   :  { %v5495_v33 = vadd.f32 %v5494_v6, %v10558_v38  ;;  %v9292_v47 = vpop.f32.mrb[165].mxu1 }
0x307e   :  { %v5497_v48 = vpop.f32.mrb[166].mxu1 }
0x307f   :  { %v11392_v53 = vpop.f32.mrb[144].mxu0  ;;  %v9293_v42 = vpop.f32.mrb[167].mxu1  ;;  %v5546_v49 = vsel %vm724_vm6, %v5495_v33, -inf }
0x3080   :  { %v9262_v58 = vpop.f32.mrb[145].mxu0  ;;  %5547 = vmax.xlane.f32.xlu0 %v5546_v49 }
0x3081   :  { %v11395_v3 = vpop.f32.mrb[146].mxu0 }
0x3082   :  { %v9263_v59 = vpop.f32.mrb[147].mxu0 }
0x3087   :  { %v5441_v63 = vpop.f32.mrb[148].mxu0 }
0x3088   :  { %v5442_v61 = vadd.f32 %v8314_v11, %v5441_v63  ;;  %v9286_v2 = vpop.f32.mrb[149].mxu0 }
0x3089   :  { %v5444_v45 = vpop.f32.mrb[150].mxu0 }
0x308a   :  { %v11398_v1 = vpack.c.bf16 %v5442_v61, %v5442_v61  ;;  %v5445_v4 = vadd.f32 %v8314_v11, %v5444_v45  ;;  %v9287_v0 = vpop.f32.mrb[151].mxu0 }
0x308c   :  { %v11400_v52 = vpack.c.bf16 %v5445_v4, %v5445_v4  ;;  %v5576_v21 = vsel %vm846_vm7, %v11398_v1, 0 }
0x308d   :  { %9301 = vmatpush3.bf16.msra.mxu1 %v5576_v21 }
0x308e   :  { %v5622_v5 = vsel %vm846_vm7, %v11400_v52, 0  ;;  %9312 = vmatprep.subr.bf16.mxu1 %v10145_v15 }
0x308f   :  { %9307 = vmatpush3.bf16.msra.mxu0 %v5622_v5 }
0x3090   :  { %9318 = vmatprep.subr.bf16.mxu0 %v10145_v15 }
0x3094   :  { %v5540_v46 = vpop.f32.mrb[152].mxu0 }
0x3095   :  { %v5541_v10 = vadd.f32 %v5540_v46, %v10561_v39  ;;  %v9298_v14 = vpop.f32.mrb[153].mxu0 }
0x3096   :  { %v5543_v7 = vpop.f32.mrb[154].mxu0 }
0x3097   :  { %v9299_v50 = vpop.f32.mrb[155].mxu0  ;;  %v5549_v57 = vsel %vm724_vm6, %v5541_v10, -inf }
0x3098   :  { %5550 = vmax.xlane.f32.xlu1 %v5549_v57 }
0x30a9   :  { %5723 = vrot.lane.b32.xlu1 %v11378_v43, %s10149_s21 }
0x310d   :  { %v5548_v51 = vpop.xlane.xlu0 %5547 }
0x310e   :  { %v5552_v31 = vsub.f32 %v5495_v33, %v5548_v51 }
0x3110   :  { %v5554_v13 = vmul.f32 1.442695, %v5552_v31 }
0x3112   :  { %9855 = vpow2.f32 %v5554_v13 }
0x311c   :  { %v9856_v44 = vpop.eup %9855 }
0x311d   :  { %v5558_v62 = vsel %vm724_vm6, %v9856_v44, 0.0 }
0x311e   :  { %5559 = vadd.xlane.f32.xlu0 %v5558_v62 }
0x3125   :  { %v5551_v17 = vpop.xlane.xlu1 %5550 }
0x3126   :  { %v5553_v16 = vsub.f32 %v5541_v10, %v5551_v17 }
0x3128   :  { %v5556_v8 = vmul.f32 1.442695, %v5553_v16 }
0x3129   :  { %v5724_v29 = vpop.permute.xlu1 %5723 }
0x312a   :  { %9857 = vpow2.f32 %v5556_v8  ;;  %v5729_v37 = vsel %vm724_vm6, %v5724_v29, 0  ;;  %v8322_v29 = vld [vmem:[%s11880_s29 + $0x30] sm:$0xf] }
0x3134   :  { %v9858_v54 = vpop.eup %9857  ;;  %5671 = vrot.lane.b32.xlu0 %v11358_v18, %s10149_s21 }
0x3135   :  { %v5561_v9 = vsel %vm724_vm6, %v9858_v54, 0.0 }
0x3136   :  { %5562 = vadd.xlane.f32.xlu1 %v5561_v9 }
0x3147   :  { %5668 = vrot.lane.b32.xlu1 %v11363_v23, %s10149_s21 }
0x314b   :  { %5720 = vrot.lane.b32.xlu1 %v11385_v32, %s10149_s21 }
0x31ab   :  { %v5560_v35 = vpop.xlane.xlu0 %5559 }
0x31ac   :  { %9859 = vrcp.f32 %v5560_v35 }
0x31af   :  { %v5672_v24 = vpop.permute.xlu0 %5671 }
0x31b0   :  { %v5677_v25 = vsel %vm724_vm6, %v5672_v24, 0 }
0x31b6   :  { %v9860_v22 = vpop.eup %9859 }
0x31b7   :  { %v5566_v20 = vmul.f32 %v9860_v22, %v9856_v44 }
0x31b9   :  { %v5568_v28 = vpack.c.bf16 %v5566_v20, %v5566_v20 }
0x31bb   :  { %9303 = vmatmul.mubr.msk.bf16.vlgmr.msra.gmra.mrb[168].mxu1 %vm724_vm6, %v5568_v28 }
0x31bc   :  { %9313 = vmatpush3.bf16.xpose.msra.mxu1 %v5677_v25  ;;  %9314 = vmatprep.mubr.msk.bf16.mxu1 %vm10146_vm1, %v10145_v15 }
0x31bd   :  { %9324 = vmatprep.subr.bf16.mxu1 %v10145_v15 }
0x31c3   :  { %v5563_v12 = vpop.xlane.xlu1 %5562 }
0x31c4   :  { %9861 = vrcp.f32 %v5563_v12 }
0x31c7   :  { %v5669_v26 = vpop.permute.xlu1 %5668 }
0x31c8   :  { %9315 = vmatmul.mubr.msk.bf16.vlgmr.msra.gmra.mrb[172].mxu1 %vm724_vm6, %v5669_v26 }
0x31c9   :  { %9326 = vmatprep.mubr.msk.bf16.mxu1 %vm10146_vm1, %v10145_v15 }
0x31cb   :  { %v5721_v40 = vpop.permute.xlu1 %5720 }
0x31ce   :  { %v9862_v60 = vpop.eup %9861 }
0x31cf   :  { %v5567_v19 = vmul.f32 %v9862_v60, %v9858_v54  ;;  %v5947_v60 = vsel %vm846_vm7, %v8322_v29, 0 }
0x31d1   :  { %v5569_v34 = vpack.c.bf16 %v5567_v19, %v5567_v19 }
0x31d3   :  { %9309 = vmatmul.mubr.msk.bf16.vlgmr.msra.gmra.mrb[156].mxu0 %vm724_vm6, %v5569_v34 }
0x31d4   :  { %9319 = vmatpush3.bf16.xpose.msra.mxu0 %v5729_v37  ;;  %9320 = vmatprep.mubr.msk.bf16.mxu0 %vm10146_vm1, %v10145_v15 }
0x31d5   :  { %9330 = vmatprep.subr.bf16.mxu0 %v10145_v15 }
0x31db   :  { %9321 = vmatmul.mubr.msk.bf16.vlgmr.msra.gmra.mrb[160].mxu0 %vm724_vm6, %v5721_v40 }
0x31dc   :  { %9332 = vmatprep.mubr.msk.bf16.mxu0 %vm10146_vm1, %v10145_v15 }
0x328e   :  { %v11436_v30 = vpop.f32.mrb[168].mxu1 }
0x328f   :  { %v9304_v27 = vpop.f32.mrb[169].mxu1 }
0x3290   :  { %v5615_v6 = vpop.f32.mrb[170].mxu1 }
0x3291   :  { %v9305_v33 = vpop.f32.mrb[171].mxu1 }
0x329b   :  { %v5713_v47 = vpop.f32.mrb[172].mxu1 }
0x329c   :  { %v5714_v48 = vadd.f32 %v5713_v47, %v10558_v38  ;;  %v9316_v42 = vpop.f32.mrb[173].mxu1 }
0x329d   :  { %v5716_v49 = vpop.f32.mrb[174].mxu1 }
0x329e   :  { %v9317_v58 = vpop.f32.mrb[175].mxu1  ;;  %v5771_v59 = vsel %vm724_vm6, %v5714_v48, -inf }
0x329f   :  { %5772 = vmax.xlane.f32.xlu0 %v5771_v59 }
0x32a6   :  { %v5658_v11 = vpop.f32.mrb[156].mxu0 }
0x32a7   :  { %v5664_v63 = vpack.c.bf16 %v5658_v11, %v11436_v30  ;;  %v9310_v61 = vpop.f32.mrb[157].mxu0  ;;  %v8327_v30 = vld [vmem:[%s11880_s29 + $0x34] sm:$0xf] }
0x32a8   :  { %v5661_v2 = vpop.f32.mrb[158].mxu0  ;;  %v5900_v27 = vsel %vm846_vm7, %v8327_v30, 0 }
0x32a9   :  { %v9311_v45 = vpop.f32.mrb[159].mxu0 }
0x32ae   :  { %v5765_v4 = vpop.f32.mrb[160].mxu0 }
0x32af   :  { %v5766_v0 = vadd.f32 %v5765_v4, %v10561_v39  ;;  %v9322_v21 = vpop.f32.mrb[161].mxu0 }
0x32b0   :  { %v5768_v5 = vpop.f32.mrb[162].mxu0 }
0x32b1   :  { %v9323_v46 = vpop.f32.mrb[163].mxu0  ;;  %v5774_v10 = vsel %vm724_vm6, %v5766_v0, -inf }
0x32b2   :  { %5775 = vmax.xlane.f32.xlu1 %v5774_v10 }
0x32c3   :  { %5845 = vrot.lane.b32.xlu1 %v11400_v52, %s10149_s21 }
0x32c7   :  { %5992 = vrot.lane.b32.xlu1 %v11358_v18, %s10150_s25 }
0x32cb   :  { %6042 = vrot.lane.b32.xlu1 %v11378_v43, %s10150_s25 }
0x32cf   :  { %6040 = vrot.lane.b32.xlu1 %v11385_v32, %s10150_s25 }
0x332c   :  { %v5773_v14 = vpop.xlane.xlu0 %5772 }
0x332d   :  { %v5777_v7 = vsub.f32 %v5714_v48, %v5773_v14 }
0x332f   :  { %v5779_v50 = vmul.f32 1.442695, %v5777_v7 }
0x3331   :  { %9863 = vpow2.f32 %v5779_v50 }
0x333b   :  { %v9864_v57 = vpop.eup %9863 }
0x333c   :  { %v5783_v51 = vsel %vm724_vm6, %v9864_v57, 0.0 }
0x333d   :  { %5784 = vadd.xlane.f32.xlu0 %v5783_v51 }
0x333f   :  { %v5776_v31 = vpop.xlane.xlu1 %5775 }
0x3340   :  { %v5778_v13 = vsub.f32 %v5766_v0, %v5776_v31 }
0x3342   :  { %v5781_v44 = vmul.f32 1.442695, %v5778_v13 }
0x3343   :  { %v5846_v62 = vpop.permute.xlu1 %5845 }
0x3344   :  { %9865 = vpow2.f32 %v5781_v44  ;;  %v5851_v17 = vsel %vm846_vm7, %v5846_v62, 0 }
0x3345   :  { %9331 = vmatpush3.bf16.msra.mxu0 %v5851_v17 }
0x3346   :  { %9342 = vmatprep.subr.bf16.mxu0 %v10145_v15 }
0x3347   :  { %v5993_v19 = vpop.permute.xlu1 %5992 }
0x3348   :  { %v5998_v11 = vsel %vm724_vm6, %v5993_v19, 0 }
0x334b   :  { %v6043_v34 = vpop.permute.xlu1 %6042 }
0x334c   :  { %v6048_v37 = vsel %vm724_vm6, %v6043_v34, 0 }
0x334e   :  { %v9866_v16 = vpop.eup %9865 }
0x334f   :  { %v5786_v8 = vsel %vm724_vm6, %v9866_v16, 0.0  ;;  %v6041_v40 = vpop.permute.xlu1 %6040 }
0x3350   :  { %5787 = vadd.xlane.f32.xlu0 %v5786_v8 }
0x3366   :  { %5796 = vrot.lane.b32.xlu0 %v11398_v1, %s10149_s21  ;;  %s11903_s21 = sld [smem:[#allocation48_spill]] }
0x336a   :  { %5990 = vrot.lane.b32.xlu0 %v11363_v23, %s10150_s25 }
0x33ca   :  { %v5785_v54 = vpop.xlane.xlu0 %5784 }
0x33cb   :  { %9867 = vrcp.f32 %v5785_v54 }
0x33d5   :  { %v9868_v9 = vpop.eup %9867 }
0x33d6   :  { %v5791_v22 = vmul.f32 %v9868_v9, %v9864_v57 }
0x33d8   :  { %v5793_v28 = vpack.c.bf16 %v5791_v22, %v5791_v22 }
0x33dd   :  { %v5788_v35 = vpop.xlane.xlu0 %5787 }
0x33de   :  { %9869 = vrcp.f32 %v5788_v35 }
0x33e1   :  { %v5797_v20 = vpop.permute.xlu0 %5796 }
0x33e2   :  { %v5802_v24 = vsel %vm846_vm7, %v5797_v20, 0 }
0x33e3   :  { %9325 = vmatpush3.bf16.msra.mxu1 %v5802_v24 }
0x33e4   :  { %9336 = vmatprep.subr.bf16.mxu1 %v10145_v15 }
0x33e5   :  { %v5991_v45 = vpop.permute.xlu0 %5990 }
0x33e6   :  { %9327 = vmatmul.mubr.msk.bf16.vlgmr.msra.gmra.mrb[176].mxu1 %vm724_vm6, %v5793_v28 }
0x33e7   :  { %9338 = vmatprep.mubr.msk.bf16.mxu1 %vm10146_vm1, %v10145_v15  ;;  %9337 = vmatpush3.bf16.msra.mxu1 %v5900_v27 }
0x33e8   :  { %v9870_v25 = vpop.eup %9869  ;;  %9348 = vmatprep.subr.bf16.mxu1 %v10145_v15 }
0x33e9   :  { %v5792_v12 = vmul.f32 %v9870_v25, %v9866_v16 }
0x33eb   :  { %v5794_v26 = vpack.c.bf16 %v5792_v12, %v5792_v12 }
0x33ed   :  { %9333 = vmatmul.mubr.msk.bf16.vlgmr.msra.gmra.mrb[164].mxu0 %vm724_vm6, %v5794_v26 }
0x33ee   :  { %9343 = vmatpush3.bf16.msra.mxu0 %v5947_v60  ;;  %9344 = vmatprep.mubr.msk.bf16.mxu0 %vm10146_vm1, %v10145_v15 }
0x33ef   :  { %9354 = vmatprep.subr.bf16.mxu0 %v10145_v15 }
0x33f5   :  { %9345 = vmatmul.mubr.msk.bf16.vlgmr.msra.gmra.mrb[168].mxu0 %vm724_vm6, %v5664_v63 }
0x33f6   :  { %9356 = vmatprep.mubr.msk.bf16.mxu0 %vm10146_vm1, %v10145_v15 }
0x33f7   :  { %9355 = vmatpush3.bf16.xpose.msra.mxu0 %v6048_v37 }
0x33f8   :  { %9366 = vmatprep.subr.bf16.mxu0 %v10145_v15 }
0x33fe   :  { %9357 = vmatmul.mubr.msk.bf16.vlgmr.msra.gmra.mrb[172].mxu0 %vm724_vm6, %v6041_v40 }
0x33ff   :  { %9368 = vmatprep.mubr.msk.bf16.mxu0 %vm10146_vm1, %v10145_v15 }
0x34b9   :  { %v5838_v6 = vpop.f32.mrb[176].mxu1 }
0x34ba   :  { %v9328_v33 = vpop.f32.mrb[177].mxu1 }
0x34bb   :  { %v5841_v47 = vpop.f32.mrb[178].mxu1 }
0x34bc   :  { %v9329_v48 = vpop.f32.mrb[179].mxu1 }
0x34c0   :  { %v5887_v42 = vpop.f32.mrb[164].mxu0 }
0x34c1   :  { %v5893_v49 = vpack.c.bf16 %v5887_v42, %v5838_v6  ;;  %v9334_v58 = vpop.f32.mrb[165].mxu0 }
0x34c2   :  { %v5890_v59 = vpop.f32.mrb[166].mxu0 }
0x34c3   :  { %v9335_v63 = vpop.f32.mrb[167].mxu0  ;;  %9339 = vmatmul.mubr.msk.bf16.vlgmr.msra.gmra.mrb[180].mxu1 %vm724_vm6, %v5893_v49 }
0x34c4   :  { %9349 = vmatpush3.bf16.xpose.msra.mxu1 %v5998_v11  ;;  %9350 = vmatprep.mubr.msk.bf16.mxu1 %vm10146_vm1, %v10145_v15  ;;  %v8334_v63 = vld [vmem:[%s11880_s29 + $0x38] sm:$0xf] }
0x34c5   :  { %9360 = vmatprep.subr.bf16.mxu1 %v10145_v15 }
0x34c8   :  { %v5983_v61 = vpop.f32.mrb[168].mxu0 }
0x34c9   :  { %v9346_v2 = vpop.f32.mrb[169].mxu0 }
0x34ca   :  { %v5986_v4 = vpop.f32.mrb[170].mxu0 }
0x34cb   :  { %v9347_v0 = vpop.f32.mrb[171].mxu0  ;;  %9351 = vmatmul.mubr.msk.bf16.vlgmr.msra.gmra.mrb[184].mxu1 %vm724_vm6, %v5991_v45 }
0x34cc   :  { %9362 = vmatprep.mubr.msk.bf16.mxu1 %vm10146_vm1, %v10145_v15 }
0x34d1   :  { %v6084_v21 = vpop.f32.mrb[172].mxu0 }
0x34d2   :  { %v6085_v5 = vadd.f32 %v6084_v21, %v10561_v39  ;;  %v9358_v46 = vpop.f32.mrb[173].mxu0 }
0x34d3   :  { %v6087_v10 = vpop.f32.mrb[174].mxu0 }
0x34d4   :  { %v9359_v14 = vpop.f32.mrb[175].mxu0  ;;  %v6093_v7 = vsel %vm724_vm6, %v6085_v5, -inf }
0x34d5   :  { %6094 = vmax.xlane.f32.xlu1 %v6093_v7 }
0x34e6   :  { %6162 = vrot.lane.b32.xlu1 %v11400_v52, %s10150_s25 }
0x34ea   :  { %6264 = vrot.lane.b32.xlu1 %v11358_v18, %s10151_s3 }
0x34ee   :  { %6314 = vrot.lane.b32.xlu1 %v11378_v43, %s10151_s3 }
0x34f2   :  { %6312 = vrot.lane.b32.xlu1 %v11385_v32, %s10151_s3 }
0x3562   :  { %v6095_v50 = vpop.xlane.xlu1 %6094 }
0x3563   :  { %v6097_v31 = vsub.f32 %v6085_v5, %v6095_v50 }
0x3565   :  { %v6100_v13 = vmul.f32 1.442695, %v6097_v31 }
0x3566   :  { %v6163_v57 = vpop.permute.xlu1 %6162 }
0x3567   :  { %v6168_v51 = vsel %vm846_vm7, %v6163_v57, 0  ;;  %9871 = vpow2.f32 %v6100_v13 }
0x3568   :  { %9367 = vmatpush3.bf16.msra.mxu0 %v6168_v51 }
0x3569   :  { %9378 = vmatprep.subr.bf16.mxu0 %v10145_v15 }
0x356a   :  { %v6265_v37 = vpop.permute.xlu1 %6264 }
0x356b   :  { %v6270_v30 = vsel %vm724_vm6, %v6265_v37, 0 }
0x356e   :  { %v6315_v46 = vpop.permute.xlu1 %6314 }
0x356f   :  { %v6320_v57 = vsel %vm724_vm6, %v6315_v46, 0 }
0x3571   :  { %v9872_v20 = vpop.eup %9871 }
0x3572   :  { %v6105_v24 = vsel %vm724_vm6, %v9872_v20, 0.0 }
0x3596   :  { %v5936_v44 = vpop.f32.mrb[180].mxu1 }
0x3597   :  { %v11501_v62 = vadd.f32 %v5983_v61, %v5936_v44  ;;  %v9340_v17 = vpop.f32.mrb[181].mxu1  ;;  %v6217_v61 = vsel %vm846_vm7, %v8334_v63, 0 }
0x3598   :  { %v5939_v18 = vpop.f32.mrb[182].mxu1 }
0x3599   :  { %v11503_v16 = vadd.f32 %v5986_v4, %v5939_v18  ;;  %v9341_v43 = vpop.f32.mrb[183].mxu1 }
0x359e   :  { %v6034_v8 = vpop.f32.mrb[184].mxu1 }
0x359f   :  { %v6035_v32 = vadd.f32 %v6034_v8, %v10558_v38  ;;  %v9352_v54 = vpop.f32.mrb[185].mxu1 }
0x35a0   :  { %v6037_v9 = vpop.f32.mrb[186].mxu1 }
0x35a1   :  { %v9353_v35 = vpop.f32.mrb[187].mxu1  ;;  %v6090_v22 = vsel %vm724_vm6, %v6035_v32, -inf }
0x35a2   :  { %6091 = vmax.xlane.f32.xlu0 %v6090_v22 }
0x35a6   :  { %6106 = vadd.xlane.f32.xlu0 %v6105_v24 }
0x362f   :  { %v6092_v28 = vpop.xlane.xlu0 %6091 }
0x3630   :  { %v6096_v25 = vsub.f32 %v6035_v32, %v6092_v28 }
0x3632   :  { %v6098_v29 = vmul.f32 1.442695, %v6096_v25 }
0x3633   :  { %v6107_v12 = vpop.xlane.xlu0 %6106 }
0x3634   :  { %9873 = vpow2.f32 %v6098_v29 }
0x3635   :  { %9875 = vrcp.f32 %v6107_v12 }
0x363e   :  { %v9874_v26 = vpop.eup %9873 }
0x363f   :  { %v9876_v60 = vpop.eup %9875  ;;  %v6102_v19 = vsel %vm724_vm6, %v9874_v26, 0.0 }
0x3640   :  { %v6111_v34 = vmul.f32 %v9876_v60, %v9872_v20  ;;  %6103 = vadd.xlane.f32.xlu0 %v6102_v19 }
0x3642   :  { %v6113_v40 = vpack.c.bf16 %v6111_v34, %v6111_v34 }
0x3644   :  { %9369 = vmatmul.mubr.msk.bf16.vlgmr.msra.gmra.mrb[176].mxu0 %vm724_vm6, %v6113_v40 }
0x3645   :  { %9379 = vmatpush3.bf16.xpose.msra.mxu0 %v6270_v30  ;;  %9380 = vmatprep.mubr.msk.bf16.mxu0 %vm10146_vm1, %v10145_v15 }
0x3646   :  { %9390 = vmatprep.subr.bf16.mxu0 %v10145_v15 }
0x3656   :  { %6114 = vrot.lane.b32.xlu0 %v11398_v1, %s10150_s25  ;;  %s11904_s25 = sld [smem:[#allocation52_spill]] }
0x365a   :  { %6262 = vrot.lane.b32.xlu0 %v11363_v23, %s10151_s3 }
0x36cd   :  { %v6104_v27 = vpop.xlane.xlu0 %6103 }
0x36ce   :  { %9877 = vrcp.f32 %v6104_v27 }
0x36d1   :  { %v6115_v6 = vpop.permute.xlu0 %6114 }
0x36d2   :  { %v6120_v33 = vsel %vm846_vm7, %v6115_v6, 0 }
0x36d3   :  { %9361 = vmatpush3.bf16.msra.mxu1 %v6120_v33 }
0x36d4   :  { %9372 = vmatprep.subr.bf16.mxu1 %v10145_v15 }
0x36d5   :  { %v6263_v47 = vpop.permute.xlu0 %6262 }
0x36d6   :  { %9381 = vmatmul.mubr.msk.bf16.vlgmr.msra.gmra.mrb[180].mxu0 %vm724_vm6, %v6263_v47 }
0x36d7   :  { %9392 = vmatprep.mubr.msk.bf16.mxu0 %vm10146_vm1, %v10145_v15 }
0x36d8   :  { %v9878_v48 = vpop.eup %9877 }
0x36d9   :  { %v6110_v42 = vmul.f32 %v9878_v48, %v9874_v26  ;;  %v8340_v48 = vld [vmem:[%s11880_s29 + $0x3c] sm:$0xf]  ;;  %s11905_s29 = sld [smem:[#allocation47_spill]] }
0x36db   :  { %v6112_v49 = vpack.c.bf16 %v6110_v42, %v6110_v42  ;;  %v6489_v42 = vsel %vm846_vm7, %v8340_v48, 0  ;;  %v9682_v48 = vld [vmem:[%s11889_s10 + $0x78] sm:$0xff]  }
0x36dd   :  { %9363 = vmatmul.mubr.msk.bf16.vlgmr.msra.gmra.mrb[188].mxu1 %vm724_vm6, %v6112_v49 }
0x36de   :  { %9374 = vmatprep.mubr.msk.bf16.mxu1 %vm10146_vm1, %v10145_v15  ;;  %9373 = vmatpush3.bf16.msra.mxu1 %v6217_v61 }
0x36df   :  { %9384 = vmatprep.subr.bf16.mxu1 %v10145_v15 }
0x3717   :  { %v6204_v23 = vpop.f32.mrb[176].mxu0 }
0x3718   :  { %v9370_v58 = vpop.f32.mrb[177].mxu0 }
0x3719   :  { %v6207_v59 = vpop.f32.mrb[178].mxu0 }
0x371a   :  { %v9371_v11 = vpop.f32.mrb[179].mxu0 }
0x37a9   :  { %v6306_v2 = vpop.f32.mrb[180].mxu0 }
0x37aa   :  { %v6307_v45 = vadd.f32 %v6306_v2, %v10558_v38  ;;  %v9382_v4 = vpop.f32.mrb[181].mxu0  ;;  %v6313_v38 = vpop.permute.xlu1 %6312 }
0x37ab   :  { %v6309_v0 = vpop.f32.mrb[182].mxu0 }
0x37ac   :  { %v9383_v21 = vpop.f32.mrb[183].mxu0  ;;  %v6362_v5 = vsel %vm724_vm6, %v6307_v45, -inf  ;;  %v8343_v0 = vld [vmem:[%s11883_s26 + $0x3] ss:$0 sm:$0xff]  ;;  %s10154_s26 = smov 1  }
0x37ad   :  { %6363 = vmax.xlane.f32.xlu0 %v6362_v5 }
0x37b0   :  { %v6156_v10 = vpop.f32.mrb[188].mxu1 }
0x37b1   :  { %v6210_v14 = vpack.c.bf16 %v6204_v23, %v6156_v10  ;;  %v9364_v7 = vpop.f32.mrb[189].mxu1 }
0x37b2   :  { %v6159_v50 = vpop.f32.mrb[190].mxu1 }
0x37b3   :  { %v9365_v51 = vpop.f32.mrb[191].mxu1  ;;  %9375 = vmatmul.mubr.msk.bf16.vlgmr.msra.gmra.mrb[192].mxu1 %vm724_vm6, %v6210_v14 }
0x37b4   :  { %9385 = vmatpush3.bf16.xpose.msra.mxu1 %v6320_v57  ;;  %9386 = vmatprep.mubr.msk.bf16.mxu1 %vm10146_vm1, %v10145_v15 }
0x37b5   :  { %9396 = vmatprep.subr.bf16.mxu1 %v10145_v15 }
0x37bb   :  { %9387 = vmatmul.mubr.msk.bf16.vlgmr.msra.gmra.mrb[196].mxu1 %vm724_vm6, %v6313_v38 }
0x37bc   :  { %9398 = vmatprep.mubr.msk.bf16.mxu1 %vm10146_vm1, %v10145_v15 }
0x383a   :  { %v6364_v31 = vpop.xlane.xlu0 %6363 }
0x383b   :  { %v6368_v13 = vsub.f32 %v6307_v45, %v6364_v31 }
0x383d   :  { %v6370_v44 = vmul.f32 1.442695, %v6368_v13 }
0x383f   :  { %9879 = vpow2.f32 %v6370_v44 }
0x3849   :  { %v9880_v17 = vpop.eup %9879 }
0x384a   :  { %v6374_v18 = vsel %vm724_vm6, %v9880_v17, 0.0 }
0x384b   :  { %6375 = vadd.xlane.f32.xlu0 %v6374_v18 }
0x3886   :  { %v6253_v43 = vpop.f32.mrb[192].mxu1 }
0x3887   :  { %v6260_v8 = vadd.f32 %v6253_v43, %v11501_v62  ;;  %v9376_v32 = vpop.f32.mrb[193].mxu1 }
0x3888   :  { %v6256_v54 = vpop.f32.mrb[194].mxu1 }
0x3889   :  { %v6261_v9 = vadd.f32 %v6256_v54, %v11503_v16  ;;  %v9377_v35 = vpop.f32.mrb[195].mxu1 }
0x388e   :  { %v6356_v22 = vpop.f32.mrb[196].mxu1 }
0x388f   :  { %v6357_v20 = vadd.f32 %v6356_v22, %v10561_v39  ;;  %v9388_v24 = vpop.f32.mrb[197].mxu1 }
0x3890   :  { %v6359_v28 = vpop.f32.mrb[198].mxu1 }
0x3891   :  { %v9389_v25 = vpop.f32.mrb[199].mxu1  ;;  %v6365_v29 = vsel %vm724_vm6, %v6357_v20, -inf  ;;  %v9678_v28 = vld [vmem:[%s11884_s28 + $0x38] sm:$0xff]  }
0x3892   :  { %6366 = vmax.xlane.f32.xlu1 %v6365_v29 }
0x38a3   :  { %6434 = vrot.lane.b32.xlu1 %v11400_v52, %s10151_s3 }
0x38d8   :  { %v6376_v34 = vpop.xlane.xlu0 %6375 }
0x391f   :  { %v6367_v12 = vpop.xlane.xlu1 %6366 }
0x3920   :  { %v6369_v26 = vsub.f32 %v6357_v20, %v6367_v12 }
0x3922   :  { %v6372_v62 = vmul.f32 1.442695, %v6369_v26 }
0x3923   :  { %v6435_v60 = vpop.permute.xlu1 %6434 }
0x3924   :  { %9881 = vpow2.f32 %v6372_v62  ;;  %v6440_v16 = vsel %vm846_vm7, %v6435_v60, 0 }
0x3925   :  { %9397 = vmatpush3.bf16.msra.mxu1 %v6440_v16  ;;  %9883 = vrcp.f32 %v6376_v34  ;;  %v8346_v16 = vld [vmem:[%s11885_s1 + $0x3] ss:$0 sm:$0xff]  ;;  %s11910_s1 = sld [smem:[#allocation53_spill]] }
0x3926   :  { %9408 = vmatprep.subr.bf16.mxu1 %v10145_v15 }
0x392e   :  { %v9882_v39 = vpop.eup %9881 }
0x392f   :  { %v6377_v19 = vsel %vm724_vm6, %v9882_v39, 0.0  ;;  %v9884_v52 = vpop.eup %9883 }
0x3930   :  { %6378 = vadd.xlane.f32.xlu0 %v6377_v19  ;;  %v6382_v40 = vmul.f32 %v9884_v52, %v9880_v17  ;;  %v8281_v17 = vld [vmem:[%s11892_s16 + $0x2] ss:$0 sm:$0xff] }
0x3931   :  { %v5199_v43 = vadd.f32 %v8281_v17, %v11395_v3  ;;  %v5196_v54 = vadd.f32 %v8281_v17, %v11392_v53 }
0x3932   :  { %v6384_v6 = vpack.c.bf16 %v6382_v40, %v6382_v40 }
0x3933   :  { %v11578_v20 = vadd.f32 %v5196_v54, %v11322_v41 }
0x3935   :  { %v5208_v53 = vsel %vm267_vm0, %v11578_v20, 0.0 }
0x3946   :  { %6386 = vrot.lane.b32.xlu0 %v11398_v1, %s10151_s3  ;;  %s11906_s3 = sld [smem:[#allocation49_spill]] }
0x39bd   :  { %v6379_v37 = vpop.xlane.xlu0 %6378 }
0x39be   :  { %9885 = vrcp.f32 %v6379_v37  ;;  %v8347_v37 = vld [vmem:[%s11886_s2 + $0x3] ss:$0 sm:$0xff]  ;;  %s10155_s2 = smov [#allocation11]  }
0x39bf   :  { %s7968_s7 = sshll.u32 %s10155_s2, 4  ;;  %s7969_s7 = int_to_ptr.vmem [resolvable:$true] %s7968_s7 }
0x39c0   :  { %s10011_s24 = scalar_lea.vmem %s7969_s7, 32  ;;  %p10016_p5 = scmp.lt.s32.totalorder %s7969_s7, %s7969_s7 }
0x39c1   :  { %v6387_v30 = vpop.permute.xlu0 %6386  ;;  %p10012_p4 = scmp.ne.s32.totalorder %s7969_s7, %s10011_s24  ;;  %p10017_p6 = scmp.lt.s32.totalorder %s10011_s24, %s10011_s24 }
0x39c2   :  { %v6392_v27 = vsel %vm846_vm7, %v6387_v30, 0 }
0x39c3   :  { %9391 = vmatpush3.bf16.msra.mxu0 %v6392_v27  ;;  %p10018_p7 = por %p10017_p6, %p10016_p5 }
0x39c4   :  { %9402 = vmatprep.subr.bf16.mxu0 %v10145_v15 }
0x39c5   :  { %p10019_p8 = pnand %p10018_p7, %p10012_p4 }
0x39c6   :  { %9393 = vmatmul.mubr.msk.bf16.vlgmr.msra.gmra.mrb[184].mxu0 %vm724_vm6, %v6384_v6 }
0x39c7   :  { %9404 = vmatprep.mubr.msk.bf16.mxu0 %vm10146_vm1, %v10145_v15  ;;  %9403 = vmatpush3.bf16.msra.mxu0 %v6489_v42  ;;  %v8353_v42 = vld [vmem:[%s11890_s11 + $0x3] ss:$0 sm:$0xff] }
0x39c8   :  { %v9886_v1 = vpop.eup %9885  ;;  %9416 = vmatprep.subr.bf16.mxu0 %v10145_v15 }
0x39c9   :  { %v6383_v33 = vmul.f32 %v9886_v1, %v9882_v39  ;;  %v9679_v1 = vld [vmem:[%s11889_s10 + $0x60] sm:$0xff]  }
0x39cb   :  { %v6385_v47 = vpack.c.bf16 %v6383_v33, %v6383_v33  ;;  %v9680_v33 = vld [vmem:[%s11889_s10 + $0x68] sm:$0xff]  }
0x39cd   :  { %9399 = vmatmul.mubr.msk.bf16.vlgmr.msra.gmra.mrb[200].mxu1 %vm724_vm6, %v6385_v47  ;;  %v9681_v47 = vld [vmem:[%s11889_s10 + $0x70] sm:$0xff]  }
0x39ce   :  { %9412 = vmatprep.mubr.msk.bf16.mxu1 %vm10146_vm1, %v10145_v15 }
0x3a99   :  { %v6428_v49 = vpop.f32.mrb[184].mxu0 }
0x3a9a   :  { %v9394_v23 = vpop.f32.mrb[185].mxu0 }
0x3a9b   :  { %v6431_v58 = vpop.f32.mrb[186].mxu0 }
0x3a9c   :  { %v9395_v59 = vpop.f32.mrb[187].mxu0 }
0x3aa0   :  { %v6476_v11 = vpop.f32.mrb[200].mxu1 }
0x3aa1   :  { %v6482_v63 = vpack.c.bf16 %v6476_v11, %v6428_v49  ;;  %v9400_v61 = vpop.f32.mrb[201].mxu1 }
0x3aa2   :  { %v6479_v2 = vpop.f32.mrb[202].mxu1 }
0x3aa3   :  { %v9401_v45 = vpop.f32.mrb[203].mxu1  ;;  %9405 = vmatmul.mubr.msk.bf16.vlgmr.msra.gmra.mrb[188].mxu0 %vm724_vm6, %v6482_v63 }
0x3aa4   :  { %9424 = vmatprep.mubr.msk.bf16.mxu0 %vm10146_vm1, %v10145_v15  ;;  %9417 = vmatpush3.bf16.msra.mxu0 %v9679_v1 }
0x3aa5   :  { %9418 = vmatprep.subr.bf16.mxu0 %v10145_v15 }
0x3aa8   :  { %9419 = vmatpush3.bf16.msra.mxu0 %v9680_v33 }
0x3aa9   :  { %9420 = vmatprep.subr.bf16.mxu0 %v10145_v15 }
0x3aac   :  { %9421 = vmatpush3.bf16.msra.mxu0 %v9681_v47 }
0x3aad   :  { %9422 = vmatprep.subr.bf16.mxu0 %v10145_v15 }
0x3ab0   :  { %9423 = vmatpush3.bf16.msra.mxu0 %v9682_v48 }
0x3ab1   :  { %9444 = vmatprep.subr.bf16.mxu0 %v10145_v15 }
0x3b76   :  { %v6525_v4 = vpop.f32.mrb[188].mxu0 }
0x3b77   :  { %v6532_v21 = vadd.f32 %v6525_v4, %v6260_v8  ;;  %v9406_v5 = vpop.f32.mrb[189].mxu0 }
0x3b78   :  { %v6528_v46 = vpop.f32.mrb[190].mxu0 }
0x3b79   :  { %v6542_v10 = vadd.f32 %v8343_v0, %v6532_v21  ;;  %v6533_v14 = vadd.f32 %v6528_v46, %v6261_v9  ;;  %v9407_v7 = vpop.f32.mrb[191].mxu0 }
0x3b7b   :  { %v6543_v50 = vadd.f32 %v8343_v0, %v6533_v14  ;;  %v6544_v57 = vadd.f32 %v6542_v10, %v11093_v55 }
0x3b7d   :  { %v6550_v51 = vsel %vm267_vm0, %v6544_v57, 0.0  ;;  %v6545_v38 = vadd.f32 %v6543_v50, %v11095_v56  ;;  %v11574_v56 = vadd.f32 %v5199_v43, %v11324_v36  ;;  %v9677_v36 = vld [vmem:[%s11884_s28 + $0x30] sm:$0xff]   ;;  %s11909_s28 = sld [smem:[#allocation50_spill]] }
0x3b7e   :  { %6551 = vadd.xlane.f32.xlu1 %v6550_v51  ;;  %9409 = vmatpush3.bf16.msra.mxu1 %v9677_v36 }
0x3b7f   :  { %v6553_v31 = vsel %vm267_vm0, %v6545_v38, 0.0  ;;  %v5211_v24 = vsel %vm267_vm0, %v11574_v56, 0.0  ;;  %9410 = vmatprep.subr.bf16.mxu1 %v10145_v15 }
0x3b80   :  { %6554 = vadd.xlane.f32.xlu0 %v6553_v31 }
0x3b82   :  { %9411 = vmatpush3.bf16.msra.mxu1 %v9678_v28 }
0x3b83   :  { %9428 = vmatprep.subr.bf16.mxu1 %v10145_v15 }
0x3c0b   :  { %v6552_v13 = vpop.xlane.xlu1 %6551 }
0x3c0c   :  { %v6556_v44 = vmul.f32 0.03125, %v6552_v13 }
0x3c0d   :  { %v6555_v18 = vpop.xlane.xlu0 %6554 }
0x3c0e   :  { %v6558_v8 = vsub.f32 %v6544_v57, %v6556_v44  ;;  %v6557_v32 = vmul.f32 0.03125, %v6555_v18 }
0x3c10   :  { %v6559_v55 = vsub.f32 %v6545_v38, %v6557_v32  ;;  %v6560_v9 = vmul.f32 %v6558_v8, %v6558_v8  ;;  %v8366_v32 = vld [vmem:[%s11892_s16 + $0x3] ss:$0 sm:$0xff] }
0x3c12   :  { %v6562_v35 = vsel %vm267_vm0, %v6560_v9, 0.0  ;;  %v6561_v22 = vmul.f32 %v6559_v55, %v6559_v55 }
0x3c13   :  { %6563 = vadd.xlane.f32.xlu0 %v6562_v35 }
0x3c14   :  { %v6565_v3 = vsel %vm267_vm0, %v6561_v22, 0.0 }
0x3c15   :  { %6566 = vadd.xlane.f32.xlu1 %v6565_v3 }
0x3c17   :  { %5212 = vadd.xlane.f32.xlu0 %v5211_v24 }
0x3c19   :  { %5209 = vadd.xlane.f32.xlu1 %v5208_v53 }
0x3ca0   :  { %v6564_v41 = vpop.xlane.xlu0 %6563 }
0x3ca1   :  { %v6568_v25 = vmul.f32 0.03125, %v6564_v41 }
0x3ca2   :  { %v6567_v29 = vpop.xlane.xlu1 %6566 }
0x3ca3   :  { %v6570_v12 = vadd.f32 1e-12, %v6568_v25  ;;  %v6569_v26 = vmul.f32 0.03125, %v6567_v29 }
0x3ca4   :  { %v5213_v43 = vpop.xlane.xlu0 %5212 }
0x3ca5   :  { %9887 = vrsqrt.f32 %v6570_v12  ;;  %v6571_v62 = vadd.f32 1e-12, %v6569_v26  ;;  %v5215_v54 = vmul.f32 0.03125, %v5213_v43 }
0x3ca6   :  { %v5210_v18 = vpop.xlane.xlu1 %5209 }
0x3ca7   :  { %9889 = vrsqrt.f32 %v6571_v62  ;;  %v5217_v24 = vsub.f32 %v11574_v56, %v5215_v54  ;;  %v9683_v56 = vld [vmem:[%s11895_s6] sm:$0xff]  }
0x3ca9   :  { %v5219_v26 = vmul.f32 %v5217_v24, %v5217_v24 }
0x3cab   :  { %v5223_v62 = vsel %vm267_vm0, %v5219_v26, 0.0  ;;  %v8376_v26 = vld [vmem:[%s11897_s4] ss:$0 sm:$0xff] }
0x3caf   :  { %v9888_v60 = vpop.eup %9887 }
0x3cb0   :  { %v6574_v39 = vmul.f32 %v9888_v60, %v6558_v8  ;;  %v5214_v8 = vmul.f32 0.03125, %v5210_v18  ;;  %v9684_v60 = vld [vmem:[%s11895_s6 + $0x8] sm:$0xff]  }
0x3cb1   :  { %v9890_v19 = vpop.eup %9889 }
0x3cb2   :  { %v6582_v34 = vmul.f32 %v8346_v16, %v6574_v39  ;;  %v6575_v52 = vmul.f32 %v9890_v19, %v6559_v55  ;;  %v5216_v9 = vsub.f32 %v11578_v20, %v5214_v8  ;;  %v8375_v8 = vld [vmem:[%s11894_s8 + $0x3] ss:$0 sm:$0xff] }
0x3cb4   :  { %v6583_v40 = vmul.f32 %v8346_v16, %v6575_v52  ;;  %v6590_v30 = vadd.f32 %v8347_v37, %v6582_v34  ;;  %v5218_v29 = vmul.f32 %v5216_v9, %v5216_v9 }
0x3cb6   :  { %v6591_v27 = vadd.f32 %v8347_v37, %v6583_v40  ;;  %v5220_v20 = vsel %vm267_vm0, %v5218_v29, 0.0  ;;  %v9687_v29 = vld [vmem:[%s11896_s20] sm:$0xff]  }
0x3cb8   :  { %v6597_v6 = vpack.c.bf16 %v6591_v27, %v6590_v30 }
0x3cba   :  { %9413 = vmatmul.mubr.msk.bf16.vlgmr.msra.gmra.mrb[204].mxu1 %vm267_vm0, %v6597_v6 }
0x3cbb   :  { %9432 = vmatprep.mubr.msk.bf16.mxu1 %vm10146_vm1, %v10145_v15  ;;  %9429 = vmatpush3.bf16.msra.mxu1 %v9683_v56 }
0x3cbc   :  { %9430 = vmatprep.subr.bf16.mxu1 %v10145_v15 }
0x3cbf   :  { %9431 = vmatpush3.bf16.msra.mxu1 %v9684_v60 }
0x3cc0   :  { %9436 = vmatprep.subr.bf16.mxu1 %v10145_v15 }
0x3d8d   :  { %v6655_v49 = vpop.f32.mrb[204].mxu1 }
0x3d8e   :  { %v6656_v23 = vadd.f32 %v8353_v42, %v6655_v49  ;;  %v9414_v58 = vpop.f32.mrb[205].mxu1 }
0x3d8f   :  { %v6658_v59 = vpop.f32.mrb[206].mxu1  ;;  %v8289_v58 = vld [vmem:[%s11893_s18 + $0x2] ss:$0 sm:$0xff] }
0x3d90   :  { %v6664_v11 = vmul.f32 0.044715, %v6656_v23  ;;  %v6659_v63 = vadd.f32 %v8353_v42, %v6658_v59  ;;  %v9415_v61 = vpop.f32.mrb[207].mxu1  ;;  %v6662_v51 = vmul.f32 0.5, %v6656_v23 }
0x3d92   :  { %v6666_v2 = vmul.f32 %v6664_v11, %v6656_v23  ;;  %v6665_v45 = vmul.f32 0.044715, %v6659_v63  ;;  %v6663_v38 = vmul.f32 0.5, %v6659_v63 }
0x3d94   :  { %v6668_v4 = vmul.f32 %v6666_v2, %v6656_v23  ;;  %v6667_v0 = vmul.f32 %v6665_v45, %v6659_v63  ;;  %v8290_v2 = vld [vmem:[%s11894_s8 + $0x2] ss:$0 sm:$0xff] }
0x3d96   :  { %v6670_v21 = vadd.f32 %v6668_v4, %v6656_v23  ;;  %v6669_v5 = vmul.f32 %v6667_v0, %v6659_v63 }
0x3d98   :  { %v6672_v46 = vmul.f32 0.7978846, %v6670_v21  ;;  %v6671_v10 = vadd.f32 %v6669_v5, %v6659_v63 }
0x3d9a   :  { %9891 = vtanh.f32 %v6672_v46  ;;  %v6673_v14 = vmul.f32 0.7978846, %v6671_v10 }
0x3d9c   :  { %9893 = vtanh.f32 %v6673_v14  ;;  %v9685_v14 = vld [vmem:[%s11895_s6 + $0x10] sm:$0xff]  }
0x3da4   :  { %v9892_v7 = vpop.eup %9891 }
0x3da5   :  { %v6676_v50 = vadd.f32 1.0, %v9892_v7  ;;  %v9686_v7 = vld [vmem:[%s11895_s6 + $0x18] sm:$0xff]  }
0x3da6   :  { %v9894_v57 = vpop.eup %9893 }
0x3da7   :  { %v6677_v31 = vadd.f32 1.0, %v9894_v57  ;;  %v6678_v13 = vmul.f32 %v6676_v50, %v6662_v51 }
0x3da9   :  { %v6679_v44 = vmul.f32 %v6677_v31, %v6663_v38 }
0x3dab   :  { %v6689_v17 = vpack.c.bf16 %v6679_v44, %v6678_v13 }
0x3dad   :  { %9425 = vmatmul.mubr.msk.bf16.vlgmr.msra.gmra.mrb[192].mxu0 %vm1986_vm8, %v6689_v17  ;;  %v8374_v17 = vld [vmem:[%s11893_s18 + $0x3] ss:$0 sm:$0xff] }
0x3dae   :  { %9448 = vmatprep.mubr.msk.bf16.mxu0 %vm10146_vm1, %v10145_v15  ;;  %9445 = vmatpush3.bf16.msra.mxu0 %v9687_v29 }
0x3daf   :  { %9446 = vmatprep.subr.bf16.mxu0 %v10145_v15 }
0x3e80   :  { %v6759_v55 = vpop.f32.mrb[192].mxu0 }
0x3e81   :  { %v6760_v35 = vadd.f32 %v8366_v32, %v6759_v55  ;;  %v9426_v22 = vpop.f32.mrb[193].mxu0 }
0x3e82   :  { %v6762_v3 = vpop.f32.mrb[194].mxu0 }
0x3e83   :  { %v6766_v53 = vadd.f32 %v6760_v35, %v6590_v30  ;;  %v6763_v36 = vadd.f32 %v8366_v32, %v6762_v3  ;;  %v9427_v28 = vpop.f32.mrb[195].mxu0 }
0x3e85   :  { %v6767_v41 = vadd.f32 %v6763_v36, %v6591_v27  ;;  %v6772_v25 = vsel %vm267_vm0, %v6766_v53, 0.0 }
0x3e86   :  { %6773 = vadd.xlane.f32.xlu1 %v6772_v25 }
0x3e87   :  { %v6775_v12 = vsel %vm267_vm0, %v6767_v41, 0.0 }
0x3e88   :  { %6776 = vadd.xlane.f32.xlu0 %v6775_v12  ;;  %v9688_v12 = vld [vmem:[%s11896_s20 + $0x8] sm:$0xff]  }
0x3e89   :  { %9447 = vmatpush3.bf16.msra.mxu0 %v9688_v12 }
0x3e8a   :  { %5221 = vadd.xlane.f32.xlu1 %v5220_v20  ;;  %9464 = vmatprep.subr.bf16.mxu0 %v10145_v15 }
0x3e8c   :  { %5224 = vadd.xlane.f32.xlu0 %v5223_v62  ;;  %v8385_v62 = vld [vmem:[%s11897_s4 + $0x1] ss:$0 sm:$0xff] }
0x3f13   :  { %v6774_v16 = vpop.xlane.xlu1 %6773 }
0x3f14   :  { %v6778_v39 = vmul.f32 0.03125, %v6774_v16 }
0x3f15   :  { %v6777_v19 = vpop.xlane.xlu0 %6776 }
0x3f16   :  { %v6780_v34 = vsub.f32 %v6766_v53, %v6778_v39  ;;  %v6779_v52 = vmul.f32 0.03125, %v6777_v19 }
0x3f17   :  { %v5222_v37 = vpop.xlane.xlu1 %5221 }
0x3f18   :  { %v6781_v40 = vsub.f32 %v6767_v41, %v6779_v52  ;;  %v5226_v30 = vmul.f32 0.03125, %v5222_v37  ;;  %v6782_v27 = vmul.f32 %v6780_v34, %v6780_v34 }
0x3f19   :  { %v5225_v6 = vpop.xlane.xlu0 %5224 }
0x3f1a   :  { %v5228_v1 = vadd.f32 1e-12, %v5226_v30  ;;  %v5227_v33 = vmul.f32 0.03125, %v5225_v6  ;;  %v6784_v47 = vsel %vm267_vm0, %v6782_v27, 0.0  ;;  %v6783_v48 = vmul.f32 %v6781_v40, %v6781_v40  ;;  %v9690_v27 = vld [vmem:[%s11896_s20 + $0x18] sm:$0xff]  }
0x3f1b   :  { %6785 = vadd.xlane.f32.xlu1 %v6784_v47  ;;  %v8389_v6 = vld [vmem:[%s11898_s22] ss:$0 sm:$0xff] }
0x3f1c   :  { %9895 = vrsqrt.f32 %v5228_v1  ;;  %v5229_v42 = vadd.f32 1e-12, %v5227_v33  ;;  %v6787_v49 = vsel %vm267_vm0, %v6783_v48, 0.0 }
0x3f1d   :  { %6788 = vadd.xlane.f32.xlu0 %v6787_v49 }
0x3f1e   :  { %9897 = vrsqrt.f32 %v5229_v42 }
0x3f26   :  { %v9896_v23 = vpop.eup %9895 }
0x3f27   :  { %v5232_v59 = vmul.f32 %v9896_v23, %v5216_v9 }
0x3f28   :  { %v9898_v11 = vpop.eup %9897 }
0x3f29   :  { %v5240_v63 = vmul.f32 %v8289_v58, %v5232_v59  ;;  %v5233_v61 = vmul.f32 %v9898_v11, %v5217_v24 }
0x3f2b   :  { %v5241_v45 = vmul.f32 %v8289_v58, %v5233_v61  ;;  %v11621_v4 = vadd.f32 %v8290_v2, %v5240_v63  ;;  %v8417_v58 = vld [vmem:[%s11898_s22 + $0x1] ss:$0 sm:$0xff] }
0x3f2d   :  { %v11623_v0 = vadd.f32 %v8290_v2, %v5241_v45 }
0x3f2f   :  { %v6815_v21 = vrot.slane %v11623_v0, 7  ;;  %v7810_v5 = vpack.c.bf16 %v11623_v0, %v11621_v4 }
0x3f31   :  { %v6818_v46 = vsel %vm6817_vm9, %v11621_v4, %v6815_v21 }
0x3f32   :  { %v6827_v10 = vpack.c.bf16 %v6818_v46, %v6818_v46 }
0x3f34   :  { %9433 = vmatmul.mubr.msk.bf16.vlgmr.msra.gmra.mrb[208].mxu1 %vm267_vm0, %v6827_v10 }
0x3f35   :  { %9440 = vmatprep.mubr.msk.bf16.mxu1 %vm10146_vm1, %v10145_v15  ;;  %9437 = vmatpush3.bf16.msra.mxu1 %v9685_v14 }
0x3f36   :  { %9438 = vmatprep.subr.bf16.mxu1 %v10145_v15 }
0x3f39   :  { %9439 = vmatpush3.bf16.msra.mxu1 %v9686_v7 }
0x3f3a   :  { %9452 = vmatprep.subr.bf16.mxu1 %v10145_v15 }
0x3fa8   :  { %v6786_v50 = vpop.xlane.xlu1 %6785 }
0x3fa9   :  { %v6790_v57 = vmul.f32 0.03125, %v6786_v50 }
0x3faa   :  { %v6789_v51 = vpop.xlane.xlu0 %6788 }
0x3fab   :  { %v6792_v38 = vadd.f32 1e-12, %v6790_v57  ;;  %v6791_v31 = vmul.f32 0.03125, %v6789_v51 }
0x3fad   :  { %9899 = vrsqrt.f32 %v6792_v38  ;;  %v6793_v13 = vadd.f32 1e-12, %v6791_v31 }
0x3faf   :  { %9901 = vrsqrt.f32 %v6793_v13 }
0x3fb7   :  { %v9900_v44 = vpop.eup %9899 }
0x3fb8   :  { %v6796_v18 = vmul.f32 %v9900_v44, %v6780_v34 }
0x3fb9   :  { %v9902_v43 = vpop.eup %9901 }
0x3fba   :  { %v6804_v32 = vmul.f32 %v8374_v17, %v6796_v18  ;;  %v6797_v54 = vmul.f32 %v9902_v43, %v6781_v40  ;;  %v9689_v40 = vld [vmem:[%s11896_s20 + $0x10] sm:$0xff]  }
0x3fbc   :  { %v11639_v55 = vadd.f32 %v8375_v8, %v6804_v32  ;;  %v6805_v9 = vmul.f32 %v8374_v17, %v6797_v54 }
0x3fbe   :  { %7948 = vst.msk [vmem:[#allocation13] sm:$0xff] %vm267_vm0, %v11639_v55  ;;  %v11643_v35 = vadd.f32 %v8375_v8, %v6805_v9 }
0x3fc0   :  { %7949 = vst.msk [vmem:[#allocation13 + $0x8] sm:$0xff] %vm267_vm0, %v11643_v35  ;;  %v6820_v22 = vrot.slane %v11643_v35, 7  ;;  %v7881_v3 = vpack.c.bf16 %v11643_v35, %v11639_v55 }
0x3fc2   :  { %v6822_v24 = vsel %vm6817_vm9, %v11639_v55, %v6820_v22 }
0x3fc3   :  { %v6896_v53 = vpack.c.bf16 %v6822_v24, %v6822_v24 }
0x3fc5   :  { %9441 = vmatmul.mubr.msk.bf16.vlgmr.msra.gmra.mrb[212].mxu1 %vm267_vm0, %v6896_v53 }
0x3fc6   :  { %9460 = vmatprep.mubr.msk.bf16.mxu1 %vm10146_vm1, %v10145_v15 }
0x4007   :  { %v6884_v36 = vpop.f32.mrb[208].mxu1 }
0x4008   :  { %v9434_v28 = vpop.f32.mrb[209].mxu1  ;;  %v6885_v20 = vadd.f32 %v8376_v26, %v6884_v36  ;;  %v9691_v26 = vld [vmem:[%s11899_s23] sm:$0xff]  }
0x4009   :  { %v6887_v41 = vpop.f32.mrb[210].mxu1  ;;  %9453 = vmatpush3.bf16.msra.mxu1 %v9691_v26 }
0x400a   :  { %v9435_v25 = vpop.f32.mrb[211].mxu1  ;;  %9903 = vtanh.f32 %v6885_v20  ;;  %9454 = vmatprep.subr.bf16.mxu1 %v10145_v15  ;;  %v9692_v20 = vld [vmem:[%s11899_s23 + $0x8] sm:$0xff]  }
0x400d   :  { %9455 = vmatpush3.bf16.msra.mxu1 %v9692_v20 }
0x400e   :  { %9456 = vmatprep.subr.bf16.mxu1 %v10145_v15 }
0x4014   :  { %v9904_v34 = vpop.eup %9903 }
0x4098   :  { %v6954_v56 = vpop.f32.mrb[212].mxu1 }
0x4099   :  { %v6955_v60 = vadd.f32 %v8385_v62, %v6954_v56  ;;  %v9442_v16 = vpop.f32.mrb[213].mxu1  ;;  %v9693_v62 = vld [vmem:[%s11899_s23 + $0x20] sm:$0xff]   ;;  %v9694_v56 = vld [vmem:[%s11899_s23 + $0x10] sm:$0xff]  }
0x409a   :  { %v6957_v39 = vpop.f32.mrb[214].mxu1  ;;  %9457 = vmatpush3.bf16.msra.mxu1 %v9694_v56  ;;  %v9696_v16 = vld [vmem:[%s11899_s23 + $0x18] sm:$0xff]  }
0x409b   :  { %9905 = vtanh.f32 %v6955_v60  ;;  %v9443_v19 = vpop.f32.mrb[215].mxu1  ;;  %9458 = vmatprep.subr.bf16.mxu1 %v10145_v15  ;;  %v9695_v60 = vld [vmem:[%s11899_s23 + $0x28] sm:$0xff]   ;;  %v9697_v39 = vld [vmem:[%s11899_s23 + $0x30] sm:$0xff]  }
0x409c   :  { %v9699_v19 = vld [vmem:[%s11899_s23 + $0x38] sm:$0xff]  }
0x409e   :  { %9459 = vmatpush3.bf16.msra.mxu1 %v9696_v16 }
0x409f   :  { %9484 = vmatprep.subr.bf16.mxu1 %v10145_v15 }
0x40a5   :  { %v9906_v52 = vpop.eup %9905 }
0x40a6   :  { %v11661_v37 = vmul.f32 %v9906_v52, %v9904_v34  ;;  %6963 = vst.msk [vmem:[#allocation11] sm:$0x3] %vm6962_vm10, %v9906_v52 }
0x40a8   :  { %v11666_v30 = vpack.c.bf16 %v11661_v37, %v11661_v37  ;;  %v7618_v12 = vrot.slane %v11661_v37, 1 }
0x40aa   :  { %9449 = vmatmul.mubr.msk.bf16.vlgmr.msra.gmra.mrb[196].mxu0 %vm267_vm0, %v11666_v30 }
0x40ab   :  { %9465 = vmatpush3.bf16.msra.mxu0 %v9689_v40  ;;  %9468 = vmatprep.mubr.msk.bf16.mxu0 %vm10146_vm1, %v10145_v15 }
0x40ac   :  { %9466 = vmatprep.subr.bf16.mxu0 %v10145_v15 }
0x40af   :  { %9467 = vmatpush3.bf16.msra.mxu0 %v9690_v27 }
0x40b0   :  { %9472 = vmatprep.subr.bf16.mxu0 %v10145_v15 }
0x40b2   :  { %9469 = vmatmul.mubr.msk.bf16.vlgmr.msra.gmra.mrb[200].mxu0 %vm267_vm0, %v11666_v30 }
0x40b3   :  { %9480 = vmatprep.mubr.msk.bf16.mxu0 %vm10146_vm1, %v10145_v15  ;;  %9473 = vmatpush3.bf16.msra.mxu0 %v9693_v62 }
0x40b4   :  { %9474 = vmatprep.subr.bf16.mxu0 %v10145_v15 }
0x40b7   :  { %9475 = vmatpush3.bf16.msra.mxu0 %v9695_v60 }
0x40b8   :  { %9476 = vmatprep.subr.bf16.mxu0 %v10145_v15 }
0x40bb   :  { %9477 = vmatpush3.bf16.msra.mxu0 %v9697_v39  ;;  %v7631_v39 = vld [vmem:[%s11906_s3] sm:$0x1] }
0x40bc   :  { %9478 = vmatprep.subr.bf16.mxu0 %v10145_v15 }
0x40bf   :  { %9479 = vmatpush3.bf16.msra.mxu0 %v9699_v19 }
0x40c0   :  { %9504 = vmatprep.subr.bf16.mxu0 %v10145_v15 }
0x417d   :  { %v7036_v1 = vpop.f32.mrb[196].mxu0 }
0x417e   :  { %v7037_v33 = vadd.f32 %v8389_v6, %v7036_v1  ;;  %v9450_v47 = vpop.f32.mrb[197].mxu0 }
0x417f   :  { %v7039_v48 = vpop.f32.mrb[198].mxu0  ;;  %v8393_v47 = vld [vmem:[%s11900_s9] ss:$0 sm:$0xff] }
0x4180   :  { %v7043_v42 = vmul.f32 0.044715, %v7037_v33  ;;  %v9451_v49 = vpop.f32.mrb[199].mxu0  ;;  %v7042_v38 = vmul.f32 0.5, %v7037_v33 }
0x4182   :  { %v7044_v23 = vmul.f32 %v7043_v42, %v7037_v33  ;;  %v8394_v42 = vld [vmem:[%s11901_s13] ss:$0 sm:$0xff] }
0x4184   :  { %v7045_v59 = vmul.f32 %v7044_v23, %v7037_v33 }
0x4185   :  { %v7228_v11 = vpop.f32.mrb[200].mxu0 }
0x4186   :  { %v7229_v63 = vadd.f32 %v8417_v58, %v7228_v11  ;;  %v9470_v61 = vpop.f32.mrb[201].mxu0  ;;  %v7046_v2 = vadd.f32 %v7045_v59, %v7037_v33  ;;  %v9698_v58 = vld [vmem:[%s11896_s20 + $0x20] sm:$0xff]  }
0x4187   :  { %v7231_v45 = vpop.f32.mrb[202].mxu0 }
0x4188   :  { %v7235_v21 = vmul.f32 0.044715, %v7229_v63  ;;  %v9471_v46 = vpop.f32.mrb[203].mxu0  ;;  %v7047_v10 = vmul.f32 0.7978846, %v7046_v2  ;;  %v7234_v18 = vmul.f32 0.5, %v7229_v63 }
0x4189   :  { %v9700_v2 = vld [vmem:[%s11896_s20 + $0x28] sm:$0xff]   ;;  %v8422_v45 = vld [vmem:[%s11901_s13 + $0x1] ss:$0 sm:$0xff] }
0x418a   :  { %v7236_v14 = vmul.f32 %v7235_v21, %v7229_v63  ;;  %9907 = vtanh.f32 %v7047_v10  ;;  %v9701_v10 = vld [vmem:[%s11902_s17] sm:$0xff]  }
0x418c   :  { %v7237_v7 = vmul.f32 %v7236_v14, %v7229_v63 }
0x418e   :  { %v7238_v50 = vadd.f32 %v7237_v7, %v7229_v63  ;;  %v8421_v63 = vld [vmem:[%s11900_s9 + $0x1] ss:$0 sm:$0xff]  ;;  %v9702_v7 = vld [vmem:[%s11902_s17 + $0x8] sm:$0xff]  }
0x4190   :  { %v7239_v57 = vmul.f32 0.7978846, %v7238_v50  ;;  %v9703_v50 = vld [vmem:[%s11903_s21] sm:$0xff]  }
0x4192   :  { %9909 = vtanh.f32 %v7239_v57  ;;  %v9704_v57 = vld [vmem:[%s11903_s21 + $0x8] sm:$0xff]  }
0x4194   :  { %v9908_v51 = vpop.eup %9907 }
0x4195   :  { %v7049_v31 = vadd.f32 1.0, %v9908_v51  ;;  %v9705_v51 = vld [vmem:[%s11903_s21 + $0x10] sm:$0xff]  }
0x4197   :  { %v7050_v13 = vmul.f32 %v7049_v31, %v7042_v38  ;;  %v9706_v31 = vld [vmem:[%s11903_s21 + $0x18] sm:$0xff]  }
0x4199   :  { %v7052_v44 = vsel %vm7051_vm11, %v7050_v13, 0.0 }
0x419a   :  { %7053 = vadd.xlane.f32.xlu0 %v7052_v44 }
0x419c   :  { %v9910_v17 = vpop.eup %9909 }
0x419d   :  { %v7241_v43 = vadd.f32 1.0, %v9910_v17  ;;  %v9708_v17 = vld [vmem:[%s11904_s25 + $0x8] sm:$0xff]  }
0x419f   :  { %v7242_v8 = vmul.f32 %v7241_v43, %v7234_v18 }
0x41a1   :  { %v7243_v32 = vsel %vm7051_vm11, %v7242_v8, 0.0 }
0x41a2   :  { %7244 = vadd.xlane.f32.xlu1 %v7243_v32  ;;  %v8445_v32 = vld [vmem:[%s11898_s22 + $0x2] ss:$0 sm:$0xff] }
0x4227   :  { %v7054_v54 = vpop.xlane.xlu0 %7053 }
0x4228   :  { %v7056_v9 = vmul.f32 0.015625, %v7054_v54 }
0x422a   :  { %v7057_v22 = vsub.f32 %v7050_v13, %v7056_v9  ;;  %v9707_v13 = vld [vmem:[%s11904_s25] sm:$0xff]  }
0x422c   :  { %v7058_v24 = vmul.f32 %v7057_v22, %v7057_v22 }
0x422e   :  { %v7059_v53 = vsel %vm7051_vm11, %v7058_v24, 0.0 }
0x422f   :  { %7060 = vadd.xlane.f32.xlu0 %v7059_v53  ;;  %v7245_v36 = vpop.xlane.xlu1 %7244 }
0x4230   :  { %v7246_v28 = vmul.f32 0.015625, %v7245_v36 }
0x4232   :  { %v7247_v41 = vsub.f32 %v7242_v8, %v7246_v28 }
0x4234   :  { %v7248_v25 = vmul.f32 %v7247_v41, %v7247_v41 }
0x4236   :  { %v7249_v29 = vsel %vm7051_vm11, %v7248_v25, 0.0  ;;  %v8457_v25 = vld [vmem:[%s11905_s29] ss:$0 sm:$0xff] }
0x4237   :  { %7250 = vadd.xlane.f32.xlu1 %v7249_v29 }
0x4245   :  { %7619 = vrot.lane.b32.xlu0 %v7618_v12, %s10152_s5 }
0x42bc   :  { %v7061_v34 = vpop.xlane.xlu0 %7060 }
0x42bd   :  { %v7062_v52 = vmul.f32 0.015625, %v7061_v34 }
0x42bf   :  { %v7063_v40 = vadd.f32 1e-12, %v7062_v52 }
0x42c0   :  { %v7620_v38 = vpop.permute.xlu0 %7619 }
0x42c1   :  { %9911 = vrsqrt.f32 %v7063_v40 }
0x42c4   :  { %v7251_v27 = vpop.xlane.xlu1 %7250 }
0x42c5   :  { %v7252_v6 = vmul.f32 0.015625, %v7251_v27 }
0x42c7   :  { %v7253_v1 = vadd.f32 1e-12, %v7252_v6 }
0x42c9   :  { %9913 = vrsqrt.f32 %v7253_v1 }
0x42cb   :  { %v9912_v33 = vpop.eup %9911 }
0x42cc   :  { %v7065_v48 = vmul.f32 %v9912_v33, %v7057_v22 }
0x42ce   :  { %v7072_v49 = vmul.f32 %v8393_v47, %v7065_v48 }
0x42d0   :  { %v7079_v23 = vadd.f32 %v8394_v42, %v7072_v49 }
0x42d2   :  { %v7080_v59 = vpack.c.bf16 %v7079_v23, %v7079_v23  ;;  %v8471_v23 = vld [vmem:[#allocation7] ss:$0 sm:$0xff] }
0x42d3   :  { %v9914_v11 = vpop.eup %9913 }
0x42d4   :  { %v7255_v61 = vmul.f32 %v9914_v11, %v7247_v41  ;;  %9461 = vmatmul.mubr.msk.bf16.vlgmr.msra.gmra.mrb[216].mxu1 %vm1986_vm8, %v7080_v59 }
0x42d5   :  { %9485 = vmatpush3.bf16.msra.mxu1 %v9698_v58  ;;  %9488 = vmatprep.mubr.msk.bf16.mxu1 %vm10146_vm1, %v10145_v15 }
0x42d6   :  { %9486 = vmatprep.subr.bf16.mxu1 %v10145_v15  ;;  %v7262_v21 = vmul.f32 %v8421_v63, %v7255_v61 }
0x42d8   :  { %v7269_v46 = vadd.f32 %v8422_v45, %v7262_v21 }
0x42d9   :  { %9487 = vmatpush3.bf16.msra.mxu1 %v9700_v2 }
0x42da   :  { %v7270_v14 = vpack.c.bf16 %v7269_v46, %v7269_v46  ;;  %9492 = vmatprep.subr.bf16.mxu1 %v10145_v15 }
0x42dc   :  { %9481 = vmatmul.mubr.msk.bf16.vlgmr.msra.gmra.mrb[204].mxu0 %vm1986_vm8, %v7270_v14  ;;  %9489 = vmatmul.mubr.msk.bf16.vlgmr.msra.gmra.mrb[220].mxu1 %vm267_vm0, %v11666_v30 }
0x42dd   :  { %9505 = vmatpush3.bf16.msra.mxu0 %v9701_v10  ;;  %9508 = vmatprep.mubr.msk.bf16.mxu0 %vm10146_vm1, %v10145_v15 }
0x42de   :  { %9506 = vmatprep.subr.bf16.mxu0 %v10145_v15  ;;  %9500 = vmatprep.mubr.msk.bf16.mxu1 %vm10146_vm1, %v10145_v15 }
0x42e1   :  { %9507 = vmatpush3.bf16.msra.mxu0 %v9702_v7 }
0x42e2   :  { %9512 = vmatprep.subr.bf16.mxu0 %v10145_v15 }
0x42e4   :  { %9509 = vmatmul.mubr.msk.bf16.vlgmr.msra.gmra.mrb[208].mxu0 %vm267_vm0, %v11666_v30  ;;  %v7622_v30 = vsel %vm267_vm0, %v11661_v37, %v7620_v38 }
0x42e5   :  { %9513 = vmatpush3.bf16.msra.mxu0 %v9703_v50  ;;  %9520 = vmatprep.mubr.msk.bf16.mxu0 %vm10146_vm1, %v10145_v15  ;;  %v7643_v44 = vpack.c.bf16 %v7622_v30, %v7622_v30 }
0x42e6   :  { %9514 = vmatprep.subr.bf16.mxu0 %v10145_v15 }
0x42e9   :  { %9515 = vmatpush3.bf16.msra.mxu0 %v9704_v57 }
0x42ea   :  { %9516 = vmatprep.subr.bf16.mxu0 %v10145_v15 }
0x42ed   :  { %9517 = vmatpush3.bf16.msra.mxu0 %v9705_v51 }
0x42ee   :  { %9518 = vmatprep.subr.bf16.mxu0 %v10145_v15 }
0x42f1   :  { %9519 = vmatpush3.bf16.msra.mxu0 %v9706_v31 }
0x42f2   :  { %9536 = vmatprep.subr.bf16.mxu0 %v10145_v15 }
0x42f4   :  { %9521 = vmatmul.mubr.msk.bf16.vlgmr.msra.gmra.mrb[212].mxu0 %vm1986_vm8, %v7643_v44 }
0x42f5   :  { %9537 = vmatpush3.bf16.msra.mxu0 %v9707_v13  ;;  %9540 = vmatprep.mubr.msk.bf16.mxu0 %vm10146_vm1, %v10145_v15 }
0x42f6   :  { %9538 = vmatprep.subr.bf16.mxu0 %v10145_v15 }
0x42f9   :  { %9539 = vmatpush3.bf16.msra.mxu0 %v9708_v17 }
0x42fc   :  { %9541 = vmatmul.mubr.msk.bf16.vlgmr.msra.gmra.mrb[216].mxu0 %vm267_vm0, %v7810_v5 }
0x43a7   :  { %v11748_v37 = vpop.f32.mrb[216].mxu1 }
0x43a8   :  { %v9462_v18 = vpop.f32.mrb[217].mxu1 }
0x43a9   :  { %v7151_v43 = vpop.f32.mrb[218].mxu1 }
0x43aa   :  { %v9463_v8 = vpop.f32.mrb[219].mxu1 }
0x43ab   :  { %v9709_v8 = vld [vmem:[%s11899_s23 + $0x40] sm:$0xff]  }
0x43ac   :  { %9493 = vmatpush3.bf16.msra.mxu1 %v9709_v8 }
0x43ad   :  { %9494 = vmatprep.subr.bf16.mxu1 %v10145_v15 }
0x43af   :  { %v11751_v54 = vpop.f32.mrb[204].mxu0  ;;  %v7418_v9 = vpop.f32.mrb[220].mxu1 }
0x43b0   :  { %v7419_v22 = vadd.f32 %v8445_v32, %v7418_v9  ;;  %v9482_v24 = vpop.f32.mrb[205].mxu0  ;;  %v9490_v53 = vpop.f32.mrb[221].mxu1  ;;  %v9710_v9 = vld [vmem:[%s11899_s23 + $0x48] sm:$0xff]  }
0x43b1   :  { %v7341_v36 = vpop.f32.mrb[206].mxu0  ;;  %v7421_v28 = vpop.f32.mrb[222].mxu1  ;;  %9495 = vmatpush3.bf16.msra.mxu1 %v9710_v9  ;;  %v9712_v24 = vld [vmem:[%s11899_s23 + $0x58] sm:$0xff]  }
0x43b2   :  { %v7425_v41 = vmul.f32 0.044715, %v7419_v22  ;;  %v9483_v4 = vpop.f32.mrb[207].mxu0  ;;  %v9491_v0 = vpop.f32.mrb[223].mxu1  ;;  %v7424_v52 = vmul.f32 0.5, %v7419_v22  ;;  %9496 = vmatprep.subr.bf16.mxu1 %v10145_v15 }
0x43b4   :  { %v7426_v5 = vmul.f32 %v7425_v41, %v7419_v22 }
0x43b6   :  { %v7427_v29 = vmul.f32 %v7426_v5, %v7419_v22  ;;  %v8449_v5 = vld [vmem:[%s11900_s9 + $0x2] ss:$0 sm:$0xff] }
0x43b7   :  { %v7591_v12 = vpop.f32.mrb[208].mxu0 }
0x43b8   :  { %v7592_v26 = vadd.f32 %v8457_v25, %v7591_v12  ;;  %v9510_v20 = vpop.f32.mrb[209].mxu0  ;;  %v7428_v62 = vadd.f32 %v7427_v29, %v7419_v22  ;;  %v9711_v22 = vld [vmem:[%s11899_s23 + $0x50] sm:$0xff]   ;;  %v8450_v29 = vld [vmem:[%s11901_s13 + $0x2] ss:$0 sm:$0xff] }
0x43b9   :  { %v7594_v56 = vpop.f32.mrb[210].mxu0  ;;  %9497 = vmatpush3.bf16.msra.mxu1 %v9711_v22  ;;  %v9713_v20 = vld [vmem:[%s11908_s0] sm:$0xff]  }
0x43ba   :  { %7602 = vrot.lane.b32.xlu0 %v7592_v26, %s10153_s14  ;;  %v9511_v60 = vpop.f32.mrb[211].mxu0  ;;  %v7429_v16 = vmul.f32 0.7978846, %v7428_v62  ;;  %9498 = vmatprep.subr.bf16.mxu1 %v10145_v15 }
0x43bb   :  { %v9714_v60 = vld [vmem:[%s11908_s0 + $0x8] sm:$0xff]  }
0x43bc   :  { %9915 = vtanh.f32 %v7429_v16 }
0x43bd   :  { %9499 = vmatpush3.bf16.msra.mxu1 %v9712_v24 }
0x43be   :  { %9524 = vmatprep.subr.bf16.mxu1 %v10145_v15 }
0x43c6   :  { %v9916_v19 = vpop.eup %9915 }
0x43c7   :  { %v7705_v34 = vpop.f32.mrb[212].mxu0  ;;  %v7431_v40 = vadd.f32 1.0, %v9916_v19  ;;  %v9716_v19 = vld [vmem:[%s11908_s0 + $0x18] sm:$0xff]  }
0x43c8   :  { %v7706_v27 = vadd.f32 %v7705_v34, %v7631_v39  ;;  %v9522_v6 = vpop.f32.mrb[213].mxu0  ;;  %v9715_v39 = vld [vmem:[%s11908_s0 + $0x10] sm:$0xff]  }
0x43c9   :  { %v7708_v1 = vpop.f32.mrb[214].mxu0  ;;  %v7432_v33 = vmul.f32 %v7431_v40, %v7424_v52  ;;  %v7632_v52 = vld [vmem:[%s11909_s28] sm:$0x1] }
0x43ca   :  { %v7712_v47 = vmul.f32 0.044715, %v7706_v27  ;;  %v9523_v48 = vpop.f32.mrb[215].mxu0  ;;  %v7711_v14 = vmul.f32 0.5, %v7706_v27 }
0x43cb   :  { %v7433_v42 = vsel %vm7051_vm11, %v7432_v33, 0.0  ;;  %v9718_v48 = vld [vmem:[%s11910_s1 + $0x8] sm:$0xff]  }
0x43cc   :  { %v7713_v49 = vmul.f32 %v7712_v47, %v7706_v27  ;;  %7434 = vadd.xlane.f32.xlu1 %v7433_v42 }
0x43ce   :  { %v7714_v58 = vmul.f32 %v7713_v49, %v7706_v27 }
0x43cf   :  { %v7867_v59 = vpop.f32.mrb[216].mxu0 }
0x43d0   :  { %v7868_v11 = vadd.f32 %v8471_v23, %v7867_v59  ;;  %v9542_v63 = vpop.f32.mrb[217].mxu0  ;;  %v7715_v61 = vadd.f32 %v7714_v58, %v7706_v27  ;;  %v7633_v27 = vld [vmem:[#allocation2] sm:$0x1] }
0x43d1   :  { %v7870_v2 = vpop.f32.mrb[218].mxu0 }
0x43d2   :  { %7875 = vst.msk [vmem:[%s10429_s27] sm:$0xff] %vm7874_vm12, %v7868_v11  ;;  %v7871_v45 = vadd.f32 %v8471_v23, %v7870_v2  ;;  %v9543_v21 = vpop.f32.mrb[219].mxu0  ;;  %v7716_v46 = vmul.f32 0.7978846, %v7715_v61 }
0x43d4   :  { %7876 = vst.msk [vmem:[%s10429_s27 + $0x8] sm:$0xff] %vm7874_vm12, %v7871_v45  ;;  %9917 = vtanh.f32 %v7716_v46  ;;  %s11907_s27 = sld [smem:[#allocation45_spill]] }
0x43da   :  { %v8423_v53 = vld [vmem:[%s11907_s27 + $0x1] ss:$0 sm:$0xff] }
0x43db   :  { %v7339_v36 = vadd.f32 %v8423_v53, %v11751_v54 }
0x43de   :  { %v9918_v10 = vpop.eup %9917 }
0x43df   :  { %v7718_v7 = vadd.f32 1.0, %v9918_v10 }
0x43e1   :  { %v7719_v50 = vmul.f32 %v7718_v7, %v7711_v14 }
0x43e3   :  { %v7721_v57 = vsel %vm7720_vm13, %v7719_v50, 0.0 }
0x43e4   :  { %7722 = vadd.xlane.f32.xlu1 %v7721_v57 }
0x4459   :  { %v7435_v51 = vpop.xlane.xlu1 %7434 }
0x445a   :  { %v7436_v38 = vmul.f32 0.015625, %v7435_v51 }
0x445c   :  { %v7437_v31 = vsub.f32 %v7432_v33, %v7436_v38  ;;  %v9717_v33 = vld [vmem:[%s11910_s1] sm:$0xff]  }
0x445e   :  { %v7438_v30 = vmul.f32 %v7437_v31, %v7437_v31 }
0x4460   :  { %v7439_v13 = vsel %vm7051_vm11, %v7438_v30, 0.0 }
0x4461   :  { %7440 = vadd.xlane.f32.xlu1 %v7439_v13 }
0x4471   :  { %v7723_v44 = vpop.xlane.xlu1 %7722 }
0x4472   :  { %v7724_v17 = vmul.f32 0.015625, %v7723_v44 }
0x4474   :  { %v7725_v18 = vsub.f32 %v7719_v50, %v7724_v17 }
0x4476   :  { %v7726_v43 = vmul.f32 %v7725_v18, %v7725_v18 }
0x4478   :  { %v7727_v32 = vsel %vm7720_vm13, %v7726_v43, 0.0 }
0x4479   :  { %7728 = vadd.xlane.f32.xlu1 %v7727_v32 }
0x448a   :  { %7598 = vrot.lane.b32.xlu1 %v7339_v36, %s10154_s26 }
0x44ee   :  { %v7441_v28 = vpop.xlane.xlu1 %7440 }
0x44ef   :  { %v7442_v41 = vmul.f32 0.015625, %v7441_v28 }
0x44f1   :  { %v7443_v4 = vadd.f32 1e-12, %v7442_v41 }
0x44f3   :  { %9919 = vrsqrt.f32 %v7443_v4 }
0x44fd   :  { %v9920_v0 = vpop.eup %9919 }
0x44fe   :  { %v7445_v25 = vmul.f32 %v9920_v0, %v7437_v31 }
0x4500   :  { %v7452_v12 = vmul.f32 %v8449_v5, %v7445_v25 }
0x4502   :  { %v7459_v26 = vadd.f32 %v8450_v29, %v7452_v12 }
0x4504   :  { %v7460_v62 = vpack.c.bf16 %v7459_v26, %v7459_v26 }
0x4506   :  { %v7729_v56 = vpop.xlane.xlu1 %7728  ;;  %9501 = vmatmul.mubr.msk.bf16.vlgmr.msra.gmra.mrb[224].mxu1 %vm1986_vm8, %v7460_v62 }
0x4507   :  { %v7730_v54 = vmul.f32 0.015625, %v7729_v56  ;;  %9525 = vmatpush3.bf16.msra.mxu1 %v9713_v20  ;;  %9532 = vmatprep.mubr.msk.bf16.mxu1 %vm10146_vm1, %v10145_v15 }
0x4508   :  { %9526 = vmatprep.subr.bf16.mxu1 %v10145_v15 }
0x4509   :  { %v7731_v16 = vadd.f32 1e-12, %v7730_v54 }
0x450b   :  { %9921 = vrsqrt.f32 %v7731_v16  ;;  %9527 = vmatpush3.bf16.msra.mxu1 %v9714_v60 }
0x450c   :  { %9528 = vmatprep.subr.bf16.mxu1 %v10145_v15 }
0x450f   :  { %9529 = vmatpush3.bf16.msra.mxu1 %v9715_v39 }
0x4510   :  { %9530 = vmatprep.subr.bf16.mxu1 %v10145_v15 }
0x4513   :  { %9531 = vmatpush3.bf16.msra.mxu1 %v9716_v19 }
0x4514   :  { %9544 = vmatprep.subr.bf16.mxu1 %v10145_v15 }
0x4515   :  { %v9922_v34 = vpop.eup %9921 }
0x4516   :  { %v7733_v40 = vmul.f32 %v9922_v34, %v7725_v18 }
0x4518   :  { %v7734_v6 = vmul.f32 %v7733_v40, %v7632_v52 }
0x451a   :  { %v7735_v1 = vadd.f32 %v7734_v6, %v7633_v27 }
0x451c   :  { %v7736_v47 = vpack.c.bf16 %v7735_v1, %v7735_v1 }
0x451e   :  { %9533 = vmatmul.mubr.msk.bf16.vlgmr.msra.gmra.mrb[228].mxu1 %vm1986_vm8, %v7736_v47 }
0x451f   :  { %9545 = vmatpush3.bf16.msra.mxu1 %v9717_v33  ;;  %9548 = vmatprep.mubr.msk.bf16.mxu1 %vm10146_vm1, %v10145_v15 }
0x4520   :  { %9546 = vmatprep.subr.bf16.mxu1 %v10145_v15 }
0x4523   :  { %9547 = vmatpush3.bf16.msra.mxu1 %v9718_v48 }
0x4526   :  { %9549 = vmatmul.mubr.msk.bf16.vlgmr.msra.gmra.mrb[232].mxu1 %vm267_vm0, %v7881_v3 }
0x4527   :  { %10022 = shalt.err (!%p10019_p8)
}
0x4528   :  { %s10023_s10 = scalar_lea.hbm %s10424_s30, 32 }
0x4529   :  { %p10024_p9 = scmp.ne.s32.totalorder %s10424_s30, %s10023_s10  ;;  %p10027_p10 = scmp.lt.u32.totalorder %s10023_s10, %s10424_s30 }
0x452b   :  { %p10029_p11 = pnand %p10027_p10, %p10024_p9 }
0x452d   :  { %10032 = shalt.err (!%p10029_p11)
}
0x452e   :  { %7971 = dma.vmem_to_hbm [thread:$0]  %s7969_s7, 32, %s10424_s30, [#allocation12]  }
0x452f   :  { %s10156_s11 = smov [#allocation13]  }
0x4530   :  { %s7981_s15 = sshll.u32 %s10156_s11, 4  ;;  %s7982_s15 = int_to_ptr.vmem [resolvable:$true] %s7981_s15 }
0x4531   :  { %s10033_s16 = scalar_lea.vmem %s7982_s15, 256  ;;  %p10038_p13 = scmp.lt.s32.totalorder %s7982_s15, %s7982_s15 }
0x4532   :  { %p10034_p12 = scmp.ne.s32.totalorder %s7982_s15, %s10033_s16  ;;  %p10039_p0 = scmp.lt.s32.totalorder %s10033_s16, %s10033_s16 }
0x4534   :  { %p10040_p1 = por %p10039_p0, %p10038_p13 }
0x4536   :  { %p10041_p2 = pnand %p10040_p1, %p10034_p12 }
0x4538   :  { %10044 = shalt.err (!%p10041_p2)
}
0x4539   :  { %s10045_s18 = scalar_lea.hbm %s10439_s12, 256 }
0x453a   :  { %p10046_p3 = scmp.ne.s32.totalorder %s10439_s12, %s10045_s18  ;;  %p10049_p4 = scmp.lt.u32.totalorder %s10045_s18, %s10439_s12 }
0x453c   :  { %p10051_p5 = pnand %p10049_p4, %p10046_p3 }
0x453e   :  { %10054 = shalt.err (!%p10051_p5)
}
0x453f   :  { %s10157_s8 = smov 128   ;;  %s10158_s30 = smov 8   ;;  %v8451_v15 = vld [vmem:[%s11907_s27 + $0x2] ss:$0 sm:$0xff]  ;;  %vm7804_vm14 = vcmask 8192  }
0x4540   :  { %7987 = dma.vmem_to_hbm [thread:$0]  %s7982_s15, 256, %s10439_s12, [#allocation12], %s10157_s8, %s10157_s8, %s10158_s30   ;;  %v7642_v23 = vld [vmem:[#allocation5] sm:$0x1] }
0x4541   :  { %s10159_s6 = smov 13   ;;  %s10160_s20 = smov [#allocation10]  }
0x4542   :  { %s7958_s4 = sshll.u32 %s10160_s20, 4  ;;  %s7959_s4 = int_to_ptr.vmem [resolvable:$true] %s7958_s4 }
0x4543   :  { %s10055_s12 = scalar_lea.vmem %s7959_s4, 16  ;;  %s10059_s22 = scalar_lea.vmem %s7959_s4, 32 }
0x4544   :  { %p10056_p6 = scmp.ne.s32.totalorder %s7959_s4, %s10055_s12  ;;  %p10060_p7 = scmp.lt.s32.totalorder %s7959_s4, %s7959_s4 }
0x4545   :  { %p10061_p8 = scmp.lt.s32.totalorder %s10059_s22, %s10055_s12 }
0x4547   :  { %p10062_p9 = por %p10061_p8, %p10060_p7 }
0x4549   :  { %p10063_p10 = pnand %p10062_p9, %p10056_p6 }
0x45d9   :  { %v7528_v55 = vpop.f32.mrb[224].mxu1 }
0x45da   :  { %v7529_v35 = vadd.f32 %v8451_v15, %v7528_v55  ;;  %v9502_v3 = vpop.f32.mrb[225].mxu1 }
0x45db   :  { %v7531_v42 = vpop.f32.mrb[226].mxu1 }
0x45dc   :  { %7606 = vrot.lane.b32.xlu0 %v7529_v35, %s10159_s6  ;;  %v9503_v49 = vpop.f32.mrb[227].mxu1 }
0x45f1   :  { %v7798_v58 = vpop.f32.mrb[228].mxu1 }
0x45f2   :  { %v7799_v59 = vadd.f32 %v7798_v58, %v7642_v23  ;;  %v9534_v11 = vpop.f32.mrb[229].mxu1 }
0x45f3   :  { %v7801_v63 = vpop.f32.mrb[230].mxu1 }
0x45f4   :  { %v9535_v61 = vpop.f32.mrb[231].mxu1  ;;  %7805 = vst.msk [vmem:[#allocation10] sm:$0x1] %vm7804_vm14, %v7799_v59 }
0x45f5   :  { %10066 = shalt.err (!%p10063_p10)
}
0x45f6   :  { %s11911_s23 = sld [smem:[#allocation55_spill]] }
0x45fc   :  { %s10067_s5 = scalar_lea.hbm %s11911_s23, 16 }
0x45fd   :  { %p10068_p11 = scmp.ne.s32.totalorder %s11911_s23, %s10067_s5  ;;  %p10071_p12 = scmp.lt.u32.totalorder %s10067_s5, %s11911_s23 }
0x45ff   :  { %p10073_p13 = pnand %p10071_p12, %p10068_p11 }
0x4601   :  { %10076 = shalt.err (!%p10073_p13)
}
0x4602   :  { %7961 = dma.vmem_to_hbm [thread:$0]  %s7959_s4, 16, %s11911_s23, [#allocation4]   ;;  %v8475_v2 = vld [vmem:[#allocation8] ss:$0 sm:$0xff]  ;;  %v7938_v45 = vpop.f32.mrb[232].mxu1  ;;  %vm7945_vm15 = vcmask 138240   ;;  %v7599_v57 = vpop.permute.xlu1 %7598 }
0x4603   :  { %v7939_v21 = vadd.f32 %v8475_v2, %v7938_v45  ;;  %v9550_v46 = vpop.f32.mrb[233].mxu1  ;;  %s11912_s9 = sld [smem:[#allocation54_spill]]  ;;  %v8395_v50 = vld [vmem:[%s11907_s27] ss:$0 sm:$0xff]  ;;  %vm7609_vm0 = vcmask 7168   ;;  %v7603_v38 = vpop.permute.xlu0 %7602  ;;  %vm7611_vm1 = vcmask 72704  }
0x4604   :  { %v7941_v10 = vpop.f32.mrb[234].mxu1  ;;  %v7149_v51 = vadd.f32 %v8395_v50, %v11748_v37  ;;  %vm7613_vm2 = vcmask 105472   ;;  %vm7615_vm3 = vcmask 107520  }
0x4605   :  { %7946 = vst.msk [vmem:[%s10434_s19] sm:$0xff] %vm7945_vm15, %v7939_v21  ;;  %v7942_v14 = vadd.f32 %v8475_v2, %v7941_v10  ;;  %v9551_v7 = vpop.f32.mrb[235].mxu1 }
0x4606   :  { %v7610_v31 = vsel %vm7609_vm0, %v7149_v51, %v7599_v57 }
0x4607   :  { %7947 = vst.msk [vmem:[%s10434_s19 + $0x8] sm:$0xff] %vm7945_vm15, %v7942_v14  ;;  %v7612_v30 = vsel %vm7611_vm1, %v7610_v31, %v7603_v38 }
0x464e   :  { %v7607_v13 = vpop.permute.xlu0 %7606 }
0x464f   :  { %v7614_v44 = vsel %vm7613_vm2, %v7612_v30, %v7607_v13 }
0x4650   :  { %7616 = vst.msk [vmem:[%s11912_s9] sm:$0x3] %vm7615_vm3, %v7614_v44 }
0x4651   :  { %10083 = dma.done.wait [#allocation4], 16  }
0x4652   :  { %10084 = vsyncadd [#allocation4], 4294967280 }
0x4653   :  { %10085 = dma.done.wait [#allocation12], 288  }
0x4654   :  { %10086 = vsyncadd [#allocation12], 4294967008 }
0x4655   :  { %8003 = vsyncpa [#allocation3], 1 }
0x4656   :  { %8004 = vsyncpa [#allocation6], 1 }
0x4657   :  { %8005 = vsyncpa [#allocation9], 1 }
0x4658   :  { %8006 = vsyncpa [#allocation4], 1 }
0x4659   :  { %8007 = vsyncpa [#allocation12], 1 }

</bundles_post_ra>
